<compile_context>
chip_gen: v5e
topology: v5e:2x2
jax: 0.10.0
libtpu: 0.0.40
codegen_flags: <defaults>
</compile_context>

<pallas_src>
import jax
import jax.numpy as jnp
from jax.experimental import pallas as pl
from jax.experimental.pallas import tpu as pltpu

LANE = 128


def _round_up(n, m):
    return (n + m - 1) // m * m


# ------------------------------------------------------------------
# Fused decoder kernel: 4 chained bf16 MXU matmuls, f32 accumulation,
# activations never leave VMEM.
# ------------------------------------------------------------------
def _decoder_kernel(x_ref, y_ref, wx_ref, wy_ref, bfc_ref,
                    w1_ref, b1_ref, w2_ref, b2_ref, w3_ref, b3_ref, o_ref):
    tb = x_ref.shape[0]

    # fc_t: Linear(12,64)+ReLU, decomposed as x@Wx + one_hot(y)@Wy (all bf16 MXU)
    classes = jax.lax.broadcasted_iota(jnp.int32, (tb, 10), 1)
    onehot = (classes == y_ref[...]).astype(jnp.bfloat16)
    h = jnp.dot(x_ref[...].astype(jnp.bfloat16), wx_ref[...],
                preferred_element_type=jnp.float32)
    h = h + jnp.dot(onehot, wy_ref[...], preferred_element_type=jnp.float32)
    h = jnp.maximum(h + bfc_ref[...], 0.0)                       # [TB, 64]

    # conv1_t: ConvTranspose2d(64,16,7) on a 1x1 map == dense matmul (784 -> 896 lanes)
    h = jnp.dot(h.astype(jnp.bfloat16), w1_ref[...],
                preferred_element_type=jnp.float32)
    h = jnp.maximum(h + b1_ref[...], 0.0)                        # [TB, 896]

    # conv2_t: ConvTranspose2d(16,8,3,s=2,p=1,op=1) pre-unrolled (1568 -> 1664 lanes)
    h = jnp.dot(h.astype(jnp.bfloat16), w2_ref[...],
                preferred_element_type=jnp.float32)
    h = jnp.maximum(h + b2_ref[...], 0.0)                        # [TB, 1664]

    # conv3_t: ConvTranspose2d(8,1,3,s=2,p=1,op=1) pre-unrolled (784 -> 896 lanes), no ReLU
    h = jnp.dot(h.astype(jnp.bfloat16), w3_ref[...],
                preferred_element_type=jnp.float32)
    o_ref[...] = (h + b3_ref[...]).astype(o_ref.dtype)           # [TB, 896]


# ------------------------------------------------------------------
# One-time param prep (off the hot path).
# ------------------------------------------------------------------
def _conv_transpose_ref(x, w, b, stride, padding, output_padding):
    """PyTorch-semantics ConvTranspose2d. x: NCHW, w: [Cin, Cout, kH, kW]."""
    k = w.shape[-1]
    lo = k - 1 - padding
    hi = k - 1 - padding + output_padding
    out = jax.lax.conv_general_dilated(
        x, w[:, :, ::-1, ::-1],
        window_strides=(1, 1),
        padding=[(lo, hi), (lo, hi)],
        lhs_dilation=(stride, stride),
        dimension_numbers=("NCHW", "IOHW", "NCHW"))
    return out + b[None, :, None, None]


def _unroll_convT(w, hin, win, stride, padding, output_padding):
    """Dense matrix M with: NHWC_flat_out = NHWC_flat_in @ M  (one-time prep)."""
    cin, cout = w.shape[0], w.shape[1]
    n_in = hin * win * cin
    basis = jnp.eye(n_in, dtype=jnp.float32).reshape(n_in, hin, win, cin)
    basis = jnp.transpose(basis, (0, 3, 1, 2))                    # NCHW
    out = _conv_transpose_ref(basis, w, jnp.zeros((cout,), jnp.float32),
                              stride, padding, output_padding)    # [n_in,Cout,Ho,Wo]
    out = jnp.transpose(out, (0, 2, 3, 1))                        # NHWC
    return out.reshape(n_in, -1)


def _pad2d(m, rows, cols):
    return jnp.pad(m, ((0, rows - m.shape[0]), (0, cols - m.shape[1])))


def init_params(key):
    """Deterministic synthetic init, PyTorch weight shapes."""
    ks = jax.random.split(key, 8)
    p = {}
    p["fc_w"] = jax.random.normal(ks[0], (12, 64), jnp.float32) * 0.1
    p["fc_b"] = jax.random.normal(ks[1], (64,), jnp.float32) * 0.1
    p["c1_w"] = jax.random.normal(ks[2], (64, 16, 7, 7), jnp.float32) * 0.05
    p["c1_b"] = jax.random.normal(ks[3], (16,), jnp.float32) * 0.05
    p["c2_w"] = jax.random.normal(ks[4], (16, 8, 3, 3), jnp.float32) * 0.05
    p["c2_b"] = jax.random.normal(ks[5], (8,), jnp.float32) * 0.05
    p["c3_w"] = jax.random.normal(ks[6], (8, 1, 3, 3), jnp.float32) * 0.05
    p["c3_b"] = jax.random.normal(ks[7], (1,), jnp.float32) * 0.05
    return p


def prepare_params(p):
    """Pre-lower every layer to lane-padded (matrix, bias-row); done once."""
    prep = {}
    # fc_t split: first 2 rows act on x, last 10 rows are the class embedding.
    prep["wx"] = p["fc_w"][:2].astype(jnp.bfloat16)                    # [2, 64]
    prep["wy"] = p["fc_w"][2:].astype(jnp.bfloat16)                    # [10, 64]
    prep["bfc"] = p["fc_b"].reshape(1, 64).astype(jnp.float32)

    n1, n2, n3 = 7 * 7 * 16, 14 * 14 * 8, 28 * 28 * 1                  # 784, 1568, 784
    n1p, n2p, n3p = (_round_up(n, LANE) for n in (n1, n2, n3))         # 896, 1664, 896

    w1 = _unroll_convT(p["c1_w"], 1, 1, stride=1, padding=0, output_padding=0)
    prep["w1"] = _pad2d(w1, 64, n1p).astype(jnp.bfloat16)              # [64, 896]
    prep["b1"] = _pad2d(jnp.tile(p["c1_b"], 49).reshape(1, n1), 1, n1p).astype(jnp.float32)

    w2 = _unroll_convT(p["c2_w"], 7, 7, stride=2, padding=1, output_padding=1)
    prep["w2"] = _pad2d(w2, n1p, n2p).astype(jnp.bfloat16)             # [896, 1664]
    prep["b2"] = _pad2d(jnp.tile(p["c2_b"], 196).reshape(1, n2), 1, n2p).astype(jnp.float32)

    w3 = _unroll_convT(p["c3_w"], 14, 14, stride=2, padding=1, output_padding=1)
    prep["w3"] = _pad2d(w3, n2p, n3p).astype(jnp.bfloat16)             # [1664, 896]
    prep["b3"] = _pad2d(jnp.tile(p["c3_b"], 784).reshape(1, n3), 1, n3p).astype(jnp.float32)
    return prep


# ------------------------------------------------------------------
# Batch-tile selection: multiple of 8, cap 256, minimise padded rows +
# per-step overhead; force >= 2 grid steps for big batches (v7x megacore).
# ------------------------------------------------------------------
def _choose_tile(B, cap=256, overhead_rows=48):
    b8 = _round_up(max(B, 8), 8)
    if b8 >= 128:                                   # make the parallel axis shardable
        cap = min(cap, _round_up((b8 + 1) // 2, 8))
    best = None
    for tb in range(8, min(cap, b8) + 1, 8):
        bp = _round_up(b8, tb)
        cost = bp + overhead_rows * (bp // tb)      # padded work + per-step overhead
        if best is None or cost < best[0] or (cost == best[0] and tb > best[1]):
            best = (cost, tb, bp)
    return best[1], best[2]


# ------------------------------------------------------------------
# Forward: one pallas_call, batch tiled on a parallel grid axis.
# ------------------------------------------------------------------
def decoder_forward(prep, x, y):
    B = x.shape[0]
    TB, Bp = _choose_tile(B)
    if Bp != B:
        x = jnp.pad(x, ((0, Bp - B), (0, 0)))
        y = jnp.pad(y, ((0, Bp - B),))
    y2 = y.reshape(Bp, 1).astype(jnp.int32)
    n_out = prep["w3"].shape[1]                     # 896 (lane-padded 28*28)
    grid = (Bp // TB,)

    resident = lambda i: (0, 0)                     # same block every step -> VMEM-resident
    single = pl.Buffered(1)                         # no dead double-buffer for weights

    def wspec(arr):
        return pl.BlockSpec(arr.shape, resident, pipeline_mode=single)

    flops = 2 * Bp * (2 * 64 + 10 * 64 + 64 * 896 + 896 * 1664 + 1664 * 896)
    wbytes = sum(int(prep[k].size) * prep[k].dtype.itemsize
                 for k in ("wx", "wy", "bfc", "w1", "b1", "w2", "b2", "w3", "b3"))
    bytes_accessed = wbytes + Bp * (2 * 4 + 4 + n_out * 4)

    out = pl.pallas_call(
        _decoder_kernel,
        out_shape=jax.ShapeDtypeStruct((Bp, n_out), jnp.float32),
        grid=grid,
        in_specs=[
            pl.BlockSpec((TB, 2), lambda i: (i, 0)),     # x tile
            pl.BlockSpec((TB, 1), lambda i: (i, 0)),     # y tile (int32)
            wspec(prep["wx"]),
            wspec(prep["wy"]),
            wspec(prep["bfc"]),
            wspec(prep["w1"]),
            wspec(prep["b1"]),
            wspec(prep["w2"]),
            wspec(prep["b2"]),
            wspec(prep["w3"]),
            wspec(prep["b3"]),
        ],
        out_specs=pl.BlockSpec((TB, n_out), lambda i: (i, 0)),
        compiler_params=pltpu.CompilerParams(
            dimension_semantics=("parallel",),
            vmem_limit_bytes=48 * 1024 * 1024,
        ),
        cost_estimate=pl.CostEstimate(
            flops=flops, transcendentals=0, bytes_accessed=bytes_accessed),
    )(x.astype(jnp.float32), y2,
      prep["wx"], prep["wy"], prep["bfc"],
      prep["w1"], prep["b1"], prep["w2"], prep["b2"], prep["w3"], prep["b3"])

    # NHWC flat with C == 1 -> NCHW is a pure reshape; drop lane + batch padding.
    return out[:B, :28 * 28].reshape(B, 1, 28, 28)


# ------------------------------------------------------------------
# Pure-JAX reference (PyTorch semantics) for the self-check.
# ------------------------------------------------------------------
def decoder_reference(params, x, y):
    onehot = jax.nn.one_hot(y, 10, dtype=x.dtype)
    h = jnp.concatenate([x, onehot], axis=1)
    h = jax.nn.relu(h @ params["fc_w"] + params["fc_b"])
    h = h[:, :, None, None]
    h = jax.nn.relu(_conv_transpose_ref(h, params["c1_w"], params["c1_b"], 1, 0, 0))
    h = jax.nn.relu(_conv_transpose_ref(h, params["c2_w"], params["c2_b"], 2, 1, 1))
    return _conv_transpose_ref(h, params["c3_w"], params["c3_b"], 2, 1, 1)


if __name__ == "__main__":
    key = jax.random.PRNGKey(0)
    pkey, xkey, ykey = jax.random.split(key, 3)
    params = init_params(pkey)
    prep = prepare_params(params)                 # one-time lowering

    B = 2
    x = jax.random.normal(xkey, (B, 2), jnp.float32)       # latent (2 features)
    y = jax.random.randint(ykey, (B,), 0, 10, jnp.int32)   # class labels

    out = jax.jit(decoder_forward)(prep, x, y)
    jax.block_until_ready(out)

    assert out.shape == (B, 1, 28, 28), out.shape
    assert out.dtype == jnp.float32

    ref = decoder_reference(params, x, y)
    err = float(jnp.max(jnp.abs(out - ref)))
    assert err < 2e-2, f"max abs error vs reference: {err}"

    print("KERNEL_OK")
</pallas_src>

<mosaic_0001>
module attributes {stable_mosaic.version = 11 : i64} {
  func.func @_decoder_kernel(%arg0: i32, %arg1: memref<8x2xf32, #tpu.memory_space<vmem>>, %arg2: memref<8x1xi32, #tpu.memory_space<vmem>>, %arg3: memref<2x64xbf16, #tpu.memory_space<vmem>>, %arg4: memref<10x64xbf16, #tpu.memory_space<vmem>>, %arg5: memref<1x64xf32, #tpu.memory_space<vmem>>, %arg6: memref<64x896xbf16, #tpu.memory_space<vmem>>, %arg7: memref<1x896xf32, #tpu.memory_space<vmem>>, %arg8: memref<896x1664xbf16, #tpu.memory_space<vmem>>, %arg9: memref<1x1664xf32, #tpu.memory_space<vmem>>, %arg10: memref<1664x896xbf16, #tpu.memory_space<vmem>>, %arg11: memref<1x896xf32, #tpu.memory_space<vmem>>, %arg12: memref<8x896xf32, #tpu.memory_space<vmem>>) attributes {dimension_semantics = [#tpu.dimension_semantics<parallel>], iteration_bounds = array<i64: 1>, scalar_prefetch = 0 : i64, scratch_operands = 0 : i64, tpu.core_type = #tpu.core_type<tc>, window_params = [{transform_indices = @transform_0, window_bounds = array<i64: 8, 2>}, {transform_indices = @transform_1, window_bounds = array<i64: 8, 1>}, {pipeline_mode = #tpu.pipeline_mode<synchronous>, transform_indices = @transform_2, window_bounds = array<i64: 2, 64>}, {pipeline_mode = #tpu.pipeline_mode<synchronous>, transform_indices = @transform_3, window_bounds = array<i64: 10, 64>}, {pipeline_mode = #tpu.pipeline_mode<synchronous>, transform_indices = @transform_4, window_bounds = array<i64: 1, 64>}, {pipeline_mode = #tpu.pipeline_mode<synchronous>, transform_indices = @transform_5, window_bounds = array<i64: 64, 896>}, {pipeline_mode = #tpu.pipeline_mode<synchronous>, transform_indices = @transform_6, window_bounds = array<i64: 1, 896>}, {pipeline_mode = #tpu.pipeline_mode<synchronous>, transform_indices = @transform_7, window_bounds = array<i64: 896, 1664>}, {pipeline_mode = #tpu.pipeline_mode<synchronous>, transform_indices = @transform_8, window_bounds = array<i64: 1, 1664>}, {pipeline_mode = #tpu.pipeline_mode<synchronous>, transform_indices = @transform_9, window_bounds = array<i64: 1664, 896>}, {pipeline_mode = #tpu.pipeline_mode<synchronous>, transform_indices = @transform_10, window_bounds = array<i64: 1, 896>}, {transform_indices = @transform_11, window_bounds = array<i64: 8, 896>}]} {
    %0 = tpu.iota {dimensions = array<i32: 1>} : vector<8x10xi32>
    %c0 = arith.constant 0 : index
    %c0_0 = arith.constant 0 : index
    %1 = vector.load %arg2[%c0, %c0_0] : memref<8x1xi32, #tpu.memory_space<vmem>>, vector<8x1xi32>
    %2 = vector.broadcast %1 : vector<8x1xi32> to vector<8x10xi32>
    %3 = arith.cmpi eq, %0, %2 : vector<8x10xi32>
    %4 = arith.extui %3 : vector<8x10xi1> to vector<8x10xi32>
    %5 = arith.sitofp %4 : vector<8x10xi32> to vector<8x10xf32>
    %6 = arith.truncf %5 : vector<8x10xf32> to vector<8x10xbf16>
    %c0_1 = arith.constant 0 : index
    %c0_2 = arith.constant 0 : index
    %7 = vector.load %arg1[%c0_1, %c0_2] : memref<8x2xf32, #tpu.memory_space<vmem>>, vector<8x2xf32>
    %8 = arith.truncf %7 : vector<8x2xf32> to vector<8x2xbf16>
    %c0_3 = arith.constant 0 : index
    %c0_4 = arith.constant 0 : index
    %9 = vector.load %arg3[%c0_3, %c0_4] : memref<2x64xbf16, #tpu.memory_space<vmem>>, vector<2x64xbf16>
    %cst = arith.constant dense<0.000000e+00> : vector<8x64xf32>
    %10 = tpu.matmul %8, %9, %cst {dimension_numbers = #tpu.dot_dimension_numbers<[1], [0], [0], [1], [0, 0, 1, 1], [], []>} : vector<8x2xbf16>, vector<2x64xbf16>, vector<8x64xf32> -> vector<8x64xf32>
    %c0_5 = arith.constant 0 : index
    %c0_6 = arith.constant 0 : index
    %11 = vector.load %arg4[%c0_5, %c0_6] : memref<10x64xbf16, #tpu.memory_space<vmem>>, vector<10x64xbf16>
    %cst_7 = arith.constant dense<0.000000e+00> : vector<8x64xf32>
    %12 = tpu.matmul %6, %11, %cst_7 {dimension_numbers = #tpu.dot_dimension_numbers<[1], [0], [0], [1], [0, 0, 1, 1], [], []>} : vector<8x10xbf16>, vector<10x64xbf16>, vector<8x64xf32> -> vector<8x64xf32>
    %13 = arith.addf %10, %12 : vector<8x64xf32>
    %c0_8 = arith.constant 0 : index
    %c0_9 = arith.constant 0 : index
    %14 = vector.load %arg5[%c0_8, %c0_9] : memref<1x64xf32, #tpu.memory_space<vmem>>, vector<1x64xf32>
    %15 = vector.broadcast %14 : vector<1x64xf32> to vector<8x64xf32>
    %16 = arith.addf %13, %15 : vector<8x64xf32>
    %cst_10 = arith.constant 0.000000e+00 : f32
    %17 = vector.broadcast %cst_10 : f32 to vector<8x64xf32>
    %18 = arith.maximumf %16, %17 : vector<8x64xf32>
    %19 = arith.truncf %18 : vector<8x64xf32> to vector<8x64xbf16>
    %c0_11 = arith.constant 0 : index
    %c0_12 = arith.constant 0 : index
    %20 = vector.load %arg6[%c0_11, %c0_12] : memref<64x896xbf16, #tpu.memory_space<vmem>>, vector<64x896xbf16>
    %cst_13 = arith.constant dense<0.000000e+00> : vector<8x896xf32>
    %21 = tpu.matmul %19, %20, %cst_13 {dimension_numbers = #tpu.dot_dimension_numbers<[1], [0], [0], [1], [0, 0, 1, 1], [], []>} : vector<8x64xbf16>, vector<64x896xbf16>, vector<8x896xf32> -> vector<8x896xf32>
    %c0_14 = arith.constant 0 : index
    %c0_15 = arith.constant 0 : index
    %22 = vector.load %arg7[%c0_14, %c0_15] : memref<1x896xf32, #tpu.memory_space<vmem>>, vector<1x896xf32>
    %23 = vector.broadcast %22 : vector<1x896xf32> to vector<8x896xf32>
    %24 = arith.addf %21, %23 : vector<8x896xf32>
    %cst_16 = arith.constant 0.000000e+00 : f32
    %25 = vector.broadcast %cst_16 : f32 to vector<8x896xf32>
    %26 = arith.maximumf %24, %25 : vector<8x896xf32>
    %27 = arith.truncf %26 : vector<8x896xf32> to vector<8x896xbf16>
    %c0_17 = arith.constant 0 : index
    %c0_18 = arith.constant 0 : index
    %28 = vector.load %arg8[%c0_17, %c0_18] : memref<896x1664xbf16, #tpu.memory_space<vmem>>, vector<896x1664xbf16>
    %cst_19 = arith.constant dense<0.000000e+00> : vector<8x1664xf32>
    %29 = tpu.matmul %27, %28, %cst_19 {dimension_numbers = #tpu.dot_dimension_numbers<[1], [0], [0], [1], [0, 0, 1, 1], [], []>} : vector<8x896xbf16>, vector<896x1664xbf16>, vector<8x1664xf32> -> vector<8x1664xf32>
    %c0_20 = arith.constant 0 : index
    %c0_21 = arith.constant 0 : index
    %30 = vector.load %arg9[%c0_20, %c0_21] : memref<1x1664xf32, #tpu.memory_space<vmem>>, vector<1x1664xf32>
    %31 = vector.broadcast %30 : vector<1x1664xf32> to vector<8x1664xf32>
    %32 = arith.addf %29, %31 : vector<8x1664xf32>
    %cst_22 = arith.constant 0.000000e+00 : f32
    %33 = vector.broadcast %cst_22 : f32 to vector<8x1664xf32>
    %34 = arith.maximumf %32, %33 : vector<8x1664xf32>
    %35 = arith.truncf %34 : vector<8x1664xf32> to vector<8x1664xbf16>
    %c0_23 = arith.constant 0 : index
    %c0_24 = arith.constant 0 : index
    %36 = vector.load %arg10[%c0_23, %c0_24] : memref<1664x896xbf16, #tpu.memory_space<vmem>>, vector<1664x896xbf16>
    %cst_25 = arith.constant dense<0.000000e+00> : vector<8x896xf32>
    %37 = tpu.matmul %35, %36, %cst_25 {dimension_numbers = #tpu.dot_dimension_numbers<[1], [0], [0], [1], [0, 0, 1, 1], [], []>} : vector<8x1664xbf16>, vector<1664x896xbf16>, vector<8x896xf32> -> vector<8x896xf32>
    %c0_26 = arith.constant 0 : index
    %c0_27 = arith.constant 0 : index
    %38 = vector.load %arg11[%c0_26, %c0_27] : memref<1x896xf32, #tpu.memory_space<vmem>>, vector<1x896xf32>
    %39 = vector.broadcast %38 : vector<1x896xf32> to vector<8x896xf32>
    %40 = arith.addf %37, %39 : vector<8x896xf32>
    %c0_28 = arith.constant 0 : index
    %c0_29 = arith.constant 0 : index
    %41 = vector.load %arg12[%c0_28, %c0_29] : memref<8x896xf32, #tpu.memory_space<vmem>>, vector<8x896xf32>
    tpu.vector_store %arg12[%c0_28, %c0_29], %40 {strides = array<i32>} : memref<8x896xf32, #tpu.memory_space<vmem>>, vector<8x896xf32>,
    return
  }
  func.func @transform_0(%arg0: i32) -> (i32, i32) {
    %c0_i32 = arith.constant 0 : i32
    %c0_i32_0 = arith.constant 0 : i32
    return %arg0, %c0_i32 : i32, i32
  }
  func.func @transform_1(%arg0: i32) -> (i32, i32) {
    %c0_i32 = arith.constant 0 : i32
    %c0_i32_0 = arith.constant 0 : i32
    return %arg0, %c0_i32 : i32, i32
  }
  func.func @transform_2(%arg0: i32) -> (i32, i32) {
    %c0_i32 = arith.constant 0 : i32
    %c0_i32_0 = arith.constant 0 : i32
    %c0_i32_1 = arith.constant 0 : i32
    return %c0_i32, %c0_i32_0 : i32, i32
  }
  func.func @transform_3(%arg0: i32) -> (i32, i32) {
    %c0_i32 = arith.constant 0 : i32
    %c0_i32_0 = arith.constant 0 : i32
    %c0_i32_1 = arith.constant 0 : i32
    return %c0_i32, %c0_i32_0 : i32, i32
  }
  func.func @transform_4(%arg0: i32) -> (i32, i32) {
    %c0_i32 = arith.constant 0 : i32
    %c0_i32_0 = arith.constant 0 : i32
    %c0_i32_1 = arith.constant 0 : i32
    return %c0_i32, %c0_i32_0 : i32, i32
  }
  func.func @transform_5(%arg0: i32) -> (i32, i32) {
    %c0_i32 = arith.constant 0 : i32
    %c0_i32_0 = arith.constant 0 : i32
    %c0_i32_1 = arith.constant 0 : i32
    return %c0_i32, %c0_i32_0 : i32, i32
  }
  func.func @transform_6(%arg0: i32) -> (i32, i32) {
    %c0_i32 = arith.constant 0 : i32
    %c0_i32_0 = arith.constant 0 : i32
    %c0_i32_1 = arith.constant 0 : i32
    return %c0_i32, %c0_i32_0 : i32, i32
  }
  func.func @transform_7(%arg0: i32) -> (i32, i32) {
    %c0_i32 = arith.constant 0 : i32
    %c0_i32_0 = arith.constant 0 : i32
    %c0_i32_1 = arith.constant 0 : i32
    return %c0_i32, %c0_i32_0 : i32, i32
  }
  func.func @transform_8(%arg0: i32) -> (i32, i32) {
    %c0_i32 = arith.constant 0 : i32
    %c0_i32_0 = arith.constant 0 : i32
    %c0_i32_1 = arith.constant 0 : i32
    return %c0_i32, %c0_i32_0 : i32, i32
  }
  func.func @transform_9(%arg0: i32) -> (i32, i32) {
    %c0_i32 = arith.constant 0 : i32
    %c0_i32_0 = arith.constant 0 : i32
    %c0_i32_1 = arith.constant 0 : i32
    return %c0_i32, %c0_i32_0 : i32, i32
  }
  func.func @transform_10(%arg0: i32) -> (i32, i32) {
    %c0_i32 = arith.constant 0 : i32
    %c0_i32_0 = arith.constant 0 : i32
    %c0_i32_1 = arith.constant 0 : i32
    return %c0_i32, %c0_i32_0 : i32, i32
  }
  func.func @transform_11(%arg0: i32) -> (i32, i32) {
    %c0_i32 = arith.constant 0 : i32
    %c0_i32_0 = arith.constant 0 : i32
    return %arg0, %c0_i32 : i32, i32
  }
}

</mosaic_0001>

<bundles_post_ra>
// kernel: decoder_forward.1
= control target key start
LH: loop header
LB: loop body
LE: loop exit
PB: predicated region body
PF: predicated region fallthrough
CT: control target
= control target key end

     0   :  { %16 = vsyncpa [#allocation3], 0  ;;  %s20553_s0 = inlined_call_operand.vmem [shape: f32[8,2], index: 0, kind: input, shape index: {}]   ;;  %s20554_s1 = inlined_call_operand.vmem [shape: s32[8,1], index: 1, kind: input, shape index: {}]   ;;  %s20555_s2 = inlined_call_operand.hbm [shape: bf16[2,64], index: 2, kind: input, shape index: {}]   ;;  %s20556_s3 = inlined_call_operand.hbm [shape: bf16[10,64], index: 3, kind: input, shape index: {}]   ;;  %s20557_s4 = inlined_call_operand.hbm [shape: f32[1,64], index: 4, kind: input, shape index: {}]   ;;  %s20558_s5 = inlined_call_operand.hbm [shape: bf16[64,896], index: 5, kind: input, shape index: {}]   ;;  %s20559_s6 = inlined_call_operand.hbm [shape: f32[1,896], index: 6, kind: input, shape index: {}]   ;;  %s20560_s7 = inlined_call_operand.hbm [shape: bf16[896,1664], index: 7, kind: input, shape index: {}]   ;;  %s20561_s8 = inlined_call_operand.hbm [shape: f32[1,1664], index: 8, kind: input, shape index: {}]   ;;  %s20562_s9 = inlined_call_operand.hbm [shape: bf16[1664,896], index: 9, kind: input, shape index: {}]   ;;  %s20563_s10 = inlined_call_operand.hbm [shape: f32[1,896], index: 10, kind: input, shape index: {}]   ;;  %s20564_s11 = inlined_call_operand.vmem [shape: f32[8,896], index: 11, kind: output, shape index: {}]  }
   0x1   :  { %17 = vsyncpa [#allocation5], 0 }
   0x2   :  { %18 = vsyncpa [#allocation8], 0 }
   0x3   :  { %19 = vsyncpa [#allocation11], 0  ;;  %s40_s19 = sshll.u32 %s20556_s3, 4  ;;  %s41_s19 = int_to_ptr.hbm [resolvable:$true] %s40_s19 }
   0x4   :  { %20 = vsyncpa [#allocation14], 0  ;;  %s19736_s20 = smov [#allocation4]   ;;  %s64_s24 = sshll.u32 %s20558_s5, 4  ;;  %s65_s24 = int_to_ptr.hbm [resolvable:$true] %s64_s24 }
   0x5   :  { %s42_s21 = sshll.u32 %s19736_s20, 4  ;;  %s19737_s25 = smov 64   ;;  %s43_s21 = int_to_ptr.vmem [resolvable:$true] %s42_s21 }
   0x6   :  { %s19738_s26 = smov 4   ;;  %s19739_s27 = smov [#allocation7]  }
   0x7   :  { %48 = dma.hbm_to_vmem [thread:$0]  %s41_s19, 128, %s43_s21, [#allocation5], %s19737_s25, %s19737_s25, %s19738_s26  }
   0x8   :  { %s66_s28 = sshll.u32 %s19739_s27, 4  ;;  %s19740_s29 = smov 448   ;;  %s67_s28 = int_to_ptr.vmem [resolvable:$true] %s66_s28 }
   0x9   :  { %s19741_s30 = smov 28   ;;  %s88_s13 = sshll.u32 %s20560_s7, 4  ;;  %s89_s13 = int_to_ptr.hbm [resolvable:$true] %s88_s13 }
   0xa   :  { %72 = dma.hbm_to_vmem [thread:$0]  %s65_s24, 3584, %s67_s28, [#allocation8], %s19740_s29, %s19740_s29, %s19741_s30  }
   0xb   :  { %s19742_s14 = smov [#allocation10]   ;;  %s112_s17 = sshll.u32 %s20562_s9, 4  ;;  %s113_s17 = int_to_ptr.hbm [resolvable:$true] %s112_s17 }
   0xc   :  { %s90_s15 = sshll.u32 %s19742_s14, 4  ;;  %s19743_s18 = smov 832   ;;  %s91_s15 = int_to_ptr.vmem [resolvable:$true] %s90_s15 }
   0xd   :  { %s19744_s19 = smov 52   ;;  %s19745_s20 = smov [#allocation13]  }
   0xe   :  { %96 = dma.hbm_to_vmem [thread:$0]  %s89_s13, 93184, %s91_s15, [#allocation11], %s19743_s18, %s19743_s18, %s19744_s19  }
   0xf   :  { %s114_s21 = sshll.u32 %s19745_s20, 4  ;;  %s30_s24 = sshll.u32 %s20555_s2, 4  ;;  %s115_s21 = int_to_ptr.vmem [resolvable:$true] %s114_s21  ;;  %s31_s24 = int_to_ptr.hbm [resolvable:$true] %s30_s24 }
  0x10   :  { %120 = dma.hbm_to_vmem [thread:$0]  %s113_s17, 93184, %s115_s21, [#allocation14], %s19740_s29, %s19740_s29, %s19741_s30  }
  0x11   :  { %s54_s26 = sshll.u32 %s20557_s4, 4  ;;  %s19746_s27 = smov [#allocation2]   ;;  %s55_s26 = int_to_ptr.hbm [resolvable:$true] %s54_s26 }
  0x12   :  { %s32_s28 = sshll.u32 %s19746_s27, 4  ;;  %s19747_s9 = smov [#allocation6]   ;;  %s33_s28 = int_to_ptr.vmem [resolvable:$true] %s32_s28 }
  0x13   :  { %35 = dma.hbm_to_vmem [thread:$0]  %s31_s24, 16, %s33_s28, [#allocation3]  }
  0x14   :  { %s56_s3 = sshll.u32 %s19747_s9, 4  ;;  %s78_s14 = sshll.u32 %s20559_s6, 4  ;;  %s57_s3 = int_to_ptr.vmem [resolvable:$true] %s56_s3  ;;  %s79_s14 = int_to_ptr.hbm [resolvable:$true] %s78_s14 }
  0x15   :  { %59 = dma.hbm_to_vmem [thread:$0]  %s55_s26, 16, %s57_s3, [#allocation5]  }
  0x16   :  { %s102_s30 = sshll.u32 %s20561_s8, 4  ;;  %s19748_s15 = smov [#allocation9]   ;;  %s103_s30 = int_to_ptr.hbm [resolvable:$true] %s102_s30 }
  0x17   :  { %s80_s4 = sshll.u32 %s19748_s15, 4  ;;  %s19749_s16 = smov [#allocation12]   ;;  %s81_s4 = int_to_ptr.vmem [resolvable:$true] %s80_s4 }
  0x18   :  { %83 = dma.hbm_to_vmem [thread:$0]  %s79_s14, 112, %s81_s4, [#allocation8]  }
  0x19   :  { %s104_s5 = sshll.u32 %s19749_s16, 4  ;;  %s126_s19 = sshll.u32 %s20563_s10, 4  ;;  %s105_s5 = int_to_ptr.vmem [resolvable:$true] %s104_s5  ;;  %s127_s19 = int_to_ptr.hbm [resolvable:$true] %s126_s19 }
  0x1a   :  { %107 = dma.hbm_to_vmem [thread:$0]  %s103_s30, 208, %s105_s5, [#allocation11]  }
  0x1b   :  { %s19750_s6 = smov [#allocation15]  }
  0x1c   :  { %s128_s20 = sshll.u32 %s19750_s6, 4  ;;  %s129_s20 = int_to_ptr.vmem [resolvable:$true] %s128_s20 }
  0x1d   :  { %131 = dma.hbm_to_vmem [thread:$0]  %s127_s19, 112, %s129_s20, [#allocation14]  }
  0x1e   :  { %19726 = dma.done.wait [#allocation3], 16  }
  0x1f   :  { %19727 = vsyncadd [#allocation3], 4294967280 }
  0x20   :  { %19728 = dma.done.wait [#allocation5], 144  }
  0x21   :  { %19729 = vsyncadd [#allocation5], 4294967152 }
  0x22   :  { %19730 = dma.done.wait [#allocation8], 3696  }
  0x23   :  { %19731 = vsyncadd [#allocation8], 4294963600 }
  0x24   :  { %19732 = dma.done.wait [#allocation11], 93392  }
  0x25   :  { %19733 = vsyncadd [#allocation11], 4294873904 }
  0x26   :  { %19734 = dma.done.wait [#allocation14], 93296  }
  0x27   :  { %19735 = vsyncadd [#allocation14], 4294874000  ;;  %v19751_v0 = vmov 0   ;;  %vm214_vm0 = vcmask 1040384   ;;  %v171_v1 = vld [vmem:[%s20554_s1] sm:$0xff]  ;;  %vm210_vm1 = vcmask 15360   ;;  %v169_v34 = vlaneseq }
  0x28   :  { %19501 = vset.pattern.permute.xlu0 %v19751_v0  ;;  %v181_v2 = vld [vmem:[#allocation2] sm:$0x1]  ;;  %v12052_v6 = vld [vmem:[#allocation4] sm:$0xf]  ;;  %v17999_v7 = vld [vmem:[#allocation4] sm:$0x10] }
  0x29   :  { %v179_v3 = vld [vmem:[%s20553_s0] sm:$0xff]  ;;  %173 = vperm.xlu0 %19501, %v171_v1   ;;  %v216_v4 = vsel %vm214_vm0, %v181_v2, 0  ;;  %v12053_v8 = vor.u32 %v17999_v7, %v12052_v6  ;;  %vm193_vm2 = vcmask 1044480   ;;  %v12142_v10 = vld [vmem:[#allocation7 + $0xa8] sm:$0xf]  ;;  %v170_v35 = vand.u32 127, %v169_v34 }
  0x2a   :  { %v180_v5 = vpack.c.bf16 %v179_v3, %v179_v3  ;;  %225 = vmatpush.bf16.msra.mxu1 %v216_v4  ;;  %v18024_v11 = vld [vmem:[#allocation7 + $0xc0] sm:$0xf0]  ;;  %v12150_v12 = vld [vmem:[#allocation7 + $0xb0] sm:$0xf]  ;;  %v18025_v14 = vld [vmem:[#allocation7 + $0xc8] sm:$0xf0] }
  0x2b   :  { %v195_v9 = vsel %vm193_vm2, %v12053_v8, 0  ;;  %v12143_v13 = vor.u32 %v18024_v11, %v12142_v10  ;;  %v18022_v15 = vld [vmem:[#allocation7 + $0xb4] sm:$0xf]  ;;  %v12152_v16 = vld [vmem:[#allocation7 + $0xcc] sm:$0xf0]  ;;  %v12151_v17 = vor.u32 %v18025_v14, %v12150_v12  ;;  %v19752_v37 = vmov 0.0  }
  0x2c   :  { %204 = vmatpush.bf16.msra.mxu0 %v195_v9  ;;  %v12155_v18 = vor.u32 %v18022_v15, %v12152_v16  ;;  %v12158_v19 = vld [vmem:[#allocation7 + $0xb8] sm:$0xf]  ;;  %v18026_v20 = vld [vmem:[#allocation7 + $0xd0] sm:$0xf0]  ;;  %v12114_v21 = vld [vmem:[#allocation7 + $0x70] sm:$0xf] }
  0x2d   :  { %12055 = vmatmul.msk.bf16.vlgmr.msra.gmra.mxu1 %vm210_vm1, %v180_v5  ;;  %438 = vmatpush.bf16.msra.mxu3 %v12143_v13  ;;  %v12159_v22 = vor.u32 %v18026_v20, %v12158_v19  ;;  %v18017_v23 = vld [vmem:[#allocation7 + $0x88] sm:$0xf0]  ;;  %v12122_v24 = vld [vmem:[#allocation7 + $0x78] sm:$0xf]  ;;  %v18018_v25 = vld [vmem:[#allocation7 + $0x90] sm:$0xf0] }
  0x2e   :  { %477 = vmatpush.bf16.msrb.mxu1 %v12155_v18  ;;  %v12115_v26 = vor.u32 %v18017_v23, %v12114_v21  ;;  %v12123_v27 = vor.u32 %v18018_v25, %v12122_v24  ;;  %v18015_v28 = vld [vmem:[#allocation7 + $0x7c] sm:$0xf]  ;;  %v12124_v29 = vld [vmem:[#allocation7 + $0x94] sm:$0xf0]  ;;  %v12130_v30 = vld [vmem:[#allocation7 + $0x80] sm:$0xf] }
  0x2f   :  { %490 = vmatpush.bf16.msra.mxu2 %v12159_v22  ;;  %v12127_v31 = vor.u32 %v18015_v28, %v12124_v29  ;;  %v18019_v32 = vld [vmem:[#allocation7 + $0x98] sm:$0xf0]  ;;  %vm189_vm4 = vcmask 80896   ;;  %v12086_v42 = vld [vmem:[#allocation7 + $0x38] sm:$0xf]  ;;  %vm430_vm5 = vcmask 523264  }
  0x30   :  { %464 = vmatpush.bf16.msrb.mxu0 %v12151_v17  ;;  %v12131_v33 = vor.u32 %v18019_v32, %v12130_v30  ;;  %v18010_v43 = vld [vmem:[#allocation7 + $0x50] sm:$0xf0]  ;;  %v12094_v44 = vld [vmem:[#allocation7 + $0x40] sm:$0xf]  ;;  %v18011_v46 = vld [vmem:[#allocation7 + $0x58] sm:$0xf0] }
  0x31   :  { %439 = vmatpush.bf16.msra.mxu3 %v12115_v26  ;;  %v12087_v45 = vor.u32 %v18010_v43, %v12086_v42  ;;  %v18008_v47 = vld [vmem:[#allocation7 + $0x44] sm:$0xf]  ;;  %v12096_v48 = vld [vmem:[#allocation7 + $0x5c] sm:$0xf0]  ;;  %v12095_v49 = vor.u32 %v18011_v46, %v12094_v44  ;;  %v12102_v51 = vld [vmem:[#allocation7 + $0x48] sm:$0xf] }
  0x32   :  { %478 = vmatpush.bf16.msrb.mxu1 %v12127_v31  ;;  %v12099_v50 = vor.u32 %v18008_v47, %v12096_v48  ;;  %v18012_v52 = vld [vmem:[#allocation7 + $0x60] sm:$0xf0]  ;;  %v12058_v54 = vld [vmem:[#allocation7] sm:$0xf]  ;;  %v18003_v55 = vld [vmem:[#allocation7 + $0x18] sm:$0xf0] }
  0x33   :  { %491 = vmatpush.bf16.msra.mxu2 %v12131_v33  ;;  %v12103_v53 = vor.u32 %v18012_v52, %v12102_v51  ;;  %v12066_v56 = vld [vmem:[#allocation7 + $0x8] sm:$0xf]  ;;  %v12059_v57 = vor.u32 %v18003_v55, %v12058_v54  ;;  %v18004_v58 = vld [vmem:[#allocation7 + $0x20] sm:$0xf0]  ;;  %v18001_v59 = vld [vmem:[#allocation7 + $0xc] sm:$0xf] }
  0x34   :  { %465 = vmatpush.bf16.msrb.mxu0 %v12123_v27  ;;  %v12068_v60 = vld [vmem:[#allocation7 + $0x24] sm:$0xf0]  ;;  %v12067_v61 = vor.u32 %v18004_v58, %v12066_v56  ;;  %v12074_v63 = vld [vmem:[#allocation7 + $0x10] sm:$0xf]  ;;  %v18005_v0 = vld [vmem:[#allocation7 + $0x28] sm:$0xf0] }
  0x35   :  { %440 = vmatpush.bf16.msra.mxu3 %v12087_v45  ;;  %v12071_v62 = vor.u32 %v18001_v59, %v12068_v60  ;;  %v12075_v1 = vor.u32 %v18005_v0, %v12074_v63  ;;  %v18021_v2 = vld [vmem:[#allocation7 + $0xac] sm:$0xf]  ;;  %v12144_v3 = vld [vmem:[#allocation7 + $0xc4] sm:$0xf0]  ;;  %v12166_v5 = vld [vmem:[#allocation7 + $0xc0] sm:$0xf] }
  0x36   :  { %479 = vmatpush.bf16.msrb.mxu1 %v12099_v50  ;;  %v12147_v4 = vor.u32 %v18021_v2, %v12144_v3  ;;  %v18027_v6 = vld [vmem:[#allocation7 + $0xd8] sm:$0xf0]  ;;  %v18014_v8 = vld [vmem:[#allocation7 + $0x74] sm:$0xf]  ;;  %v12116_v9 = vld [vmem:[#allocation7 + $0x8c] sm:$0xf0] }
  0x37   :  { %492 = vmatpush.bf16.msra.mxu2 %v12103_v53  ;;  %v12167_v7 = vor.u32 %v18027_v6, %v12166_v5  ;;  %v12138_v10 = vld [vmem:[#allocation7 + $0x88] sm:$0xf]  ;;  %v12119_v11 = vor.u32 %v18014_v8, %v12116_v9  ;;  %v18020_v12 = vld [vmem:[#allocation7 + $0xa0] sm:$0xf0]  ;;  %v18007_v14 = vld [vmem:[#allocation7 + $0x3c] sm:$0xf] }
  0x38   :  { %466 = vmatpush.bf16.msrb.mxu0 %v12095_v49  ;;  %v12139_v13 = vor.u32 %v18020_v12, %v12138_v10  ;;  %v12088_v15 = vld [vmem:[#allocation7 + $0x54] sm:$0xf0]  ;;  %v12110_v16 = vld [vmem:[#allocation7 + $0x50] sm:$0xf]  ;;  %v18013_v17 = vld [vmem:[#allocation7 + $0x68] sm:$0xf0] }
  0x39   :  { %441 = vmatpush.bf16.msra.mxu3 %v12059_v57  ;;  %v12091_v18 = vor.u32 %v18007_v14, %v12088_v15  ;;  %v12111_v19 = vor.u32 %v18013_v17, %v12110_v16  ;;  %v18000_v20 = vld [vmem:[#allocation7 + $0x4] sm:$0xf]  ;;  %v12060_v21 = vld [vmem:[#allocation7 + $0x1c] sm:$0xf0]  ;;  %v12082_v22 = vld [vmem:[#allocation7 + $0x18] sm:$0xf] }
  0x3a   :  { %480 = vmatpush.bf16.msrb.mxu1 %v12071_v62  ;;  %v18006_v23 = vld [vmem:[#allocation7 + $0x30] sm:$0xf0]  ;;  %v12063_v24 = vor.u32 %v18000_v20, %v12060_v21  ;;  %v19502_v26 = vld [vmem:[#allocation6] ss:$0 sm:$0xff]  ;;  %v12160_v31 = vld [vmem:[#allocation7 + $0xd4] sm:$0xf0] }
  0x3b   :  { %493 = vmatpush.bf16.msra.mxu2 %v12075_v1  ;;  %v12083_v25 = vor.u32 %v18006_v23, %v12082_v22  ;;  %v18023_v30 = vld [vmem:[#allocation7 + $0xbc] sm:$0xf]  ;;  %v13737_v42 = vld [vmem:[#allocation10 + $0xc30] sm:$0xf]  ;;  %v18424_v43 = vld [vmem:[#allocation10 + $0xc60] sm:$0xf0] }
  0x3c   :  { %467 = vmatpush.bf16.msrb.mxu0 %v12067_v61  ;;  %v12163_v34 = vor.u32 %v18023_v30, %v12160_v31  ;;  %v12541_v44 = vld [vmem:[#allocation10 + $0x2d8] sm:$0xf]  ;;  %v18009_v45 = vld [vmem:[#allocation7 + $0x4c] sm:$0xf]  ;;  %v12104_v46 = vld [vmem:[#allocation7 + $0x64] sm:$0xf0]  ;;  %v13738_v48 = vor.u32 %v18424_v43, %v13737_v42 }
  0x3d   :  { %451 = vmatpush.bf16.msrb.mxu3 %v12147_v4  ;;  %v18125_v47 = vld [vmem:[#allocation10 + $0x308] sm:$0xf0]  ;;  %v12489_v50 = vld [vmem:[#allocation10 + $0x270] sm:$0xf]  ;;  %v13685_v51 = vld [vmem:[#allocation10 + $0xbc8] sm:$0xf]  ;;  %v12107_v54 = vor.u32 %v18009_v45, %v12104_v46 }
  0x3e   :  { %v12542_v49 = vor.u32 %v18125_v47, %v12541_v44  ;;  %v18411_v52 = vld [vmem:[#allocation10 + $0xbf8] sm:$0xf0]  ;;  %v18112_v53 = vld [vmem:[#allocation10 + $0x2a0] sm:$0xf0]  ;;  %v18002_v55 = vld [vmem:[#allocation7 + $0x14] sm:$0xf] }
  0x3f   :  { %v12490_v56 = vor.u32 %v18112_v53, %v12489_v50  ;;  %v12076_v57 = vld [vmem:[#allocation7 + $0x2c] sm:$0xf0]  ;;  %v18099_v59 = vld [vmem:[#allocation10 + $0x238] sm:$0xf0]  ;;  %v13686_v60 = vor.u32 %v18411_v52, %v13685_v51  ;;  %v13373_v61 = vld [vmem:[#allocation10 + $0x958] sm:$0xf] }
  0x40   :  { %5049 = vmatpush.bf16.msra.mxu1 %v12542_v49  ;;  %v12437_v58 = vld [vmem:[#allocation10 + $0x208] sm:$0xf]  ;;  %v18333_v62 = vld [vmem:[#allocation10 + $0x988] sm:$0xf0]  ;;  %v12079_v63 = vor.u32 %v18002_v55, %v12076_v57  ;;  %v13633_v0 = vld [vmem:[#allocation10 + $0xb60] sm:$0xf] }
  0x41   :  { %452 = vmatpush.bf16.msrb.mxu3 %v12119_v11  ;;  %v18398_v1 = vld [vmem:[#allocation10 + $0xb90] sm:$0xf0]  ;;  %v12438_v2 = vor.u32 %v18099_v59, %v12437_v58  ;;  %v12385_v3 = vld [vmem:[#allocation10 + $0x1a0] sm:$0xf]  ;;  %v12957_v5 = vld [vmem:[#allocation10 + $0x618] sm:$0xf]  ;;  %v13374_v8 = vor.u32 %v18333_v62, %v13373_v61 }
  0x42   :  { %v18086_v4 = vld [vmem:[#allocation10 + $0x1d0] sm:$0xf0]  ;;  %v18229_v6 = vld [vmem:[#allocation10 + $0x648] sm:$0xf0]  ;;  %v13321_v9 = vld [vmem:[#allocation10 + $0x8f0] sm:$0xf]  ;;  %v13634_v11 = vor.u32 %v18398_v1, %v13633_v0 }
  0x43   :  { %v18320_v10 = vld [vmem:[#allocation10 + $0x920] sm:$0xf0]  ;;  %v13581_v12 = vld [vmem:[#allocation10 + $0xaf8] sm:$0xf]  ;;  %v12386_v14 = vor.u32 %v18086_v4, %v12385_v3  ;;  %v12905_v15 = vld [vmem:[#allocation10 + $0x5b0] sm:$0xf] }
  0x44   :  { %5050 = vmatpush.bf16.msra.mxu1 %v12490_v56  ;;  %v18216_v16 = vld [vmem:[#allocation10 + $0x5e0] sm:$0xf0]  ;;  %v12333_v17 = vld [vmem:[#allocation10 + $0x138] sm:$0xf]  ;;  %v13322_v20 = vor.u32 %v18320_v10, %v13321_v9  ;;  %v13269_v21 = vld [vmem:[#allocation10 + $0x888] sm:$0xf] }
  0x45   :  { %453 = vmatpush.bf16.msrb.mxu3 %v12091_v18  ;;  %v18073_v18 = vld [vmem:[#allocation10 + $0x168] sm:$0xf0]  ;;  %v18307_v22 = vld [vmem:[#allocation10 + $0x8b8] sm:$0xf0]  ;;  %v18060_v30 = vld [vmem:[#allocation10 + $0x100] sm:$0xf0] }
  0x46   :  { %v12229_v42 = vld [vmem:[#allocation10 + $0x68] sm:$0xf]  ;;  %v18047_v43 = vld [vmem:[#allocation10 + $0x98] sm:$0xf0]  ;;  %v12749_v45 = vld [vmem:[#allocation10 + $0x478] sm:$0xf] }
  0x47   :  { %v18177_v46 = vld [vmem:[#allocation10 + $0x4a8] sm:$0xf0]  ;;  %v13425_v51 = vld [vmem:[#allocation10 + $0x9c0] sm:$0xf]  ;;  %v18346_v52 = vld [vmem:[#allocation10 + $0x9f0] sm:$0xf0]  ;;  %v12230_v55 = vor.u32 %v18047_v43, %v12229_v42 }
  0x48   :  { %5051 = vmatpush.bf16.msra.mxu1 %v12438_v2  ;;  %v18281_v49 = vld [vmem:[#allocation10 + $0x7e8] sm:$0xf0]  ;;  %v18119_v53 = vld [vmem:[#allocation10 + $0x2dc] sm:$0xf]  ;;  %v12177_v56 = vld [vmem:[#allocation10] sm:$0xf]  ;;  %v12750_v59 = vor.u32 %v18177_v46, %v12749_v45  ;;  %v13426_v0 = vor.u32 %v18346_v52, %v13425_v51 }
  0x49   :  { %454 = vmatpush.bf16.msrb.mxu3 %v12063_v24  ;;  %v13529_v24 = vld [vmem:[#allocation10 + $0xa90] sm:$0xf]  ;;  %v18034_v57 = vld [vmem:[#allocation10 + $0x30] sm:$0xf0]  ;;  %v14205_v58 = vld [vmem:[#allocation10 + $0xfd8] sm:$0xf] }
  0x4a   :  { %v12697_v61 = vld [vmem:[#allocation10 + $0x410] sm:$0xf]  ;;  %v18164_v62 = vld [vmem:[#allocation10 + $0x440] sm:$0xf0]  ;;  %v12178_v4 = vor.u32 %v18034_v57, %v12177_v56  ;;  %v18067_v42 = vld [vmem:[#allocation10 + $0x13c] sm:$0xf] }
  0x4b   :  { %v13113_v1 = vld [vmem:[#allocation10 + $0x750] sm:$0xf]  ;;  %v18268_v2 = vld [vmem:[#allocation10 + $0x780] sm:$0xf0]  ;;  %v12698_v9 = vor.u32 %v18164_v62, %v12697_v61  ;;  %v14933_v46 = vld [vmem:[#allocation10 + $0x1588] sm:$0xf] }
  0x4c   :  { %5052 = vmatpush.bf16.msra.mxu1 %v12386_v14  ;;  %v18528_v10 = vld [vmem:[#allocation10 + $0xfa0] sm:$0xf0]  ;;  %v13061_v14 = vld [vmem:[#allocation10 + $0x6e8] sm:$0xf]  ;;  %v12335_v43 = vld [vmem:[#allocation10 + $0x16c] sm:$0xf0] }
  0x4d   :  { %v14829_v56 = vld [vmem:[#allocation10 + $0x14b8] sm:$0xf]  ;;  %v18697_v57 = vld [vmem:[#allocation10 + $0x14e8] sm:$0xf0] }
  0x4e   :  { %v13997_v62 = vld [vmem:[#allocation10 + $0xe38] sm:$0xf] }
  0x9b   :  { %v174_v36 = vpop.permute.xlu0 %173 }
  0x9c   :  { %vm175_vm3 = vcmp.eq.s32.totalorder %v170_v35, %v174_v36  ;;  %v18016_v36 = vld [vmem:[#allocation7 + $0x84] sm:$0xf] }
  0x9d   :  { %v12049_v38 = vsel %vm175_vm3, 1.0, %v19752_v37  ;;  %v12132_v37 = vld [vmem:[#allocation7 + $0x9c] sm:$0xf0] }
  0x9e   :  { %v178_v39 = vpack.c.bf16 %v12049_v38, %v12049_v38  ;;  %v13789_v38 = vld [vmem:[#allocation10 + $0xc98] sm:$0xf] }
  0xa0   :  { %12054 = vmatmul.msk.bf16.vlgmr.msra.gmra.mxu0 %vm189_vm4, %v178_v39  ;;  %v18437_v39 = vld [vmem:[#allocation10 + $0xcc8] sm:$0xf0] }
  0xa1   :  { %516 = vmatpush.bf16.msra.mxu0 %v12167_v7  ;;  %v12958_v7 = vor.u32 %v18229_v6, %v12957_v5  ;;  %v18106_v5 = vld [vmem:[#allocation10 + $0x274] sm:$0xf]  ;;  %v12491_v6 = vld [vmem:[#allocation10 + $0x2a4] sm:$0xf0] }
  0xa3   :  { %5062 = vmatpush.bf16.msrb.mxu2 %v12958_v7 }
  0xa5   :  { %517 = vmatpush.bf16.msra.mxu0 %v12139_v13  ;;  %v18385_v13 = vld [vmem:[#allocation10 + $0xb28] sm:$0xf0] }
  0xa6   :  { %v13582_v23 = vor.u32 %v18385_v13, %v13581_v12  ;;  %v18151_v12 = vld [vmem:[#allocation10 + $0x3d8] sm:$0xf0]  ;;  %v13114_v13 = vor.u32 %v18268_v2, %v13113_v1  ;;  %v18645_v2 = vld [vmem:[#allocation10 + $0x1348] sm:$0xf0] }
  0xa9   :  { %518 = vmatpush.bf16.msra.mxu0 %v12111_v19  ;;  %v12906_v19 = vor.u32 %v18216_v16, %v12905_v15  ;;  %v18255_v15 = vld [vmem:[#allocation10 + $0x718] sm:$0xf0]  ;;  %v12494_v16 = vor.u32 %v18106_v5, %v12491_v6 }
  0xaa   :  { %v19846_v40 = vpop.f32.mrf.mxu1  ;;  %v18671_v5 = vld [vmem:[#allocation10 + $0x1418] sm:$0xf0] }
  0xab   :  { %5063 = vmatpush.bf16.msrb.mxu2 %v12906_v19 }
  0xad   :  { %519 = vmatpush.bf16.msra.mxu0 %v12083_v25  ;;  %v18372_v25 = vld [vmem:[#allocation10 + $0xac0] sm:$0xf0] }
  0xb2   :  { %v229_v41 = vpop.f32.mrf.mxu1 }
  0xb3   :  { %v13790_v41 = vor.u32 %v18437_v39, %v13789_v38  ;;  %v18294_v38 = vld [vmem:[#allocation10 + $0x850] sm:$0xf0]  ;;  %v13477_v39 = vld [vmem:[#allocation10 + $0xa28] sm:$0xf] }
 0x11d   :  { %v206_v27 = vpop.f32.mrf.mxu0 }
 0x11e   :  { %v228_v28 = vadd.f32 %v19846_v40, %v206_v27  ;;  %v12135_v40 = vor.u32 %v18016_v36, %v12132_v37  ;;  %v12853_v27 = vld [vmem:[#allocation10 + $0x548] sm:$0xf]  ;;  %v13530_v36 = vor.u32 %v18372_v25, %v13529_v24  ;;  %v18190_v37 = vld [vmem:[#allocation10 + $0x510] sm:$0xf0]  ;;  %v13062_v24 = vor.u32 %v18255_v15, %v13061_v14  ;;  %v13009_v25 = vld [vmem:[#allocation10 + $0x680] sm:$0xf] }
 0x11f   :  { %v18632_v14 = vld [vmem:[#allocation10 + $0x12e0] sm:$0xf0] }
 0x120   :  { %v235_v29 = vadd.f32 %v19502_v26, %v228_v28  ;;  %v12334_v26 = vor.u32 %v18073_v18, %v12333_v17  ;;  %v18203_v28 = vld [vmem:[#allocation10 + $0x578] sm:$0xf0]  ;;  %v18093_v17 = vld [vmem:[#allocation10 + $0x20c] sm:$0xf]  ;;  %v12439_v18 = vld [vmem:[#allocation10 + $0x23c] sm:$0xf0] }
 0x121   :  { %v12854_v31 = vor.u32 %v18203_v28, %v12853_v27  ;;  %v15037_v27 = vld [vmem:[#allocation10 + $0x1658] sm:$0xf]  ;;  %v12442_v28 = vor.u32 %v18093_v17, %v12439_v18  ;;  %v18658_v17 = vld [vmem:[#allocation10 + $0x13b0] sm:$0xf0]  ;;  %v18028_v18 = vld [vmem:[#allocation10 + $0x4] sm:$0xf] }
 0x122   :  { %v236_v32 = vmax.f32 %v235_v29, 0.0  ;;  %v12281_v29 = vld [vmem:[#allocation10 + $0xd0] sm:$0xf]  ;;  %5053 = vmatpush.bf16.msra.mxu1 %v12334_v26  ;;  %v18242_v26 = vld [vmem:[#allocation10 + $0x6b0] sm:$0xf0] }
 0x123   :  { %5064 = vmatpush.bf16.msrb.mxu2 %v12854_v31  ;;  %v12387_v31 = vld [vmem:[#allocation10 + $0x1d4] sm:$0xf0] }
 0x124   :  { %v19849_v33 = vpack.c.bf16 %v236_v32, %v236_v32  ;;  %v12801_v32 = vld [vmem:[#allocation10 + $0x4e0] sm:$0xf] }
 0x125   :  { %v208_v35 = vpop.f32.mrf.mxu0  ;;  %v12802_v44 = vor.u32 %v18190_v37, %v12801_v32  ;;  %v13010_v37 = vor.u32 %v18242_v26, %v13009_v25  ;;  %v18619_v25 = vld [vmem:[#allocation10 + $0x1278] sm:$0xf0] }
 0x126   :  { %12168 = vmatmul.msk.bf16.vlgmr.msra.gmra.mxu3 %vm430_vm5, %v19849_v33  ;;  %12170 = vmatmul.msk.bf16.vlgmr.msrb.gmra.mxu0 %vm430_vm5, %v19849_v33  ;;  %v13217_v35 = vld [vmem:[#allocation10 + $0x820] sm:$0xf] }
 0x127   :  { %12171 = vmatmul.msk.bf16.vlgmr.msrb.gmra.mxu1 %vm430_vm5, %v19849_v33  ;;  %12172 = vmatmul.msk.bf16.vlgmr.msra.gmra.mxu2 %vm430_vm5, %v19849_v33  ;;  %v13218_v47 = vor.u32 %v18294_v38, %v13217_v35  ;;  %v14049_v35 = vld [vmem:[#allocation10 + $0xea0] sm:$0xf] }
 0x128   :  { %503 = vmatpush.bf16.msra.mxu3 %v12163_v34  ;;  %5088 = vmatpush.bf16.msrb.mxu0 %v13790_v41  ;;  %v13270_v34 = vor.u32 %v18307_v22, %v13269_v21  ;;  %v12282_v41 = vor.u32 %v18060_v30, %v12281_v29  ;;  %v18515_v22 = vld [vmem:[#allocation10 + $0xf38] sm:$0xf0]  ;;  %v18749_v29 = vld [vmem:[#allocation10 + $0x1688] sm:$0xf0]  ;;  %v18080_v30 = vld [vmem:[#allocation10 + $0x1a4] sm:$0xf] }
 0x129   :  { %5065 = vmatpush.bf16.msrb.mxu2 %v12802_v44  ;;  %v15038_v38 = vor.u32 %v18749_v29, %v15037_v27  ;;  %v13841_v27 = vld [vmem:[#allocation10 + $0xd00] sm:$0xf] }
 0x12a   :  { %5054 = vmatpush.bf16.msra.mxu1 %v12282_v41  ;;  %v18736_v41 = vld [vmem:[#allocation10 + $0x1620] sm:$0xf0] }
 0x12c   :  { %504 = vmatpush.bf16.msra.mxu3 %v12135_v40  ;;  %5089 = vmatpush.bf16.msrb.mxu0 %v13738_v48  ;;  %v18359_v40 = vld [vmem:[#allocation10 + $0xa58] sm:$0xf0]  ;;  %v13165_v48 = vld [vmem:[#allocation10 + $0x7b8] sm:$0xf] }
 0x12d   :  { %v13478_v50 = vor.u32 %v18359_v40, %v13477_v39  ;;  %5066 = vmatpush.bf16.msrb.mxu2 %v12750_v59  ;;  %v14985_v39 = vld [vmem:[#allocation10 + $0x15f0] sm:$0xf]  ;;  %v12390_v40 = vor.u32 %v18080_v30, %v12387_v31  ;;  %v14465_v30 = vld [vmem:[#allocation10 + $0x11e0] sm:$0xf]  ;;  %v18606_v31 = vld [vmem:[#allocation10 + $0x1210] sm:$0xf0] }
 0x12e   :  { %5055 = vmatpush.bf16.msra.mxu1 %v12230_v55  ;;  %v14986_v45 = vor.u32 %v18736_v41, %v14985_v39  ;;  %v14777_v59 = vld [vmem:[#allocation10 + $0x1450] sm:$0xf]  ;;  %v18567_v41 = vld [vmem:[#allocation10 + $0x10d8] sm:$0xf0] }
 0x130   :  { %505 = vmatpush.bf16.msra.mxu3 %v12107_v54  ;;  %5090 = vmatpush.bf16.msrb.mxu0 %v13686_v60  ;;  %v12543_v54 = vld [vmem:[#allocation10 + $0x30c] sm:$0xf0]  ;;  %v18541_v60 = vld [vmem:[#allocation10 + $0x1008] sm:$0xf0] }
 0x131   :  { %v12546_v3 = vor.u32 %v18119_v53, %v12543_v54  ;;  %v14206_v7 = vor.u32 %v18541_v60, %v14205_v58  ;;  %5067 = vmatpush.bf16.msrb.mxu2 %v12698_v9  ;;  %v14881_v53 = vld [vmem:[#allocation10 + $0x1520] sm:$0xf]  ;;  %v18710_v54 = vld [vmem:[#allocation10 + $0x1550] sm:$0xf0]  ;;  %v14830_v58 = vor.u32 %v18697_v57, %v14829_v56  ;;  %v18684_v60 = vld [vmem:[#allocation10 + $0x1480] sm:$0xf0] }
 0x132   :  { %5056 = vmatpush.bf16.msra.mxu1 %v12178_v4  ;;  %v14882_v55 = vor.u32 %v18710_v54, %v14881_v53  ;;  %v14778_v61 = vor.u32 %v18684_v60, %v14777_v59  ;;  %v14725_v4 = vld [vmem:[#allocation10 + $0x13e8] sm:$0xf]  ;;  %v13791_v53 = vld [vmem:[#allocation10 + $0xccc] sm:$0xf0] }
 0x133   :  { %v14726_v6 = vor.u32 %v18671_v5, %v14725_v4  ;;  %v14207_v56 = vld [vmem:[#allocation10 + $0x100c] sm:$0xf0]  ;;  %v14155_v4 = vld [vmem:[#allocation10 + $0xfa4] sm:$0xf0] }
 0x134   :  { %506 = vmatpush.bf16.msra.mxu3 %v12079_v63  ;;  %5091 = vmatpush.bf16.msrb.mxu0 %v13634_v11  ;;  %v13166_v63 = vor.u32 %v18281_v49, %v13165_v48  ;;  %v12645_v11 = vld [vmem:[#allocation10 + $0x3a8] sm:$0xf]  ;;  %v18723_v48 = vld [vmem:[#allocation10 + $0x15b8] sm:$0xf0]  ;;  %v18054_v49 = vld [vmem:[#allocation10 + $0xd4] sm:$0xf] }
 0x135   :  { %v12646_v21 = vor.u32 %v18151_v12, %v12645_v11  ;;  %v14934_v51 = vor.u32 %v18723_v48, %v14933_v46  ;;  %v18476_v11 = vld [vmem:[#allocation10 + $0xe00] sm:$0xf0]  ;;  %v14569_v12 = vld [vmem:[#allocation10 + $0x12b0] sm:$0xf] }
 0x136   :  { %12169 = vmatmul.msk.bf16.vlgmr.msrb.gmra.mxu3 %vm430_vm5, %v19849_v33  ;;  %12174 = vmatmul.msk.bf16.vlgmr.msra.gmra.mxu0 %vm430_vm5, %v19849_v33  ;;  %v14570_v15 = vor.u32 %v18632_v14, %v14569_v12  ;;  %v18405_v14 = vld [vmem:[#allocation10 + $0xbcc] sm:$0xf] }
 0x137   :  { %5101 = vmatpush.bf16.msrb.mxu1 %v14206_v7  ;;  %5068 = vmatpush.bf16.msrb.mxu2 %v12646_v21  ;;  %v18041_v7 = vld [vmem:[#allocation10 + $0x6c] sm:$0xf] }
 0x138   :  { %5075 = vmatpush.bf16.msrb.mxu3 %v13374_v8  ;;  %5092 = vmatpush.bf16.msrb.mxu0 %v13582_v23  ;;  %v14153_v8 = vld [vmem:[#allocation10 + $0xf70] sm:$0xf]  ;;  %v18138_v23 = vld [vmem:[#allocation10 + $0x370] sm:$0xf0] }
 0x139   :  { %v14154_v19 = vor.u32 %v18528_v10, %v14153_v8  ;;  %v12231_v8 = vld [vmem:[#allocation10 + $0x9c] sm:$0xf0]  ;;  %v13945_v10 = vld [vmem:[#allocation10 + $0xdd0] sm:$0xf] }
 0x13a   :  { %v12234_v9 = vor.u32 %v18041_v7, %v12231_v8  ;;  %v18223_v7 = vld [vmem:[#allocation10 + $0x61c] sm:$0xf]  ;;  %v12959_v8 = vld [vmem:[#allocation10 + $0x64c] sm:$0xf0] }
 0x13b   :  { %5102 = vmatpush.bf16.msrb.mxu1 %v14154_v19 }
 0x13c   :  { %5076 = vmatpush.bf16.msrb.mxu3 %v13322_v20  ;;  %5093 = vmatpush.bf16.msrb.mxu0 %v13530_v36  ;;  %v14101_v20 = vld [vmem:[#allocation10 + $0xf08] sm:$0xf]  ;;  %v18502_v36 = vld [vmem:[#allocation10 + $0xed0] sm:$0xf0] }
 0x13d   :  { %v14102_v32 = vor.u32 %v18515_v22, %v14101_v20  ;;  %v14050_v44 = vor.u32 %v18502_v36, %v14049_v35  ;;  %v12179_v20 = vld [vmem:[#allocation10 + $0x34] sm:$0xf0]  ;;  %v13893_v22 = vld [vmem:[#allocation10 + $0xd68] sm:$0xf]  ;;  %v18593_v35 = vld [vmem:[#allocation10 + $0x11a8] sm:$0xf0] }
 0x13e   :  { %v12182_v21 = vor.u32 %v18028_v18, %v12179_v20  ;;  %v14103_v18 = vld [vmem:[#allocation10 + $0xf3c] sm:$0xf0]  ;;  %v18210_v20 = vld [vmem:[#allocation10 + $0x5b4] sm:$0xf] }
 0x13f   :  { %5103 = vmatpush.bf16.msrb.mxu1 %v14102_v32  ;;  %v14466_v32 = vor.u32 %v18606_v31, %v14465_v30  ;;  %v18197_v31 = vld [vmem:[#allocation10 + $0x54c] sm:$0xf] }
 0x140   :  { %5077 = vmatpush.bf16.msrb.mxu3 %v13270_v34  ;;  %5094 = vmatpush.bf16.msrb.mxu0 %v13478_v50  ;;  %v12283_v50 = vld [vmem:[#allocation10 + $0x104] sm:$0xf0] }
 0x141   :  { %v12286_v52 = vor.u32 %v18054_v49, %v12283_v50 }
 0x143   :  { %5104 = vmatpush.bf16.msrb.mxu1 %v14050_v44  ;;  %v14257_v44 = vld [vmem:[#allocation10 + $0x1040] sm:$0xf] }
 0x144   :  { %5078 = vmatpush.bf16.msrb.mxu3 %v13218_v47  ;;  %5095 = vmatpush.bf16.msrb.mxu0 %v13426_v0  ;;  %v12338_v47 = vor.u32 %v18067_v42, %v12335_v43  ;;  %v14621_v0 = vld [vmem:[#allocation10 + $0x1318] sm:$0xf] }
 0x145   :  { %v19865_v43 = vld [vmem:[#allocation9] sm:$0xff] }
 0x146   :  { %12173 = vmatmul.msk.bf16.vlgmr.msra.gmra.mxu3 %vm430_vm5, %v19849_v33  ;;  %v12593_v33 = vld [vmem:[#allocation10 + $0x340] sm:$0xf]  ;;  %v275_v48 = vperm.slane %v19865_v43, 3 }
 0x147   :  { %v12594_v34 = vor.u32 %v18138_v23, %v12593_v33  ;;  %v18463_v33 = vld [vmem:[#allocation10 + $0xd98] sm:$0xf0]  ;;  %v14517_v23 = vld [vmem:[#allocation10 + $0x1248] sm:$0xf] }
 0x148   :  { %5079 = vmatpush.bf16.msrb.mxu3 %v13166_v63  ;;  %5140 = vmatpush.bf16.msra.mxu0 %v12546_v3  ;;  %v18489_v63 = vld [vmem:[#allocation10 + $0xe68] sm:$0xf0]  ;;  %v14622_v3 = vor.u32 %v18645_v2, %v14621_v0  ;;  %v14518_v26 = vor.u32 %v18619_v25, %v14517_v23  ;;  %v13739_v0 = vld [vmem:[#allocation10 + $0xc64] sm:$0xf0]  ;;  %v278_v23 = vperm.slane %v19865_v43, 6 }
 0x149   :  { %5069 = vmatpush.bf16.msrb.mxu2 %v12594_v34  ;;  %v13998_v1 = vor.u32 %v18489_v63, %v13997_v62  ;;  %v14413_v34 = vld [vmem:[#allocation10 + $0x1178] sm:$0xf]  ;;  %v18418_v63 = vld [vmem:[#allocation10 + $0xc34] sm:$0xf] }
 0x14a   :  { %v14414_v36 = vor.u32 %v18593_v35, %v14413_v34  ;;  %v13635_v25 = vld [vmem:[#allocation10 + $0xb94] sm:$0xf0]  ;;  %v276_v34 = vperm.slane %v19865_v43, 4 }
 0x14b   :  { %5105 = vmatpush.bf16.msrb.mxu1 %v13998_v1 }
 0x14c   :  { %5080 = vmatpush.bf16.msrb.mxu3 %v13114_v13  ;;  %5141 = vmatpush.bf16.msra.mxu0 %v12494_v16  ;;  %v13946_v13 = vor.u32 %v18476_v11, %v13945_v10  ;;  %v14673_v16 = vld [vmem:[#allocation10 + $0x1380] sm:$0xf]  ;;  %v13742_v10 = vor.u32 %v18418_v63, %v13739_v0 }
 0x14d   :  { %5114 = vmatpush.bf16.msra.mxu2 %v14622_v3  ;;  %v14674_v19 = vor.u32 %v18658_v17, %v14673_v16  ;;  %v18522_v3 = vld [vmem:[#allocation10 + $0xf74] sm:$0xf]  ;;  %v12962_v16 = vor.u32 %v18223_v7, %v12959_v8  ;;  %v18509_v17 = vld [vmem:[#allocation10 + $0xf0c] sm:$0xf]  ;;  %v13479_v8 = vld [vmem:[#allocation10 + $0xa5c] sm:$0xf0] }
 0x14e   :  { %v18353_v7 = vld [vmem:[#allocation10 + $0xa2c] sm:$0xf] }
 0x14f   :  { %5106 = vmatpush.bf16.msrb.mxu1 %v13946_v13  ;;  %v14158_v13 = vor.u32 %v18522_v3, %v14155_v4  ;;  %v18171_v3 = vld [vmem:[#allocation10 + $0x47c] sm:$0xf]  ;;  %v12751_v4 = vld [vmem:[#allocation10 + $0x4ac] sm:$0xf0] }
 0x150   :  { %5081 = vmatpush.bf16.msrb.mxu3 %v13062_v24  ;;  %5142 = vmatpush.bf16.msra.mxu0 %v12442_v28  ;;  %v13894_v24 = vor.u32 %v18463_v33, %v13893_v22  ;;  %v18450_v28 = vld [vmem:[#allocation10 + $0xd30] sm:$0xf0]  ;;  %v14106_v33 = vor.u32 %v18509_v17, %v14103_v18  ;;  %v13482_v17 = vor.u32 %v18353_v7, %v13479_v8 }
 0x151   :  { %5115 = vmatpush.bf16.msra.mxu2 %v14570_v15  ;;  %v13842_v29 = vor.u32 %v18450_v28, %v13841_v27  ;;  %v13687_v15 = vld [vmem:[#allocation10 + $0xbfc] sm:$0xf0]  ;;  %v18496_v28 = vld [vmem:[#allocation10 + $0xea4] sm:$0xf]  ;;  %v18158_v18 = vld [vmem:[#allocation10 + $0x414] sm:$0xf] }
 0x152   :  { %v13690_v22 = vor.u32 %v18405_v14, %v13687_v15  ;;  %v18314_v14 = vld [vmem:[#allocation10 + $0x8f4] sm:$0xf]  ;;  %v13323_v15 = vld [vmem:[#allocation10 + $0x924] sm:$0xf0] }
 0x153   :  { %5107 = vmatpush.bf16.msrb.mxu1 %v13894_v24  ;;  %v18392_v24 = vld [vmem:[#allocation10 + $0xb64] sm:$0xf]  ;;  %v18626_v8 = vld [vmem:[#allocation10 + $0x12b4] sm:$0xf] }
 0x154   :  { %5082 = vmatpush.bf16.msrb.mxu3 %v13010_v37  ;;  %5143 = vmatpush.bf16.msra.mxu0 %v12390_v40  ;;  %v14361_v37 = vld [vmem:[#allocation10 + $0x1110] sm:$0xf]  ;;  %v14309_v40 = vld [vmem:[#allocation10 + $0x10a8] sm:$0xf] }
 0x155   :  { %5116 = vmatpush.bf16.msra.mxu2 %v14518_v26  ;;  %v14310_v42 = vor.u32 %v18567_v41, %v14309_v40  ;;  %v13583_v40 = vld [vmem:[#allocation10 + $0xb2c] sm:$0xf0] }
 0x157   :  { %5108 = vmatpush.bf16.msrb.mxu1 %v13842_v29  ;;  %v14051_v29 = vld [vmem:[#allocation10 + $0xed4] sm:$0xf0] }
 0x158   :  { %5127 = vmatpush.bf16.msra.mxu3 %v15038_v38  ;;  %5144 = vmatpush.bf16.msra.mxu0 %v12338_v47  ;;  %v18580_v38 = vld [vmem:[#allocation10 + $0x1140] sm:$0xf0]  ;;  %v274_v47 = vperm.slane %v19865_v43, 2 }
 0x159   :  { %5117 = vmatpush.bf16.msra.mxu2 %v14466_v32  ;;  %v14362_v39 = vor.u32 %v18580_v38, %v14361_v37  ;;  %v12855_v32 = vld [vmem:[#allocation10 + $0x57c] sm:$0xf0]  ;;  %v14054_v38 = vor.u32 %v18496_v28, %v14051_v29  ;;  %v18126_v28 = vld [vmem:[#allocation10 + $0x310] sm:$0xf0] }
 0x15a   :  { %v12858_v41 = vor.u32 %v18197_v31, %v12855_v32  ;;  %v12965_v29 = vld [vmem:[#allocation10 + $0x620] sm:$0xf]  ;;  %v18230_v31 = vld [vmem:[#allocation10 + $0x650] sm:$0xf0]  ;;  %v18301_v32 = vld [vmem:[#allocation10 + $0x88c] sm:$0xf] }
 0x15c   :  { %5128 = vmatpush.bf16.msra.mxu3 %v14986_v45  ;;  %5145 = vmatpush.bf16.msra.mxu0 %v12286_v52  ;;  %v18554_v45 = vld [vmem:[#allocation10 + $0x1070] sm:$0xf0]  ;;  %v18431_v52 = vld [vmem:[#allocation10 + $0xc9c] sm:$0xf] }
 0x15d   :  { %5118 = vmatpush.bf16.msra.mxu2 %v14414_v36  ;;  %v14258_v46 = vor.u32 %v18554_v45, %v14257_v44  ;;  %v13794_v60 = vor.u32 %v18431_v52, %v13791_v53  ;;  %v13638_v36 = vor.u32 %v18392_v24, %v13635_v25  ;;  %v13999_v44 = vld [vmem:[#allocation10 + $0xe6c] sm:$0xf0]  ;;  %v18366_v53 = vld [vmem:[#allocation10 + $0xa94] sm:$0xf]  ;;  %v13843_v24 = vld [vmem:[#allocation10 + $0xd34] sm:$0xf0] }
 0x160   :  { %5129 = vmatpush.bf16.msra.mxu3 %v14934_v51  ;;  %5146 = vmatpush.bf16.msra.mxu0 %v12234_v9 }
 0x161   :  { %5119 = vmatpush.bf16.msra.mxu2 %v14362_v39  ;;  %v18379_v39 = vld [vmem:[#allocation10 + $0xafc] sm:$0xf] }
 0x164   :  { %5130 = vmatpush.bf16.msra.mxu3 %v14882_v55  ;;  %5147 = vmatpush.bf16.msra.mxu0 %v12182_v21  ;;  %v18535_v55 = vld [vmem:[#allocation10 + $0xfdc] sm:$0xf]  ;;  %v12907_v21 = vld [vmem:[#allocation10 + $0x5e4] sm:$0xf0] }
 0x165   :  { %5120 = vmatpush.bf16.msra.mxu2 %v14310_v42  ;;  %v14210_v62 = vor.u32 %v18535_v55, %v14207_v56  ;;  %v12910_v27 = vor.u32 %v18210_v20, %v12907_v21  ;;  %v18483_v42 = vld [vmem:[#allocation10 + $0xe3c] sm:$0xf]  ;;  %v12699_v20 = vld [vmem:[#allocation10 + $0x444] sm:$0xf0]  ;;  %v18340_v21 = vld [vmem:[#allocation10 + $0x9c4] sm:$0xf] }
 0x166   :  { %v14002_v52 = vor.u32 %v18483_v42, %v13999_v44  ;;  %v12497_v44 = vld [vmem:[#allocation10 + $0x278] sm:$0xf] }
 0x168   :  { %5131 = vmatpush.bf16.msra.mxu3 %v14830_v58  ;;  %v272_v58 = vperm.slane %v19865_v43, 0 }
 0x169   :  { %5121 = vmatpush.bf16.msra.mxu2 %v14258_v46  ;;  %v273_v46 = vperm.slane %v19865_v43, 1 }
 0x16c   :  { %5132 = vmatpush.bf16.msra.mxu3 %v14778_v61 }
 0x170   :  { %5133 = vmatpush.bf16.msra.mxu3 %v14726_v6 }
 0x174   :  { %5134 = vmatpush.bf16.msra.mxu3 %v14674_v19 }
 0x1a3   :  { %v469_v49 = vpop.f32.mrf.mxu0 }
 0x1a4   :  { %v470_v50 = vadd.f32 %v469_v49, %v274_v47  ;;  %v482_v51 = vpop.f32.mrf.mxu1  ;;  %v18184_v47 = vld [vmem:[#allocation10 + $0x4e4] sm:$0xf] }
 0x1a5   :  { %v483_v54 = vadd.f32 %v482_v51, %v275_v48  ;;  %v12803_v48 = vld [vmem:[#allocation10 + $0x514] sm:$0xf0] }
 0x1a6   :  { %v527_v57 = vmax.f32 %v470_v50, 0.0  ;;  %v13586_v50 = vor.u32 %v18379_v39, %v13583_v40  ;;  %v12806_v56 = vor.u32 %v18184_v47, %v12803_v48  ;;  %v277_v40 = vperm.slane %v19865_v43, 5  ;;  %v18217_v48 = vld [vmem:[#allocation10 + $0x5e8] sm:$0xf0] }
 0x1a7   :  { %v528_v59 = vmax.f32 %v483_v54, 0.0  ;;  %v13531_v54 = vld [vmem:[#allocation10 + $0xac4] sm:$0xf0] }
 0x1a8   :  { %v19870_v61 = vpack.c.bf16 %v527_v57, %v527_v57  ;;  %v18470_v57 = vld [vmem:[#allocation10 + $0xdd4] sm:$0xf] }
 0x1a9   :  { %v19872_v1 = vpack.c.bf16 %v528_v59, %v528_v59  ;;  %v443_v2 = vpop.f32.mrf.mxu3 }
 0x1aa   :  { %v444_v5 = vadd.f32 %v443_v2, %v272_v58  ;;  %v495_v6 = vpop.f32.mrf.mxu2  ;;  %5083 = vmatmul.bf16.vlgmr.msrb.gmra.mxu3 %v19870_v61  ;;  %v13947_v58 = vld [vmem:[#allocation10 + $0xe04] sm:$0xf0]  ;;  %v13534_v2 = vor.u32 %v18366_v53, %v13531_v54  ;;  %v12595_v53 = vld [vmem:[#allocation10 + $0x374] sm:$0xf0] }
 0x1ab   :  { %5096 = vmatmul.bf16.vlgmr.msrb.gmra.mxu0 %v19872_v1  ;;  %5179 = vmatpush.bf16.msrb.mxu3 %v13794_v60  ;;  %v471_v9 = vpop.f32.mrf.mxu0  ;;  %v496_v49 = vadd.f32 %v495_v6, %v276_v34  ;;  %v18327_v60 = vld [vmem:[#allocation10 + $0x95c] sm:$0xf]  ;;  %v13950_v6 = vor.u32 %v18470_v57, %v13947_v58  ;;  %v13271_v34 = vld [vmem:[#allocation10 + $0x8bc] sm:$0xf0] }
 0x1ac   :  { %v525_v11 = vmax.f32 %v444_v5, 0.0  ;;  %5192 = vmatpush.bf16.msrb.mxu0 %v14210_v62  ;;  %v484_v12 = vpop.f32.mrf.mxu1  ;;  %v13375_v62 = vld [vmem:[#allocation10 + $0x98c] sm:$0xf0]  ;;  %v13274_v42 = vor.u32 %v18301_v32, %v13271_v34  ;;  %v18249_v34 = vld [vmem:[#allocation10 + $0x6ec] sm:$0xf] }
 0x1ad   :  { %v529_v63 = vmax.f32 %v496_v49, 0.0  ;;  %v13378_v9 = vor.u32 %v18327_v60, %v13375_v62  ;;  %v18288_v49 = vld [vmem:[#allocation10 + $0x824] sm:$0xf] }
 0x1ae   :  { %v19876_v19 = vpack.c.bf16 %v525_v11, %v525_v11  ;;  %v13895_v11 = vld [vmem:[#allocation10 + $0xd9c] sm:$0xf0]  ;;  %v18100_v60 = vld [vmem:[#allocation10 + $0x240] sm:$0xf0] }
 0x1af   :  { %5180 = vmatpush.bf16.msrb.mxu3 %v13742_v10  ;;  %v18457_v10 = vld [vmem:[#allocation10 + $0xd6c] sm:$0xf] }
 0x1b0   :  { %5193 = vmatpush.bf16.msrb.mxu0 %v14158_v13  ;;  %5057 = vmatmul.bf16.vlgmr.msra.gmra.mxu1 %v19876_v19  ;;  %v12754_v13 = vor.u32 %v18171_v3, %v12751_v4  ;;  %v18275_v4 = vld [vmem:[#allocation10 + $0x7bc] sm:$0xf] }
 0x1b1   :  { %5153 = vmatpush.bf16.msra.mxu1 %v12962_v16  ;;  %v445_v26 = vpop.f32.mrf.mxu3  ;;  %v19888_v16 = vpack.c.bf16 %v529_v63, %v529_v63 }
 0x1b2   :  { %v497_v30 = vpop.f32.mrf.mxu2  ;;  %v13326_v26 = vor.u32 %v18314_v14, %v13323_v15 }
 0x1b3   :  { %5181 = vmatpush.bf16.msrb.mxu3 %v13690_v22  ;;  %v521_v35 = vpop.f32.mrf.mxu0  ;;  %v13898_v22 = vor.u32 %v18457_v10, %v13895_v11  ;;  %v12702_v30 = vor.u32 %v18158_v18, %v12699_v20  ;;  %v12393_v11 = vld [vmem:[#allocation10 + $0x1a8] sm:$0xf]  ;;  %v18191_v18 = vld [vmem:[#allocation10 + $0x518] sm:$0xf0] }
 0x1b4   :  { %5194 = vmatpush.bf16.msrb.mxu0 %v14106_v33  ;;  %v522_v37 = vadd.f32 %v521_v35, %v278_v23  ;;  %v13427_v33 = vld [vmem:[#allocation10 + $0x9f4] sm:$0xf0]  ;;  %v18444_v23 = vld [vmem:[#allocation10 + $0xd04] sm:$0xf] }
 0x1b5   :  { %5154 = vmatpush.bf16.msra.mxu1 %v12910_v27  ;;  %v12549_v27 = vld [vmem:[#allocation10 + $0x2e0] sm:$0xf]  ;;  %v13430_v35 = vor.u32 %v18340_v21, %v13427_v33  ;;  %v18262_v21 = vld [vmem:[#allocation10 + $0x754] sm:$0xf] }
 0x1b6   :  { %v531_v45 = vmax.f32 %v522_v37, 0.0  ;;  %v12647_v37 = vld [vmem:[#allocation10 + $0x3dc] sm:$0xf0]  ;;  %v12550_v39 = vor.u32 %v18126_v28, %v12549_v27  ;;  %v18074_v28 = vld [vmem:[#allocation10 + $0x170] sm:$0xf0] }
 0x1b7   :  { %5182 = vmatpush.bf16.msrb.mxu3 %v13638_v36  ;;  %v18145_v36 = vld [vmem:[#allocation10 + $0x3ac] sm:$0xf]  ;;  %v12341_v27 = vld [vmem:[#allocation10 + $0x140] sm:$0xf] }
 0x1b8   :  { %v19882_v51 = vpack.c.bf16 %v531_v45, %v531_v45  ;;  %5195 = vmatpush.bf16.msrb.mxu0 %v14054_v38  ;;  %v13846_v38 = vor.u32 %v18444_v23, %v13843_v24  ;;  %v18113_v45 = vld [vmem:[#allocation10 + $0x2a8] sm:$0xf0]  ;;  %v12650_v47 = vor.u32 %v18145_v36, %v12647_v37  ;;  %v14519_v24 = vld [vmem:[#allocation10 + $0x127c] sm:$0xf0]  ;;  %v12342_v36 = vor.u32 %v18074_v28, %v12341_v27  ;;  %v18600_v37 = vld [vmem:[#allocation10 + $0x11e4] sm:$0xf] }
 0x1b9   :  { %5155 = vmatpush.bf16.msra.mxu1 %v12858_v41  ;;  %v456_v55 = vpop.f32.mrf.mxu3  ;;  %v12966_v41 = vor.u32 %v18230_v31, %v12965_v29  ;;  %v12498_v54 = vor.u32 %v18113_v45, %v12497_v44  ;;  %v18613_v23 = vld [vmem:[#allocation10 + $0x124c] sm:$0xf]  ;;  %v18178_v31 = vld [vmem:[#allocation10 + $0x4b0] sm:$0xf0]  ;;  %v12705_v44 = vld [vmem:[#allocation10 + $0x418] sm:$0xf] }
 0x1ba   :  { %v457_v59 = vadd.f32 %v456_v55, %v273_v46  ;;  %5135 = vmatmul.bf16.vlgmr.msra.gmra.mxu3 %v19882_v51  ;;  %v12913_v46 = vld [vmem:[#allocation10 + $0x5b8] sm:$0xf]  ;;  %v18639_v55 = vld [vmem:[#allocation10 + $0x131c] sm:$0xf]  ;;  %v14522_v32 = vor.u32 %v18613_v23, %v14519_v24  ;;  %v18165_v45 = vld [vmem:[#allocation10 + $0x448] sm:$0xf0] }
 0x1bb   :  { %5148 = vmatmul.bf16.vlgmr.msra.gmra.mxu0 %v19876_v19  ;;  %5183 = vmatpush.bf16.msrb.mxu3 %v13586_v50  ;;  %v523_v0 = vpop.f32.mrf.mxu0  ;;  %v13219_v50 = vld [vmem:[#allocation10 + $0x854] sm:$0xf0]  ;;  %v12914_v57 = vor.u32 %v18217_v48, %v12913_v46  ;;  %v14935_v23 = vld [vmem:[#allocation10 + $0x15bc] sm:$0xf0]  ;;  %v18529_v28 = vld [vmem:[#allocation10 + $0xfa8] sm:$0xf0] }
 0x1bc   :  { %v526_v5 = vmax.f32 %v457_v59, 0.0  ;;  %5196 = vmatpush.bf16.msrb.mxu0 %v14002_v52  ;;  %v18132_v52 = vld [vmem:[#allocation10 + $0x344] sm:$0xf]  ;;  %v13222_v58 = vor.u32 %v18288_v49, %v13219_v50  ;;  %v12445_v59 = vld [vmem:[#allocation10 + $0x210] sm:$0xf] }
 0x1bd   :  { %5156 = vmatpush.bf16.msra.mxu1 %v12806_v56  ;;  %v14623_v56 = vld [vmem:[#allocation10 + $0x134c] sm:$0xf0]  ;;  %v12598_v63 = vor.u32 %v18132_v52, %v12595_v53  ;;  %v12446_v7 = vor.u32 %v18100_v60, %v12445_v59  ;;  %v13011_v48 = vld [vmem:[#allocation10 + $0x6b4] sm:$0xf0]  ;;  %v18587_v49 = vld [vmem:[#allocation10 + $0x117c] sm:$0xf] }
 0x1be   :  { %v19886_v12 = vpack.c.bf16 %v526_v5, %v526_v5  ;;  %v12861_v0 = vld [vmem:[#allocation10 + $0x550] sm:$0xf]  ;;  %v14626_v3 = vor.u32 %v18639_v55, %v14623_v56  ;;  %v18743_v53 = vld [vmem:[#allocation10 + $0x165c] sm:$0xf]  ;;  %v12706_v55 = vor.u32 %v18165_v45, %v12705_v44  ;;  %v18152_v59 = vld [vmem:[#allocation10 + $0x3e0] sm:$0xf0] }
 0x1bf   :  { %5184 = vmatpush.bf16.msrb.mxu3 %v13534_v2  ;;  %v18204_v2 = vld [vmem:[#allocation10 + $0x580] sm:$0xf0]  ;;  %v13167_v5 = vld [vmem:[#allocation10 + $0x7ec] sm:$0xf0]  ;;  %v14161_v27 = vld [vmem:[#allocation10 + $0xf78] sm:$0xf] }
 0x1c0   :  { %5197 = vmatpush.bf16.msrb.mxu0 %v13950_v6  ;;  %5070 = vmatmul.bf16.vlgmr.msrb.gmra.mxu2 %v19886_v12  ;;  %v12862_v10 = vor.u32 %v18204_v2, %v12861_v0  ;;  %v13170_v15 = vor.u32 %v18275_v4, %v13167_v5  ;;  %v14415_v52 = vld [vmem:[#allocation10 + $0x11ac] sm:$0xf0]  ;;  %v14363_v2 = vld [vmem:[#allocation10 + $0x1144] sm:$0xf0]  ;;  %v18516_v44 = vld [vmem:[#allocation10 + $0xf40] sm:$0xf0] }
 0x1c1   :  { %5109 = vmatmul.bf16.vlgmr.msrb.gmra.mxu1 %v19888_v16  ;;  %5166 = vmatpush.bf16.msrb.mxu2 %v13378_v9  ;;  %v458_v25 = vpop.f32.mrf.mxu3  ;;  %v14571_v9 = vld [vmem:[#allocation10 + $0x12e4] sm:$0xf0]  ;;  %v12237_v56 = vld [vmem:[#allocation10 + $0x70] sm:$0xf]  ;;  %v14418_v60 = vor.u32 %v18587_v49, %v14415_v52 }
 0x1c2   :  { %5157 = vmatpush.bf16.msra.mxu1 %v12754_v13  ;;  %v18087_v13 = vld [vmem:[#allocation10 + $0x1d8] sm:$0xf0]  ;;  %v14574_v20 = vor.u32 %v18626_v8, %v14571_v9  ;;  %v14987_v4 = vld [vmem:[#allocation10 + $0x1624] sm:$0xf0]  ;;  %v14831_v52 = vld [vmem:[#allocation10 + $0x14ec] sm:$0xf0] }
 0x1c3   :  { %5185 = vmatpush.bf16.msrb.mxu3 %v13482_v17  ;;  %v12809_v17 = vld [vmem:[#allocation10 + $0x4e8] sm:$0xf]  ;;  %v12394_v33 = vor.u32 %v18087_v13, %v12393_v11  ;;  %v18139_v9 = vld [vmem:[#allocation10 + $0x378] sm:$0xf0]  ;;  %v18542_v11 = vld [vmem:[#allocation10 + $0x1010] sm:$0xf0] }
 0x1c4   :  { %5198 = vmatpush.bf16.msrb.mxu0 %v13898_v22  ;;  %v13115_v22 = vld [vmem:[#allocation10 + $0x784] sm:$0xf0] }
 0x1c5   :  { %5167 = vmatpush.bf16.msrb.mxu2 %v13326_v26  ;;  %v12810_v26 = vor.u32 %v18191_v18, %v12809_v17  ;;  %v13118_v29 = vor.u32 %v18262_v21, %v13115_v22  ;;  %v12601_v8 = vld [vmem:[#allocation10 + $0x348] sm:$0xf]  ;;  %v14629_v17 = vld [vmem:[#allocation10 + $0x1320] sm:$0xf]  ;;  %v18646_v18 = vld [vmem:[#allocation10 + $0x1350] sm:$0xf0] }
 0x1c6   :  { %5158 = vmatpush.bf16.msra.mxu1 %v12702_v30  ;;  %v12757_v30 = vld [vmem:[#allocation10 + $0x480] sm:$0xf]  ;;  %v12602_v24 = vor.u32 %v18139_v9, %v12601_v8 }
 0x1c7   :  { %5186 = vmatpush.bf16.msrb.mxu3 %v13430_v35  ;;  %v13063_v35 = vld [vmem:[#allocation10 + $0x71c] sm:$0xf0] }
 0x1c8   :  { %5199 = vmatpush.bf16.msrb.mxu0 %v13846_v38  ;;  %v14467_v38 = vld [vmem:[#allocation10 + $0x1214] sm:$0xf0]  ;;  %v14311_v22 = vld [vmem:[#allocation10 + $0x10dc] sm:$0xf0] }
 0x1c9   :  { %5168 = vmatpush.bf16.msrb.mxu2 %v13274_v42  ;;  %v508_v43 = vpop.f32.mrf.mxu3  ;;  %v13066_v42 = vor.u32 %v18249_v34, %v13063_v35  ;;  %v14470_v46 = vor.u32 %v18600_v37, %v14467_v38  ;;  %v18548_v34 = vld [vmem:[#allocation10 + $0x1044] sm:$0xf]  ;;  %v14259_v35 = vld [vmem:[#allocation10 + $0x1074] sm:$0xf0]  ;;  %v14162_v38 = vor.u32 %v18529_v28, %v14161_v27  ;;  %v14421_v9 = vld [vmem:[#allocation10 + $0x1180] sm:$0xf] }
 0x1ca   :  { %5159 = vmatpush.bf16.msra.mxu1 %v12650_v47  ;;  %v509_v62 = vadd.f32 %v508_v43, %v277_v40  ;;  %5187 = vmatmul.bf16.vlgmr.msrb.gmra.mxu3 %v19872_v1  ;;  %v12289_v40 = vld [vmem:[#allocation10 + $0xd8] sm:$0xf]  ;;  %v18236_v47 = vld [vmem:[#allocation10 + $0x684] sm:$0xf]  ;;  %v14262_v45 = vor.u32 %v18548_v34, %v14259_v35  ;;  %v18438_v34 = vld [vmem:[#allocation10 + $0xcd0] sm:$0xf0] }
 0x1cb   :  { %5231 = vmatpush.bf16.msra.mxu3 %v12550_v39  ;;  %5200 = vmatmul.bf16.vlgmr.msrb.gmra.mxu0 %v19888_v16  ;;  %v12758_v39 = vor.u32 %v18178_v31, %v12757_v30  ;;  %v18048_v43 = vld [vmem:[#allocation10 + $0xa0] sm:$0xf0]  ;;  %v14577_v31 = vld [vmem:[#allocation10 + $0x12b8] sm:$0xf] }
 0x1cc   :  { %5244 = vmatpush.bf16.msra.mxu0 %v12966_v41  ;;  %v530_v6 = vmax.f32 %v509_v62, 0.0  ;;  %v18061_v41 = vld [vmem:[#allocation10 + $0x108] sm:$0xf0]  ;;  %v12238_v0 = vor.u32 %v18048_v43, %v12237_v56  ;;  %v14883_v37 = vld [vmem:[#allocation10 + $0x1554] sm:$0xf0] }
 0x1cd   :  { %5169 = vmatpush.bf16.msrb.mxu2 %v13222_v58  ;;  %v12290_v50 = vor.u32 %v18061_v41, %v12289_v40  ;;  %v12653_v58 = vld [vmem:[#allocation10 + $0x3b0] sm:$0xf]  ;;  %v18334_v40 = vld [vmem:[#allocation10 + $0x990] sm:$0xf0]  ;;  %v14057_v43 = vld [vmem:[#allocation10 + $0xea8] sm:$0xf] }
 0x1ce   :  { %v19895_v14 = vpack.c.bf16 %v530_v6, %v530_v6  ;;  %5160 = vmatpush.bf16.msra.mxu1 %v12598_v63  ;;  %v18574_v63 = vld [vmem:[#allocation10 + $0x1114] sm:$0xf]  ;;  %v12654_v5 = vor.u32 %v18152_v59, %v12653_v58  ;;  %v12185_v6 = vld [vmem:[#allocation10 + $0x8] sm:$0xf]  ;;  %v18652_v27 = vld [vmem:[#allocation10 + $0x1384] sm:$0xf] }
 0x1cf   :  { %5232 = vmatpush.bf16.msra.mxu3 %v12498_v54  ;;  %v15039_v54 = vld [vmem:[#allocation10 + $0x168c] sm:$0xf0]  ;;  %v14366_v13 = vor.u32 %v18574_v63, %v14363_v2  ;;  %v14473_v59 = vld [vmem:[#allocation10 + $0x11e8] sm:$0xf]  ;;  %v18678_v63 = vld [vmem:[#allocation10 + $0x1454] sm:$0xf] }
 0x1d0   :  { %5245 = vmatpush.bf16.msra.mxu0 %v12914_v57  ;;  %5122 = vmatmul.bf16.vlgmr.msra.gmra.mxu2 %v19895_v14  ;;  %v13014_v57 = vor.u32 %v18236_v47, %v13011_v48  ;;  %v15042_v62 = vor.u32 %v18743_v53, %v15039_v54  ;;  %v14525_v47 = vld [vmem:[#allocation10 + $0x1250] sm:$0xf]  ;;  %v18620_v48 = vld [vmem:[#allocation10 + $0x1280] sm:$0xf0]  ;;  %v13329_v54 = vld [vmem:[#allocation10 + $0x8f8] sm:$0xf] }
 0x1d1   :  { %5161 = vmatmul.bf16.vlgmr.msra.gmra.mxu1 %v19886_v12  ;;  %v510_v25 = vpop.f32.mrf.mxu3  ;;  %5170 = vmatpush.bf16.msrb.mxu2 %v13170_v15  ;;  %v14526_v56 = vor.u32 %v18620_v48, %v14525_v47  ;;  %v14675_v28 = vld [vmem:[#allocation10 + $0x13b4] sm:$0xf0]  ;;  %v18425_v48 = vld [vmem:[#allocation10 + $0xc68] sm:$0xf0] }
 0x1d2   :  { %5205 = vmatpush.bf16.msrb.mxu1 %v14626_v3  ;;  %v18730_v3 = vld [vmem:[#allocation10 + $0x15f4] sm:$0xf]  ;;  %v13745_v47 = vld [vmem:[#allocation10 + $0xc38] sm:$0xf] }
 0x1d3   :  { %5233 = vmatpush.bf16.msra.mxu3 %v12446_v7  ;;  %v18035_v7 = vld [vmem:[#allocation10 + $0x38] sm:$0xf0]  ;;  %v14990_v15 = vor.u32 %v18730_v3, %v14987_v4  ;;  %v13277_v3 = vld [vmem:[#allocation10 + $0x890] sm:$0xf]  ;;  %v18308_v4 = vld [vmem:[#allocation10 + $0x8c0] sm:$0xf0] }
 0x1d4   :  { %5246 = vmatpush.bf16.msra.mxu0 %v12862_v10  ;;  %v14213_v10 = vld [vmem:[#allocation10 + $0xfe0] sm:$0xf]  ;;  %v12186_v21 = vor.u32 %v18035_v7, %v12185_v6  ;;  %v18490_v7 = vld [vmem:[#allocation10 + $0xe70] sm:$0xf0] }
 0x1d5   :  { %5171 = vmatpush.bf16.msrb.mxu2 %v13118_v29  ;;  %v14214_v25 = vor.u32 %v18542_v11, %v14213_v10  ;;  %v14005_v6 = vld [vmem:[#allocation10 + $0xe40] sm:$0xf]  ;;  %v18594_v10 = vld [vmem:[#allocation10 + $0x11b0] sm:$0xf0]  ;;  %v13278_v11 = vor.u32 %v18308_v4, %v13277_v3 }
 0x1d6   :  { %5206 = vmatpush.bf16.msrb.mxu1 %v14574_v20  ;;  %v18561_v20 = vld [vmem:[#allocation10 + $0x10ac] sm:$0xf] }
 0x1d7   :  { %5234 = vmatpush.bf16.msra.mxu3 %v12394_v33  ;;  %v18717_v33 = vld [vmem:[#allocation10 + $0x158c] sm:$0xf]  ;;  %v14314_v29 = vor.u32 %v18561_v20, %v14311_v22  ;;  %v18295_v20 = vld [vmem:[#allocation10 + $0x858] sm:$0xf0]  ;;  %v13953_v22 = vld [vmem:[#allocation10 + $0xdd8] sm:$0xf] }
 0x1d8   :  { %5247 = vmatpush.bf16.msra.mxu0 %v12810_v26  ;;  %v14630_v26 = vor.u32 %v18646_v18, %v14629_v17  ;;  %v14938_v30 = vor.u32 %v18717_v33, %v14935_v23  ;;  %v14006_v17 = vor.u32 %v18490_v7, %v14005_v6  ;;  %v13225_v18 = vld [vmem:[#allocation10 + $0x828] sm:$0xf]  ;;  %v18477_v33 = vld [vmem:[#allocation10 + $0xe08] sm:$0xf0]  ;;  %v18211_v6 = vld [vmem:[#allocation10 + $0x5bc] sm:$0xf] }
 0x1d9   :  { %5172 = vmatpush.bf16.msrb.mxu2 %v13066_v42  ;;  %v14109_v42 = vld [vmem:[#allocation10 + $0xf10] sm:$0xf] }
 0x1da   :  { %5207 = vmatpush.bf16.msrb.mxu1 %v14522_v32  ;;  %v18633_v32 = vld [vmem:[#allocation10 + $0x12e8] sm:$0xf0]  ;;  %v14110_v53 = vor.u32 %v18516_v44, %v14109_v42  ;;  %v13121_v44 = vld [vmem:[#allocation10 + $0x758] sm:$0xf]  ;;  %v12915_v7 = vld [vmem:[#allocation10 + $0x5ec] sm:$0xf0] }
 0x1db   :  { %5235 = vmatpush.bf16.msra.mxu3 %v12342_v36  ;;  %v18704_v36 = vld [vmem:[#allocation10 + $0x1524] sm:$0xf]  ;;  %v14578_v41 = vor.u32 %v18633_v32, %v14577_v31  ;;  %v18282_v31 = vld [vmem:[#allocation10 + $0x7f0] sm:$0xf0]  ;;  %v13797_v32 = vld [vmem:[#allocation10 + $0xca0] sm:$0xf] }
 0x1dc   :  { %5248 = vmatpush.bf16.msra.mxu0 %v12758_v39  ;;  %v13381_v39 = vld [vmem:[#allocation10 + $0x960] sm:$0xf]  ;;  %v13798_v42 = vor.u32 %v18438_v34, %v13797_v32  ;;  %v14993_v34 = vld [vmem:[#allocation10 + $0x15f8] sm:$0xf] }
 0x1dd   :  { %5173 = vmatpush.bf16.msrb.mxu2 %v13014_v57  ;;  %v13382_v49 = vor.u32 %v18334_v40, %v13381_v39  ;;  %v18503_v57 = vld [vmem:[#allocation10 + $0xed8] sm:$0xf0]  ;;  %v14317_v39 = vld [vmem:[#allocation10 + $0x10b0] sm:$0xf]  ;;  %v18568_v40 = vld [vmem:[#allocation10 + $0x10e0] sm:$0xf0] }
 0x1de   :  { %5208 = vmatpush.bf16.msrb.mxu1 %v14470_v46  ;;  %v14886_v46 = vor.u32 %v18704_v36, %v14883_v37  ;;  %v14058_v2 = vor.u32 %v18503_v57, %v14057_v43  ;;  %v13901_v36 = vld [vmem:[#allocation10 + $0xd70] sm:$0xf]  ;;  %v18464_v37 = vld [vmem:[#allocation10 + $0xda0] sm:$0xf0]  ;;  %v13746_v57 = vor.u32 %v18425_v48, %v13745_v47 }
 0x1df   :  { %5236 = vmatpush.bf16.msra.mxu3 %v12290_v50  ;;  %v18691_v50 = vld [vmem:[#allocation10 + $0x14bc] sm:$0xf]  ;;  %v14941_v47 = vld [vmem:[#allocation10 + $0x1590] sm:$0xf]  ;;  %v18724_v48 = vld [vmem:[#allocation10 + $0x15c0] sm:$0xf0] }
 0x1e0   :  { %5249 = vmatpush.bf16.msra.mxu0 %v12706_v55  ;;  %5174 = vmatmul.bf16.vlgmr.msrb.gmra.mxu2 %v19870_v61  ;;  %v18321_v55 = vld [vmem:[#allocation10 + $0x928] sm:$0xf0]  ;;  %v14834_v58 = vor.u32 %v18691_v50, %v14831_v52  ;;  %v13849_v50 = vld [vmem:[#allocation10 + $0xd08] sm:$0xf]  ;;  %v18451_v52 = vld [vmem:[#allocation10 + $0xd38] sm:$0xf0] }
 0x1e1   :  { %5218 = vmatpush.bf16.msra.mxu2 %v15042_v62  ;;  %v13330_v62 = vor.u32 %v18321_v55, %v13329_v54  ;;  %v18555_v54 = vld [vmem:[#allocation10 + $0x1078] sm:$0xf0]  ;;  %v18224_v55 = vld [vmem:[#allocation10 + $0x624] sm:$0xf] }
 0x1e2   :  { %5209 = vmatpush.bf16.msrb.mxu1 %v14418_v60  ;;  %v18607_v60 = vld [vmem:[#allocation10 + $0x1218] sm:$0xf0] }
 0x1e3   :  { %5237 = vmatpush.bf16.msra.mxu3 %v12238_v0  ;;  %v14779_v0 = vld [vmem:[#allocation10 + $0x1484] sm:$0xf0] }
 0x1e4   :  { %5250 = vmatpush.bf16.msra.mxu0 %v12654_v5  ;;  %v14474_v5 = vor.u32 %v18607_v60, %v14473_v59  ;;  %v14782_v8 = vor.u32 %v18678_v63, %v14779_v0  ;;  %v13383_v59 = vld [vmem:[#allocation10 + $0x994] sm:$0xf0]  ;;  %v13069_v60 = vld [vmem:[#allocation10 + $0x6f0] sm:$0xf]  ;;  %v18256_v63 = vld [vmem:[#allocation10 + $0x720] sm:$0xf0] }
 0x1e5   :  { %5219 = vmatpush.bf16.msra.mxu2 %v14990_v15  ;;  %v14727_v15 = vld [vmem:[#allocation10 + $0x141c] sm:$0xf0]  ;;  %v13693_v0 = vld [vmem:[#allocation10 + $0xbd0] sm:$0xf] }
 0x1e6   :  { %5210 = vmatpush.bf16.msrb.mxu1 %v14366_v13  ;;  %v18665_v13 = vld [vmem:[#allocation10 + $0x13ec] sm:$0xf] }
 0x1e7   :  { %5238 = vmatpush.bf16.msra.mxu3 %v12186_v21  ;;  %v14422_v21 = vor.u32 %v18594_v10, %v14421_v9  ;;  %v14730_v23 = vor.u32 %v18665_v13, %v14727_v15  ;;  %v18315_v10 = vld [vmem:[#allocation10 + $0x8fc] sm:$0xf]  ;;  %v13017_v13 = vld [vmem:[#allocation10 + $0x688] sm:$0xf] }
 0x1e8   :  { %5251 = vmatpush.bf16.msra.mxu0 %v12602_v24  ;;  %v14369_v24 = vld [vmem:[#allocation10 + $0x1118] sm:$0xf]  ;;  %v18243_v15 = vld [vmem:[#allocation10 + $0x6b8] sm:$0xf0] }
 0x1e9   :  { %5220 = vmatpush.bf16.msra.mxu2 %v14938_v30  ;;  %v13954_v30 = vor.u32 %v18477_v33, %v13953_v22  ;;  %v18750_v22 = vld [vmem:[#allocation10 + $0x1690] sm:$0xf0] }
 0x1ea   :  { %5211 = vmatpush.bf16.msrb.mxu1 %v14314_v29  ;;  %5239 = vmatmul.bf16.vlgmr.msra.gmra.mxu3 %v19876_v19  ;;  %v13173_v29 = vld [vmem:[#allocation10 + $0x7c0] sm:$0xf] }
 0x1eb   :  { %5283 = vmatpush.bf16.msrb.mxu3 %v14214_v25  ;;  %5252 = vmatmul.bf16.vlgmr.msra.gmra.mxu0 %v19886_v12  ;;  %v18581_v25 = vld [vmem:[#allocation10 + $0x1148] sm:$0xf0] }
 0x1ec   :  { %5296 = vmatpush.bf16.msrb.mxu0 %v14630_v26  ;;  %v13226_v26 = vor.u32 %v18295_v20, %v13225_v18  ;;  %v14370_v35 = vor.u32 %v18581_v25, %v14369_v24  ;;  %v18399_v18 = vld [vmem:[#allocation10 + $0xb98] sm:$0xf0]  ;;  %v12918_v20 = vor.u32 %v18211_v6, %v12915_v7  ;;  %v12863_v24 = vld [vmem:[#allocation10 + $0x584] sm:$0xf0]  ;;  %v13018_v25 = vor.u32 %v18243_v15, %v13017_v13  ;;  %v12551_v13 = vld [vmem:[#allocation10 + $0x314] sm:$0xf0] }
 0x1ed   :  { %5221 = vmatpush.bf16.msra.mxu2 %v14886_v46  ;;  %v18269_v46 = vld [vmem:[#allocation10 + $0x788] sm:$0xf0]  ;;  %v13433_v6 = vld [vmem:[#allocation10 + $0x9c8] sm:$0xf]  ;;  %v18347_v7 = vld [vmem:[#allocation10 + $0x9f8] sm:$0xf0] }
 0x1ee   :  { %5212 = vmatpush.bf16.msrb.mxu1 %v14262_v45  ;;  %v13902_v45 = vor.u32 %v18464_v37, %v13901_v36  ;;  %v13122_v43 = vor.u32 %v18269_v46, %v13121_v44  ;;  %v18185_v37 = vld [vmem:[#allocation10 + $0x4ec] sm:$0xf]  ;;  %v13537_v44 = vld [vmem:[#allocation10 + $0xa98] sm:$0xf] }
 0x1ef   :  { %5284 = vmatpush.bf16.msrb.mxu3 %v14162_v38  ;;  %v14678_v38 = vor.u32 %v18652_v27, %v14675_v28  ;;  %v18302_v27 = vld [vmem:[#allocation10 + $0x894] sm:$0xf]  ;;  %v13279_v28 = vld [vmem:[#allocation10 + $0x8c4] sm:$0xf0] }
 0x1f0   :  { %5297 = vmatpush.bf16.msrb.mxu0 %v14578_v41  ;;  %v13174_v41 = vor.u32 %v18282_v31, %v13173_v29  ;;  %v18386_v31 = vld [vmem:[#allocation10 + $0xb30] sm:$0xf0]  ;;  %v13282_v36 = vor.u32 %v18302_v27, %v13279_v28  ;;  %v18107_v27 = vld [vmem:[#allocation10 + $0x27c] sm:$0xf]  ;;  %v12499_v28 = vld [vmem:[#allocation10 + $0x2ac] sm:$0xf0] }
 0x1f1   :  { %5213 = vmatmul.bf16.vlgmr.msrb.gmra.mxu1 %v19895_v14  ;;  %5222 = vmatpush.bf16.msra.mxu2 %v14834_v58  ;;  %v18328_v58 = vld [vmem:[#allocation10 + $0x964] sm:$0xf] }
 0x1f2   :  { %5257 = vmatpush.bf16.msra.mxu1 %v13382_v49  ;;  %v14318_v49 = vor.u32 %v18568_v40, %v14317_v39  ;;  %v18289_v40 = vld [vmem:[#allocation10 + $0x82c] sm:$0xf] }
 0x1f3   :  { %5285 = vmatpush.bf16.msrb.mxu3 %v14110_v53  ;;  %v14265_v53 = vld [vmem:[#allocation10 + $0x1048] sm:$0xf] }
 0x1f4   :  { %5298 = vmatpush.bf16.msrb.mxu0 %v14526_v56  ;;  %v12967_v56 = vld [vmem:[#allocation10 + $0x654] sm:$0xf0]  ;;  %v14266_v3 = vor.u32 %v18555_v54, %v14265_v53  ;;  %v18276_v54 = vld [vmem:[#allocation10 + $0x7c4] sm:$0xf] }
 0x1f5   :  { %5223 = vmatpush.bf16.msra.mxu2 %v14782_v8  ;;  %v12970_v4 = vor.u32 %v18224_v55, %v12967_v56  ;;  %v13070_v8 = vor.u32 %v18256_v63, %v13069_v60  ;;  %v13175_v55 = vld [vmem:[#allocation10 + $0x7f4] sm:$0xf0]  ;;  %v14942_v56 = vor.u32 %v18724_v48, %v14941_v47  ;;  %v18711_v60 = vld [vmem:[#allocation10 + $0x1558] sm:$0xf0] }
 0x1f6   :  { %5258 = vmatpush.bf16.msra.mxu1 %v13330_v62  ;;  %v13850_v62 = vor.u32 %v18451_v52, %v13849_v50  ;;  %v18172_v50 = vld [vmem:[#allocation10 + $0x484] sm:$0xf]  ;;  %v12759_v52 = vld [vmem:[#allocation10 + $0x4b4] sm:$0xf0]  ;;  %v18159_v63 = vld [vmem:[#allocation10 + $0x41c] sm:$0xf] }
 0x1f7   :  { %5286 = vmatpush.bf16.msrb.mxu3 %v14058_v2  ;;  %v18412_v2 = vld [vmem:[#allocation10 + $0xc00] sm:$0xf0] }
 0x1f8   :  { %5299 = vmatpush.bf16.msrb.mxu0 %v14474_v5  ;;  %v13386_v5 = vor.u32 %v18328_v58, %v13383_v59  ;;  %v13694_v9 = vor.u32 %v18412_v2, %v13693_v0  ;;  %v12762_v58 = vor.u32 %v18172_v50, %v12759_v52  ;;  %v14889_v59 = vld [vmem:[#allocation10 + $0x1528] sm:$0xf]  ;;  %v12707_v0 = vld [vmem:[#allocation10 + $0x44c] sm:$0xf0]  ;;  %v18627_v50 = vld [vmem:[#allocation10 + $0x12bc] sm:$0xf] }
 0x1f9   :  { %5224 = vmatpush.bf16.msra.mxu2 %v14730_v23  ;;  %v18198_v23 = vld [vmem:[#allocation10 + $0x554] sm:$0xf]  ;;  %v14579_v52 = vld [vmem:[#allocation10 + $0x12ec] sm:$0xf0] }
 0x1fa   :  { %5259 = vmatpush.bf16.msra.mxu1 %v13278_v11  ;;  %v13331_v11 = vld [vmem:[#allocation10 + $0x92c] sm:$0xf0]  ;;  %v12866_v32 = vor.u32 %v18198_v23, %v12863_v24  ;;  %v14785_v24 = vld [vmem:[#allocation10 + $0x1458] sm:$0xf] }
 0x1fb   :  { %5287 = vmatpush.bf16.msrb.mxu3 %v14006_v17  ;;  %v13641_v17 = vld [vmem:[#allocation10 + $0xb68] sm:$0xf]  ;;  %v13334_v33 = vor.u32 %v18315_v10, %v13331_v11  ;;  %v18698_v10 = vld [vmem:[#allocation10 + $0x14f0] sm:$0xf0]  ;;  %v18120_v11 = vld [vmem:[#allocation10 + $0x2e4] sm:$0xf] }
 0x1fc   :  { %5300 = vmatpush.bf16.msrb.mxu0 %v14422_v21  ;;  %v15045_v21 = vld [vmem:[#allocation10 + $0x1660] sm:$0xf]  ;;  %v12554_v23 = vor.u32 %v18120_v11, %v12551_v13  ;;  %v18419_v13 = vld [vmem:[#allocation10 + $0xc3c] sm:$0xf] }
 0x1fd   :  { %5225 = vmatpush.bf16.msra.mxu2 %v14678_v38  ;;  %v15046_v29 = vor.u32 %v18750_v22, %v15045_v21  ;;  %v12811_v38 = vld [vmem:[#allocation10 + $0x51c] sm:$0xf0]  ;;  %v18250_v21 = vld [vmem:[#allocation10 + $0x6f4] sm:$0xf]  ;;  %v13071_v22 = vld [vmem:[#allocation10 + $0x724] sm:$0xf0] }
 0x1fe   :  { %5260 = vmatpush.bf16.msra.mxu1 %v13226_v26  ;;  %v13642_v26 = vor.u32 %v18399_v18, %v13641_v17  ;;  %v12814_v46 = vor.u32 %v18185_v37, %v12811_v38  ;;  %v18146_v17 = vld [vmem:[#allocation10 + $0x3b4] sm:$0xf]  ;;  %v12655_v18 = vld [vmem:[#allocation10 + $0x3e4] sm:$0xf0]  ;;  %v12502_v38 = vor.u32 %v18107_v27, %v12499_v28 }
 0x1ff   :  { %5288 = vmatpush.bf16.msrb.mxu3 %v13954_v30  ;;  %v13589_v30 = vld [vmem:[#allocation10 + $0xb00] sm:$0xf]  ;;  %v18406_v27 = vld [vmem:[#allocation10 + $0xbd4] sm:$0xf]  ;;  %v13695_v28 = vld [vmem:[#allocation10 + $0xc04] sm:$0xf0] }
 0x200   :  { %5301 = vmatpush.bf16.msrb.mxu0 %v14370_v35  ;;  %5226 = vmatmul.bf16.vlgmr.msra.gmra.mxu2 %v19882_v51  ;;  %v18737_v35 = vld [vmem:[#allocation10 + $0x1628] sm:$0xf0]  ;;  %v13590_v39 = vor.u32 %v18386_v31, %v13589_v30  ;;  %v12603_v31 = vld [vmem:[#allocation10 + $0x37c] sm:$0xf0] }
 0x201   :  { %5270 = vmatpush.bf16.msrb.mxu2 %v13798_v42  ;;  %v14994_v42 = vor.u32 %v18737_v35, %v14993_v34  ;;  %v18133_v30 = vld [vmem:[#allocation10 + $0x34c] sm:$0xf]  ;;  %v13019_v34 = vld [vmem:[#allocation10 + $0x6bc] sm:$0xf0]  ;;  %v18640_v35 = vld [vmem:[#allocation10 + $0x1324] sm:$0xf] }
 0x202   :  { %5261 = vmatpush.bf16.msra.mxu1 %v13174_v41  ;;  %v13227_v41 = vld [vmem:[#allocation10 + $0x85c] sm:$0xf0] }
 0x203   :  { %5289 = vmatpush.bf16.msrb.mxu3 %v13902_v45  ;;  %v18373_v45 = vld [vmem:[#allocation10 + $0xac8] sm:$0xf0] }
 0x204   :  { %5302 = vmatpush.bf16.msrb.mxu0 %v14318_v49  ;;  %v13230_v49 = vor.u32 %v18289_v40, %v13227_v41  ;;  %v13538_v53 = vor.u32 %v18373_v45, %v13537_v44  ;;  %v15047_v40 = vld [vmem:[#allocation10 + $0x1694] sm:$0xf0]  ;;  %v14733_v41 = vld [vmem:[#allocation10 + $0x13f0] sm:$0xf]  ;;  %v18672_v44 = vld [vmem:[#allocation10 + $0x1420] sm:$0xf0] }
 0x205   :  { %5271 = vmatpush.bf16.msrb.mxu2 %v13746_v57  ;;  %v18360_v57 = vld [vmem:[#allocation10 + $0xa60] sm:$0xf0]  ;;  %v18094_v45 = vld [vmem:[#allocation10 + $0x214] sm:$0xf] }
 0x206   :  { %5262 = vmatpush.bf16.msra.mxu1 %v13122_v43  ;;  %v13485_v43 = vld [vmem:[#allocation10 + $0xa30] sm:$0xf] }
 0x207   :  { %5290 = vmatpush.bf16.msrb.mxu3 %v13850_v62  ;;  %v13178_v62 = vor.u32 %v18276_v54, %v13175_v55  ;;  %v13486_v2 = vor.u32 %v18360_v57, %v13485_v43  ;;  %v18731_v55 = vld [vmem:[#allocation10 + $0x15fc] sm:$0xf]  ;;  %v14681_v43 = vld [vmem:[#allocation10 + $0x1388] sm:$0xf] }
 0x208   :  { %5303 = vmatpush.bf16.msrb.mxu0 %v14266_v3  ;;  %v18263_v3 = vld [vmem:[#allocation10 + $0x75c] sm:$0xf] }
 0x209   :  { %5272 = vmatpush.bf16.msrb.mxu2 %v13694_v9  ;;  %v12710_v9 = vor.u32 %v18159_v63, %v12707_v0  ;;  %v18659_v57 = vld [vmem:[#allocation10 + $0x13b8] sm:$0xf0]  ;;  %v13799_v63 = vld [vmem:[#allocation10 + $0xcd4] sm:$0xf0] }
 0x20a   :  { %5263 = vmatpush.bf16.msra.mxu1 %v13070_v8  ;;  %5291 = vmatmul.bf16.vlgmr.msrb.gmra.mxu3 %v19888_v16  ;;  %v14837_v8 = vld [vmem:[#allocation10 + $0x14c0] sm:$0xf] }
 0x20b   :  { %5335 = vmatpush.bf16.msra.mxu3 %v12970_v4  ;;  %5304 = vmatmul.bf16.vlgmr.msrb.gmra.mxu0 %v19895_v14  ;;  %v13123_v4 = vld [vmem:[#allocation10 + $0x78c] sm:$0xf0] }
 0x20c   :  { %5348 = vmatpush.bf16.msra.mxu0 %v13386_v5  ;;  %v14890_v5 = vor.u32 %v18711_v60, %v14889_v59  ;;  %v13126_v15 = vor.u32 %v18263_v3, %v13123_v4  ;;  %v12395_v59 = vld [vmem:[#allocation10 + $0x1dc] sm:$0xf0]  ;;  %v14582_v60 = vor.u32 %v18627_v50, %v14579_v52  ;;  %v14527_v3 = vld [vmem:[#allocation10 + $0x1284] sm:$0xf0]  ;;  %v14682_v4 = vor.u32 %v18659_v57, %v14681_v43  ;;  %v18679_v50 = vld [vmem:[#allocation10 + $0x145c] sm:$0xf] }
 0x20d   :  { %5273 = vmatpush.bf16.msrb.mxu2 %v13642_v26  ;;  %v18685_v26 = vld [vmem:[#allocation10 + $0x1488] sm:$0xf0]  ;;  %v14787_v52 = vld [vmem:[#allocation10 + $0x148c] sm:$0xf0]  ;;  %v13591_v57 = vld [vmem:[#allocation10 + $0xb34] sm:$0xf0] }
 0x20e   :  { %5264 = vmatpush.bf16.msra.mxu1 %v13018_v25  ;;  %v12658_v25 = vor.u32 %v18146_v17, %v12655_v18  ;;  %v14786_v37 = vor.u32 %v18685_v26, %v14785_v24  ;;  %v18601_v18 = vld [vmem:[#allocation10 + $0x11ec] sm:$0xf]  ;;  %v18055_v24 = vld [vmem:[#allocation10 + $0xdc] sm:$0xf] }
 0x20f   :  { %5336 = vmatpush.bf16.msra.mxu3 %v12918_v20  ;;  %v13434_v20 = vor.u32 %v18347_v7, %v13433_v6  ;;  %v18718_v6 = vld [vmem:[#allocation10 + $0x1594] sm:$0xf]  ;;  %v14943_v7 = vld [vmem:[#allocation10 + $0x15c4] sm:$0xf0] }
 0x210   :  { %5349 = vmatpush.bf16.msra.mxu0 %v13334_v33  ;;  %v14838_v33 = vor.u32 %v18698_v10, %v14837_v8  ;;  %v12343_v10 = vld [vmem:[#allocation10 + $0x174] sm:$0xf0]  ;;  %v14946_v17 = vor.u32 %v18718_v6, %v14943_v7  ;;  %v18367_v7 = vld [vmem:[#allocation10 + $0xa9c] sm:$0xf] }
 0x211   :  { %5265 = vmatmul.bf16.vlgmr.msra.gmra.mxu1 %v19870_v61  ;;  %5274 = vmatpush.bf16.msrb.mxu2 %v13590_v39  ;;  %v18744_v39 = vld [vmem:[#allocation10 + $0x1664] sm:$0xf] }
 0x212   :  { %5309 = vmatpush.bf16.msrb.mxu1 %v15046_v29  ;;  %v13074_v29 = vor.u32 %v18250_v21, %v13071_v22  ;;  %v18705_v22 = vld [vmem:[#allocation10 + $0x152c] sm:$0xf] }
 0x213   :  { %5337 = vmatpush.bf16.msra.mxu3 %v12866_v32  ;;  %v18237_v32 = vld [vmem:[#allocation10 + $0x68c] sm:$0xf] }
 0x214   :  { %5350 = vmatpush.bf16.msra.mxu0 %v13282_v36  ;;  %v14631_v36 = vld [vmem:[#allocation10 + $0x1354] sm:$0xf0]  ;;  %v13022_v47 = vor.u32 %v18237_v32, %v13019_v34 }
 0x215   :  { %5275 = vmatpush.bf16.msrb.mxu2 %v13538_v53  ;;  %v14634_v48 = vor.u32 %v18640_v35, %v14631_v36  ;;  %v14734_v53 = vor.u32 %v18672_v44, %v14733_v41  ;;  %v14423_v32 = vld [vmem:[#allocation10 + $0x11b4] sm:$0xf0]  ;;  %v18692_v35 = vld [vmem:[#allocation10 + $0x14c4] sm:$0xf]  ;;  %v18393_v41 = vld [vmem:[#allocation10 + $0xb6c] sm:$0xf] }
 0x216   :  { %5310 = vmatpush.bf16.msrb.mxu1 %v14994_v42  ;;  %v12606_v42 = vor.u32 %v18133_v30, %v12603_v31  ;;  %v18588_v31 = vld [vmem:[#allocation10 + $0x1184] sm:$0xf]  ;;  %v14839_v36 = vld [vmem:[#allocation10 + $0x14f4] sm:$0xf0] }
 0x217   :  { %5338 = vmatpush.bf16.msra.mxu3 %v12814_v46  ;;  %v12447_v46 = vld [vmem:[#allocation10 + $0x244] sm:$0xf0]  ;;  %v14842_v44 = vor.u32 %v18692_v35, %v14839_v36 }
 0x218   :  { %5351 = vmatpush.bf16.msra.mxu0 %v13230_v49  ;;  %v15050_v49 = vor.u32 %v18744_v39, %v15047_v40  ;;  %v12450_v54 = vor.u32 %v18094_v45, %v12447_v46  ;;  %v12239_v39 = vld [vmem:[#allocation10 + $0xa4] sm:$0xf0]  ;;  %v14426_v40 = vor.u32 %v18588_v31, %v14423_v32  ;;  %v18575_v45 = vld [vmem:[#allocation10 + $0x111c] sm:$0xf]  ;;  %v14371_v46 = vld [vmem:[#allocation10 + $0x114c] sm:$0xf0] }
 0x219   :  { %5276 = vmatpush.bf16.msrb.mxu2 %v13486_v2  ;;  %v18614_v2 = vld [vmem:[#allocation10 + $0x1254] sm:$0xf]  ;;  %v14374_v43 = vor.u32 %v18575_v45, %v14371_v46  ;;  %v13487_v31 = vld [vmem:[#allocation10 + $0xa64] sm:$0xf0]  ;;  %v13753_v45 = vld [vmem:[#allocation10 + $0xc40] sm:$0xf] }
 0x21a   :  { %5311 = vmatpush.bf16.msrb.mxu1 %v14942_v56  ;;  %v14995_v56 = vld [vmem:[#allocation10 + $0x162c] sm:$0xf0]  ;;  %v14530_v11 = vor.u32 %v18614_v2, %v14527_v3  ;;  %v18666_v3 = vld [vmem:[#allocation10 + $0x13f4] sm:$0xf] }
 0x21b   :  { %5339 = vmatpush.bf16.msra.mxu3 %v12762_v58  ;;  %v18081_v58 = vld [vmem:[#allocation10 + $0x1ac] sm:$0xf]  ;;  %v14998_v0 = vor.u32 %v18731_v55, %v14995_v56  ;;  %v12187_v55 = vld [vmem:[#allocation10 + $0x3c] sm:$0xf0]  ;;  %v18380_v56 = vld [vmem:[#allocation10 + $0xb04] sm:$0xf] }
 0x21c   :  { %5352 = vmatpush.bf16.msra.mxu0 %v13178_v62  ;;  %v18432_v62 = vld [vmem:[#allocation10 + $0xca4] sm:$0xf]  ;;  %v18510_v32 = vld [vmem:[#allocation10 + $0xf14] sm:$0xf] }
 0x21d   :  { %5277 = vmatpush.bf16.msrb.mxu2 %v13434_v20  ;;  %v13802_v8 = vor.u32 %v18432_v62, %v13799_v63  ;;  %v14475_v20 = vld [vmem:[#allocation10 + $0x121c] sm:$0xf0]  ;;  %v14790_v62 = vor.u32 %v18679_v50, %v14787_v52  ;;  %v18562_v63 = vld [vmem:[#allocation10 + $0x10b4] sm:$0xf]  ;;  %v18497_v52 = vld [vmem:[#allocation10 + $0xeac] sm:$0xf] }
 0x21e   :  { %5312 = vmatpush.bf16.msrb.mxu1 %v14890_v5  ;;  %v12398_v5 = vor.u32 %v18081_v58, %v12395_v59  ;;  %v14478_v26 = vor.u32 %v18601_v18, %v14475_v20  ;;  %v18536_v58 = vld [vmem:[#allocation10 + $0xfe4] sm:$0xf]  ;;  %v14215_v59 = vld [vmem:[#allocation10 + $0x1014] sm:$0xf0]  ;;  %v18653_v18 = vld [vmem:[#allocation10 + $0x138c] sm:$0xf] }
 0x21f   :  { %5340 = vmatpush.bf16.msra.mxu3 %v12710_v9  ;;  %v18068_v9 = vld [vmem:[#allocation10 + $0x144] sm:$0xf]  ;;  %v14218_v6 = vor.u32 %v18536_v58, %v14215_v59  ;;  %v18426_v46 = vld [vmem:[#allocation10 + $0xc70] sm:$0xf0]  ;;  %v13435_v50 = vld [vmem:[#allocation10 + $0x9fc] sm:$0xf0] }
 0x220   :  { %5353 = vmatpush.bf16.msra.mxu0 %v13126_v15  ;;  %5278 = vmatmul.bf16.vlgmr.msrb.gmra.mxu2 %v19872_v1  ;;  %v13747_v15 = vld [vmem:[#allocation10 + $0xc6c] sm:$0xf0]  ;;  %v12346_v21 = vor.u32 %v18068_v9, %v12343_v10  ;;  %v18523_v10 = vld [vmem:[#allocation10 + $0xf7c] sm:$0xf]  ;;  %v13285_v58 = vld [vmem:[#allocation10 + $0x898] sm:$0xf] }
 0x221   :  { %5322 = vmatpush.bf16.msra.mxu2 %v12554_v23  ;;  %v13750_v23 = vor.u32 %v18419_v13, %v13747_v15  ;;  %v13539_v9 = vld [vmem:[#allocation10 + $0xacc] sm:$0xf0]  ;;  %v18549_v15 = vld [vmem:[#allocation10 + $0x104c] sm:$0xf] }
 0x222   :  { %5313 = vmatpush.bf16.msrb.mxu1 %v14838_v33  ;;  %v14891_v33 = vld [vmem:[#allocation10 + $0x155c] sm:$0xf0]  ;;  %v18309_v59 = vld [vmem:[#allocation10 + $0x8c8] sm:$0xf0] }
 0x223   :  { %5341 = vmatpush.bf16.msra.mxu3 %v12658_v25  ;;  %v12291_v25 = vld [vmem:[#allocation10 + $0x10c] sm:$0xf0]  ;;  %v14894_v30 = vor.u32 %v18705_v22, %v14891_v33  ;;  %v14683_v22 = vld [vmem:[#allocation10 + $0x13bc] sm:$0xf0]  ;;  %v13389_v33 = vld [vmem:[#allocation10 + $0x968] sm:$0xf] }
 0x224   :  { %5354 = vmatpush.bf16.msra.mxu0 %v13074_v29  ;;  %v12294_v34 = vor.u32 %v18055_v24, %v12291_v25  ;;  %v13542_v24 = vor.u32 %v18367_v7, %v13539_v9  ;;  %v14686_v36 = vor.u32 %v18653_v18, %v14683_v22  ;;  %v12505_v9 = vld [vmem:[#allocation10 + $0x280] sm:$0xf] }
 0x225   :  { %5323 = vmatpush.bf16.msra.mxu2 %v12502_v38  ;;  %v18042_v38 = vld [vmem:[#allocation10 + $0x74] sm:$0xf] }
 0x226   :  { %5314 = vmatpush.bf16.msrb.mxu1 %v14786_v37  ;;  %v13698_v37 = vor.u32 %v18406_v27, %v13695_v28  ;;  %v18439_v27 = vld [vmem:[#allocation10 + $0xcd8] sm:$0xf0]  ;;  %v18354_v28 = vld [vmem:[#allocation10 + $0xa34] sm:$0xf] }
 0x227   :  { %5342 = vmatpush.bf16.msra.mxu3 %v12606_v42  ;;  %v13643_v42 = vld [vmem:[#allocation10 + $0xb9c] sm:$0xf0] }
 0x228   :  { %5355 = vmatpush.bf16.msra.mxu0 %v13022_v47  ;;  %v19911_v29 = vpop.f32.mrf.mxu0 }
 0x229   :  { %5324 = vmatpush.bf16.msra.mxu2 %v12450_v54  ;;  %v18029_v54 = vld [vmem:[#allocation10 + $0xc] sm:$0xf] }
 0x22a   :  { %5315 = vmatpush.bf16.msrb.mxu1 %v14734_v53  ;;  %5343 = vmatmul.bf16.vlgmr.msra.gmra.mxu3 %v19886_v12  ;;  %v13646_v53 = vor.u32 %v18393_v41, %v13643_v42  ;;  %v12190_v2 = vor.u32 %v18029_v54, %v12187_v55  ;;  %v18322_v41 = vld [vmem:[#allocation10 + $0x930] sm:$0xf0]  ;;  %v13490_v42 = vor.u32 %v18354_v28, %v13487_v31  ;;  %v12557_v55 = vld [vmem:[#allocation10 + $0x2e8] sm:$0xf]  ;;  %v18101_v28 = vld [vmem:[#allocation10 + $0x248] sm:$0xf0] }
 0x22b   :  { %5387 = vmatpush.bf16.msrb.mxu3 %v14634_v48  ;;  %5356 = vmatmul.bf16.vlgmr.msra.gmra.mxu0 %v19870_v61  ;;  %v13181_v31 = vld [vmem:[#allocation10 + $0x7c8] sm:$0xf] }
 0x22c   :  { %5400 = vmatpush.bf16.msrb.mxu0 %v15050_v49  ;;  %v12242_v49 = vor.u32 %v18042_v38, %v12239_v39  ;;  %v19920_v38 = vld [vmem:[#allocation12] sm:$0xff] }
 0x22d   :  { %5325 = vmatpush.bf16.msra.mxu2 %v12398_v5  ;;  %v19913_v47 = vpop.f32.mrf.mxu1  ;;  %v19915_v48 = vpop.f32.mrf.mxu3  ;;  %v13594_v5 = vor.u32 %v18380_v56, %v13591_v57  ;;  %v18127_v56 = vld [vmem:[#allocation10 + $0x318] sm:$0xf0]  ;;  %v13754_v57 = vor.u32 %v18426_v46, %v13753_v45 }
 0x22e   :  { %5316 = vmatpush.bf16.msrb.mxu1 %v14682_v4  ;;  %v14735_v4 = vld [vmem:[#allocation10 + $0x1424] sm:$0xf0] }
 0x22f   :  { %5388 = vmatpush.bf16.msrb.mxu3 %v14582_v60  ;;  %v14738_v13 = vor.u32 %v18666_v3, %v14735_v4  ;;  %v18413_v3 = vld [vmem:[#allocation10 + $0xc08] sm:$0xf0]  ;;  %v12558_v4 = vor.u32 %v18127_v56, %v12557_v55  ;;  %v18270_v55 = vld [vmem:[#allocation10 + $0x790] sm:$0xf0] }
 0x230   :  { %5401 = vmatpush.bf16.msrb.mxu0 %v14998_v0  ;;  %v5099_v60 = vpop.f32.mrf.mxu0  ;;  %v14319_v0 = vld [vmem:[#allocation10 + $0x10e4] sm:$0xf0] }
 0x231   :  { %5317 = vmatmul.bf16.vlgmr.msrb.gmra.mxu1 %v19882_v51  ;;  %5326 = vmatpush.bf16.msra.mxu2 %v12346_v21  ;;  %v1327_v60 = vperm.slane %v19920_v38, 0 }
 0x232   :  { %5361 = vmatpush.bf16.msra.mxu1 %v13802_v8  ;;  %v14322_v8 = vor.u32 %v18562_v63, %v14319_v0 }
 0x233   :  { %5389 = vmatpush.bf16.msrb.mxu3 %v14530_v11  ;;  %v14163_v11 = vld [vmem:[#allocation10 + $0xfac] sm:$0xf0] }
 0x234   :  { %5402 = vmatpush.bf16.msrb.mxu0 %v14946_v17  ;;  %v14267_v17 = vld [vmem:[#allocation10 + $0x107c] sm:$0xf0]  ;;  %v14166_v25 = vor.u32 %v18523_v10, %v14163_v11  ;;  %v18114_v10 = vld [vmem:[#allocation10 + $0x2b0] sm:$0xf0] }
 0x235   :  { %5327 = vmatpush.bf16.msra.mxu2 %v12294_v34  ;;  %v5060_v20 = vpop.f32.mrf.mxu1  ;;  %v5086_v21 = vpop.f32.mrf.mxu3  ;;  %v14111_v34 = vld [vmem:[#allocation10 + $0xf44] sm:$0xf0] }
 0x236   :  { %5362 = vmatpush.bf16.msra.mxu1 %v13750_v23  ;;  %v18335_v23 = vld [vmem:[#allocation10 + $0x998] sm:$0xf0]  ;;  %v13649_v20 = vld [vmem:[#allocation10 + $0xb70] sm:$0xf]  ;;  %v18400_v21 = vld [vmem:[#allocation10 + $0xba0] sm:$0xf0] }
 0x237   :  { %5390 = vmatpush.bf16.msrb.mxu3 %v14478_v26  ;;  %v13805_v26 = vld [vmem:[#allocation10 + $0xca8] sm:$0xf] }
 0x238   :  { %5403 = vmatpush.bf16.msrb.mxu0 %v14894_v30  ;;  %v14270_v30 = vor.u32 %v18549_v15, %v14267_v17  ;;  %v19918_v35 = vpop.f32.mrf.mxu0  ;;  %v13806_v39 = vor.u32 %v18439_v27, %v13805_v26  ;;  %v18296_v15 = vld [vmem:[#allocation10 + $0x860] sm:$0xf0]  ;;  %v5059_v17 = vadd.f32 %v19913_v47, %v1327_v60  ;;  %v12453_v27 = vld [vmem:[#allocation10 + $0x218] sm:$0xf]  ;;  %v13650_v47 = vor.u32 %v18400_v21, %v13649_v20 }
 0x239   :  { %5328 = vmatpush.bf16.msra.mxu2 %v12242_v49  ;;  %v18341_v49 = vld [vmem:[#allocation10 + $0x9cc] sm:$0xf] }
 0x23a   :  { %5363 = vmatpush.bf16.msra.mxu1 %v13698_v37  ;;  %v13390_v37 = vor.u32 %v18335_v23, %v13389_v33  ;;  %v13438_v63 = vor.u32 %v18341_v49, %v13435_v50  ;;  %v12506_v33 = vor.u32 %v18114_v10, %v12505_v9  ;;  %v18471_v23 = vld [vmem:[#allocation10 + $0xddc] sm:$0xf]  ;;  %v12401_v49 = vld [vmem:[#allocation10 + $0x1b0] sm:$0xf]  ;;  %v18088_v50 = vld [vmem:[#allocation10 + $0x1e0] sm:$0xf0] }
 0x23b   :  { %5391 = vmatpush.bf16.msrb.mxu3 %v14426_v40  ;;  %v13337_v40 = vld [vmem:[#allocation10 + $0x900] sm:$0xf]  ;;  %v13077_v10 = vld [vmem:[#allocation10 + $0x6f8] sm:$0xf] }
 0x23c   :  { %5404 = vmatpush.bf16.msrb.mxu0 %v14842_v44  ;;  %v14114_v44 = vor.u32 %v18510_v32, %v14111_v34  ;;  %v13338_v54 = vor.u32 %v18322_v41, %v13337_v40  ;;  %v18283_v32 = vld [vmem:[#allocation10 + $0x7f8] sm:$0xf0]  ;;  %v12454_v41 = vor.u32 %v18101_v28, %v12453_v27  ;;  %v13025_v27 = vld [vmem:[#allocation10 + $0x690] sm:$0xf]  ;;  %v18244_v28 = vld [vmem:[#allocation10 + $0x6c0] sm:$0xf0] }
 0x23d   :  { %5329 = vmatpush.bf16.msra.mxu2 %v12190_v2  ;;  %v13701_v2 = vld [vmem:[#allocation10 + $0xbd8] sm:$0xf]  ;;  %v18387_v40 = vld [vmem:[#allocation10 + $0xb38] sm:$0xf0]  ;;  %v13182_v46 = vor.u32 %v18283_v32, %v13181_v31  ;;  %v15053_v31 = vld [vmem:[#allocation10 + $0x1668] sm:$0xf] }
 0x23e   :  { %5364 = vmatpush.bf16.msra.mxu1 %v13646_v53  ;;  %v14059_v53 = vld [vmem:[#allocation10 + $0xedc] sm:$0xf0]  ;;  %v13702_v11 = vor.u32 %v18413_v3, %v13701_v2  ;;  %v12349_v3 = vld [vmem:[#allocation10 + $0x148] sm:$0xf]  ;;  %v18751_v32 = vld [vmem:[#allocation10 + $0x1698] sm:$0xf0] }
 0x23f   :  { %5392 = vmatpush.bf16.msrb.mxu3 %v14374_v43  ;;  %v19922_v43 = vpop.f32.mrf.mxu3  ;;  %v14062_v0 = vor.u32 %v18497_v52, %v14059_v53  ;;  %v1328_v53 = vperm.slane %v19920_v38, 1  ;;  %v13851_v2 = vld [vmem:[#allocation10 + $0xd3c] sm:$0xf0] }
 0x240   :  { %5405 = vmatpush.bf16.msrb.mxu0 %v14790_v62  ;;  %5330 = vmatmul.bf16.vlgmr.msra.gmra.mxu2 %v19876_v19  ;;  %v19925_v62 = vpop.f32.mrf.mxu1  ;;  %v5151_v7 = vpop.f32.mrf.mxu0 }
 0x241   :  { %5374 = vmatpush.bf16.msrb.mxu2 %v14218_v6  ;;  %v14007_v6 = vld [vmem:[#allocation10 + $0xe74] sm:$0xf0]  ;;  %v5150_v7 = vadd.f32 %v19918_v35, %v1328_v53 }
 0x242   :  { %5365 = vmatpush.bf16.msra.mxu1 %v13594_v5  ;;  %v18484_v5 = vld [vmem:[#allocation10 + $0xe44] sm:$0xf] }
 0x243   :  { %5393 = vmatpush.bf16.msrb.mxu3 %v14322_v8  ;;  %v13286_v8 = vor.u32 %v18309_v59, %v13285_v58  ;;  %v14010_v18 = vor.u32 %v18484_v5, %v14007_v6  ;;  %v5071_v22 = vpop.f32.mrf.mxu2  ;;  %v18374_v58 = vld [vmem:[#allocation10 + $0xad0] sm:$0xf0]  ;;  %v12973_v5 = vld [vmem:[#allocation10 + $0x628] sm:$0xf]  ;;  %v18231_v6 = vld [vmem:[#allocation10 + $0x658] sm:$0xf0] }
 0x244   :  { %5406 = vmatpush.bf16.msrb.mxu0 %v14738_v13  ;;  %v13233_v13 = vld [vmem:[#allocation10 + $0x830] sm:$0xf]  ;;  %v12974_v21 = vor.u32 %v18231_v6, %v12973_v5  ;;  %v18543_v6 = vld [vmem:[#allocation10 + $0x1018] sm:$0xf0] }
 0x245   :  { %5375 = vmatpush.bf16.msrb.mxu2 %v14166_v25  ;;  %v5072_v25 = vadd.f32 %v5071_v22, %v5059_v17  ;;  %v13234_v26 = vor.u32 %v18296_v15, %v13233_v13  ;;  %v13493_v15 = vld [vmem:[#allocation10 + $0xa38] sm:$0xf]  ;;  %v18361_v17 = vld [vmem:[#allocation10 + $0xa68] sm:$0xf0]  ;;  %v12297_v22 = vld [vmem:[#allocation10 + $0xe0] sm:$0xf] }
 0x246   :  { %5366 = vmatpush.bf16.msra.mxu1 %v13542_v24  ;;  %v13955_v24 = vld [vmem:[#allocation10 + $0xe0c] sm:$0xf0] }
 0x247   :  { %5394 = vmatpush.bf16.msrb.mxu3 %v14270_v30  ;;  %v5138_v30 = vpop.f32.mrf.mxu3  ;;  %v5085_v34 = vadd.f32 %v19915_v48, %v5072_v25  ;;  %v18218_v25 = vld [vmem:[#allocation10 + $0x5f0] sm:$0xf0] }
 0x248   :  { %5407 = vmatpush.bf16.msrb.mxu0 %v14686_v36  ;;  %v5112_v36 = vpop.f32.mrf.mxu1  ;;  %v19932_v45 = vpop.f32.mrf.mxu0  ;;  %v13441_v30 = vld [vmem:[#allocation10 + $0x9d0] sm:$0xf] }
 0x249   :  { %5376 = vmatpush.bf16.msrb.mxu2 %v14114_v44  ;;  %v13903_v44 = vld [vmem:[#allocation10 + $0xda4] sm:$0xf0]  ;;  %v5098_v52 = vadd.f32 %v19911_v29, %v5085_v34 }
 0x24a   :  { %5367 = vmatpush.bf16.msra.mxu1 %v13490_v42  ;;  %5395 = vmatmul.bf16.vlgmr.msrb.gmra.mxu3 %v19895_v14  ;;  %v18458_v42 = vld [vmem:[#allocation10 + $0xd74] sm:$0xf] }
 0x24b   :  { %5439 = vmatpush.bf16.msra.mxu3 %v13390_v37  ;;  %5408 = vmatmul.bf16.vlgmr.msrb.gmra.mxu0 %v19882_v51  ;;  %v13958_v37 = vor.u32 %v18471_v23, %v13955_v24  ;;  %v13906_v56 = vor.u32 %v18458_v42, %v13903_v44  ;;  %v5111_v59 = vadd.f32 %v19925_v62, %v5098_v52  ;;  %v5073_v60 = vpop.f32.mrf.mxu2  ;;  %v18062_v23 = vld [vmem:[#allocation10 + $0x110] sm:$0xf0]  ;;  %v12921_v24 = vld [vmem:[#allocation10 + $0x5c0] sm:$0xf] }
 0x24c   :  { %5452 = vmatpush.bf16.msra.mxu0 %v13806_v39  ;;  %v13597_v39 = vld [vmem:[#allocation10 + $0xb08] sm:$0xf]  ;;  %v12298_v36 = vor.u32 %v18062_v23, %v12297_v22  ;;  %v13026_v44 = vor.u32 %v18244_v28, %v13025_v27  ;;  %v18179_v22 = vld [vmem:[#allocation10 + $0x4b8] sm:$0xf0]  ;;  %v18530_v23 = vld [vmem:[#allocation10 + $0xfb0] sm:$0xf0] }
 0x24d   :  { %5377 = vmatpush.bf16.msrb.mxu2 %v14062_v0  ;;  %v13598_v48 = vor.u32 %v18387_v40, %v13597_v39  ;;  %v18445_v0 = vld [vmem:[#allocation10 + $0xd0c] sm:$0xf]  ;;  %v12559_v40 = vld [vmem:[#allocation10 + $0x31c] sm:$0xf0]  ;;  %v18082_v28 = vld [vmem:[#allocation10 + $0x1b4] sm:$0xf] }
 0x24e   :  { %5368 = vmatpush.bf16.msra.mxu1 %v13438_v63  ;;  %v12402_v63 = vor.u32 %v18088_v50, %v12401_v49  ;;  %v13854_v13 = vor.u32 %v18445_v0, %v13851_v2  ;;  %v18121_v39 = vld [vmem:[#allocation10 + $0x2ec] sm:$0xf]  ;;  %v12869_v49 = vld [vmem:[#allocation10 + $0x558] sm:$0xf]  ;;  %v12193_v2 = vld [vmem:[#allocation10 + $0x10] sm:$0xf] }
 0x24f   :  { %5440 = vmatpush.bf16.msra.mxu3 %v13338_v54  ;;  %v13129_v54 = vld [vmem:[#allocation10 + $0x760] sm:$0xf]  ;;  %v18205_v50 = vld [vmem:[#allocation10 + $0x588] sm:$0xf0]  ;;  %v12507_v0 = vld [vmem:[#allocation10 + $0x2b4] sm:$0xf0] }
 0x250   :  { %5453 = vmatpush.bf16.msra.mxu0 %v13754_v57  ;;  %v13545_v57 = vld [vmem:[#allocation10 + $0xaa0] sm:$0xf]  ;;  %v13130_v29 = vor.u32 %v18270_v55, %v13129_v54  ;;  %v5162_v62 = vpop.f32.mrf.mxu1  ;;  %v12870_v60 = vor.u32 %v18205_v50, %v12869_v49 }
 0x251   :  { %5369 = vmatmul.bf16.vlgmr.msra.gmra.mxu1 %v19872_v1  ;;  %5378 = vmatpush.bf16.msrb.mxu2 %v14010_v18  ;;  %v13546_v9 = vor.u32 %v18374_v58, %v13545_v57  ;;  %v19940_v18 = vadd.f32 %v5162_v62, %v5150_v7  ;;  %v15001_v57 = vld [vmem:[#allocation10 + $0x1600] sm:$0xf]  ;;  %v18738_v58 = vld [vmem:[#allocation10 + $0x1630] sm:$0xf0] }
 0x252   :  { %5413 = vmatpush.bf16.msrb.mxu1 %v12558_v4  ;;  %v18075_v4 = vld [vmem:[#allocation10 + $0x178] sm:$0xf0]  ;;  %v15002_v5 = vor.u32 %v18738_v58, %v15001_v57  ;;  %v14065_v57 = vld [vmem:[#allocation10 + $0xeb0] sm:$0xf]  ;;  %v18504_v58 = vld [vmem:[#allocation10 + $0xee0] sm:$0xf0] }
 0x253   :  { %5441 = vmatpush.bf16.msra.mxu3 %v13286_v8  ;;  %v19938_v8 = vpop.f32.mrf.mxu3  ;;  %v12350_v20 = vor.u32 %v18075_v4, %v12349_v3  ;;  %v5123_v34 = vpop.f32.mrf.mxu2  ;;  %v18036_v3 = vld [vmem:[#allocation10 + $0x40] sm:$0xf0] }
 0x254   :  { %5454 = vmatpush.bf16.msra.mxu0 %v13702_v11  ;;  %v18257_v11 = vld [vmem:[#allocation10 + $0x728] sm:$0xf0]  ;;  %v5124_v42 = vadd.f32 %v5123_v34, %v5111_v59  ;;  %v18192_v4 = vld [vmem:[#allocation10 + $0x520] sm:$0xf0]  ;;  %v12194_v62 = vor.u32 %v18036_v3, %v12193_v2  ;;  %v1329_v2 = vperm.slane %v19920_v38, 2 }
 0x255   :  { %5379 = vmatpush.bf16.msrb.mxu2 %v13958_v37  ;;  %v13078_v35 = vor.u32 %v18257_v11, %v13077_v10  ;;  %v12922_v37 = vor.u32 %v18218_v25, %v12921_v24  ;;  %v18725_v10 = vld [vmem:[#allocation10 + $0x15c8] sm:$0xf0]  ;;  %v14897_v25 = vld [vmem:[#allocation10 + $0x1530] sm:$0xf] }
 0x256   :  { %5414 = vmatpush.bf16.msrb.mxu1 %v12506_v33  ;;  %v5203_v33 = vpop.f32.mrf.mxu0  ;;  %v19944_v54 = vadd.f32 %v19922_v43, %v5124_v42  ;;  %v14221_v43 = vld [vmem:[#allocation10 + $0xfe8] sm:$0xf] }
 0x257   :  { %5442 = vmatpush.bf16.msra.mxu3 %v13234_v26  ;;  %v13494_v26 = vor.u32 %v18361_v17, %v13493_v15  ;;  %v18095_v15 = vld [vmem:[#allocation10 + $0x21c] sm:$0xf]  ;;  %v12455_v17 = vld [vmem:[#allocation10 + $0x24c] sm:$0xf0] }
 0x258   :  { %5455 = vmatpush.bf16.msra.mxu0 %v13650_v47  ;;  %v18348_v47 = vld [vmem:[#allocation10 + $0xa00] sm:$0xf0]  ;;  %v5164_v55 = vpop.f32.mrf.mxu1  ;;  %v12458_v24 = vor.u32 %v18095_v15, %v12455_v17  ;;  %v18673_v15 = vld [vmem:[#allocation10 + $0x1428] sm:$0xf0] }
 0x259   :  { %5380 = vmatpush.bf16.msrb.mxu2 %v13906_v56  ;;  %v13442_v53 = vor.u32 %v18348_v47, %v13441_v30  ;;  %v12562_v56 = vor.u32 %v18121_v39, %v12559_v40  ;;  %v12403_v30 = vld [vmem:[#allocation10 + $0x1e4] sm:$0xf0] }
 0x25a   :  { %5415 = vmatpush.bf16.msrb.mxu1 %v12454_v41  ;;  %v12245_v41 = vld [vmem:[#allocation10 + $0x78] sm:$0xf]  ;;  %v12406_v39 = vor.u32 %v18082_v28, %v12403_v30  ;;  %v14845_v40 = vld [vmem:[#allocation10 + $0x14c8] sm:$0xf]  ;;  %v18478_v28 = vld [vmem:[#allocation10 + $0xe10] sm:$0xf0] }
 0x25b   :  { %5443 = vmatpush.bf16.msra.mxu3 %v13182_v46  ;;  %v18049_v46 = vld [vmem:[#allocation10 + $0xa8] sm:$0xf0]  ;;  %v5190_v52 = vpop.f32.mrf.mxu3  ;;  %v5125_v11 = vpop.f32.mrf.mxu2  ;;  %v14585_v30 = vld [vmem:[#allocation10 + $0x12c0] sm:$0xf] }
 0x25c   :  { %5456 = vmatpush.bf16.msra.mxu0 %v13598_v48  ;;  %v15054_v48 = vor.u32 %v18751_v32, %v15053_v31  ;;  %v12246_v59 = vor.u32 %v18049_v46, %v12245_v41  ;;  %v12713_v31 = vld [vmem:[#allocation10 + $0x420] sm:$0xf]  ;;  %v18166_v32 = vld [vmem:[#allocation10 + $0x450] sm:$0xf0]  ;;  %v18699_v41 = vld [vmem:[#allocation10 + $0x14f8] sm:$0xf0] }
 0x25d   :  { %5381 = vmatpush.bf16.msrb.mxu2 %v13854_v13  ;;  %v12714_v42 = vor.u32 %v18166_v32, %v12713_v31  ;;  %v12351_v46 = vld [vmem:[#allocation10 + $0x17c] sm:$0xf0]  ;;  %v12661_v52 = vld [vmem:[#allocation10 + $0x3b8] sm:$0xf]  ;;  %v14637_v11 = vld [vmem:[#allocation10 + $0x1328] sm:$0xf] }
 0x25e   :  { %5416 = vmatpush.bf16.msrb.mxu1 %v12402_v63  ;;  %v18108_v63 = vld [vmem:[#allocation10 + $0x284] sm:$0xf]  ;;  %v14689_v32 = vld [vmem:[#allocation10 + $0x1390] sm:$0xf] }
 0x25f   :  { %5444 = vmatpush.bf16.msra.mxu3 %v13130_v29  ;;  %v12817_v29 = vld [vmem:[#allocation10 + $0x4f0] sm:$0xf]  ;;  %v12510_v7 = vor.u32 %v18108_v63, %v12507_v0  ;;  %v18686_v63 = vld [vmem:[#allocation10 + $0x1490] sm:$0xf0] }
 0x260   :  { %5457 = vmatpush.bf16.msra.mxu0 %v13546_v9  ;;  %5382 = vmatmul.bf16.vlgmr.msrb.gmra.mxu2 %v19888_v16  ;;  %v14949_v9 = vld [vmem:[#allocation10 + $0x1598] sm:$0xf]  ;;  %v12818_v13 = vor.u32 %v18192_v4, %v12817_v29  ;;  %v18056_v29 = vld [vmem:[#allocation10 + $0xe4] sm:$0xf] }
 0x261   :  { %5426 = vmatpush.bf16.msra.mxu2 %v12974_v21  ;;  %v12765_v21 = vld [vmem:[#allocation10 + $0x488] sm:$0xf]  ;;  %v14950_v33 = vor.u32 %v18725_v10, %v14949_v9  ;;  %v12299_v4 = vld [vmem:[#allocation10 + $0x114] sm:$0xf0]  ;;  %v18491_v10 = vld [vmem:[#allocation10 + $0xe78] sm:$0xf0] }
 0x262   :  { %5417 = vmatpush.bf16.msrb.mxu1 %v12350_v20  ;;  %v14222_v20 = vor.u32 %v18543_v6, %v14221_v43  ;;  %v12766_v27 = vor.u32 %v18179_v22, %v12765_v21  ;;  %v18140_v43 = vld [vmem:[#allocation10 + $0x380] sm:$0xf0]  ;;  %v14013_v6 = vld [vmem:[#allocation10 + $0xe48] sm:$0xf]  ;;  %v18043_v21 = vld [vmem:[#allocation10 + $0x7c] sm:$0xf] }
 0x263   :  { %5445 = vmatpush.bf16.msra.mxu3 %v13078_v35  ;;  %v14169_v35 = vld [vmem:[#allocation10 + $0xf80] sm:$0xf]  ;;  %v5175_v49 = vpop.f32.mrf.mxu2  ;;  %v12247_v22 = vld [vmem:[#allocation10 + $0xac] sm:$0xf0] }
 0x264   :  { %5458 = vmatpush.bf16.msra.mxu0 %v13494_v26  ;;  %v18712_v26 = vld [vmem:[#allocation10 + $0x1560] sm:$0xf0]  ;;  %v14170_v47 = vor.u32 %v18530_v23, %v14169_v35  ;;  %v12250_v31 = vor.u32 %v18043_v21, %v12247_v22  ;;  %v14429_v21 = vld [vmem:[#allocation10 + $0x1188] sm:$0xf]  ;;  %v18595_v22 = vld [vmem:[#allocation10 + $0x11b8] sm:$0xf0] }
 0x265   :  { %5427 = vmatpush.bf16.msra.mxu2 %v12922_v37  ;;  %v14898_v34 = vor.u32 %v18712_v26, %v14897_v25  ;;  %v18517_v37 = vld [vmem:[#allocation10 + $0xf48] sm:$0xf0]  ;;  %v13961_v25 = vld [vmem:[#allocation10 + $0xde0] sm:$0xf] }
 0x266   :  { %5418 = vmatpush.bf16.msrb.mxu1 %v12298_v36  ;;  %v14117_v36 = vld [vmem:[#allocation10 + $0xf18] sm:$0xf] }
 0x267   :  { %5446 = vmatpush.bf16.msra.mxu3 %v13026_v44  ;;  %v18069_v44 = vld [vmem:[#allocation10 + $0x14c] sm:$0xf]  ;;  %v14118_v50 = vor.u32 %v18517_v37, %v14117_v36  ;;  %v18030_v36 = vld [vmem:[#allocation10 + $0x14] sm:$0xf] }
 0x268   :  { %5459 = vmatpush.bf16.msra.mxu0 %v13442_v53  ;;  %v18153_v53 = vld [vmem:[#allocation10 + $0x3e8] sm:$0xf0]  ;;  %v5253_v55 = vpop.f32.mrf.mxu0 }
 0x269   :  { %5428 = vmatpush.bf16.msra.mxu2 %v12870_v60  ;;  %v14793_v60 = vld [vmem:[#allocation10 + $0x1460] sm:$0xf]  ;;  %v12662_v3 = vor.u32 %v18153_v53, %v12661_v52  ;;  %v18465_v53 = vld [vmem:[#allocation10 + $0xda8] sm:$0xf0] }
 0x26a   :  { %5419 = vmatpush.bf16.msrb.mxu1 %v12246_v59  ;;  %5447 = vmatmul.bf16.vlgmr.msra.gmra.mxu3 %v19870_v61  ;;  %v12354_v59 = vor.u32 %v18069_v44, %v12351_v46  ;;  %v14794_v9 = vor.u32 %v18686_v63, %v14793_v60  ;;  %v18537_v46 = vld [vmem:[#allocation10 + $0xfec] sm:$0xf]  ;;  %v18420_v63 = vld [vmem:[#allocation10 + $0xc44] sm:$0xf] }
 0x26b   :  { %5491 = vmatpush.bf16.msrb.mxu3 %v15054_v48  ;;  %5460 = vmatmul.bf16.vlgmr.msra.gmra.mxu0 %v19872_v1  ;;  %v5176_v48 = vadd.f32 %v5175_v49, %v19940_v18  ;;  %v12609_v18 = vld [vmem:[#allocation10 + $0x350] sm:$0xf]  ;;  %v5177_v23 = vpop.f32.mrf.mxu2  ;;  %v14223_v49 = vld [vmem:[#allocation10 + $0x101c] sm:$0xf0] }
 0x26c   :  { %5504 = vmatpush.bf16.msrb.mxu0 %v12562_v56  ;;  %v14846_v56 = vor.u32 %v18699_v41, %v14845_v40  ;;  %v18433_v40 = vld [vmem:[#allocation10 + $0xcac] sm:$0xf]  ;;  %v13807_v41 = vld [vmem:[#allocation10 + $0xcdc] sm:$0xf0]  ;;  %v14226_v60 = vor.u32 %v18537_v46, %v14223_v49  ;;  %v18212_v23 = vld [vmem:[#allocation10 + $0x5c4] sm:$0xf] }
 0x26d   :  { %5429 = vmatpush.bf16.msra.mxu2 %v12818_v13  ;;  %v5189_v0 = vadd.f32 %v19938_v8, %v5176_v48  ;;  %v12302_v8 = vor.u32 %v18056_v29, %v12299_v4  ;;  %v14741_v13 = vld [vmem:[#allocation10 + $0x13f8] sm:$0xf]  ;;  %v5240_v17 = vpop.f32.mrf.mxu3  ;;  %v18524_v29 = vld [vmem:[#allocation10 + $0xf84] sm:$0xf]  ;;  %v18485_v46 = vld [vmem:[#allocation10 + $0xe4c] sm:$0xf] }
 0x26e   :  { %5420 = vmatpush.bf16.msrb.mxu1 %v12194_v62  ;;  %v18647_v62 = vld [vmem:[#allocation10 + $0x1358] sm:$0xf0]  ;;  %v5214_v38 = vpop.f32.mrf.mxu1  ;;  %v5241_v35 = vadd.f32 %v5240_v17, %v1329_v2  ;;  %v14533_v48 = vld [vmem:[#allocation10 + $0x1258] sm:$0xf]  ;;  %v14119_v17 = vld [vmem:[#allocation10 + $0xf4c] sm:$0xf0] }
 0x26f   :  { %5492 = vmatpush.bf16.msrb.mxu3 %v15002_v5  ;;  %v14066_v5 = vor.u32 %v18504_v58, %v14065_v57  ;;  %v13810_v57 = vor.u32 %v18433_v40, %v13807_v41  ;;  %v14171_v4 = vld [vmem:[#allocation10 + $0xfb4] sm:$0xf0]  ;;  %v18381_v41 = vld [vmem:[#allocation10 + $0xb0c] sm:$0xf]  ;;  %v14015_v49 = vld [vmem:[#allocation10 + $0xe7c] sm:$0xf0] }
 0x270   :  { %5505 = vmatpush.bf16.msrb.mxu0 %v12510_v7  ;;  %v5202_v7 = vadd.f32 %v19932_v45, %v5189_v0  ;;  %v14014_v45 = vor.u32 %v18491_v10, %v14013_v6  ;;  %v5255_v26 = vpop.f32.mrf.mxu0  ;;  %v19955_v37 = vadd.f32 %v5253_v55, %v5241_v35  ;;  %v13755_v0 = vld [vmem:[#allocation10 + $0xc74] sm:$0xf0]  ;;  %v18608_v6 = vld [vmem:[#allocation10 + $0x1220] sm:$0xf0]  ;;  %v12975_v10 = vld [vmem:[#allocation10 + $0x65c] sm:$0xf0] }
 0x271   :  { %5421 = vmatmul.bf16.vlgmr.msrb.gmra.mxu1 %v19876_v19  ;;  %5430 = vmatpush.bf16.msra.mxu2 %v12766_v27  ;;  %v14742_v27 = vor.u32 %v18673_v15, %v14741_v13  ;;  %v13651_v26 = vld [vmem:[#allocation10 + $0xba4] sm:$0xf0] }
 0x272   :  { %5465 = vmatpush.bf16.msra.mxu1 %v14222_v20  ;;  %v12610_v20 = vor.u32 %v18140_v43, %v12609_v18  ;;  %v18452_v18 = vld [vmem:[#allocation10 + $0xd40] sm:$0xf0]  ;;  %v14481_v43 = vld [vmem:[#allocation10 + $0x11f0] sm:$0xf] }
 0x273   :  { %5493 = vmatpush.bf16.msrb.mxu3 %v14950_v33  ;;  %v19953_v33 = vadd.f32 %v5214_v38, %v5202_v7  ;;  %v13758_v7 = vor.u32 %v18420_v63, %v13755_v0  ;;  %v14482_v15 = vor.u32 %v18608_v6, %v14481_v43  ;;  %v18511_v38 = vld [vmem:[#allocation10 + $0xf1c] sm:$0xf]  ;;  %v18368_v63 = vld [vmem:[#allocation10 + $0xaa4] sm:$0xf]  ;;  %v13547_v0 = vld [vmem:[#allocation10 + $0xad4] sm:$0xf0] }
 0x274   :  { %5506 = vmatpush.bf16.msrb.mxu0 %v12458_v24  ;;  %v14638_v24 = vor.u32 %v18647_v62, %v14637_v11  ;;  %v14174_v11 = vor.u32 %v18524_v29, %v14171_v4  ;;  %v18407_v62 = vld [vmem:[#allocation10 + $0xbdc] sm:$0xf]  ;;  %v13963_v29 = vld [vmem:[#allocation10 + $0xe14] sm:$0xf0]  ;;  %v13550_v43 = vor.u32 %v18368_v63, %v13547_v0  ;;  %v12767_v6 = vld [vmem:[#allocation10 + $0x4bc] sm:$0xf0] }
 0x275   :  { %5431 = vmatpush.bf16.msra.mxu2 %v12714_v42  ;;  %v13962_v42 = vor.u32 %v18478_v28, %v13961_v25  ;;  %v18394_v25 = vld [vmem:[#allocation10 + $0xb74] sm:$0xf] }
 0x276   :  { %5466 = vmatpush.bf16.msra.mxu1 %v14170_v47  ;;  %v18634_v47 = vld [vmem:[#allocation10 + $0x12f0] sm:$0xf0]  ;;  %v5216_v58 = vpop.f32.mrf.mxu1 }
 0x277   :  { %5494 = vmatpush.bf16.msrb.mxu3 %v14898_v34  ;;  %v18660_v34 = vld [vmem:[#allocation10 + $0x13c0] sm:$0xf0]  ;;  %v14586_v44 = vor.u32 %v18634_v47, %v14585_v30  ;;  %v18498_v28 = vld [vmem:[#allocation10 + $0xeb4] sm:$0xf]  ;;  %v14067_v30 = vld [vmem:[#allocation10 + $0xee4] sm:$0xf0] }
 0x278   :  { %5507 = vmatpush.bf16.msrb.mxu0 %v12406_v39  ;;  %v12195_v39 = vld [vmem:[#allocation10 + $0x44] sm:$0xf0]  ;;  %v14690_v52 = vor.u32 %v18660_v34, %v14689_v32  ;;  %v18582_v32 = vld [vmem:[#allocation10 + $0x1150] sm:$0xf0]  ;;  %v13654_v34 = vor.u32 %v18394_v25, %v13651_v26  ;;  %v14070_v40 = vor.u32 %v18498_v28, %v14067_v30  ;;  %v12715_v25 = vld [vmem:[#allocation10 + $0x454] sm:$0xf0] }
 0x279   :  { %5432 = vmatpush.bf16.msra.mxu2 %v12662_v3  ;;  %v12198_v55 = vor.u32 %v18030_v36, %v12195_v39  ;;  %v18199_v36 = vld [vmem:[#allocation10 + $0x55c] sm:$0xf]  ;;  %v12871_v39 = vld [vmem:[#allocation10 + $0x58c] sm:$0xf0]  ;;  %v18186_v58 = vld [vmem:[#allocation10 + $0x4f4] sm:$0xf] }
 0x27a   :  { %5467 = vmatpush.bf16.msra.mxu1 %v14118_v50  ;;  %v13909_v50 = vld [vmem:[#allocation10 + $0xd78] sm:$0xf]  ;;  %v18316_v26 = vld [vmem:[#allocation10 + $0x904] sm:$0xf]  ;;  %v18342_v30 = vld [vmem:[#allocation10 + $0x9d4] sm:$0xf] }
 0x27b   :  { %5495 = vmatpush.bf16.msrb.mxu3 %v14846_v56  ;;  %v18621_v56 = vld [vmem:[#allocation10 + $0x1288] sm:$0xf0]  ;;  %v13910_v2 = vor.u32 %v18465_v53, %v13909_v50  ;;  %v14325_v53 = vld [vmem:[#allocation10 + $0x10b8] sm:$0xf] }
 0x27c   :  { %5508 = vmatpush.bf16.msrb.mxu0 %v12354_v59  ;;  %v5242_v59 = vpop.f32.mrf.mxu3  ;;  %v14534_v3 = vor.u32 %v18621_v56, %v14533_v48  ;;  %v18569_v48 = vld [vmem:[#allocation10 + $0x10e8] sm:$0xf0] }
 0x27d   :  { %5433 = vmatpush.bf16.msra.mxu2 %v12610_v20  ;;  %v12819_v59 = vld [vmem:[#allocation10 + $0x524] sm:$0xf0] }
 0x27e   :  { %5468 = vmatpush.bf16.msra.mxu1 %v14066_v5  ;;  %v13857_v5 = vld [vmem:[#allocation10 + $0xd10] sm:$0xf]  ;;  %v12822_v4 = vor.u32 %v18186_v58, %v12819_v59  ;;  %v12513_v59 = vld [vmem:[#allocation10 + $0x288] sm:$0xf] }
 0x27f   :  { %5496 = vmatpush.bf16.msrb.mxu3 %v14794_v9  ;;  %v18225_v9 = vld [vmem:[#allocation10 + $0x62c] sm:$0xf]  ;;  %v13858_v13 = vor.u32 %v18452_v18, %v13857_v5  ;;  %v14273_v5 = vld [vmem:[#allocation10 + $0x1050] sm:$0xf]  ;;  %v18556_v18 = vld [vmem:[#allocation10 + $0x1080] sm:$0xf0] }
 0x280   :  { %5509 = vmatpush.bf16.msrb.mxu0 %v12302_v8  ;;  %5434 = vmatmul.bf16.vlgmr.msra.gmra.mxu2 %v19886_v12  ;;  %v13703_v8 = vld [vmem:[#allocation10 + $0xc0c] sm:$0xf0]  ;;  %v12978_v20 = vor.u32 %v18225_v9, %v12975_v10  ;;  %v13391_v9 = vld [vmem:[#allocation10 + $0x99c] sm:$0xf0] }
 0x281   :  { %5478 = vmatpush.bf16.msrb.mxu2 %v14638_v24  ;;  %v13706_v35 = vor.u32 %v18407_v62, %v13703_v8  ;;  %v14122_v24 = vor.u32 %v18511_v38, %v14119_v17  ;;  %v13495_v62 = vld [vmem:[#allocation10 + $0xa6c] sm:$0xf0]  ;;  %v18459_v38 = vld [vmem:[#allocation10 + $0xd7c] sm:$0xf] }
 0x282   :  { %5469 = vmatpush.bf16.msra.mxu1 %v14014_v45  ;;  %v12923_v45 = vld [vmem:[#allocation10 + $0x5f4] sm:$0xf0]  ;;  %v13911_v17 = vld [vmem:[#allocation10 + $0xdac] sm:$0xf0] }
 0x283   :  { %5497 = vmatpush.bf16.msrb.mxu3 %v14742_v27  ;;  %v14430_v27 = vor.u32 %v18595_v22, %v14429_v21  ;;  %v12926_v47 = vor.u32 %v18212_v23, %v12923_v45  ;;  %v5227_v50 = vpop.f32.mrf.mxu2  ;;  %v18160_v23 = vld [vmem:[#allocation10 + $0x424] sm:$0xf]  ;;  %v13914_v28 = vor.u32 %v18459_v38, %v13911_v17  ;;  %v18277_v17 = vld [vmem:[#allocation10 + $0x7cc] sm:$0xf] }
 0x284   :  { %5510 = vmatpush.bf16.msrb.mxu0 %v12250_v31  ;;  %v14377_v31 = vld [vmem:[#allocation10 + $0x1120] sm:$0xf]  ;;  %v19962_v56 = vadd.f32 %v5227_v50, %v19953_v33  ;;  %v18173_v33 = vld [vmem:[#allocation10 + $0x48c] sm:$0xf]  ;;  %v13287_v50 = vld [vmem:[#allocation10 + $0x8cc] sm:$0xf0] }
 0x285   :  { %5479 = vmatpush.bf16.msrb.mxu2 %v14586_v44  ;;  %v14378_v44 = vor.u32 %v18582_v32, %v14377_v31  ;;  %v12770_v22 = vor.u32 %v18173_v33, %v12767_v6  ;;  %v18446_v31 = vld [vmem:[#allocation10 + $0xd14] sm:$0xf]  ;;  %v13859_v32 = vld [vmem:[#allocation10 + $0xd44] sm:$0xf0]  ;;  %v14639_v6 = vld [vmem:[#allocation10 + $0x135c] sm:$0xf0] }
 0x286   :  { %5470 = vmatpush.bf16.msra.mxu1 %v13962_v42  ;;  %v13599_v42 = vld [vmem:[#allocation10 + $0xb3c] sm:$0xf0] }
 0x287   :  { %5498 = vmatpush.bf16.msrb.mxu3 %v14690_v52  ;;  %v12874_v52 = vor.u32 %v18199_v36, %v12871_v39  ;;  %v12718_v36 = vor.u32 %v18160_v23, %v12715_v25  ;;  %v14587_v23 = vld [vmem:[#allocation10 + $0x12f4] sm:$0xf0]  ;;  %v18089_v25 = vld [vmem:[#allocation10 + $0x1e8] sm:$0xf0] }
 0x288   :  { %5511 = vmatpush.bf16.msrb.mxu0 %v12198_v55  ;;  %v19964_v55 = vpop.f32.mrf.mxu0 }
 0x289   :  { %5480 = vmatpush.bf16.msrb.mxu2 %v14534_v3  ;;  %v18472_v3 = vld [vmem:[#allocation10 + $0xde4] sm:$0xf] }
 0x28a   :  { %5471 = vmatpush.bf16.msra.mxu1 %v13910_v2  ;;  %5499 = vmatmul.bf16.vlgmr.msrb.gmra.mxu3 %v19882_v51  ;;  %v14326_v2 = vor.u32 %v18569_v48, %v14325_v53  ;;  %v13966_v10 = vor.u32 %v18472_v3, %v13963_v29  ;;  %v18219_v3 = vld [vmem:[#allocation10 + $0x5f8] sm:$0xf0]  ;;  %v18134_v29 = vld [vmem:[#allocation10 + $0x354] sm:$0xf] }
 0x28b   :  { %5543 = vmatpush.bf16.msra.mxu3 %v13810_v57  ;;  %5512 = vmatmul.bf16.vlgmr.msrb.gmra.mxu0 %v19876_v19  ;;  %v13602_v57 = vor.u32 %v18381_v41, %v13599_v42  ;;  %v5229_v21 = vpop.f32.mrf.mxu2  ;;  %v18232_v41 = vld [vmem:[#allocation10 + $0x660] sm:$0xf0]  ;;  %v18147_v42 = vld [vmem:[#allocation10 + $0x3bc] sm:$0xf] }
 0x28c   :  { %5556 = vmatpush.bf16.msra.mxu0 %v14226_v60  ;;  %v14018_v60 = vor.u32 %v18485_v46, %v14015_v49  ;;  %v12663_v46 = vld [vmem:[#allocation10 + $0x3ec] sm:$0xf0]  ;;  %v18303_v49 = vld [vmem:[#allocation10 + $0x89c] sm:$0xf]  ;;  %v13183_v21 = vld [vmem:[#allocation10 + $0x7fc] sm:$0xf0] }
 0x28d   :  { %5481 = vmatpush.bf16.msrb.mxu2 %v14482_v15  ;;  %v14274_v15 = vor.u32 %v18556_v18, %v14273_v5  ;;  %v12666_v63 = vor.u32 %v18147_v42, %v12663_v46  ;;  %v13290_v0 = vor.u32 %v18303_v49, %v13287_v50  ;;  %v18290_v5 = vld [vmem:[#allocation10 + $0x834] sm:$0xf]  ;;  %v13235_v18 = vld [vmem:[#allocation10 + $0x864] sm:$0xf0]  ;;  %v12773_v42 = vld [vmem:[#allocation10 + $0x490] sm:$0xf] }
 0x28e   :  { %5472 = vmatpush.bf16.msra.mxu1 %v13858_v13  ;;  %v5266_v8 = vpop.f32.mrf.mxu1  ;;  %v19966_v13 = vpop.f32.mrf.mxu3  ;;  %v18251_v50 = vld [vmem:[#allocation10 + $0x6fc] sm:$0xf] }
 0x28f   :  { %5544 = vmatpush.bf16.msra.mxu3 %v13758_v7  ;;  %v18329_v7 = vld [vmem:[#allocation10 + $0x96c] sm:$0xf] }
 0x290   :  { %5557 = vmatpush.bf16.msra.mxu0 %v14174_v11  ;;  %v18355_v11 = vld [vmem:[#allocation10 + $0xa3c] sm:$0xf]  ;;  %v5307_v45 = vpop.f32.mrf.mxu0 }
 0x291   :  { %5473 = vmatmul.bf16.vlgmr.msra.gmra.mxu1 %v19888_v16  ;;  %5482 = vmatpush.bf16.msrb.mxu2 %v14430_v27  ;;  %v13339_v27 = vld [vmem:[#allocation10 + $0x934] sm:$0xf0] }
 0x292   :  { %5517 = vmatpush.bf16.msrb.mxu1 %v12978_v20  ;;  %v19969_v20 = vadd.f32 %v5266_v8, %v19955_v37  ;;  %v12565_v37 = vld [vmem:[#allocation10 + $0x2f0] sm:$0xf]  ;;  %v13342_v39 = vor.u32 %v18316_v26, %v13339_v27  ;;  %v12877_v8 = vld [vmem:[#allocation10 + $0x560] sm:$0xf]  ;;  %v13186_v26 = vor.u32 %v18277_v17, %v13183_v21  ;;  %v12825_v27 = vld [vmem:[#allocation10 + $0x4f8] sm:$0xf] }
 0x293   :  { %5545 = vmatpush.bf16.msra.mxu3 %v13706_v35  ;;  %v13394_v35 = vor.u32 %v18329_v7, %v13391_v9  ;;  %v12461_v9 = vld [vmem:[#allocation10 + $0x220] sm:$0xf]  ;;  %v18154_v21 = vld [vmem:[#allocation10 + $0x3f0] sm:$0xf0] }
 0x294   :  { %5558 = vmatpush.bf16.msra.mxu0 %v14122_v24  ;;  %v13498_v24 = vor.u32 %v18355_v11, %v13495_v62  ;;  %v13238_v62 = vor.u32 %v18290_v5, %v13235_v18  ;;  %v18238_v18 = vld [vmem:[#allocation10 + $0x694] sm:$0xf]  ;;  %v12669_v17 = vld [vmem:[#allocation10 + $0x3c0] sm:$0xf] }
 0x295   :  { %5483 = vmatpush.bf16.msrb.mxu2 %v14378_v44 }
 0x296   :  { %5518 = vmatpush.bf16.msrb.mxu1 %v12926_v47  ;;  %v13443_v47 = vld [vmem:[#allocation10 + $0xa04] sm:$0xf0]  ;;  %v5268_v48 = vpop.f32.mrf.mxu1 }
 0x297   :  { %5546 = vmatpush.bf16.msra.mxu3 %v13654_v34  ;;  %v18128_v34 = vld [vmem:[#allocation10 + $0x320] sm:$0xf0]  ;;  %v13446_v44 = vor.u32 %v18342_v30, %v13443_v47 }
 0x298   :  { %5559 = vmatpush.bf16.msra.mxu0 %v14070_v40  ;;  %v12981_v40 = vld [vmem:[#allocation10 + $0x630] sm:$0xf]  ;;  %v12566_v53 = vor.u32 %v18128_v34, %v12565_v37  ;;  %v18264_v47 = vld [vmem:[#allocation10 + $0x764] sm:$0xf]  ;;  %v18615_v37 = vld [vmem:[#allocation10 + $0x125c] sm:$0xf] }
 0x299   :  { %5484 = vmatpush.bf16.msrb.mxu2 %v14326_v2  ;;  %v12982_v58 = vor.u32 %v18232_v41, %v12981_v40  ;;  %v12929_v2 = vld [vmem:[#allocation10 + $0x5c8] sm:$0xf]  ;;  %v14535_v34 = vld [vmem:[#allocation10 + $0x128c] sm:$0xf0]  ;;  %v18076_v40 = vld [vmem:[#allocation10 + $0x180] sm:$0xf0] }
 0x29a   :  { %5519 = vmatpush.bf16.msrb.mxu1 %v12874_v52  ;;  %v13862_v52 = vor.u32 %v18446_v31, %v13859_v32  ;;  %v12930_v7 = vor.u32 %v18219_v3, %v12929_v2  ;;  %v13131_v31 = vld [vmem:[#allocation10 + $0x794] sm:$0xf0]  ;;  %v14538_v49 = vor.u32 %v18615_v37, %v14535_v34  ;;  %v18141_v37 = vld [vmem:[#allocation10 + $0x388] sm:$0xf0]  ;;  %v14229_v34 = vld [vmem:[#allocation10 + $0xff0] sm:$0xf] }
 0x29b   :  { %5547 = vmatpush.bf16.msra.mxu3 %v13602_v57  ;;  %v5294_v57 = vpop.f32.mrf.mxu3  ;;  %v13134_v41 = vor.u32 %v18264_v47, %v13131_v31  ;;  %v12201_v47 = vld [vmem:[#allocation10 + $0x18] sm:$0xf]  ;;  %v18037_v31 = vld [vmem:[#allocation10 + $0x48] sm:$0xf0] }
 0x29c   :  { %5560 = vmatpush.bf16.msra.mxu0 %v14018_v60  ;;  %v18115_v60 = vld [vmem:[#allocation10 + $0x2b8] sm:$0xf0] }
 0x29d   :  { %5485 = vmatpush.bf16.msrb.mxu2 %v14274_v15  ;;  %v12514_v33 = vor.u32 %v18115_v60, %v12513_v59  ;;  %v18206_v15 = vld [vmem:[#allocation10 + $0x590] sm:$0xf0]  ;;  %v14483_v59 = vld [vmem:[#allocation10 + $0x1224] sm:$0xf0] }
 0x29e   :  { %5520 = vmatpush.bf16.msrb.mxu1 %v12822_v4  ;;  %v12611_v4 = vld [vmem:[#allocation10 + $0x384] sm:$0xf0]  ;;  %v12878_v45 = vor.u32 %v18206_v15, %v12877_v8 }
 0x29f   :  { %5548 = vmatpush.bf16.msra.mxu3 %v13550_v43  ;;  %v18641_v43 = vld [vmem:[#allocation10 + $0x132c] sm:$0xf]  ;;  %v12614_v11 = vor.u32 %v18134_v29, %v12611_v4  ;;  %v12721_v29 = vld [vmem:[#allocation10 + $0x428] sm:$0xf]  ;;  %v18167_v4 = vld [vmem:[#allocation10 + $0x458] sm:$0xf0] }
 0x2a0   :  { %5561 = vmatpush.bf16.msra.mxu0 %v13966_v10  ;;  %5486 = vmatmul.bf16.vlgmr.msrb.gmra.mxu2 %v19895_v14  ;;  %v18102_v10 = vld [vmem:[#allocation10 + $0x250] sm:$0xf0]  ;;  %v14642_v38 = vor.u32 %v18641_v43, %v14639_v6 }
 0x2a1   :  { %5530 = vmatpush.bf16.msra.mxu2 %v13394_v35  ;;  %v18628_v35 = vld [vmem:[#allocation10 + $0x12c4] sm:$0xf] }
 0x2a2   :  { %5521 = vmatpush.bf16.msrb.mxu1 %v12770_v22  ;;  %v12462_v22 = vor.u32 %v18102_v10, %v12461_v9  ;;  %v14590_v30 = vor.u32 %v18628_v35, %v14587_v23  ;;  %v18745_v9 = vld [vmem:[#allocation10 + $0x166c] sm:$0xf]  ;;  %v15055_v10 = vld [vmem:[#allocation10 + $0x169c] sm:$0xf0] }
 0x2a3   :  { %5549 = vmatpush.bf16.msra.mxu3 %v13498_v24  ;;  %v12409_v24 = vld [vmem:[#allocation10 + $0x1b8] sm:$0xf]  ;;  %v5279_v46 = vpop.f32.mrf.mxu2  ;;  %v15058_v23 = vor.u32 %v18745_v9, %v15055_v10  ;;  %v14125_v10 = vld [vmem:[#allocation10 + $0xf20] sm:$0xf] }
 0x2a4   :  { %5562 = vmatpush.bf16.msra.mxu0 %v13914_v28  ;;  %v18193_v28 = vld [vmem:[#allocation10 + $0x528] sm:$0xf0]  ;;  %v12410_v32 = vor.u32 %v18089_v25, %v12409_v24 }
 0x2a5   :  { %5531 = vmatpush.bf16.msra.mxu2 %v13342_v39  ;;  %v12357_v39 = vld [vmem:[#allocation10 + $0x150] sm:$0xf] }
 0x2a6   :  { %5522 = vmatpush.bf16.msrb.mxu1 %v12718_v36  ;;  %v12826_v36 = vor.u32 %v18193_v28, %v12825_v27  ;;  %v12358_v57 = vor.u32 %v18076_v40, %v12357_v39  ;;  %v18732_v27 = vld [vmem:[#allocation10 + $0x1604] sm:$0xf]  ;;  %v15003_v28 = vld [vmem:[#allocation10 + $0x1634] sm:$0xf0] }
 0x2a7   :  { %5550 = vmatpush.bf16.msra.mxu3 %v13446_v44  ;;  %v18180_v44 = vld [vmem:[#allocation10 + $0x4c0] sm:$0xf0]  ;;  %v15006_v40 = vor.u32 %v18732_v27, %v15003_v28  ;;  %v14489_v28 = vld [vmem:[#allocation10 + $0x11f8] sm:$0xf] }
 0x2a8   :  { %5563 = vmatpush.bf16.msra.mxu0 %v13862_v52  ;;  %v13079_v52 = vld [vmem:[#allocation10 + $0x72c] sm:$0xf0]  ;;  %v19976_v48 = vpop.f32.mrf.mxu0  ;;  %v12774_v60 = vor.u32 %v18180_v44, %v12773_v42  ;;  %v18648_v42 = vld [vmem:[#allocation10 + $0x1360] sm:$0xf0]  ;;  %v18563_v44 = vld [vmem:[#allocation10 + $0x10bc] sm:$0xf] }
 0x2a9   :  { %5532 = vmatpush.bf16.msra.mxu2 %v13290_v0  ;;  %v18063_v0 = vld [vmem:[#allocation10 + $0x118] sm:$0xf0]  ;;  %v13082_v3 = vor.u32 %v18251_v50, %v13079_v52  ;;  %v14951_v52 = vld [vmem:[#allocation10 + $0x15cc] sm:$0xf0] }
 0x2aa   :  { %5523 = vmatpush.bf16.msrb.mxu1 %v12666_v63  ;;  %5551 = vmatmul.bf16.vlgmr.msra.gmra.mxu3 %v19872_v1  ;;  %v12305_v63 = vld [vmem:[#allocation10 + $0xe8] sm:$0xf]  ;;  %v18719_v50 = vld [vmem:[#allocation10 + $0x159c] sm:$0xf] }
 0x2ab   :  { %5595 = vmatpush.bf16.msrb.mxu3 %v12566_v53  ;;  %5564 = vmatmul.bf16.vlgmr.msra.gmra.mxu0 %v19888_v16  ;;  %v5280_v53 = vadd.f32 %v5279_v46, %v19969_v20  ;;  %v13027_v20 = vld [vmem:[#allocation10 + $0x6c4] sm:$0xf0]  ;;  %v12306_v6 = vor.u32 %v18063_v0, %v12305_v63  ;;  %v5281_v35 = vpop.f32.mrf.mxu2  ;;  %v12202_v46 = vor.u32 %v18037_v31, %v12201_v47  ;;  %v18531_v0 = vld [vmem:[#allocation10 + $0xfb8] sm:$0xf0]  ;;  %v18680_v31 = vld [vmem:[#allocation10 + $0x1464] sm:$0xf] }
 0x2ac   :  { %5608 = vmatpush.bf16.msrb.mxu0 %v12982_v58  ;;  %v18602_v58 = vld [vmem:[#allocation10 + $0x11f4] sm:$0xf]  ;;  %v14177_v63 = vld [vmem:[#allocation10 + $0xf88] sm:$0xf]  ;;  %v14847_v35 = vld [vmem:[#allocation10 + $0x14fc] sm:$0xf0] }
 0x2ad   :  { %5533 = vmatpush.bf16.msra.mxu2 %v13238_v62  ;;  %v5293_v2 = vadd.f32 %v19966_v13, %v5280_v53  ;;  %v14486_v5 = vor.u32 %v18602_v58, %v14483_v59  ;;  %v12253_v62 = vld [vmem:[#allocation10 + $0x80] sm:$0xf]  ;;  %v18050_v13 = vld [vmem:[#allocation10 + $0xb0] sm:$0xf0]  ;;  %v19980_v15 = vpop.f32.mrf.mxu3 }
 0x2ae   :  { %5524 = vmatpush.bf16.msrb.mxu1 %v12614_v11  ;;  %v12722_v11 = vor.u32 %v18167_v4, %v12721_v29  ;;  %v5318_v8 = vpop.f32.mrf.mxu1  ;;  %v12254_v25 = vor.u32 %v18050_v13, %v12253_v62  ;;  %v14593_v29 = vld [vmem:[#allocation10 + $0x12c8] sm:$0xf]  ;;  %v18635_v4 = vld [vmem:[#allocation10 + $0x12f8] sm:$0xf0] }
 0x2af   :  { %5596 = vmatpush.bf16.msrb.mxu3 %v12514_v33  ;;  %v18589_v33 = vld [vmem:[#allocation10 + $0x118c] sm:$0xf]  ;;  %v5306_v43 = vadd.f32 %v19964_v55, %v5293_v2  ;;  %v14594_v9 = vor.u32 %v18635_v4, %v14593_v29  ;;  %v13969_v29 = vld [vmem:[#allocation10 + $0xde8] sm:$0xf]  ;;  %v18479_v4 = vld [vmem:[#allocation10 + $0xe18] sm:$0xf0] }
 0x2b0   :  { %5609 = vmatpush.bf16.msrb.mxu0 %v12930_v7  ;;  %v14431_v7 = vld [vmem:[#allocation10 + $0x11bc] sm:$0xf0]  ;;  %v5359_v24 = vpop.f32.mrf.mxu0 }
 0x2b1   :  { %5525 = vmatmul.bf16.vlgmr.msrb.gmra.mxu1 %v19886_v12  ;;  %5534 = vmatpush.bf16.msra.mxu2 %v13186_v26  ;;  %v14434_v55 = vor.u32 %v18589_v33, %v14431_v7  ;;  %v14379_v26 = vld [vmem:[#allocation10 + $0x1154] sm:$0xf0]  ;;  %v14899_v33 = vld [vmem:[#allocation10 + $0x1564] sm:$0xf0]  ;;  %v18336_v7 = vld [vmem:[#allocation10 + $0x9a0] sm:$0xf0] }
 0x2b2   :  { %5569 = vmatpush.bf16.msra.mxu1 %v14642_v38  ;;  %v13030_v38 = vor.u32 %v18238_v18, %v13027_v20  ;;  %v14275_v18 = vld [vmem:[#allocation10 + $0x1084] sm:$0xf0]  ;;  %v18706_v20 = vld [vmem:[#allocation10 + $0x1534] sm:$0xf] }
 0x2b3   :  { %5597 = vmatpush.bf16.msrb.mxu3 %v12462_v22  ;;  %v19982_v22 = vadd.f32 %v5318_v8, %v5306_v43  ;;  %v14178_v43 = vor.u32 %v18531_v0, %v14177_v63  ;;  %v14902_v13 = vor.u32 %v18706_v20, %v14899_v33  ;;  %v14541_v8 = vld [vmem:[#allocation10 + $0x1260] sm:$0xf]  ;;  %v13241_v0 = vld [vmem:[#allocation10 + $0x838] sm:$0xf]  ;;  %v14385_v20 = vld [vmem:[#allocation10 + $0x1128] sm:$0xf] }
 0x2b4   :  { %5610 = vmatpush.bf16.msrb.mxu0 %v12878_v45  ;;  %v18576_v45 = vld [vmem:[#allocation10 + $0x1124] sm:$0xf]  ;;  %v18583_v33 = vld [vmem:[#allocation10 + $0x1158] sm:$0xf0] }
 0x2b5   :  { %5535 = vmatpush.bf16.msra.mxu2 %v13134_v41  ;;  %v14382_v39 = vor.u32 %v18576_v45, %v14379_v26  ;;  %v14645_v41 = vld [vmem:[#allocation10 + $0x1330] sm:$0xf]  ;;  %v5346_v59 = vpop.f32.mrf.mxu3  ;;  %v18323_v45 = vld [vmem:[#allocation10 + $0x938] sm:$0xf0]  ;;  %v18505_v26 = vld [vmem:[#allocation10 + $0xee8] sm:$0xf0] }
 0x2b6   :  { %5570 = vmatpush.bf16.msra.mxu1 %v14590_v30  ;;  %v12670_v30 = vor.u32 %v18154_v21, %v12669_v17  ;;  %v5320_v58 = vpop.f32.mrf.mxu1  ;;  %v18693_v21 = vld [vmem:[#allocation10 + $0x14cc] sm:$0xf] }
 0x2b7   :  { %5598 = vmatpush.bf16.msrb.mxu3 %v12410_v32  ;;  %v12617_v32 = vld [vmem:[#allocation10 + $0x358] sm:$0xf]  ;;  %v14850_v27 = vor.u32 %v18693_v21, %v14847_v35  ;;  %v14743_v58 = vld [vmem:[#allocation10 + $0x142c] sm:$0xf0] }
 0x2b8   :  { %5611 = vmatpush.bf16.msrb.mxu0 %v12826_v36  ;;  %v18544_v36 = vld [vmem:[#allocation10 + $0x1020] sm:$0xf0]  ;;  %v12618_v53 = vor.u32 %v18141_v37, %v12617_v32  ;;  %v14795_v32 = vld [vmem:[#allocation10 + $0x1494] sm:$0xf0] }
 0x2b9   :  { %5536 = vmatpush.bf16.msra.mxu2 %v13082_v3  ;;  %v14954_v3 = vor.u32 %v18719_v50, %v14951_v52  ;;  %v19987_v37 = vld [vmem:[#allocation12] sm:$0xff] }
 0x2ba   :  { %5571 = vmatpush.bf16.msra.mxu1 %v14538_v49  ;;  %v14327_v49 = vld [vmem:[#allocation10 + $0x10ec] sm:$0xf0]  ;;  %v18596_v50 = vld [vmem:[#allocation10 + $0x11c0] sm:$0xf0] }
 0x2bb   :  { %5599 = vmatpush.bf16.msrb.mxu3 %v12358_v57  ;;  %v14230_v57 = vor.u32 %v18544_v36, %v14229_v34  ;;  %v14330_v2 = vor.u32 %v18563_v44, %v14327_v49  ;;  %v1330_v34 = vperm.slane %v19987_v37, 3  ;;  %v18492_v44 = vld [vmem:[#allocation10 + $0xe80] sm:$0xf0]  ;;  %v14437_v49 = vld [vmem:[#allocation10 + $0x1190] sm:$0xf] }
 0x2bc   :  { %5612 = vmatpush.bf16.msrb.mxu0 %v12774_v60  ;;  %v14646_v60 = vor.u32 %v18648_v42, %v14645_v41  ;;  %v14021_v42 = vld [vmem:[#allocation10 + $0xe50] sm:$0xf] }
 0x2bd   :  { %5537 = vmatpush.bf16.msra.mxu2 %v13030_v38  ;;  %v18622_v38 = vld [vmem:[#allocation10 + $0x1290] sm:$0xf0]  ;;  %v14022_v63 = vor.u32 %v18492_v44, %v14021_v42  ;;  %v12983_v44 = vld [vmem:[#allocation10 + $0x664] sm:$0xf0] }
 0x2be   :  { %5572 = vmatpush.bf16.msra.mxu1 %v14486_v5  ;;  %v18550_v5 = vld [vmem:[#allocation10 + $0x1054] sm:$0xf]  ;;  %v14542_v24 = vor.u32 %v18622_v38, %v14541_v8  ;;  %v18440_v8 = vld [vmem:[#allocation10 + $0xce0] sm:$0xf0]  ;;  %v14386_v38 = vor.u32 %v18583_v33, %v14385_v20 }
 0x2bf   :  { %5600 = vmatpush.bf16.msrb.mxu3 %v12306_v6  ;;  %v13397_v6 = vld [vmem:[#allocation10 + $0x970] sm:$0xf]  ;;  %v14278_v62 = vor.u32 %v18550_v5, %v14275_v18  ;;  %v18226_v42 = vld [vmem:[#allocation10 + $0x634] sm:$0xf] }
 0x2c0   :  { %5613 = vmatpush.bf16.msrb.mxu0 %v12722_v11  ;;  %5538 = vmatmul.bf16.vlgmr.msra.gmra.mxu2 %v19870_v61  ;;  %v18518_v11 = vld [vmem:[#allocation10 + $0xf50] sm:$0xf0]  ;;  %v13398_v17 = vor.u32 %v18336_v7, %v13397_v6  ;;  %v14691_v7 = vld [vmem:[#allocation10 + $0x13c4] sm:$0xf0] }
 0x2c1   :  { %5582 = vmatpush.bf16.msrb.mxu2 %v15058_v23  ;;  %v13345_v23 = vld [vmem:[#allocation10 + $0x908] sm:$0xf]  ;;  %v18654_v6 = vld [vmem:[#allocation10 + $0x1394] sm:$0xf] }
 0x2c2   :  { %5573 = vmatpush.bf16.msra.mxu1 %v14434_v55  ;;  %v14126_v55 = vor.u32 %v18518_v11, %v14125_v10  ;;  %v13346_v47 = vor.u32 %v18323_v45, %v13345_v23  ;;  %v13970_v11 = vor.u32 %v18479_v4, %v13969_v29  ;;  %v14333_v23 = vld [vmem:[#allocation10 + $0x10c0] sm:$0xf]  ;;  %v18570_v45 = vld [vmem:[#allocation10 + $0x10f0] sm:$0xf0] }
 0x2c3   :  { %5601 = vmatpush.bf16.msrb.mxu3 %v12254_v25  ;;  %v14073_v25 = vld [vmem:[#allocation10 + $0xeb8] sm:$0xf]  ;;  %v5331_v52 = vpop.f32.mrf.mxu2 }
 0x2c4   :  { %5614 = vmatpush.bf16.msrb.mxu0 %v12670_v30  ;;  %v18609_v30 = vld [vmem:[#allocation10 + $0x1228] sm:$0xf0]  ;;  %v14074_v36 = vor.u32 %v18505_v26, %v14073_v25  ;;  %v5332_v59 = vadd.f32 %v5331_v52, %v1330_v34  ;;  %v14334_v34 = vor.u32 %v18570_v45, %v14333_v23  ;;  %v13399_v52 = vld [vmem:[#allocation10 + $0x9a4] sm:$0xf0]  ;;  %v18304_v23 = vld [vmem:[#allocation10 + $0x8a4] sm:$0xf] }
 0x2c5   :  { %5583 = vmatpush.bf16.msrb.mxu2 %v15006_v40  ;;  %v18310_v40 = vld [vmem:[#allocation10 + $0x8d0] sm:$0xf0]  ;;  %v14490_v41 = vor.u32 %v18609_v30, %v14489_v28  ;;  %v13295_v45 = vld [vmem:[#allocation10 + $0x8d4] sm:$0xf0] }
 0x2c6   :  { %5574 = vmatpush.bf16.msra.mxu1 %v14382_v39  ;;  %v13293_v39 = vld [vmem:[#allocation10 + $0x8a0] sm:$0xf]  ;;  %v5345_v5 = vadd.f32 %v19980_v15, %v5332_v59  ;;  %v18466_v15 = vld [vmem:[#allocation10 + $0xdb0] sm:$0xf0] }
 0x2c7   :  { %5602 = vmatpush.bf16.msrb.mxu3 %v12202_v46  ;;  %v14798_v46 = vor.u32 %v18680_v31, %v14795_v32  ;;  %v13761_v31 = vld [vmem:[#allocation10 + $0xc48] sm:$0xf]  ;;  %v18427_v32 = vld [vmem:[#allocation10 + $0xc78] sm:$0xf0]  ;;  %v13709_v59 = vld [vmem:[#allocation10 + $0xbe0] sm:$0xf] }
 0x2c8   :  { %5615 = vmatpush.bf16.msrb.mxu0 %v12618_v53  ;;  %v13294_v53 = vor.u32 %v18310_v40, %v13293_v39  ;;  %v5358_v10 = vadd.f32 %v19976_v48, %v5345_v5  ;;  %v18453_v39 = vld [vmem:[#allocation10 + $0xd48] sm:$0xf0]  ;;  %v14281_v40 = vld [vmem:[#allocation10 + $0x1058] sm:$0xf] }
 0x2c9   :  { %5584 = vmatpush.bf16.msrb.mxu2 %v14954_v3  ;;  %v14438_v3 = vor.u32 %v18596_v50, %v14437_v49  ;;  %v13762_v49 = vor.u32 %v18427_v32, %v13761_v31  ;;  %v18330_v50 = vld [vmem:[#allocation10 + $0x974] sm:$0xf]  ;;  %v18213_v5 = vld [vmem:[#allocation10 + $0x5cc] sm:$0xf]  ;;  %v18187_v31 = vld [vmem:[#allocation10 + $0x4fc] sm:$0xf] }
 0x2ca   :  { %5575 = vmatpush.bf16.msra.mxu1 %v14330_v2  ;;  %5603 = vmatmul.bf16.vlgmr.msrb.gmra.mxu3 %v19876_v19  ;;  %v18297_v2 = vld [vmem:[#allocation10 + $0x868] sm:$0xf0]  ;;  %v13402_v4 = vor.u32 %v18330_v50, %v13399_v52  ;;  %v12827_v32 = vld [vmem:[#allocation10 + $0x52c] sm:$0xf0]  ;;  %v18174_v52 = vld [vmem:[#allocation10 + $0x494] sm:$0xf] }
 0x2cb   :  { %5647 = vmatpush.bf16.msra.mxu3 %v14230_v57  ;;  %5616 = vmatmul.bf16.vlgmr.msrb.gmra.mxu0 %v19886_v12  ;;  %v18667_v57 = vld [vmem:[#allocation10 + $0x13fc] sm:$0xf]  ;;  %v5333_v25 = vpop.f32.mrf.mxu2 }
 0x2cc   :  { %5660 = vmatpush.bf16.msra.mxu0 %v14646_v60  ;;  %v19991_v60 = vpop.f32.mrf.mxu0  ;;  %v14746_v18 = vor.u32 %v18667_v57, %v14743_v58  ;;  %v18258_v58 = vld [vmem:[#allocation10 + $0x730] sm:$0xf0] }
 0x2cd   :  { %5585 = vmatpush.bf16.msrb.mxu2 %v14902_v13  ;;  %v13813_v13 = vld [vmem:[#allocation10 + $0xcb0] sm:$0xf]  ;;  %v19995_v35 = vpop.f32.mrf.mxu3 }
 0x2ce   :  { %5576 = vmatpush.bf16.msra.mxu1 %v14278_v62  ;;  %v18284_v62 = vld [vmem:[#allocation10 + $0x800] sm:$0xf0]  ;;  %v5370_v21 = vpop.f32.mrf.mxu1  ;;  %v13814_v26 = vor.u32 %v18440_v8, %v13813_v13  ;;  %v15061_v13 = vld [vmem:[#allocation10 + $0x1670] sm:$0xf] }
 0x2cf   :  { %5648 = vmatpush.bf16.msra.mxu3 %v14178_v43  ;;  %v13242_v43 = vor.u32 %v18297_v2, %v13241_v0  ;;  %v12986_v2 = vor.u32 %v18226_v42, %v12983_v44  ;;  %v18752_v8 = vld [vmem:[#allocation10 + $0x16a0] sm:$0xf0]  ;;  %v18375_v42 = vld [vmem:[#allocation10 + $0xad8] sm:$0xf0]  ;;  %v12830_v44 = vor.u32 %v18187_v31, %v12827_v32  ;;  %v14801_v31 = vld [vmem:[#allocation10 + $0x1468] sm:$0xf] }
 0x2d0   :  { %5661 = vmatpush.bf16.msra.mxu0 %v14594_v9  ;;  %v13189_v9 = vld [vmem:[#allocation10 + $0x7d0] sm:$0xf]  ;;  %v15062_v25 = vor.u32 %v18752_v8, %v15061_v13  ;;  %v13449_v13 = vld [vmem:[#allocation10 + $0x9d8] sm:$0xf] }
 0x2d1   :  { %5577 = vmatmul.bf16.vlgmr.msra.gmra.mxu1 %v19895_v14  ;;  %5586 = vmatpush.bf16.msrb.mxu2 %v14850_v27  ;;  %v13190_v48 = vor.u32 %v18284_v62, %v13189_v9  ;;  %v13137_v27 = vld [vmem:[#allocation10 + $0x768] sm:$0xf]  ;;  %v18245_v9 = vld [vmem:[#allocation10 + $0x6c8] sm:$0xf0]  ;;  %v14853_v8 = vld [vmem:[#allocation10 + $0x14d0] sm:$0xf] }
 0x2d2   :  { %5621 = vmatpush.bf16.msrb.mxu1 %v13398_v17  ;;  %v13917_v17 = vld [vmem:[#allocation10 + $0xd80] sm:$0xf] }
 0x2d3   :  { %5649 = vmatpush.bf16.msra.mxu3 %v14126_v55  ;;  %v14694_v55 = vor.u32 %v18654_v6, %v14691_v7  ;;  %v13918_v30 = vor.u32 %v18466_v15, %v13917_v17  ;;  %v13347_v6 = vld [vmem:[#allocation10 + $0x93c] sm:$0xf0]  ;;  %v13033_v7 = vld [vmem:[#allocation10 + $0x698] sm:$0xf]  ;;  %v18200_v17 = vld [vmem:[#allocation10 + $0x564] sm:$0xf] }
 0x2d4   :  { %5662 = vmatpush.bf16.msra.mxu0 %v14542_v24  ;;  %v19997_v24 = vadd.f32 %v5370_v21, %v5358_v10  ;;  %v5411_v28 = vpop.f32.mrf.mxu0  ;;  %v13657_v10 = vld [vmem:[#allocation10 + $0xb78] sm:$0xf]  ;;  %v13034_v21 = vor.u32 %v18245_v9, %v13033_v7 }
 0x2d5   :  { %5587 = vmatpush.bf16.msrb.mxu2 %v14798_v46  ;;  %v5398_v29 = vpop.f32.mrf.mxu3  ;;  %v12879_v15 = vld [vmem:[#allocation10 + $0x594] sm:$0xf0]  ;;  %v15009_v28 = vld [vmem:[#allocation10 + $0x1608] sm:$0xf] }
 0x2d6   :  { %5622 = vmatpush.bf16.msrb.mxu1 %v13346_v47  ;;  %v18271_v47 = vld [vmem:[#allocation10 + $0x798] sm:$0xf0] }
 0x2d7   :  { %5650 = vmatpush.bf16.msra.mxu3 %v14074_v36  ;;  %v13865_v36 = vld [vmem:[#allocation10 + $0xd18] sm:$0xf]  ;;  %v13138_v46 = vor.u32 %v18271_v47, %v13137_v27  ;;  %v12882_v27 = vor.u32 %v18200_v17, %v12879_v15  ;;  %v13298_v47 = vor.u32 %v18304_v23, %v13295_v45  ;;  %v18700_v15 = vld [vmem:[#allocation10 + $0x1500] sm:$0xf0] }
 0x2d8   :  { %5663 = vmatpush.bf16.msra.mxu0 %v14490_v41  ;;  %v18557_v41 = vld [vmem:[#allocation10 + $0x1088] sm:$0xf0]  ;;  %v13866_v57 = vor.u32 %v18453_v39, %v13865_v36  ;;  %v18291_v36 = vld [vmem:[#allocation10 + $0x83c] sm:$0xf]  ;;  %v13243_v39 = vld [vmem:[#allocation10 + $0x86c] sm:$0xf0] }
 0x2d9   :  { %5588 = vmatpush.bf16.msrb.mxu2 %v14746_v18  ;;  %v14282_v0 = vor.u32 %v18557_v41, %v14281_v40  ;;  %v12931_v18 = vld [vmem:[#allocation10 + $0x5fc] sm:$0xf0]  ;;  %v13553_v41 = vld [vmem:[#allocation10 + $0xaa8] sm:$0xf]  ;;  %v13246_v50 = vor.u32 %v18291_v36, %v13243_v39  ;;  %v12671_v45 = vld [vmem:[#allocation10 + $0x3f4] sm:$0xf0] }
 0x2da   :  { %5623 = vmatpush.bf16.msrb.mxu1 %v13294_v53  ;;  %v13085_v53 = vld [vmem:[#allocation10 + $0x700] sm:$0xf]  ;;  %v12934_v62 = vor.u32 %v18213_v5, %v12931_v18  ;;  %v14905_v18 = vld [vmem:[#allocation10 + $0x1538] sm:$0xf]  ;;  %v18687_v36 = vld [vmem:[#allocation10 + $0x1498] sm:$0xf0] }
 0x2db   :  { %5651 = vmatpush.bf16.msra.mxu3 %v14022_v63  ;;  %v18414_v63 = vld [vmem:[#allocation10 + $0xc10] sm:$0xf0]  ;;  %v13086_v20 = vor.u32 %v18258_v58, %v13085_v53  ;;  %v12775_v53 = vld [vmem:[#allocation10 + $0x4c4] sm:$0xf0]  ;;  %v18109_v39 = vld [vmem:[#allocation10 + $0x28c] sm:$0xf] }
 0x2dc   :  { %5664 = vmatpush.bf16.msra.mxu0 %v14438_v3  ;;  %v5372_v3 = vpop.f32.mrf.mxu1  ;;  %v13710_v33 = vor.u32 %v18414_v63, %v13709_v59  ;;  %v18278_v58 = vld [vmem:[#allocation10 + $0x7d4] sm:$0xf]  ;;  %v13191_v59 = vld [vmem:[#allocation10 + $0x804] sm:$0xf0]  ;;  %v12778_v5 = vor.u32 %v18174_v52, %v12775_v53  ;;  %v14802_v53 = vor.u32 %v18687_v36, %v14801_v31  ;;  %v13763_v36 = vld [vmem:[#allocation10 + $0xc7c] sm:$0xf0] }
 0x2dd   :  { %5589 = vmatpush.bf16.msrb.mxu2 %v14694_v55  ;;  %v18362_v3 = vld [vmem:[#allocation10 + $0xa70] sm:$0xf0]  ;;  %v14647_v52 = vld [vmem:[#allocation10 + $0x1364] sm:$0xf0] }
 0x2de   :  { %5624 = vmatpush.bf16.msrb.mxu1 %v13242_v43  ;;  %v18317_v43 = vld [vmem:[#allocation10 + $0x90c] sm:$0xf]  ;;  %v12359_v31 = vld [vmem:[#allocation10 + $0x184] sm:$0xf0] }
 0x2df   :  { %5652 = vmatpush.bf16.msra.mxu3 %v13970_v11  ;;  %v18401_v11 = vld [vmem:[#allocation10 + $0xba8] sm:$0xf0] }
 0x2e0   :  { %5665 = vmatpush.bf16.msra.mxu0 %v14386_v38  ;;  %5590 = vmatmul.bf16.vlgmr.msrb.gmra.mxu2 %v19882_v51  ;;  %v13350_v38 = vor.u32 %v18317_v43, %v13347_v6  ;;  %v13658_v55 = vor.u32 %v18401_v11, %v13657_v10  ;;  %v18161_v43 = vld [vmem:[#allocation10 + $0x42c] sm:$0xf]  ;;  %v12723_v6 = vld [vmem:[#allocation10 + $0x45c] sm:$0xf0] }
 0x2e1   :  { %5634 = vmatpush.bf16.msra.mxu2 %v13814_v26  ;;  %v18388_v26 = vld [vmem:[#allocation10 + $0xb40] sm:$0xf0]  ;;  %v18265_v10 = vld [vmem:[#allocation10 + $0x76c] sm:$0xf]  ;;  %v13139_v11 = vld [vmem:[#allocation10 + $0x79c] sm:$0xf0]  ;;  %v12726_v17 = vor.u32 %v18161_v43, %v12723_v6 }
 0x2e2   :  { %5625 = vmatpush.bf16.msrb.mxu1 %v13190_v48  ;;  %v13605_v48 = vld [vmem:[#allocation10 + $0xb10] sm:$0xf]  ;;  %v13142_v23 = vor.u32 %v18265_v10, %v13139_v11  ;;  %v18629_v6 = vld [vmem:[#allocation10 + $0x12cc] sm:$0xf] }
 0x2e3   :  { %5653 = vmatpush.bf16.msra.mxu3 %v13918_v30  ;;  %v18739_v30 = vld [vmem:[#allocation10 + $0x1638] sm:$0xf0]  ;;  %v5383_v63 = vpop.f32.mrf.mxu2  ;;  %v18733_v11 = vld [vmem:[#allocation10 + $0x160c] sm:$0xf] }
 0x2e4   :  { %5666 = vmatpush.bf16.msra.mxu0 %v14334_v34  ;;  %v13606_v34 = vor.u32 %v18388_v26, %v13605_v48  ;;  %v15010_v40 = vor.u32 %v18739_v30, %v15009_v28  ;;  %v5384_v29 = vadd.f32 %v5383_v63, %v19997_v24  ;;  %v18349_v24 = vld [vmem:[#allocation10 + $0xa08] sm:$0xf0]  ;;  %v13087_v28 = vld [vmem:[#allocation10 + $0x734] sm:$0xf0]  ;;  %v14749_v63 = vld [vmem:[#allocation10 + $0x1400] sm:$0xf] }
 0x2e5   :  { %5635 = vmatpush.bf16.msra.mxu2 %v13762_v49  ;;  %v18726_v49 = vld [vmem:[#allocation10 + $0x15d0] sm:$0xf0]  ;;  %v13450_v26 = vor.u32 %v18349_v24, %v13449_v13  ;;  %v14697_v13 = vld [vmem:[#allocation10 + $0x1398] sm:$0xf]  ;;  %v18661_v24 = vld [vmem:[#allocation10 + $0x13c8] sm:$0xf0] }
 0x2e6   :  { %5626 = vmatpush.bf16.msrb.mxu1 %v13138_v46  ;;  %v14957_v46 = vld [vmem:[#allocation10 + $0x15a0] sm:$0xf]  ;;  %v5397_v7 = vadd.f32 %v19995_v35, %v5384_v29  ;;  %v18148_v35 = vld [vmem:[#allocation10 + $0x3c4] sm:$0xf]  ;;  %v12463_v29 = vld [vmem:[#allocation10 + $0x254] sm:$0xf0] }
 0x2e7   :  { %5654 = vmatpush.bf16.msra.mxu3 %v13866_v57  ;;  %v13554_v57 = vor.u32 %v18375_v42, %v13553_v41  ;;  %v18135_v42 = vld [vmem:[#allocation10 + $0x35c] sm:$0xf] }
 0x2e8   :  { %5667 = vmatpush.bf16.msra.mxu0 %v14282_v0  ;;  %v14958_v0 = vor.u32 %v18726_v49, %v14957_v46  ;;  %v18239_v46 = vld [vmem:[#allocation10 + $0x69c] sm:$0xf]  ;;  %v13035_v49 = vld [vmem:[#allocation10 + $0x6cc] sm:$0xf0] }
 0x2e9   :  { %5636 = vmatpush.bf16.msra.mxu2 %v13710_v33  ;;  %v13194_v33 = vor.u32 %v18278_v58, %v13191_v59  ;;  %v18746_v58 = vld [vmem:[#allocation10 + $0x1674] sm:$0xf]  ;;  %v15063_v59 = vld [vmem:[#allocation10 + $0x16a4] sm:$0xf0] }
 0x2ea   :  { %5627 = vmatpush.bf16.msrb.mxu1 %v13086_v20  ;;  %5655 = vmatmul.bf16.vlgmr.msra.gmra.mxu3 %v19888_v16  ;;  %v18713_v20 = vld [vmem:[#allocation10 + $0x1568] sm:$0xf0]  ;;  %v15066_v43 = vor.u32 %v18746_v58, %v15063_v59  ;;  %v18408_v58 = vld [vmem:[#allocation10 + $0xbe4] sm:$0xf]  ;;  %v13711_v59 = vld [vmem:[#allocation10 + $0xc14] sm:$0xf0] }
 0x2eb   :  { %5699 = vmatpush.bf16.msrb.mxu3 %v12986_v2  ;;  %5668 = vmatmul.bf16.vlgmr.msra.gmra.mxu0 %v19895_v14  ;;  %v13501_v2 = vld [vmem:[#allocation10 + $0xa40] sm:$0xf]  ;;  %v5385_v30 = vpop.f32.mrf.mxu2 }
 0x2ec   :  { %5712 = vmatpush.bf16.msrb.mxu0 %v13402_v4  ;;  %v20004_v4 = vpop.f32.mrf.mxu0  ;;  %v13502_v9 = vor.u32 %v18362_v3, %v13501_v2  ;;  %v18674_v2 = vld [vmem:[#allocation10 + $0x1430] sm:$0xf0]  ;;  %v18096_v3 = vld [vmem:[#allocation10 + $0x224] sm:$0xf]  ;;  %v14959_v30 = vld [vmem:[#allocation10 + $0x15d4] sm:$0xf0] }
 0x2ed   :  { %5637 = vmatpush.bf16.msra.mxu2 %v13658_v55  ;;  %v12567_v55 = vld [vmem:[#allocation10 + $0x324] sm:$0xf0]  ;;  %v20012_v48 = vpop.f32.mrf.mxu3  ;;  %v12466_v10 = vor.u32 %v18096_v3, %v12463_v29 }
 0x2ee   :  { %5628 = vmatpush.bf16.msrb.mxu1 %v13034_v21  ;;  %v18122_v21 = vld [vmem:[#allocation10 + $0x2f4] sm:$0xf] }
 0x2ef   :  { %5700 = vmatpush.bf16.msrb.mxu3 %v12934_v62  ;;  %v14906_v62 = vor.u32 %v18713_v20, %v14905_v18 }
 0x2f0   :  { %5713 = vmatpush.bf16.msrb.mxu0 %v13350_v38  ;;  %v20008_v38 = vadd.f32 %v19991_v60, %v5397_v7  ;;  %v14854_v60 = vor.u32 %v18700_v15, %v14853_v8  ;;  %v14595_v7 = vld [vmem:[#allocation10 + $0x12fc] sm:$0xf0]  ;;  %v18083_v8 = vld [vmem:[#allocation10 + $0x1bc] sm:$0xf] }
 0x2f1   :  { %5629 = vmatmul.bf16.vlgmr.msrb.gmra.mxu1 %v19870_v61  ;;  %5638 = vmatpush.bf16.msra.mxu2 %v13606_v34  ;;  %v12674_v34 = vor.u32 %v18148_v35, %v12671_v45  ;;  %v14598_v15 = vor.u32 %v18629_v6, %v14595_v7  ;;  %v18616_v35 = vld [vmem:[#allocation10 + $0x1264] sm:$0xf]  ;;  %v14543_v45 = vld [vmem:[#allocation10 + $0x1294] sm:$0xf0] }
 0x2f2   :  { %5673 = vmatpush.bf16.msra.mxu1 %v15062_v25  ;;  %v20010_v25 = vpop.f32.mrf.mxu1  ;;  %v12255_v6 = vld [vmem:[#allocation10 + $0xb4] sm:$0xf0] }
 0x2f3   :  { %5701 = vmatpush.bf16.msrb.mxu3 %v12882_v27  ;;  %v18252_v27 = vld [vmem:[#allocation10 + $0x704] sm:$0xf] }
 0x2f4   :  { %5714 = vmatpush.bf16.msrb.mxu0 %v13298_v47  ;;  %v12570_v47 = vor.u32 %v18122_v21, %v12567_v55  ;;  %v5463_v32 = vpop.f32.mrf.mxu0  ;;  %v13090_v41 = vor.u32 %v18252_v27, %v13087_v28  ;;  %v18434_v21 = vld [vmem:[#allocation10 + $0xcb4] sm:$0xf]  ;;  %v13815_v55 = vld [vmem:[#allocation10 + $0xce4] sm:$0xf0]  ;;  %v18720_v28 = vld [vmem:[#allocation10 + $0x15a4] sm:$0xf] }
 0x2f5   :  { %5639 = vmatpush.bf16.msra.mxu2 %v13554_v57  ;;  %v14546_v32 = vor.u32 %v18616_v35, %v14543_v45  ;;  %v12203_v35 = vld [vmem:[#allocation10 + $0x4c] sm:$0xf0]  ;;  %v18382_v45 = vld [vmem:[#allocation10 + $0xb14] sm:$0xf] }
 0x2f6   :  { %5674 = vmatpush.bf16.msra.mxu1 %v15010_v40  ;;  %v12515_v40 = vld [vmem:[#allocation10 + $0x2bc] sm:$0xf0] }
 0x2f7   :  { %5702 = vmatpush.bf16.msrb.mxu3 %v12830_v44  ;;  %v12619_v44 = vld [vmem:[#allocation10 + $0x38c] sm:$0xf0]  ;;  %v12518_v57 = vor.u32 %v18109_v39, %v12515_v40  ;;  %v14962_v39 = vor.u32 %v18720_v28, %v14959_v30  ;;  %v18603_v40 = vld [vmem:[#allocation10 + $0x11fc] sm:$0xf]  ;;  %v13607_v28 = vld [vmem:[#allocation10 + $0xb44] sm:$0xf0] }
 0x2f8   :  { %5715 = vmatpush.bf16.msrb.mxu0 %v13246_v50  ;;  %v18642_v50 = vld [vmem:[#allocation10 + $0x1334] sm:$0xf] }
 0x2f9   :  { %5640 = vmatpush.bf16.msra.mxu2 %v13502_v9  ;;  %v14650_v18 = vor.u32 %v18642_v50, %v14647_v52  ;;  %v14750_v9 = vor.u32 %v18674_v2, %v14749_v63  ;;  %v18057_v52 = vld [vmem:[#allocation10 + $0xec] sm:$0xf]  ;;  %v14439_v2 = vld [vmem:[#allocation10 + $0x11c4] sm:$0xf0]  ;;  %v18538_v30 = vld [vmem:[#allocation10 + $0xff4] sm:$0xf] }
 0x2fa   :  { %5675 = vmatpush.bf16.msra.mxu1 %v14958_v0  ;;  %v12622_v0 = vor.u32 %v18135_v42, %v12619_v44  ;;  %v5424_v20 = vpop.f32.mrf.mxu1  ;;  %v1331_v42 = vperm.slane %v19987_v37, 4 }
 0x2fb   :  { %5703 = vmatpush.bf16.msrb.mxu3 %v12778_v5  ;;  %v13038_v5 = vor.u32 %v18239_v46, %v13035_v49  ;;  %v18707_v46 = vld [vmem:[#allocation10 + $0x153c] sm:$0xf]  ;;  %v14907_v49 = vld [vmem:[#allocation10 + $0x156c] sm:$0xf0] }
 0x2fc   :  { %5716 = vmatpush.bf16.msrb.mxu0 %v13194_v33  ;;  %v5450_v33 = vpop.f32.mrf.mxu3  ;;  %v14910_v63 = vor.u32 %v18707_v46, %v14907_v49  ;;  %v5423_v3 = vadd.f32 %v20010_v25, %v1331_v42  ;;  %v14387_v25 = vld [vmem:[#allocation10 + $0x115c] sm:$0xf0]  ;;  %v18369_v46 = vld [vmem:[#allocation10 + $0xaac] sm:$0xf] }
 0x2fd   :  { %5641 = vmatpush.bf16.msra.mxu2 %v13450_v26  ;;  %v14698_v26 = vor.u32 %v18661_v24, %v14697_v13  ;;  %v13714_v33 = vor.u32 %v18408_v58, %v13711_v59  ;;  %v18577_v24 = vld [vmem:[#allocation10 + $0x112c] sm:$0xf]  ;;  %v18551_v59 = vld [vmem:[#allocation10 + $0x105c] sm:$0xf] }
 0x2fe   :  { %5676 = vmatpush.bf16.msra.mxu1 %v14906_v62  ;;  %v15011_v62 = vld [vmem:[#allocation10 + $0x163c] sm:$0xf0] }
 0x2ff   :  { %5704 = vmatpush.bf16.msrb.mxu3 %v12726_v17  ;;  %v12411_v17 = vld [vmem:[#allocation10 + $0x1ec] sm:$0xf0] }
 0x300   :  { %5717 = vmatpush.bf16.msrb.mxu0 %v13142_v23  ;;  %5642 = vmatmul.bf16.vlgmr.msra.gmra.mxu2 %v19872_v1  ;;  %v15014_v23 = vor.u32 %v18733_v11, %v15011_v62  ;;  %v12414_v27 = vor.u32 %v18083_v8, %v12411_v17  ;;  %v18395_v11 = vld [vmem:[#allocation10 + $0xb7c] sm:$0xf]  ;;  %v13659_v62 = vld [vmem:[#allocation10 + $0xbac] sm:$0xf0] }
 0x301   :  { %5686 = vmatpush.bf16.msrb.mxu2 %v12570_v47  ;;  %v18070_v47 = vld [vmem:[#allocation10 + $0x154] sm:$0xf] }
 0x302   :  { %5677 = vmatpush.bf16.msra.mxu1 %v14854_v60  ;;  %v13818_v60 = vor.u32 %v18434_v21, %v13815_v55  ;;  %v12362_v44 = vor.u32 %v18070_v47, %v12359_v31  ;;  %v14803_v21 = vld [vmem:[#allocation10 + $0x149c] sm:$0xf0]  ;;  %v13662_v55 = vor.u32 %v18395_v11, %v13659_v62  ;;  %v18564_v31 = vld [vmem:[#allocation10 + $0x10c4] sm:$0xf]  ;;  %v14127_v11 = vld [vmem:[#allocation10 + $0xf54] sm:$0xf0] }
 0x303   :  { %5705 = vmatpush.bf16.msrb.mxu3 %v12674_v34  ;;  %v18421_v34 = vld [vmem:[#allocation10 + $0xc4c] sm:$0xf]  ;;  %v5435_v20 = vpop.f32.mrf.mxu2 }
 0x304   :  { %5718 = vmatpush.bf16.msrb.mxu0 %v13090_v41  ;;  %v14491_v41 = vld [vmem:[#allocation10 + $0x122c] sm:$0xf0]  ;;  %v13766_v50 = vor.u32 %v18421_v34, %v13763_v36  ;;  %v5436_v7 = vadd.f32 %v5435_v20, %v5423_v3  ;;  %v13405_v3 = vld [vmem:[#allocation10 + $0x978] sm:$0xf] }
 0x305   :  { %5687 = vmatpush.bf16.msrb.mxu2 %v12518_v57  ;;  %v14494_v57 = vor.u32 %v18603_v40, %v14491_v41  ;;  %v14751_v40 = vld [vmem:[#allocation10 + $0x1434] sm:$0xf0] }
 0x306   :  { %5678 = vmatpush.bf16.msra.mxu1 %v14802_v53  ;;  %v12307_v53 = vld [vmem:[#allocation10 + $0x11c] sm:$0xf0]  ;;  %v5449_v8 = vadd.f32 %v20012_v48, %v5436_v7  ;;  %v14335_v48 = vld [vmem:[#allocation10 + $0x10f4] sm:$0xf0] }
 0x307   :  { %5706 = vmatpush.bf16.msrb.mxu3 %v12622_v0  ;;  %v18590_v0 = vld [vmem:[#allocation10 + $0x1194] sm:$0xf]  ;;  %v12310_v29 = vor.u32 %v18057_v52, %v12307_v53  ;;  %v13555_v52 = vld [vmem:[#allocation10 + $0xadc] sm:$0xf0]  ;;  %v18525_v53 = vld [vmem:[#allocation10 + $0xf8c] sm:$0xf] }
 0x308   :  { %5719 = vmatpush.bf16.msrb.mxu0 %v13038_v5  ;;  %v18694_v5 = vld [vmem:[#allocation10 + $0x14d4] sm:$0xf]  ;;  %v13821_v20 = vld [vmem:[#allocation10 + $0xcb8] sm:$0xf] }
 0x309   :  { %5688 = vmatpush.bf16.msrb.mxu2 %v12466_v10  ;;  %v14442_v10 = vor.u32 %v18590_v0, %v14439_v2  ;;  %v18655_v0 = vld [vmem:[#allocation10 + $0x139c] sm:$0xf]  ;;  %v14699_v2 = vld [vmem:[#allocation10 + $0x13cc] sm:$0xf0]  ;;  %v13503_v7 = vld [vmem:[#allocation10 + $0xa74] sm:$0xf0] }
 0x30a   :  { %5679 = vmatpush.bf16.msra.mxu1 %v14750_v9  ;;  %5707 = vmatmul.bf16.vlgmr.msrb.gmra.mxu3 %v19886_v12  ;;  %v20020_v9 = vpop.f32.mrf.mxu0  ;;  %v14702_v62 = vor.u32 %v18655_v0, %v14699_v2  ;;  %v18402_v0 = vld [vmem:[#allocation10 + $0xbb0] sm:$0xf0] }
 0x30b   :  { %5751 = vmatpush.bf16.msra.mxu3 %v14650_v18  ;;  %5720 = vmatmul.bf16.vlgmr.msrb.gmra.mxu0 %v19870_v61  ;;  %v14855_v18 = vld [vmem:[#allocation10 + $0x1504] sm:$0xf0]  ;;  %v5437_v42 = vpop.f32.mrf.mxu2 }
 0x30c   :  { %5764 = vmatpush.bf16.msra.mxu0 %v15066_v43  ;;  %v18044_v43 = vld [vmem:[#allocation10 + $0x84] sm:$0xf]  ;;  %v14858_v13 = vor.u32 %v18694_v5, %v14855_v18  ;;  %v13558_v5 = vor.u32 %v18369_v46, %v13555_v52  ;;  %v18415_v42 = vld [vmem:[#allocation10 + $0xc18] sm:$0xf0]  ;;  %v14023_v46 = vld [vmem:[#allocation10 + $0xe84] sm:$0xf0] }
 0x30d   :  { %5689 = vmatpush.bf16.msrb.mxu2 %v12414_v27  ;;  %v12258_v17 = vor.u32 %v18044_v43, %v12255_v6  ;;  %v14390_v27 = vor.u32 %v18577_v24, %v14387_v25  ;;  %v20024_v34 = vpop.f32.mrf.mxu3  ;;  %v18356_v43 = vld [vmem:[#allocation10 + $0xa44] sm:$0xf] }
 0x30e   :  { %5680 = vmatpush.bf16.msra.mxu1 %v14698_v26  ;;  %v5462_v26 = vadd.f32 %v20004_v4, %v5449_v8  ;;  %v13610_v4 = vor.u32 %v18382_v45, %v13607_v28  ;;  %v18343_v45 = vld [vmem:[#allocation10 + $0x9dc] sm:$0xf]  ;;  %v14075_v28 = vld [vmem:[#allocation10 + $0xeec] sm:$0xf0]  ;;  %v18116_v52 = vld [vmem:[#allocation10 + $0x2c0] sm:$0xf0] }
 0x30f   :  { %5752 = vmatpush.bf16.msra.mxu3 %v14598_v15  ;;  %v18681_v15 = vld [vmem:[#allocation10 + $0x146c] sm:$0xf] }
 0x310   :  { %5765 = vmatpush.bf16.msra.mxu0 %v15014_v23  ;;  %v18031_v23 = vld [vmem:[#allocation10 + $0x1c] sm:$0xf]  ;;  %v14806_v47 = vor.u32 %v18681_v15, %v14803_v21  ;;  %v18324_v15 = vld [vmem:[#allocation10 + $0x940] sm:$0xf0]  ;;  %v13506_v21 = vor.u32 %v18356_v43, %v13503_v7  ;;  %v13197_v43 = vld [vmem:[#allocation10 + $0x7d8] sm:$0xf] }
 0x311   :  { %5681 = vmatmul.bf16.vlgmr.msra.gmra.mxu1 %v19882_v51  ;;  %5690 = vmatpush.bf16.msrb.mxu2 %v12362_v44  ;;  %v12206_v36 = vor.u32 %v18031_v23, %v12203_v35  ;;  %v13769_v23 = vld [vmem:[#allocation10 + $0xc50] sm:$0xf]  ;;  %v18428_v35 = vld [vmem:[#allocation10 + $0xc80] sm:$0xf0] }
 0x312   :  { %5725 = vmatpush.bf16.msrb.mxu1 %v13818_v60  ;;  %v14231_v60 = vld [vmem:[#allocation10 + $0x1024] sm:$0xf0]  ;;  %v5515_v49 = vpop.f32.mrf.mxu0 }
 0x313   :  { %5753 = vmatpush.bf16.msra.mxu3 %v14546_v32  ;;  %v5474_v32 = vpop.f32.mrf.mxu1  ;;  %v14234_v44 = vor.u32 %v18538_v30, %v14231_v60  ;;  %v12573_v60 = vld [vmem:[#allocation10 + $0x2f8] sm:$0xf] }
 0x314   :  { %5766 = vmatpush.bf16.msra.mxu0 %v14962_v39  ;;  %v18668_v39 = vld [vmem:[#allocation10 + $0x1404] sm:$0xf]  ;;  %v20026_v41 = vadd.f32 %v5474_v32, %v5462_v26  ;;  %v13451_v26 = vld [vmem:[#allocation10 + $0xa0c] sm:$0xf0]  ;;  %v18311_v32 = vld [vmem:[#allocation10 + $0x8d8] sm:$0xf0] }
 0x315   :  { %5691 = vmatpush.bf16.msrb.mxu2 %v12310_v29  ;;  %v14754_v58 = vor.u32 %v18668_v39, %v14751_v40  ;;  %v18337_v29 = vld [vmem:[#allocation10 + $0x9a8] sm:$0xf0]  ;;  %v5502_v25 = vpop.f32.mrf.mxu3  ;;  %v13717_v40 = vld [vmem:[#allocation10 + $0xbe8] sm:$0xf] }
 0x316   :  { %5726 = vmatpush.bf16.msrb.mxu1 %v13766_v50  ;;  %v14338_v50 = vor.u32 %v18564_v31, %v14335_v48  ;;  %v13770_v31 = vor.u32 %v18428_v35, %v13769_v23  ;;  %v13301_v48 = vld [vmem:[#allocation10 + $0x8a8] sm:$0xf]  ;;  %v13919_v25 = vld [vmem:[#allocation10 + $0xdb4] sm:$0xf0]  ;;  %v1332_v23 = vperm.slane %v19987_v37, 5 }
 0x317   :  { %5754 = vmatpush.bf16.msra.mxu3 %v14494_v57  ;;  %v14179_v57 = vld [vmem:[#allocation10 + $0xfbc] sm:$0xf0]  ;;  %v13302_v49 = vor.u32 %v18311_v32, %v13301_v48  ;;  %v12365_v48 = vld [vmem:[#allocation10 + $0x158] sm:$0xf] }
 0x318   :  { %5767 = vmatpush.bf16.msra.mxu0 %v14910_v63  ;;  %v14283_v63 = vld [vmem:[#allocation10 + $0x108c] sm:$0xf0]  ;;  %v14182_v18 = vor.u32 %v18525_v53, %v14179_v57  ;;  %v13718_v53 = vor.u32 %v18415_v42, %v13717_v40  ;;  %v13249_v57 = vld [vmem:[#allocation10 + $0x840] sm:$0xf]  ;;  %v12989_v37 = vld [vmem:[#allocation10 + $0x638] sm:$0xf]  ;;  %v5514_v40 = vadd.f32 %v20020_v9, %v1332_v23 }
 0x319   :  { %5692 = vmatpush.bf16.msrb.mxu2 %v12258_v17  ;;  %v14286_v6 = vor.u32 %v18551_v59, %v14283_v63  ;;  %v13353_v17 = vld [vmem:[#allocation10 + $0x910] sm:$0xf]  ;;  %v13665_v63 = vld [vmem:[#allocation10 + $0xb80] sm:$0xf] }
 0x31a   :  { %5727 = vmatpush.bf16.msrb.mxu1 %v13714_v33  ;;  %v18441_v33 = vld [vmem:[#allocation10 + $0xce8] sm:$0xf0]  ;;  %v13354_v30 = vor.u32 %v18324_v15, %v13353_v17 }
 0x31b   :  { %5755 = vmatpush.bf16.msra.mxu3 %v14442_v10  ;;  %v18512_v10 = vld [vmem:[#allocation10 + $0xf24] sm:$0xf]  ;;  %v5476_v24 = vpop.f32.mrf.mxu1  ;;  %v13822_v8 = vor.u32 %v18441_v33, %v13821_v20  ;;  %v18103_v20 = vld [vmem:[#allocation10 + $0x258] sm:$0xf0]  ;;  %v13666_v33 = vor.u32 %v18402_v0, %v13665_v63  ;;  %v12313_v63 = vld [vmem:[#allocation10 + $0xf0] sm:$0xf] }
 0x31c   :  { %5768 = vmatpush.bf16.msra.mxu0 %v14858_v13  ;;  %v13406_v13 = vor.u32 %v18337_v29, %v13405_v3  ;;  %v18473_v3 = vld [vmem:[#allocation10 + $0xdec] sm:$0xf]  ;;  %v13971_v29 = vld [vmem:[#allocation10 + $0xe1c] sm:$0xf0]  ;;  %v18460_v24 = vld [vmem:[#allocation10 + $0xd84] sm:$0xf] }
 0x31d   :  { %5693 = vmatpush.bf16.msrb.mxu2 %v12206_v36  ;;  %v13454_v36 = vor.u32 %v18343_v45, %v13451_v26  ;;  %v13974_v7 = vor.u32 %v18473_v3, %v13971_v29  ;;  %v13145_v45 = vld [vmem:[#allocation10 + $0x770] sm:$0xf]  ;;  %v18272_v26 = vld [vmem:[#allocation10 + $0x7a0] sm:$0xf0] }
 0x31e   :  { %5728 = vmatpush.bf16.msrb.mxu1 %v13662_v55  ;;  %v14130_v55 = vor.u32 %v18512_v10, %v14127_v11  ;;  %v13613_v10 = vld [vmem:[#allocation10 + $0xb18] sm:$0xf]  ;;  %v18389_v11 = vld [vmem:[#allocation10 + $0xb48] sm:$0xf0]  ;;  %v13146_v32 = vor.u32 %v18272_v26, %v13145_v45  ;;  %v12937_v3 = vld [vmem:[#allocation10 + $0x5d0] sm:$0xf] }
 0x31f   :  { %5756 = vmatpush.bf16.msra.mxu3 %v14390_v27  ;;  %v18499_v27 = vld [vmem:[#allocation10 + $0xebc] sm:$0xf]  ;;  %v13614_v35 = vor.u32 %v18389_v11, %v13613_v10  ;;  %v18220_v29 = vld [vmem:[#allocation10 + $0x600] sm:$0xf0] }
 0x320   :  { %5769 = vmatpush.bf16.msra.mxu0 %v14806_v47  ;;  %5694 = vmatmul.bf16.vlgmr.msrb.gmra.mxu2 %v19876_v19  ;;  %v18129_v47 = vld [vmem:[#allocation10 + $0x328] sm:$0xf0]  ;;  %v14078_v39 = vor.u32 %v18499_v27, %v14075_v28  ;;  %v13922_v28 = vor.u32 %v18460_v24, %v13919_v25  ;;  %v12938_v11 = vor.u32 %v18220_v29, %v12937_v3  ;;  %v12261_v24 = vld [vmem:[#allocation10 + $0x88] sm:$0xf]  ;;  %v14913_v29 = vld [vmem:[#allocation10 + $0x1540] sm:$0xf] }
 0x321   :  { %5738 = vmatpush.bf16.msra.mxu2 %v14234_v44  ;;  %v18486_v44 = vld [vmem:[#allocation10 + $0xe54] sm:$0xf] }
 0x322   :  { %5729 = vmatpush.bf16.msrb.mxu1 %v13610_v4  ;;  %v12574_v4 = vor.u32 %v18129_v47, %v12573_v60  ;;  %v14026_v59 = vor.u32 %v18486_v44, %v14023_v46  ;;  %v18376_v60 = vld [vmem:[#allocation10 + $0xae0] sm:$0xf0]  ;;  %v18447_v47 = vld [vmem:[#allocation10 + $0xd1c] sm:$0xf] }
 0x323   :  { %5757 = vmatpush.bf16.msra.mxu3 %v14338_v50  ;;  %v12521_v50 = vld [vmem:[#allocation10 + $0x290] sm:$0xf] }
 0x324   :  { %5770 = vmatpush.bf16.msra.mxu0 %v14754_v58  ;;  %v18298_v58 = vld [vmem:[#allocation10 + $0x870] sm:$0xf0]  ;;  %v12522_v2 = vor.u32 %v18116_v52, %v12521_v50  ;;  %v13509_v50 = vld [vmem:[#allocation10 + $0xa48] sm:$0xf]  ;;  %v18363_v52 = vld [vmem:[#allocation10 + $0xa78] sm:$0xf0] }
 0x325   :  { %5739 = vmatpush.bf16.msra.mxu2 %v14182_v18  ;;  %v12469_v18 = vld [vmem:[#allocation10 + $0x228] sm:$0xf] }
 0x326   :  { %5730 = vmatpush.bf16.msrb.mxu1 %v13558_v5  ;;  %v13250_v5 = vor.u32 %v18298_v58, %v13249_v57 }
 0x327   :  { %5758 = vmatpush.bf16.msra.mxu3 %v14286_v6  ;;  %v18285_v6 = vld [vmem:[#allocation10 + $0x808] sm:$0xf0] }
 0x328   :  { %5771 = vmatpush.bf16.msra.mxu0 %v14702_v62  ;;  %v5487_v62 = vpop.f32.mrf.mxu2  ;;  %v20033_v17 = vpop.f32.mrf.mxu0  ;;  %v13198_v15 = vor.u32 %v18285_v6, %v13197_v43  ;;  %v18350_v43 = vld [vmem:[#allocation10 + $0xa10] sm:$0xf0]  ;;  %v15069_v6 = vld [vmem:[#allocation10 + $0x1678] sm:$0xf] }
 0x329   :  { %5740 = vmatpush.bf16.msra.mxu2 %v14130_v55  ;;  %v18090_v55 = vld [vmem:[#allocation10 + $0x1f0] sm:$0xf0] }
 0x32a   :  { %5731 = vmatpush.bf16.msrb.mxu1 %v13506_v21  ;;  %5759 = vmatmul.bf16.vlgmr.msra.gmra.mxu3 %v19895_v14  ;;  %v12417_v21 = vld [vmem:[#allocation10 + $0x1c0] sm:$0xf] }
 0x32b   :  { %5803 = vmatpush.bf16.msrb.mxu3 %v13406_v13  ;;  %5772 = vmatmul.bf16.vlgmr.msra.gmra.mxu0 %v19882_v51  ;;  %v12470_v13 = vor.u32 %v18103_v20, %v12469_v18  ;;  %v13041_v18 = vld [vmem:[#allocation10 + $0x6a0] sm:$0xf]  ;;  %v18246_v20 = vld [vmem:[#allocation10 + $0x6d0] sm:$0xf0] }
 0x32c   :  { %5816 = vmatpush.bf16.msrb.mxu0 %v13822_v8  ;;  %v5488_v8 = vadd.f32 %v5487_v62, %v20026_v41  ;;  %v12418_v41 = vor.u32 %v18090_v55, %v12417_v21  ;;  %v18123_v62 = vld [vmem:[#allocation10 + $0x2fc] sm:$0xf]  ;;  %v13042_v25 = vor.u32 %v18246_v20, %v13041_v18  ;;  %v18084_v20 = vld [vmem:[#allocation10 + $0x1c4] sm:$0xf] }
 0x32d   :  { %5741 = vmatpush.bf16.msra.mxu2 %v14078_v39  ;;  %v18233_v39 = vld [vmem:[#allocation10 + $0x668] sm:$0xf0]  ;;  %v20040_v46 = vpop.f32.mrf.mxu3  ;;  %v18207_v21 = vld [vmem:[#allocation10 + $0x598] sm:$0xf0] }
 0x32e   :  { %5732 = vmatpush.bf16.msrb.mxu1 %v13454_v36  ;;  %v20037_v27 = vadd.f32 %v20024_v34, %v5488_v8  ;;  %v18077_v36 = vld [vmem:[#allocation10 + $0x188] sm:$0xf0]  ;;  %v13093_v34 = vld [vmem:[#allocation10 + $0x708] sm:$0xf]  ;;  %v5526_v44 = vpop.f32.mrf.mxu1  ;;  %v18051_v8 = vld [vmem:[#allocation10 + $0xb8] sm:$0xf0] }
 0x32f   :  { %5804 = vmatpush.bf16.msrb.mxu3 %v13354_v30  ;;  %v13561_v30 = vld [vmem:[#allocation10 + $0xab0] sm:$0xf]  ;;  %v12366_v58 = vor.u32 %v18077_v36, %v12365_v48  ;;  %v12209_v48 = vld [vmem:[#allocation10 + $0x20] sm:$0xf] }
 0x330   :  { %5817 = vmatpush.bf16.msrb.mxu0 %v13770_v31  ;;  %v13867_v31 = vld [vmem:[#allocation10 + $0xd4c] sm:$0xf0]  ;;  %v13562_v42 = vor.u32 %v18376_v60, %v13561_v30  ;;  %v5489_v57 = vpop.f32.mrf.mxu2  ;;  %v5567_v0 = vpop.f32.mrf.mxu0  ;;  %v18740_v30 = vld [vmem:[#allocation10 + $0x1640] sm:$0xf0]  ;;  %v12262_v60 = vor.u32 %v18051_v8, %v12261_v24  ;;  %v12833_v36 = vld [vmem:[#allocation10 + $0x500] sm:$0xf] }
 0x331   :  { %5733 = vmatmul.bf16.vlgmr.msrb.gmra.mxu1 %v19872_v1  ;;  %5742 = vmatpush.bf16.msra.mxu2 %v14026_v59  ;;  %v12990_v59 = vor.u32 %v18233_v39, %v12989_v37  ;;  %v18194_v37 = vld [vmem:[#allocation10 + $0x530] sm:$0xf0]  ;;  %v12471_v57 = vld [vmem:[#allocation10 + $0x25c] sm:$0xf0]  ;;  %v14861_v24 = vld [vmem:[#allocation10 + $0x14d8] sm:$0xf] }
 0x332   :  { %5777 = vmatpush.bf16.msra.mxu1 %v12574_v4  ;;  %v18259_v4 = vld [vmem:[#allocation10 + $0x738] sm:$0xf0] }
 0x333   :  { %5805 = vmatpush.bf16.msrb.mxu3 %v13302_v49  ;;  %v13870_v49 = vor.u32 %v18447_v47, %v13867_v31  ;;  %v13094_v9 = vor.u32 %v18259_v4, %v13093_v34  ;;  %v18110_v47 = vld [vmem:[#allocation10 + $0x294] sm:$0xf]  ;;  %v12523_v31 = vld [vmem:[#allocation10 + $0x2c4] sm:$0xf0] }
 0x334   :  { %5818 = vmatpush.bf16.msrb.mxu0 %v13718_v53  ;;  %v20042_v53 = vadd.f32 %v5526_v44, %v5514_v40  ;;  %v14237_v40 = vld [vmem:[#allocation10 + $0xff8] sm:$0xf]  ;;  %v12526_v34 = vor.u32 %v18110_v47, %v12523_v31  ;;  %v14965_v4 = vld [vmem:[#allocation10 + $0x15a8] sm:$0xf]  ;;  %v18727_v44 = vld [vmem:[#allocation10 + $0x15d8] sm:$0xf0] }
 0x335   :  { %5743 = vmatpush.bf16.msra.mxu2 %v13974_v7  ;;  %v18753_v7 = vld [vmem:[#allocation10 + $0x16a8] sm:$0xf0]  ;;  %v5554_v45 = vpop.f32.mrf.mxu3  ;;  %v14966_v0 = vor.u32 %v18727_v44, %v14965_v4  ;;  %v14809_v31 = vld [vmem:[#allocation10 + $0x1470] sm:$0xf]  ;;  %v18142_v4 = vld [vmem:[#allocation10 + $0x390] sm:$0xf0] }
 0x336   :  { %5778 = vmatpush.bf16.msra.mxu1 %v12522_v2  ;;  %v18064_v2 = vld [vmem:[#allocation10 + $0x120] sm:$0xf0]  ;;  %v15070_v23 = vor.u32 %v18753_v7, %v15069_v6  ;;  %v12729_v6 = vld [vmem:[#allocation10 + $0x430] sm:$0xf]  ;;  %v18155_v45 = vld [vmem:[#allocation10 + $0x3f8] sm:$0xf0] }
 0x337   :  { %5806 = vmatpush.bf16.msrb.mxu3 %v13250_v5  ;;  %v13510_v5 = vor.u32 %v18363_v52, %v13509_v50  ;;  %v12314_v10 = vor.u32 %v18064_v2, %v12313_v63  ;;  %v12834_v50 = vor.u32 %v18194_v37, %v12833_v36  ;;  %v18097_v52 = vld [vmem:[#allocation10 + $0x22c] sm:$0xf]  ;;  %v18532_v2 = vld [vmem:[#allocation10 + $0xfc0] sm:$0xf0]  ;;  %v14029_v44 = vld [vmem:[#allocation10 + $0xe58] sm:$0xf] }
 0x338   :  { %5819 = vmatpush.bf16.msrb.mxu0 %v13666_v33  ;;  %v13457_v33 = vld [vmem:[#allocation10 + $0x9e0] sm:$0xf]  ;;  %v18181_v63 = vld [vmem:[#allocation10 + $0x4c8] sm:$0xf0]  ;;  %v12474_v3 = vor.u32 %v18097_v52, %v12471_v57  ;;  %v18168_v7 = vld [vmem:[#allocation10 + $0x460] sm:$0xf0] }
 0x339   :  { %5744 = vmatpush.bf16.msra.mxu2 %v13922_v28  ;;  %v13458_v55 = vor.u32 %v18350_v43, %v13457_v33  ;;  %v15017_v28 = vld [vmem:[#allocation10 + $0x1610] sm:$0xf]  ;;  %v12419_v33 = vld [vmem:[#allocation10 + $0x1f4] sm:$0xf0]  ;;  %v12730_v8 = vor.u32 %v18168_v7, %v12729_v6  ;;  %v20050_v36 = vld [vmem:[#allocation12] sm:$0xff] }
 0x33a   :  { %5779 = vmatpush.bf16.msra.mxu1 %v12470_v13  ;;  %v12575_v13 = vld [vmem:[#allocation10 + $0x32c] sm:$0xf0]  ;;  %v15018_v39 = vor.u32 %v18740_v30, %v15017_v28  ;;  %v1333_v37 = vperm.slane %v20050_v36, 6  ;;  %v18493_v52 = vld [vmem:[#allocation10 + $0xe88] sm:$0xf0] }
 0x33b   :  { %5807 = vmatpush.bf16.msrb.mxu3 %v13198_v15  ;;  %v12885_v15 = vld [vmem:[#allocation10 + $0x568] sm:$0xf]  ;;  %v12578_v26 = vor.u32 %v18123_v62, %v12575_v13  ;;  %v18519_v62 = vld [vmem:[#allocation10 + $0xf58] sm:$0xf0]  ;;  %v12422_v13 = vor.u32 %v18084_v20, %v12419_v33  ;;  %v14653_v57 = vld [vmem:[#allocation10 + $0x1338] sm:$0xf] }
 0x33c   :  { %5820 = vmatpush.bf16.msrb.mxu0 %v13614_v35  ;;  %v5528_v35 = vpop.f32.mrf.mxu1 }
 0x33d   :  { %5745 = vmatpush.bf16.msra.mxu2 %v13870_v49  ;;  %v12677_v35 = vld [vmem:[#allocation10 + $0x3c8] sm:$0xf] }
 0x33e   :  { %5780 = vmatpush.bf16.msra.mxu1 %v12418_v41  ;;  %v12886_v41 = vor.u32 %v18207_v21, %v12885_v15  ;;  %v18071_v15 = vld [vmem:[#allocation10 + $0x15c] sm:$0xf]  ;;  %v12367_v21 = vld [vmem:[#allocation10 + $0x18c] sm:$0xf0] }
 0x33f   :  { %5808 = vmatpush.bf16.msrb.mxu3 %v13146_v32  ;;  %v18038_v32 = vld [vmem:[#allocation10 + $0x50] sm:$0xf0]  ;;  %v12370_v47 = vor.u32 %v18071_v15, %v12367_v21  ;;  %v12211_v21 = vld [vmem:[#allocation10 + $0x54] sm:$0xf0] }
 0x340   :  { %5821 = vmatpush.bf16.msrb.mxu0 %v13562_v42  ;;  %5746 = vmatmul.bf16.vlgmr.msra.gmra.mxu2 %v19888_v16  ;;  %v18545_v42 = vld [vmem:[#allocation10 + $0x1028] sm:$0xf0]  ;;  %v12210_v49 = vor.u32 %v18038_v32, %v12209_v48  ;;  %v18688_v48 = vld [vmem:[#allocation10 + $0x14a0] sm:$0xf0] }
 0x341   :  { %5790 = vmatpush.bf16.msrb.mxu2 %v12990_v59  ;;  %v12781_v59 = vld [vmem:[#allocation10 + $0x498] sm:$0xf] }
 0x342   :  { %5781 = vmatpush.bf16.msra.mxu1 %v12366_v58  ;;  %v14238_v58 = vor.u32 %v18545_v42, %v14237_v40  ;;  %v12782_v18 = vor.u32 %v18181_v63, %v12781_v59  ;;  %v18058_v40 = vld [vmem:[#allocation10 + $0xf4] sm:$0xf]  ;;  %v12315_v42 = vld [vmem:[#allocation10 + $0x124] sm:$0xf0]  ;;  %v18675_v63 = vld [vmem:[#allocation10 + $0x1438] sm:$0xf0] }
 0x343   :  { %5809 = vmatpush.bf16.msrb.mxu3 %v13094_v9  ;;  %v14185_v9 = vld [vmem:[#allocation10 + $0xf90] sm:$0xf]  ;;  %v14757_v59 = vld [vmem:[#allocation10 + $0x1408] sm:$0xf] }
 0x344   :  { %5822 = vmatpush.bf16.msrb.mxu0 %v13510_v5  ;;  %v18714_v5 = vld [vmem:[#allocation10 + $0x1570] sm:$0xf0]  ;;  %v14186_v43 = vor.u32 %v18532_v2, %v14185_v9  ;;  %v14758_v7 = vor.u32 %v18675_v63, %v14757_v59  ;;  %v18227_v59 = vld [vmem:[#allocation10 + $0x63c] sm:$0xf]  ;;  %v12991_v63 = vld [vmem:[#allocation10 + $0x66c] sm:$0xf0] }
 0x345   :  { %5791 = vmatpush.bf16.msrb.mxu2 %v12938_v11  ;;  %v14133_v11 = vld [vmem:[#allocation10 + $0xf28] sm:$0xf] }
 0x346   :  { %5782 = vmatpush.bf16.msra.mxu1 %v12314_v10  ;;  %v14914_v10 = vor.u32 %v18714_v5, %v14913_v29  ;;  %v12263_v29 = vld [vmem:[#allocation10 + $0xbc] sm:$0xf0] }
 0x347   :  { %5810 = vmatpush.bf16.msrb.mxu3 %v13042_v25  ;;  %v18701_v25 = vld [vmem:[#allocation10 + $0x1508] sm:$0xf0] }
 0x348   :  { %5823 = vmatpush.bf16.msrb.mxu0 %v13458_v55  ;;  %v5539_v55 = vpop.f32.mrf.mxu2  ;;  %v5617_v28 = vpop.f32.mrf.mxu0  ;;  %v14862_v30 = vor.u32 %v18701_v25, %v14861_v24  ;;  %v14705_v24 = vld [vmem:[#allocation10 + $0x13a0] sm:$0xf]  ;;  %v18662_v25 = vld [vmem:[#allocation10 + $0x13d0] sm:$0xf0] }
 0x349   :  { %5792 = vmatpush.bf16.msrb.mxu2 %v12886_v41  ;;  %v18506_v41 = vld [vmem:[#allocation10 + $0xef0] sm:$0xf0] }
 0x34a   :  { %5783 = vmatpush.bf16.msra.mxu1 %v12262_v60  ;;  %5811 = vmatmul.bf16.vlgmr.msrb.gmra.mxu3 %v19870_v61  ;;  %v14081_v60 = vld [vmem:[#allocation10 + $0xec0] sm:$0xf] }
 0x34b   :  { %5855 = vmatpush.bf16.msra.mxu3 %v15070_v23  ;;  %5824 = vmatmul.bf16.vlgmr.msrb.gmra.mxu0 %v19872_v1  ;;  %v14134_v23 = vor.u32 %v18519_v62, %v14133_v11  ;;  %v14601_v11 = vld [vmem:[#allocation10 + $0x12d0] sm:$0xf]  ;;  %v18636_v62 = vld [vmem:[#allocation10 + $0x1300] sm:$0xf0] }
 0x34c   :  { %5868 = vmatpush.bf16.msra.mxu0 %v12578_v26  ;;  %v5540_v26 = vadd.f32 %v5539_v55, %v20042_v53  ;;  %v14082_v53 = vor.u32 %v18506_v41, %v14081_v60  ;;  %v18435_v55 = vld [vmem:[#allocation10 + $0xcbc] sm:$0xf]  ;;  %v13925_v60 = vld [vmem:[#allocation10 + $0xd88] sm:$0xf]  ;;  %v14706_v41 = vor.u32 %v18662_v25, %v14705_v24  ;;  %v18500_v25 = vld [vmem:[#allocation10 + $0xec4] sm:$0xf] }
 0x34d   :  { %5793 = vmatpush.bf16.msrb.mxu2 %v12834_v50  ;;  %v14810_v50 = vor.u32 %v18688_v48, %v14809_v31  ;;  %v5604_v9 = vpop.f32.mrf.mxu3  ;;  %v14549_v31 = vld [vmem:[#allocation10 + $0x1268] sm:$0xf]  ;;  %v18623_v48 = vld [vmem:[#allocation10 + $0x1298] sm:$0xf0] }
 0x34e   :  { %5784 = vmatpush.bf16.msra.mxu1 %v12210_v49  ;;  %v5553_v32 = vadd.f32 %v20040_v46, %v5540_v26  ;;  %v18649_v46 = vld [vmem:[#allocation10 + $0x1368] sm:$0xf0]  ;;  %v18539_v26 = vld [vmem:[#allocation10 + $0xffc] sm:$0xf] }
 0x34f   :  { %5856 = vmatpush.bf16.msra.mxu3 %v15018_v39  ;;  %v12678_v39 = vor.u32 %v18155_v45, %v12677_v35  ;;  %v14654_v33 = vor.u32 %v18649_v46, %v14653_v57  ;;  %v14602_v45 = vor.u32 %v18636_v62, %v14601_v11  ;;  %v14497_v57 = vld [vmem:[#allocation10 + $0x1200] sm:$0xf]  ;;  %v18610_v46 = vld [vmem:[#allocation10 + $0x1230] sm:$0xf0]  ;;  %v18396_v62 = vld [vmem:[#allocation10 + $0xb84] sm:$0xf] }
 0x350   :  { %5869 = vmatpush.bf16.msra.mxu0 %v12526_v34  ;;  %v12625_v34 = vld [vmem:[#allocation10 + $0x360] sm:$0xf]  ;;  %v5566_v49 = vadd.f32 %v20033_v17, %v5553_v32  ;;  %v5541_v20 = vpop.f32.mrf.mxu2  ;;  %v14030_v17 = vor.u32 %v18493_v52, %v14029_v44  ;;  %v5619_v6 = vpop.f32.mrf.mxu0  ;;  %v18526_v44 = vld [vmem:[#allocation10 + $0xf94] sm:$0xf] }
 0x351   :  { %5785 = vmatmul.bf16.vlgmr.msra.gmra.mxu1 %v19876_v19  ;;  %5794 = vmatpush.bf16.msrb.mxu2 %v12782_v18  ;;  %v12626_v2 = vor.u32 %v18142_v4, %v12625_v34  ;;  %v5605_v18 = vadd.f32 %v5604_v9, %v1333_v37  ;;  %v14550_v4 = vor.u32 %v18623_v48, %v14549_v31  ;;  %v18454_v52 = vld [vmem:[#allocation10 + $0xd50] sm:$0xf0]  ;;  %v18409_v9 = vld [vmem:[#allocation10 + $0xbec] sm:$0xf]  ;;  %v14135_v20 = vld [vmem:[#allocation10 + $0xf5c] sm:$0xf0] }
 0x352   :  { %5829 = vmatpush.bf16.msrb.mxu1 %v14238_v58  ;;  %v12318_v58 = vor.u32 %v18058_v40, %v12315_v42  ;;  %v18422_v42 = vld [vmem:[#allocation10 + $0xc54] sm:$0xf]  ;;  %v18487_v31 = vld [vmem:[#allocation10 + $0xe5c] sm:$0xf]  ;;  %v14031_v48 = vld [vmem:[#allocation10 + $0xe8c] sm:$0xf0] }
 0x353   :  { %5857 = vmatpush.bf16.msra.mxu3 %v14966_v0  ;;  %v5578_v0 = vpop.f32.mrf.mxu1  ;;  %v20056_v15 = vadd.f32 %v5617_v28, %v5605_v18  ;;  %v18513_v18 = vld [vmem:[#allocation10 + $0xf2c] sm:$0xf] }
 0x354   :  { %5870 = vmatpush.bf16.msra.mxu0 %v12474_v3  ;;  %v18045_v3 = vld [vmem:[#allocation10 + $0x8c] sm:$0xf]  ;;  %v20054_v5 = vadd.f32 %v5578_v0, %v5566_v49  ;;  %v14187_v49 = vld [vmem:[#allocation10 + $0xfc4] sm:$0xf0]  ;;  %v14138_v11 = vor.u32 %v18513_v18, %v14135_v20  ;;  %v13511_v20 = vld [vmem:[#allocation10 + $0xa7c] sm:$0xf0] }
 0x355   :  { %5795 = vmatpush.bf16.msrb.mxu2 %v12730_v8  ;;  %v18032_v8 = vld [vmem:[#allocation10 + $0x24] sm:$0xf]  ;;  %v14190_v0 = vor.u32 %v18526_v44, %v14187_v49  ;;  %v14034_v44 = vor.u32 %v18487_v31, %v14031_v48  ;;  %v18370_v49 = vld [vmem:[#allocation10 + $0xab4] sm:$0xf]  ;;  %v18357_v18 = vld [vmem:[#allocation10 + $0xa4c] sm:$0xf] }
 0x356   :  { %5830 = vmatpush.bf16.msrb.mxu1 %v14186_v43  ;;  %v13977_v43 = vld [vmem:[#allocation10 + $0xdf0] sm:$0xf]  ;;  %v12214_v28 = vor.u32 %v18032_v8, %v12211_v21  ;;  %v14083_v8 = vld [vmem:[#allocation10 + $0xef4] sm:$0xf0]  ;;  %v12997_v48 = vld [vmem:[#allocation10 + $0x640] sm:$0xf] }
 0x357   :  { %5858 = vmatpush.bf16.msra.mxu3 %v14914_v10  ;;  %v18480_v10 = vld [vmem:[#allocation10 + $0xe20] sm:$0xf0] }
 0x358   :  { %5871 = vmatpush.bf16.msra.mxu0 %v12422_v13  ;;  %v12266_v13 = vor.u32 %v18045_v3, %v12263_v29  ;;  %v13978_v35 = vor.u32 %v18480_v10, %v13977_v43  ;;  %v14498_v29 = vor.u32 %v18610_v46, %v14497_v57  ;;  %v18597_v43 = vld [vmem:[#allocation10 + $0x11c8] sm:$0xf0]  ;;  %v12939_v10 = vld [vmem:[#allocation10 + $0x604] sm:$0xf0]  ;;  %v18474_v57 = vld [vmem:[#allocation10 + $0xdf4] sm:$0xf] }
 0x359   :  { %5796 = vmatpush.bf16.msrb.mxu2 %v12678_v39  ;;  %v5606_v39 = vpop.f32.mrf.mxu3  ;;  %v13979_v46 = vld [vmem:[#allocation10 + $0xe24] sm:$0xf0] }
 0x35a   :  { %5831 = vmatpush.bf16.msrb.mxu1 %v14134_v23  ;;  %v13823_v23 = vld [vmem:[#allocation10 + $0xcec] sm:$0xf0]  ;;  %v18571_v39 = vld [vmem:[#allocation10 + $0x10f8] sm:$0xf0] }
 0x35b   :  { %5859 = vmatpush.bf16.msra.mxu3 %v14862_v30  ;;  %v14239_v30 = vld [vmem:[#allocation10 + $0x102c] sm:$0xf0]  ;;  %v13826_v32 = vor.u32 %v18435_v55, %v13823_v23  ;;  %v5580_v37 = vpop.f32.mrf.mxu1  ;;  %v18584_v23 = vld [vmem:[#allocation10 + $0x1160] sm:$0xf0] }
 0x35c   :  { %5872 = vmatpush.bf16.msra.mxu0 %v12370_v47  ;;  %v18467_v47 = vld [vmem:[#allocation10 + $0xdb8] sm:$0xf0]  ;;  %v14242_v40 = vor.u32 %v18539_v26, %v14239_v30  ;;  %v14393_v55 = vld [vmem:[#allocation10 + $0x1130] sm:$0xf]  ;;  %v12887_v26 = vld [vmem:[#allocation10 + $0x59c] sm:$0xf0]  ;;  %v14086_v30 = vor.u32 %v18500_v25, %v14083_v8  ;;  %v13514_v8 = vor.u32 %v18357_v18, %v13511_v20 }
 0x35d   :  { %5797 = vmatpush.bf16.msrb.mxu2 %v12626_v2  ;;  %v13926_v34 = vor.u32 %v18467_v47, %v13925_v60  ;;  %v13719_v2 = vld [vmem:[#allocation10 + $0xc1c] sm:$0xf0]  ;;  %v18383_v60 = vld [vmem:[#allocation10 + $0xb1c] sm:$0xf]  ;;  %v14394_v47 = vor.u32 %v18584_v23, %v14393_v55  ;;  %v14341_v37 = vld [vmem:[#allocation10 + $0x10c8] sm:$0xf] }
 0x35e   :  { %5832 = vmatpush.bf16.msrb.mxu1 %v14082_v53  ;;  %v13771_v53 = vld [vmem:[#allocation10 + $0xc84] sm:$0xf0]  ;;  %v13722_v6 = vor.u32 %v18409_v9, %v13719_v2  ;;  %v12783_v9 = vld [vmem:[#allocation10 + $0x4cc] sm:$0xf0]  ;;  %v18331_v2 = vld [vmem:[#allocation10 + $0x97c] sm:$0xf] }
 0x35f   :  { %5860 = vmatpush.bf16.msra.mxu3 %v14810_v50  ;;  %v13873_v50 = vld [vmem:[#allocation10 + $0xd20] sm:$0xf]  ;;  %v18318_v55 = vld [vmem:[#allocation10 + $0x914] sm:$0xf]  ;;  %v13355_v23 = vld [vmem:[#allocation10 + $0x944] sm:$0xf0] }
 0x360   :  { %5873 = vmatpush.bf16.msra.mxu0 %v12318_v58  ;;  %5798 = vmatmul.bf16.vlgmr.msrb.gmra.mxu2 %v19886_v12  ;;  %v13774_v58 = vor.u32 %v18422_v42, %v13771_v53  ;;  %v13874_v3 = vor.u32 %v18454_v52, %v13873_v50  ;;  %v13563_v50 = vld [vmem:[#allocation10 + $0xae4] sm:$0xf0]  ;;  %v14342_v52 = vor.u32 %v18571_v39, %v14341_v37  ;;  %v12679_v39 = vld [vmem:[#allocation10 + $0x3fc] sm:$0xf0]  ;;  %v18643_v18 = vld [vmem:[#allocation10 + $0x133c] sm:$0xf] }
 0x361   :  { %5842 = vmatpush.bf16.msra.mxu2 %v14654_v33  ;;  %v14445_v33 = vld [vmem:[#allocation10 + $0x1198] sm:$0xf]  ;;  %v13358_v31 = vor.u32 %v18318_v55, %v13355_v23  ;;  %v14655_v20 = vld [vmem:[#allocation10 + $0x136c] sm:$0xf0]  ;;  %v18630_v55 = vld [vmem:[#allocation10 + $0x12d4] sm:$0xf] }
 0x362   :  { %5833 = vmatpush.bf16.msrb.mxu1 %v14030_v17  ;;  %v12994_v17 = vor.u32 %v18227_v59, %v12991_v63  ;;  %v14446_v24 = vor.u32 %v18597_v43, %v14445_v33  ;;  %v14289_v59 = vld [vmem:[#allocation10 + $0x1060] sm:$0xf]  ;;  %v18558_v63 = vld [vmem:[#allocation10 + $0x1090] sm:$0xf0]  ;;  %v14603_v23 = vld [vmem:[#allocation10 + $0x1304] sm:$0xf0] }
 0x363   :  { %5861 = vmatpush.bf16.msra.mxu3 %v14758_v7  ;;  %v18214_v7 = vld [vmem:[#allocation10 + $0x5d4] sm:$0xf]  ;;  %v14290_v43 = vor.u32 %v18558_v63, %v14289_v59  ;;  %v12945_v63 = vld [vmem:[#allocation10 + $0x5d8] sm:$0xf] }
 0x364   :  { %5874 = vmatpush.bf16.msra.mxu0 %v12266_v13  ;;  %v13667_v13 = vld [vmem:[#allocation10 + $0xbb4] sm:$0xf0]  ;;  %v12942_v21 = vor.u32 %v18214_v7, %v12939_v10  ;;  %v13927_v7 = vld [vmem:[#allocation10 + $0xdbc] sm:$0xf0] }
 0x365   :  { %5843 = vmatpush.bf16.msra.mxu2 %v14602_v45  ;;  %v18201_v45 = vld [vmem:[#allocation10 + $0x56c] sm:$0xf] }
 0x366   :  { %5834 = vmatpush.bf16.msrb.mxu1 %v13978_v35  ;;  %v13670_v35 = vor.u32 %v18396_v62, %v13667_v13 }
 0x367   :  { %5862 = vmatpush.bf16.msra.mxu3 %v14706_v41  ;;  %v13615_v41 = vld [vmem:[#allocation10 + $0xb4c] sm:$0xf0] }
 0x368   :  { %5875 = vmatpush.bf16.msra.mxu0 %v12214_v28  ;;  %v5591_v28 = vpop.f32.mrf.mxu2  ;;  %v20065_v42 = vpop.f32.mrf.mxu0  ;;  %v13618_v53 = vor.u32 %v18383_v60, %v13615_v41  ;;  %v13875_v60 = vld [vmem:[#allocation10 + $0xd54] sm:$0xf0]  ;;  %v18130_v41 = vld [vmem:[#allocation10 + $0x330] sm:$0xf0] }
 0x369   :  { %5844 = vmatpush.bf16.msra.mxu2 %v14550_v4  ;;  %v12835_v4 = vld [vmem:[#allocation10 + $0x534] sm:$0xf0] }
 0x36a   :  { %5835 = vmatpush.bf16.msrb.mxu1 %v13926_v34  ;;  %5863 = vmatmul.bf16.vlgmr.msra.gmra.mxu3 %v19882_v51  ;;  %v18188_v34 = vld [vmem:[#allocation10 + $0x504] sm:$0xf] }
 0x36b   :  { %5907 = vmatpush.bf16.msrb.mxu3 %v13826_v32  ;;  %5876 = vmatmul.bf16.vlgmr.msra.gmra.mxu0 %v19876_v19  ;;  %v12890_v32 = vor.u32 %v18201_v45, %v12887_v26  ;;  %v18344_v45 = vld [vmem:[#allocation10 + $0x9e4] sm:$0xf]  ;;  %v13459_v26 = vld [vmem:[#allocation10 + $0xa14] sm:$0xf0] }
 0x36c   :  { %5920 = vmatpush.bf16.msrb.mxu0 %v14242_v40  ;;  %v20063_v40 = vadd.f32 %v5591_v28, %v20054_v5  ;;  %v18175_v5 = vld [vmem:[#allocation10 + $0x49c] sm:$0xf]  ;;  %v18234_v28 = vld [vmem:[#allocation10 + $0x670] sm:$0xf0]  ;;  %v13462_v37 = vor.u32 %v18344_v45, %v13459_v26  ;;  %v12425_v45 = vld [vmem:[#allocation10 + $0x1c8] sm:$0xf] }
 0x36d   :  { %5845 = vmatpush.bf16.msra.mxu2 %v14498_v29  ;;  %v13982_v29 = vor.u32 %v18474_v57, %v13979_v46  ;;  %v20067_v33 = vpop.f32.mrf.mxu3  ;;  %v12786_v62 = vor.u32 %v18175_v5, %v12783_v9  ;;  %v12529_v57 = vld [vmem:[#allocation10 + $0x298] sm:$0xf]  ;;  %v18117_v46 = vld [vmem:[#allocation10 + $0x2c8] sm:$0xf0]  ;;  %v18091_v26 = vld [vmem:[#allocation10 + $0x1f8] sm:$0xf0] }
 0x36e   :  { %5836 = vmatpush.bf16.msrb.mxu1 %v13874_v3  ;;  %v13407_v3 = vld [vmem:[#allocation10 + $0x9ac] sm:$0xf0]  ;;  %v18221_v5 = vld [vmem:[#allocation10 + $0x608] sm:$0xf0]  ;;  %v12627_v9 = vld [vmem:[#allocation10 + $0x394] sm:$0xf0] }
 0x36f   :  { %5908 = vmatpush.bf16.msrb.mxu3 %v13774_v58  ;;  %v12838_v58 = vor.u32 %v18188_v34, %v12835_v4  ;;  %v13410_v13 = vor.u32 %v18331_v2, %v13407_v3  ;;  %v13303_v34 = vld [vmem:[#allocation10 + $0x8dc] sm:$0xf0]  ;;  %v18292_v2 = vld [vmem:[#allocation10 + $0x844] sm:$0xf]  ;;  %v13251_v3 = vld [vmem:[#allocation10 + $0x874] sm:$0xf0] }
 0x370   :  { %5921 = vmatpush.bf16.msrb.mxu0 %v14190_v0  ;;  %v13566_v0 = vor.u32 %v18370_v49, %v13563_v50  ;;  %v5671_v25 = vpop.f32.mrf.mxu0 }
 0x371   :  { %5837 = vmatmul.bf16.vlgmr.msrb.gmra.mxu1 %v19888_v16  ;;  %5846 = vmatpush.bf16.msra.mxu2 %v14446_v24  ;;  %v18162_v24 = vld [vmem:[#allocation10 + $0x434] sm:$0xf]  ;;  %v18279_v25 = vld [vmem:[#allocation10 + $0x7dc] sm:$0xf] }
 0x372   :  { %5881 = vmatpush.bf16.msra.mxu1 %v12994_v17  ;;  %v5630_v17 = vpop.f32.mrf.mxu1 }
 0x373   :  { %5909 = vmatpush.bf16.msrb.mxu3 %v13722_v6  ;;  %v18461_v6 = vld [vmem:[#allocation10 + $0xd8c] sm:$0xf]  ;;  %v20070_v10 = vadd.f32 %v5630_v17, %v20056_v15  ;;  %v12581_v15 = vld [vmem:[#allocation10 + $0x300] sm:$0xf]  ;;  %v12946_v17 = vor.u32 %v18221_v5, %v12945_v63  ;;  %v18604_v63 = vld [vmem:[#allocation10 + $0x1204] sm:$0xf] }
 0x374   :  { %5922 = vmatpush.bf16.msrb.mxu0 %v14138_v11  ;;  %v5593_v11 = vpop.f32.mrf.mxu2  ;;  %v14499_v5 = vld [vmem:[#allocation10 + $0x1234] sm:$0xf0] }
 0x375   :  { %5847 = vmatpush.bf16.msra.mxu2 %v14394_v47  ;;  %v5658_v50 = vpop.f32.mrf.mxu3  ;;  %v13254_v11 = vor.u32 %v18292_v2, %v13251_v3  ;;  %v18065_v2 = vld [vmem:[#allocation10 + $0x128] sm:$0xf0] }
 0x376   :  { %5882 = vmatpush.bf16.msra.mxu1 %v12942_v21  ;;  %v12731_v21 = vld [vmem:[#allocation10 + $0x464] sm:$0xf0] }
 0x377   :  { %5910 = vmatpush.bf16.msrb.mxu3 %v13670_v35  ;;  %v13930_v35 = vor.u32 %v18461_v6, %v13927_v7  ;;  %v12734_v47 = vor.u32 %v18162_v24, %v12731_v21  ;;  %v18104_v6 = vld [vmem:[#allocation10 + $0x260] sm:$0xf0]  ;;  %v14658_v24 = vor.u32 %v18643_v18, %v14655_v20  ;;  %v12737_v18 = vld [vmem:[#allocation10 + $0x438] sm:$0xf]  ;;  %v18169_v20 = vld [vmem:[#allocation10 + $0x468] sm:$0xf0] }
 0x378   :  { %5923 = vmatpush.bf16.msrb.mxu0 %v14086_v30  ;;  %v18448_v30 = vld [vmem:[#allocation10 + $0xd24] sm:$0xf] }
 0x379   :  { %5848 = vmatpush.bf16.msra.mxu2 %v14342_v52  ;;  %v13878_v4 = vor.u32 %v18448_v30, %v13875_v60  ;;  %v12998_v52 = vor.u32 %v18234_v28, %v12997_v48  ;;  %v12841_v60 = vld [vmem:[#allocation10 + $0x508] sm:$0xf]  ;;  %v12426_v48 = vor.u32 %v18091_v26, %v12425_v45  ;;  %v18617_v28 = vld [vmem:[#allocation10 + $0x126c] sm:$0xf]  ;;  %v18156_v45 = vld [vmem:[#allocation10 + $0x400] sm:$0xf0] }
 0x37a   :  { %5883 = vmatpush.bf16.msra.mxu1 %v12890_v32  ;;  %v18149_v32 = vld [vmem:[#allocation10 + $0x3cc] sm:$0xf]  ;;  %v5632_v49 = vpop.f32.mrf.mxu1 }
 0x37b   :  { %5911 = vmatpush.bf16.msrb.mxu3 %v13618_v53  ;;  %v18305_v53 = vld [vmem:[#allocation10 + $0x8ac] sm:$0xf] }
 0x37c   :  { %5924 = vmatpush.bf16.msrb.mxu0 %v14034_v44  ;;  %v12582_v44 = vor.u32 %v18130_v41, %v12581_v15  ;;  %v13306_v59 = vor.u32 %v18305_v53, %v13303_v34  ;;  %v18195_v15 = vld [vmem:[#allocation10 + $0x538] sm:$0xf0]  ;;  %v14606_v41 = vor.u32 %v18630_v55, %v14603_v23  ;;  %v18078_v53 = vld [vmem:[#allocation10 + $0x190] sm:$0xf0] }
 0x37d   :  { %5849 = vmatpush.bf16.msra.mxu2 %v14290_v43  ;;  %v12477_v43 = vld [vmem:[#allocation10 + $0x230] sm:$0xf] }
 0x37e   :  { %5884 = vmatpush.bf16.msra.mxu1 %v12838_v58  ;;  %v12682_v58 = vor.u32 %v18149_v32, %v12679_v39  ;;  %v12478_v21 = vor.u32 %v18104_v6, %v12477_v43  ;;  %v14551_v32 = vld [vmem:[#allocation10 + $0x129c] sm:$0xf0]  ;;  %v18240_v43 = vld [vmem:[#allocation10 + $0x6a4] sm:$0xf]  ;;  %v18591_v6 = vld [vmem:[#allocation10 + $0x119c] sm:$0xf] }
 0x37f   :  { %5912 = vmatpush.bf16.msrb.mxu3 %v13566_v0  ;;  %v18136_v0 = vld [vmem:[#allocation10 + $0x364] sm:$0xf]  ;;  %v12373_v39 = vld [vmem:[#allocation10 + $0x160] sm:$0xf]  ;;  %v14554_v50 = vor.u32 %v18617_v28, %v14551_v32  ;;  %v15019_v28 = vld [vmem:[#allocation10 + $0x1644] sm:$0xf0] }
 0x380   :  { %5925 = vmatpush.bf16.msrb.mxu0 %v13982_v29  ;;  %5850 = vmatmul.bf16.vlgmr.msra.gmra.mxu2 %v19895_v14  ;;  %v12530_v29 = vor.u32 %v18117_v46, %v12529_v57  ;;  %v12630_v7 = vor.u32 %v18136_v0, %v12627_v9  ;;  %v13095_v57 = vld [vmem:[#allocation10 + $0x73c] sm:$0xf0]  ;;  %v12321_v9 = vld [vmem:[#allocation10 + $0xf8] sm:$0xf] }
 0x381   :  { %5894 = vmatpush.bf16.msrb.mxu2 %v13410_v13  ;;  %v18208_v13 = vld [vmem:[#allocation10 + $0x5a0] sm:$0xf0] }
 0x382   :  { %5885 = vmatpush.bf16.msra.mxu1 %v12786_v62  ;;  %v12893_v62 = vld [vmem:[#allocation10 + $0x570] sm:$0xf] }
 0x383   :  { %5913 = vmatpush.bf16.msrb.mxu3 %v13514_v8  ;;  %v13199_v8 = vld [vmem:[#allocation10 + $0x80c] sm:$0xf0]  ;;  %v5643_v49 = vpop.f32.mrf.mxu2 }
 0x384   :  { %5926 = vmatpush.bf16.msrb.mxu0 %v13930_v35  ;;  %v12894_v35 = vor.u32 %v18208_v13, %v12893_v62  ;;  %v13202_v30 = vor.u32 %v18279_v25, %v13199_v8  ;;  %v5644_v46 = vadd.f32 %v5643_v49, %v20070_v10  ;;  %v13043_v10 = vld [vmem:[#allocation10 + $0x6d4] sm:$0xf0]  ;;  %v14447_v62 = vld [vmem:[#allocation10 + $0x11cc] sm:$0xf0]  ;;  %v18747_v13 = vld [vmem:[#allocation10 + $0x167c] sm:$0xf]  ;;  %v12738_v25 = vor.u32 %v18169_v20, %v12737_v18 }
 0x385   :  { %5895 = vmatpush.bf16.msrb.mxu2 %v13358_v31  ;;  %v13147_v31 = vld [vmem:[#allocation10 + $0x7a4] sm:$0xf0]  ;;  %v12269_v8 = vld [vmem:[#allocation10 + $0x90] sm:$0xf]  ;;  %v13046_v23 = vor.u32 %v18240_v43, %v13043_v10  ;;  %v14193_v20 = vld [vmem:[#allocation10 + $0xf98] sm:$0xf] }
 0x386   :  { %5886 = vmatpush.bf16.msra.mxu1 %v12734_v47  ;;  %v18266_v47 = vld [vmem:[#allocation10 + $0x774] sm:$0xf]  ;;  %v5657_v3 = vadd.f32 %v20067_v33, %v5644_v46  ;;  %v18052_v33 = vld [vmem:[#allocation10 + $0xc0] sm:$0xf0]  ;;  %v18565_v46 = vld [vmem:[#allocation10 + $0x10cc] sm:$0xf] }
 0x387   :  { %5914 = vmatpush.bf16.msrb.mxu3 %v13462_v37  ;;  %v12842_v37 = vor.u32 %v18195_v15, %v12841_v60  ;;  %v13150_v34 = vor.u32 %v18266_v47, %v13147_v31  ;;  %v18578_v15 = vld [vmem:[#allocation10 + $0x1134] sm:$0xf]  ;;  %v12270_v47 = vor.u32 %v18052_v33, %v12269_v8  ;;  %v14395_v31 = vld [vmem:[#allocation10 + $0x1164] sm:$0xf0]  ;;  %v13413_v8 = vld [vmem:[#allocation10 + $0x980] sm:$0xf] }
 0x388   :  { %5927 = vmatpush.bf16.msrb.mxu0 %v13878_v4  ;;  %v12789_v4 = vld [vmem:[#allocation10 + $0x4a0] sm:$0xf]  ;;  %v14398_v49 = vor.u32 %v18578_v15, %v14395_v31  ;;  %v18338_v33 = vld [vmem:[#allocation10 + $0x9b0] sm:$0xf0] }
 0x389   :  { %5896 = vmatpush.bf16.msrb.mxu2 %v13306_v59  ;;  %v12374_v59 = vor.u32 %v18078_v53, %v12373_v39  ;;  %v18039_v39 = vld [vmem:[#allocation10 + $0x58] sm:$0xf0]  ;;  %v12633_v53 = vld [vmem:[#allocation10 + $0x368] sm:$0xf]  ;;  %v13414_v15 = vor.u32 %v18338_v33, %v13413_v8  ;;  %v14401_v8 = vld [vmem:[#allocation10 + $0x1138] sm:$0xf] }
 0x38a   :  { %5887 = vmatpush.bf16.msra.mxu1 %v12682_v58  ;;  %5915 = vmatmul.bf16.vlgmr.msrb.gmra.mxu3 %v19872_v1  ;;  %v20077_v58 = vpop.f32.mrf.mxu0  ;;  %v18585_v33 = vld [vmem:[#allocation10 + $0x1168] sm:$0xf0] }
 0x38b   :  { %5959 = vmatpush.bf16.msra.mxu3 %v12582_v44  ;;  %5928 = vmatmul.bf16.vlgmr.msrb.gmra.mxu0 %v19888_v16  ;;  %v18182_v44 = vld [vmem:[#allocation10 + $0x4d0] sm:$0xf0] }
 0x38c   :  { %5972 = vmatpush.bf16.msra.mxu0 %v12998_v52  ;;  %v18253_v52 = vld [vmem:[#allocation10 + $0x70c] sm:$0xf]  ;;  %v12790_v0 = vor.u32 %v18182_v44, %v12789_v4  ;;  %v14245_v4 = vld [vmem:[#allocation10 + $0x1000] sm:$0xf]  ;;  %v18546_v44 = vld [vmem:[#allocation10 + $0x1030] sm:$0xf0] }
 0x38d   :  { %5897 = vmatpush.bf16.msrb.mxu2 %v13254_v11  ;;  %v12322_v11 = vor.u32 %v18065_v2, %v12321_v9  ;;  %v20081_v55 = vpop.f32.mrf.mxu3  ;;  %v14246_v2 = vor.u32 %v18546_v44, %v14245_v4  ;;  %v18611_v4 = vld [vmem:[#allocation10 + $0x1238] sm:$0xf0] }
 0x38e   :  { %5888 = vmatpush.bf16.msra.mxu1 %v12630_v7  ;;  %v5670_v7 = vadd.f32 %v20065_v42, %v5657_v3  ;;  %v14450_v42 = vor.u32 %v18591_v6, %v14447_v62  ;;  %v14609_v6 = vld [vmem:[#allocation10 + $0x12d8] sm:$0xf] }
 0x38f   :  { %5960 = vmatpush.bf16.msra.mxu3 %v12530_v29  ;;  %v13098_v29 = vor.u32 %v18253_v52, %v13095_v57  ;;  %v14661_v52 = vld [vmem:[#allocation10 + $0x1340] sm:$0xf]  ;;  %v18650_v57 = vld [vmem:[#allocation10 + $0x1370] sm:$0xf0]  ;;  %v14291_v62 = vld [vmem:[#allocation10 + $0x1094] sm:$0xf0] }
 0x390   :  { %5973 = vmatpush.bf16.msra.mxu0 %v12946_v17  ;;  %v14502_v17 = vor.u32 %v18604_v63, %v14499_v5  ;;  %v14343_v63 = vld [vmem:[#allocation10 + $0x10fc] sm:$0xf0]  ;;  %v18721_v5 = vld [vmem:[#allocation10 + $0x15ac] sm:$0xf]  ;;  %v14662_v18 = vor.u32 %v18650_v57, %v14661_v52  ;;  %v1334_v52 = vperm.slane %v20050_v36, 7 }
 0x391   :  { %5889 = vmatmul.bf16.vlgmr.msra.gmra.mxu1 %v19886_v12  ;;  %5898 = vmatpush.bf16.msrb.mxu2 %v13202_v30  ;;  %v5645_v30 = vpop.f32.mrf.mxu2  ;;  %v14346_v43 = vor.u32 %v18565_v46, %v14343_v63  ;;  %v13309_v46 = vld [vmem:[#allocation10 + $0x8b0] sm:$0xf] }
 0x392   :  { %5933 = vmatpush.bf16.msrb.mxu1 %v14658_v24  ;;  %v15071_v24 = vld [vmem:[#allocation10 + $0x16ac] sm:$0xf0] }
 0x393   :  { %5961 = vmatpush.bf16.msra.mxu3 %v12478_v21  ;;  %v5682_v21 = vpop.f32.mrf.mxu1  ;;  %v15074_v60 = vor.u32 %v18747_v13, %v15071_v24  ;;  %v18708_v13 = vld [vmem:[#allocation10 + $0x1544] sm:$0xf]  ;;  %v14915_v24 = vld [vmem:[#allocation10 + $0x1574] sm:$0xf0] }
 0x394   :  { %5974 = vmatpush.bf16.msra.mxu0 %v12894_v35  ;;  %v12685_v35 = vld [vmem:[#allocation10 + $0x3d0] sm:$0xf]  ;;  %v20083_v26 = vadd.f32 %v5682_v21, %v5670_v7  ;;  %v18637_v7 = vld [vmem:[#allocation10 + $0x1308] sm:$0xf0]  ;;  %v14918_v30 = vor.u32 %v18708_v13, %v14915_v24 }
 0x395   :  { %5899 = vmatpush.bf16.msrb.mxu2 %v13150_v34  ;;  %v12686_v32 = vor.u32 %v18156_v45, %v12685_v35  ;;  %v18143_v34 = vld [vmem:[#allocation10 + $0x398] sm:$0xf0]  ;;  %v14610_v21 = vor.u32 %v18637_v7, %v14609_v6  ;;  %v18520_v35 = vld [vmem:[#allocation10 + $0xf60] sm:$0xf0]  ;;  %v13257_v6 = vld [vmem:[#allocation10 + $0x848] sm:$0xf] }
 0x396   :  { %5934 = vmatpush.bf16.msrb.mxu1 %v14606_v41  ;;  %v5723_v41 = vpop.f32.mrf.mxu0  ;;  %v12634_v9 = vor.u32 %v18143_v34, %v12633_v53  ;;  %v14505_v34 = vld [vmem:[#allocation10 + $0x1208] sm:$0xf]  ;;  %v18299_v7 = vld [vmem:[#allocation10 + $0x878] sm:$0xf0]  ;;  %v18481_v13 = vld [vmem:[#allocation10 + $0xe28] sm:$0xf0] }
 0x397   :  { %5962 = vmatpush.bf16.msra.mxu3 %v12426_v48  ;;  %v18734_v48 = vld [vmem:[#allocation10 + $0x1614] sm:$0xf]  ;;  %v18695_v41 = vld [vmem:[#allocation10 + $0x14dc] sm:$0xf]  ;;  %v14506_v63 = vor.u32 %v18611_v4, %v14505_v34 }
 0x398   :  { %5975 = vmatpush.bf16.msra.mxu0 %v12842_v37  ;;  %v12217_v37 = vld [vmem:[#allocation10 + $0x28] sm:$0xf] }
 0x399   :  { %5900 = vmatpush.bf16.msrb.mxu2 %v13098_v29  ;;  %v5710_v29 = vpop.f32.mrf.mxu3 }
 0x39a   :  { %5935 = vmatpush.bf16.msrb.mxu1 %v14554_v50  ;;  %v15022_v50 = vor.u32 %v18734_v48, %v15019_v28  ;;  %v13361_v48 = vld [vmem:[#allocation10 + $0x918] sm:$0xf]  ;;  %v18325_v28 = vld [vmem:[#allocation10 + $0x948] sm:$0xf0] }
 0x39b   :  { %5963 = vmatpush.bf16.msra.mxu3 %v12374_v59  ;;  %v12218_v59 = vor.u32 %v18039_v39, %v12217_v37  ;;  %v5684_v3 = vpop.f32.mrf.mxu1  ;;  %v14089_v37 = vld [vmem:[#allocation10 + $0xec8] sm:$0xf]  ;;  %v18507_v39 = vld [vmem:[#allocation10 + $0xef8] sm:$0xf0]  ;;  %v13362_v44 = vor.u32 %v18325_v28, %v13361_v48 }
 0x39c   :  { %5976 = vmatpush.bf16.msra.mxu0 %v12790_v0  ;;  %v14967_v0 = vld [vmem:[#allocation10 + $0x15dc] sm:$0xf0]  ;;  %v14090_v57 = vor.u32 %v18507_v39, %v14089_v37  ;;  %v18598_v3 = vld [vmem:[#allocation10 + $0x11d0] sm:$0xf0]  ;;  %v14349_v37 = vld [vmem:[#allocation10 + $0x10d0] sm:$0xf] }
 0x39d   :  { %5901 = vmatpush.bf16.msrb.mxu2 %v13046_v23  ;;  %v14970_v10 = vor.u32 %v18721_v5, %v14967_v0  ;;  %v14141_v23 = vld [vmem:[#allocation10 + $0xf30] sm:$0xf]  ;;  %v14037_v5 = vld [vmem:[#allocation10 + $0xe60] sm:$0xf]  ;;  %v18494_v0 = vld [vmem:[#allocation10 + $0xe90] sm:$0xf0] }
 0x39e   :  { %5936 = vmatpush.bf16.msrb.mxu1 %v14502_v17  ;;  %v18533_v17 = vld [vmem:[#allocation10 + $0xfc8] sm:$0xf0]  ;;  %v14142_v31 = vor.u32 %v18520_v35, %v14141_v23  ;;  %v18656_v23 = vld [vmem:[#allocation10 + $0x13a4] sm:$0xf]  ;;  %v14707_v35 = vld [vmem:[#allocation10 + $0x13d4] sm:$0xf0] }
 0x39f   :  { %5964 = vmatpush.bf16.msra.mxu3 %v12322_v11  ;;  %v18552_v11 = vld [vmem:[#allocation10 + $0x1064] sm:$0xf] }
 0x3a0   :  { %5977 = vmatpush.bf16.msra.mxu0 %v12738_v25  ;;  %5902 = vmatmul.bf16.vlgmr.msrb.gmra.mxu2 %v19870_v61  ;;  %v14194_v25 = vor.u32 %v18533_v17, %v14193_v20  ;;  %v14294_v45 = vor.u32 %v18552_v11, %v14291_v62  ;;  %v18669_v20 = vld [vmem:[#allocation10 + $0x140c] sm:$0xf]  ;;  %v14759_v17 = vld [vmem:[#allocation10 + $0x143c] sm:$0xf0]  ;;  %v13985_v62 = vld [vmem:[#allocation10 + $0xdf8] sm:$0xf] }
 0x3a1   :  { %5946 = vmatpush.bf16.msra.mxu2 %v15074_v60  ;;  %v18624_v60 = vld [vmem:[#allocation10 + $0x12a0] sm:$0xf0] }
 0x3a2   :  { %5937 = vmatpush.bf16.msrb.mxu1 %v14450_v42  ;;  %v14557_v42 = vld [vmem:[#allocation10 + $0x1270] sm:$0xf]  ;;  %v18572_v39 = vld [vmem:[#allocation10 + $0x1100] sm:$0xf0] }
 0x3a3   :  { %5965 = vmatpush.bf16.msra.mxu3 %v12270_v47  ;;  %v14863_v47 = vld [vmem:[#allocation10 + $0x150c] sm:$0xf0]  ;;  %v5695_v29 = vpop.f32.mrf.mxu2 }
 0x3a4   :  { %5978 = vmatpush.bf16.msra.mxu0 %v12686_v32  ;;  %v14558_v32 = vor.u32 %v18624_v60, %v14557_v42  ;;  %v14866_v53 = vor.u32 %v18695_v41, %v14863_v47  ;;  %v13986_v42 = vor.u32 %v18481_v13, %v13985_v62  ;;  %v18286_v60 = vld [vmem:[#allocation10 + $0x810] sm:$0xf0]  ;;  %v14402_v47 = vor.u32 %v18585_v33, %v14401_v8  ;;  %v18215_v33 = vld [vmem:[#allocation10 + $0x5dc] sm:$0xf] }
 0x3a5   :  { %5947 = vmatpush.bf16.msra.mxu2 %v15022_v50  ;;  %v14811_v50 = vld [vmem:[#allocation10 + $0x14a4] sm:$0xf0]  ;;  %v18442_v41 = vld [vmem:[#allocation10 + $0xcf0] sm:$0xf0] }
 0x3a6   :  { %5938 = vmatpush.bf16.msrb.mxu1 %v14398_v49  ;;  %v18682_v49 = vld [vmem:[#allocation10 + $0x1474] sm:$0xf] }
 0x3a7   :  { %5966 = vmatpush.bf16.msra.mxu3 %v12218_v59  ;;  %v18312_v59 = vld [vmem:[#allocation10 + $0x8e0] sm:$0xf0] }
 0x3a8   :  { %5979 = vmatpush.bf16.msra.mxu0 %v12634_v9  ;;  %v14814_v9 = vor.u32 %v18682_v49, %v14811_v50  ;;  %v20090_v36 = vpop.f32.mrf.mxu0 }
 0x3a9   :  { %5948 = vmatpush.bf16.msra.mxu2 %v14970_v10  ;;  %v14038_v10 = vor.u32 %v18494_v0, %v14037_v5  ;;  %v18455_v5 = vld [vmem:[#allocation10 + $0xd58] sm:$0xf0]  ;;  %v14297_v0 = vld [vmem:[#allocation10 + $0x1068] sm:$0xf] }
 0x3aa   :  { %5939 = vmatpush.bf16.msrb.mxu1 %v14346_v43  ;;  %5967 = vmatmul.bf16.vlgmr.msra.gmra.mxu3 %v19876_v19  ;;  %v5696_v43 = vadd.f32 %v5695_v29, %v1334_v52  ;;  %v18273_v52 = vld [vmem:[#allocation10 + $0x7a8] sm:$0xf0] }
 0x3ab   :  { %6011 = vmatpush.bf16.msrb.mxu3 %v14246_v2  ;;  %5980 = vmatmul.bf16.vlgmr.msra.gmra.mxu0 %v19886_v12  ;;  %v14453_v2 = vld [vmem:[#allocation10 + $0x11a0] sm:$0xf]  ;;  %v5697_v34 = vpop.f32.mrf.mxu2 }
 0x3ac   :  { %6024 = vmatpush.bf16.msrb.mxu0 %v14662_v18  ;;  %v13310_v18 = vor.u32 %v18312_v59, %v13309_v46  ;;  %v14454_v11 = vor.u32 %v18598_v3, %v14453_v2  ;;  %v5709_v24 = vadd.f32 %v20081_v55, %v5696_v43  ;;  %v18468_v55 = vld [vmem:[#allocation10 + $0xdc0] sm:$0xf0]  ;;  %v18429_v46 = vld [vmem:[#allocation10 + $0xc88] sm:$0xf0]  ;;  %v14350_v59 = vor.u32 %v18572_v39, %v14349_v37  ;;  %v12999_v3 = vld [vmem:[#allocation10 + $0x674] sm:$0xf0] }
 0x3ad   :  { %5949 = vmatpush.bf16.msra.mxu2 %v14918_v30  ;;  %v20094_v28 = vpop.f32.mrf.mxu3  ;;  %v18228_v2 = vld [vmem:[#allocation10 + $0x644] sm:$0xf]  ;;  %v13101_v43 = vld [vmem:[#allocation10 + $0x710] sm:$0xf]  ;;  %v12895_v37 = vld [vmem:[#allocation10 + $0x5a4] sm:$0xf0] }
 0x3ae   :  { %5940 = vmatpush.bf16.msrb.mxu1 %v14294_v45  ;;  %v13205_v45 = vld [vmem:[#allocation10 + $0x7e0] sm:$0xf]  ;;  %v5722_v30 = vadd.f32 %v20077_v58, %v5709_v24  ;;  %v5734_v48 = vpop.f32.mrf.mxu1  ;;  %v13002_v13 = vor.u32 %v18228_v2, %v12999_v3 }
 0x3af   :  { %6012 = vmatpush.bf16.msrb.mxu3 %v14194_v25  ;;  %v14762_v25 = vor.u32 %v18669_v20, %v14759_v17  ;;  %v13206_v58 = vor.u32 %v18286_v60, %v13205_v45  ;;  %v18332_v20 = vld [vmem:[#allocation10 + $0x984] sm:$0xf]  ;;  %v13415_v17 = vld [vmem:[#allocation10 + $0x9b4] sm:$0xf0]  ;;  %v18319_v45 = vld [vmem:[#allocation10 + $0x91c] sm:$0xf] }
 0x3b0   :  { %6025 = vmatpush.bf16.msrb.mxu0 %v14610_v21  ;;  %v13258_v21 = vor.u32 %v18299_v7, %v13257_v6  ;;  %v5775_v49 = vpop.f32.mrf.mxu0  ;;  %v18260_v6 = vld [vmem:[#allocation10 + $0x740] sm:$0xf0]  ;;  %v13725_v7 = vld [vmem:[#allocation10 + $0xbf0] sm:$0xf]  ;;  %v13418_v8 = vor.u32 %v18332_v20, %v13415_v17  ;;  %v18247_v60 = vld [vmem:[#allocation10 + $0x6d8] sm:$0xf0] }
 0x3b1   :  { %5941 = vmatmul.bf16.vlgmr.msrb.gmra.mxu1 %v19895_v14  ;;  %5950 = vmatpush.bf16.msra.mxu2 %v14866_v53  ;;  %v20096_v53 = vadd.f32 %v5734_v48, %v5722_v30  ;;  %v13363_v30 = vld [vmem:[#allocation10 + $0x94c] sm:$0xf0]  ;;  %v13621_v49 = vld [vmem:[#allocation10 + $0xb20] sm:$0xf] }
 0x3b2   :  { %5985 = vmatpush.bf16.msra.mxu1 %v13414_v15  ;;  %v13829_v15 = vld [vmem:[#allocation10 + $0xcc0] sm:$0xf]  ;;  %v13366_v48 = vor.u32 %v18319_v45, %v13363_v30  ;;  %v14973_v17 = vld [vmem:[#allocation10 + $0x15b0] sm:$0xf]  ;;  %v14921_v45 = vld [vmem:[#allocation10 + $0x1548] sm:$0xf] }
 0x3b3   :  { %6013 = vmatpush.bf16.msrb.mxu3 %v14142_v31  ;;  %v13933_v31 = vld [vmem:[#allocation10 + $0xd90] sm:$0xf]  ;;  %v13830_v4 = vor.u32 %v18442_v41, %v13829_v15  ;;  %v13673_v15 = vld [vmem:[#allocation10 + $0xb88] sm:$0xf]  ;;  %v18403_v41 = vld [vmem:[#allocation10 + $0xbb8] sm:$0xf0] }
 0x3b4   :  { %6026 = vmatpush.bf16.msrb.mxu0 %v14558_v32  ;;  %v14710_v32 = vor.u32 %v18656_v23, %v14707_v35  ;;  %v13934_v50 = vor.u32 %v18468_v55, %v13933_v31  ;;  %v13102_v23 = vor.u32 %v18260_v6, %v13101_v43  ;;  %v15077_v31 = vld [vmem:[#allocation10 + $0x1680] sm:$0xf]  ;;  %v18754_v55 = vld [vmem:[#allocation10 + $0x16b0] sm:$0xf0]  ;;  %v13674_v34 = vor.u32 %v18403_v41, %v13673_v15  ;;  %v18728_v43 = vld [vmem:[#allocation10 + $0x15e0] sm:$0xf0] }
 0x3b5   :  { %5951 = vmatpush.bf16.msra.mxu2 %v14814_v9  ;;  %v18559_v9 = vld [vmem:[#allocation10 + $0x1098] sm:$0xf0]  ;;  %v13259_v2 = vld [vmem:[#allocation10 + $0x87c] sm:$0xf0]  ;;  %v18176_v6 = vld [vmem:[#allocation10 + $0x4a4] sm:$0xf] }
 0x3b6   :  { %5986 = vmatpush.bf16.msra.mxu1 %v13362_v44  ;;  %v13153_v44 = vld [vmem:[#allocation10 + $0x778] sm:$0xf]  ;;  %v14298_v62 = vor.u32 %v18559_v9, %v14297_v0  ;;  %v5736_v24 = vpop.f32.mrf.mxu1  ;;  %v18293_v9 = vld [vmem:[#allocation10 + $0x84c] sm:$0xf]  ;;  %v18715_v30 = vld [vmem:[#allocation10 + $0x1578] sm:$0xf0] }
 0x3b7   :  { %6014 = vmatpush.bf16.msrb.mxu3 %v14090_v57  ;;  %v13777_v57 = vld [vmem:[#allocation10 + $0xc58] sm:$0xf]  ;;  %v13154_v29 = vor.u32 %v18273_v52, %v13153_v44  ;;  %v15078_v44 = vor.u32 %v18754_v55, %v15077_v31  ;;  %v12739_v15 = vld [vmem:[#allocation10 + $0x46c] sm:$0xf0]  ;;  %v18267_v31 = vld [vmem:[#allocation10 + $0x77c] sm:$0xf] }
 0x3b8   :  { %6027 = vmatpush.bf16.msrb.mxu0 %v14506_v63  ;;  %v13881_v63 = vld [vmem:[#allocation10 + $0xd28] sm:$0xf]  ;;  %v13155_v55 = vld [vmem:[#allocation10 + $0x7ac] sm:$0xf0] }
 0x3b9   :  { %5952 = vmatpush.bf16.msra.mxu2 %v14762_v25  ;;  %v5762_v25 = vpop.f32.mrf.mxu3 }
 0x3ba   :  { %5987 = vmatpush.bf16.msra.mxu1 %v13310_v18  ;;  %v13778_v18 = vor.u32 %v18429_v46, %v13777_v57  ;;  %v15025_v57 = vld [vmem:[#allocation10 + $0x1618] sm:$0xf]  ;;  %v18741_v46 = vld [vmem:[#allocation10 + $0x1648] sm:$0xf0]  ;;  %v14974_v25 = vor.u32 %v18728_v43, %v14973_v17 }
 0x3bb   :  { %6015 = vmatpush.bf16.msrb.mxu3 %v14038_v10  ;;  %v13882_v10 = vor.u32 %v18455_v5, %v13881_v63  ;;  %v18189_v63 = vld [vmem:[#allocation10 + $0x50c] sm:$0xf]  ;;  %v12843_v5 = vld [vmem:[#allocation10 + $0x53c] sm:$0xf0]  ;;  %v15026_v3 = vor.u32 %v18741_v46, %v15025_v57 }
 0x3bc   :  { %6028 = vmatpush.bf16.msrb.mxu0 %v14454_v11  ;;  %v18416_v11 = vld [vmem:[#allocation10 + $0xc20] sm:$0xf0]  ;;  %v12846_v20 = vor.u32 %v18189_v63, %v12843_v5  ;;  %v13103_v63 = vld [vmem:[#allocation10 + $0x744] sm:$0xf0]  ;;  %v18137_v43 = vld [vmem:[#allocation10 + $0x36c] sm:$0xf] }
 0x3bd   :  { %5953 = vmatpush.bf16.msra.mxu2 %v14710_v32  ;;  %v13726_v35 = vor.u32 %v18416_v11, %v13725_v7  ;;  %v18202_v32 = vld [vmem:[#allocation10 + $0x574] sm:$0xf]  ;;  %v12791_v7 = vld [vmem:[#allocation10 + $0x4d4] sm:$0xf0] }
 0x3be   :  { %5988 = vmatpush.bf16.msra.mxu1 %v13258_v21  ;;  %v12947_v21 = vld [vmem:[#allocation10 + $0x60c] sm:$0xf0]  ;;  %v12898_v52 = vor.u32 %v18202_v32, %v12895_v37  ;;  %v13465_v32 = vld [vmem:[#allocation10 + $0x9e8] sm:$0xf]  ;;  %v14869_v37 = vld [vmem:[#allocation10 + $0x14e0] sm:$0xf] }
 0x3bf   :  { %6016 = vmatpush.bf16.msrb.mxu3 %v13986_v42  ;;  %v13049_v42 = vld [vmem:[#allocation10 + $0x6a8] sm:$0xf] }
 0x3c0   :  { %6029 = vmatpush.bf16.msrb.mxu0 %v14402_v47  ;;  %5954 = vmatmul.bf16.vlgmr.msra.gmra.mxu2 %v19882_v51  ;;  %v12950_v47 = vor.u32 %v18215_v33, %v12947_v21  ;;  %v13050_v39 = vor.u32 %v18247_v60, %v13049_v42  ;;  %v18364_v33 = vld [vmem:[#allocation10 + $0xa80] sm:$0xf0]  ;;  %v18163_v60 = vld [vmem:[#allocation10 + $0x43c] sm:$0xf] }
 0x3c1   :  { %5998 = vmatpush.bf16.msrb.mxu2 %v13830_v4  ;;  %v13311_v4 = vld [vmem:[#allocation10 + $0x8e4] sm:$0xf0] }
 0x3c2   :  { %5989 = vmatpush.bf16.msra.mxu1 %v13206_v58  ;;  %v18306_v58 = vld [vmem:[#allocation10 + $0x8b4] sm:$0xf] }
 0x3c3   :  { %6017 = vmatpush.bf16.msrb.mxu3 %v13934_v50  ;;  %v18390_v50 = vld [vmem:[#allocation10 + $0xb50] sm:$0xf0]  ;;  %v5747_v24 = vpop.f32.mrf.mxu2 }
 0x3c4   :  { %6030 = vmatpush.bf16.msrb.mxu0 %v14350_v59  ;;  %v13314_v59 = vor.u32 %v18306_v58, %v13311_v4  ;;  %v13622_v0 = vor.u32 %v18390_v50, %v13621_v49  ;;  %v5748_v21 = vadd.f32 %v5747_v24, %v20096_v53  ;;  %v18351_v53 = vld [vmem:[#allocation10 + $0xa18] sm:$0xf0]  ;;  %v18702_v58 = vld [vmem:[#allocation10 + $0x1510] sm:$0xf0]  ;;  %v18124_v4 = vld [vmem:[#allocation10 + $0x304] sm:$0xf]  ;;  %v13158_v49 = vor.u32 %v18267_v31, %v13155_v55 }
 0x3c5   :  { %5999 = vmatpush.bf16.msrb.mxu2 %v13778_v18  ;;  %v18377_v18 = vld [vmem:[#allocation10 + $0xae8] sm:$0xf0]  ;;  %v12687_v50 = vld [vmem:[#allocation10 + $0x404] sm:$0xf0]  ;;  %v13466_v46 = vor.u32 %v18351_v53, %v13465_v32  ;;  %v18631_v31 = vld [vmem:[#allocation10 + $0x12dc] sm:$0xf] }
 0x3c6   :  { %5990 = vmatpush.bf16.msra.mxu1 %v13154_v29  ;;  %v13569_v29 = vld [vmem:[#allocation10 + $0xab8] sm:$0xf]  ;;  %v5761_v41 = vadd.f32 %v20094_v28, %v5748_v21  ;;  %v18150_v28 = vld [vmem:[#allocation10 + $0x3d4] sm:$0xf]  ;;  %v14611_v55 = vld [vmem:[#allocation10 + $0x130c] sm:$0xf0] }
 0x3c7   :  { %6018 = vmatpush.bf16.msrb.mxu3 %v13882_v10  ;;  %v13262_v10 = vor.u32 %v18293_v9, %v13259_v2  ;;  %v13570_v11 = vor.u32 %v18377_v18, %v13569_v29  ;;  %v14817_v9 = vld [vmem:[#allocation10 + $0x1478] sm:$0xf]  ;;  %v18689_v29 = vld [vmem:[#allocation10 + $0x14a8] sm:$0xf0]  ;;  %v18111_v18 = vld [vmem:[#allocation10 + $0x29c] sm:$0xf] }
 0x3c8   :  { %6031 = vmatpush.bf16.msrb.mxu0 %v14298_v62  ;;  %v18280_v62 = vld [vmem:[#allocation10 + $0x7e4] sm:$0xf]  ;;  %v18735_v53 = vld [vmem:[#allocation10 + $0x161c] sm:$0xf] }
 0x3c9   :  { %6000 = vmatpush.bf16.msrb.mxu2 %v13726_v35  ;;  %v12794_v35 = vor.u32 %v18176_v6, %v12791_v7  ;;  %v18241_v6 = vld [vmem:[#allocation10 + $0x6ac] sm:$0xf]  ;;  %v13051_v7 = vld [vmem:[#allocation10 + $0x6dc] sm:$0xf0] }
 0x3ca   :  { %5991 = vmatpush.bf16.msra.mxu1 %v13102_v23  ;;  %6019 = vmatmul.bf16.vlgmr.msrb.gmra.mxu3 %v19888_v16  ;;  %v20103_v23 = vpop.f32.mrf.mxu0 }
 0x3cb   :  { %6063 = vmatpush.bf16.msra.mxu3 %v13002_v13  ;;  %6032 = vmatmul.bf16.vlgmr.msrb.gmra.mxu0 %v19895_v14  ;;  %v13207_v13 = vld [vmem:[#allocation10 + $0x814] sm:$0xf0]  ;;  %v5749_v5 = vpop.f32.mrf.mxu2 }
 0x3cc   :  { %6076 = vmatpush.bf16.msra.mxu0 %v13418_v8  ;;  %v13517_v8 = vld [vmem:[#allocation10 + $0xa50] sm:$0xf]  ;;  %v13210_v42 = vor.u32 %v18280_v62, %v13207_v13  ;;  %v14663_v62 = vld [vmem:[#allocation10 + $0x1374] sm:$0xf0]  ;;  %v14818_v13 = vor.u32 %v18689_v29, %v14817_v9  ;;  %v14975_v9 = vld [vmem:[#allocation10 + $0x15e4] sm:$0xf0] }
 0x3cd   :  { %6001 = vmatpush.bf16.msrb.mxu2 %v13674_v34  ;;  %v12742_v34 = vor.u32 %v18163_v60, %v12739_v15  ;;  %v20111_v57 = vpop.f32.mrf.mxu3  ;;  %v18072_v29 = vld [vmem:[#allocation10 + $0x164] sm:$0xf] }
 0x3ce   :  { %5992 = vmatpush.bf16.msra.mxu1 %v13050_v39  ;;  %v20107_v39 = vadd.f32 %v20090_v36, %v5761_v41  ;;  %v14870_v36 = vor.u32 %v18702_v58, %v14869_v37  ;;  %v15027_v37 = vld [vmem:[#allocation10 + $0x164c] sm:$0xf0]  ;;  %v18663_v58 = vld [vmem:[#allocation10 + $0x13d8] sm:$0xf0] }
 0x3cf   :  { %6064 = vmatpush.bf16.msra.mxu3 %v12950_v47  ;;  %v13518_v47 = vor.u32 %v18364_v33, %v13517_v8  ;;  %v15079_v8 = vld [vmem:[#allocation10 + $0x16b4] sm:$0xf0]  ;;  %v14765_v33 = vld [vmem:[#allocation10 + $0x1410] sm:$0xf] }
 0x3d0   :  { %6077 = vmatpush.bf16.msra.mxu0 %v13366_v48  ;;  %v14922_v48 = vor.u32 %v18715_v30, %v14921_v45  ;;  %v18098_v45 = vld [vmem:[#allocation10 + $0x234] sm:$0xf]  ;;  %v12479_v30 = vld [vmem:[#allocation10 + $0x264] sm:$0xf0] }
 0x3d1   :  { %5993 = vmatmul.bf16.vlgmr.msra.gmra.mxu1 %v19870_v61  ;;  %6002 = vmatpush.bf16.msrb.mxu2 %v13622_v0  ;;  %v12482_v32 = vor.u32 %v18098_v45, %v12479_v30  ;;  %v13727_v45 = vld [vmem:[#allocation10 + $0xc24] sm:$0xf0] }
 0x3d2   :  { %6037 = vmatpush.bf16.msrb.mxu1 %v15078_v44  ;;  %v12583_v44 = vld [vmem:[#allocation10 + $0x334] sm:$0xf0]  ;;  %v5827_v2 = vpop.f32.mrf.mxu0 }
 0x3d3   :  { %6065 = vmatpush.bf16.msra.mxu3 %v12898_v52  ;;  %v20109_v52 = vpop.f32.mrf.mxu1  ;;  %v12586_v0 = vor.u32 %v18124_v4, %v12583_v44  ;;  %v18085_v4 = vld [vmem:[#allocation10 + $0x1cc] sm:$0xf]  ;;  %v12427_v44 = vld [vmem:[#allocation10 + $0x1fc] sm:$0xf0] }
 0x3d4   :  { %6078 = vmatpush.bf16.msra.mxu0 %v13314_v59  ;;  %v18254_v59 = vld [vmem:[#allocation10 + $0x714] sm:$0xf]  ;;  %v20114_v2 = vld [vmem:[#allocation12 + $0x8] sm:$0x1f] }
 0x3d5   :  { %6003 = vmatpush.bf16.msrb.mxu2 %v13570_v11  ;;  %v13106_v17 = vor.u32 %v18254_v59, %v13103_v63  ;;  %v18644_v11 = vld [vmem:[#allocation10 + $0x1344] sm:$0xf]  ;;  %v5814_v41 = vpop.f32.mrf.mxu3  ;;  %v18618_v59 = vld [vmem:[#allocation10 + $0x1274] sm:$0xf]  ;;  %v14559_v63 = vld [vmem:[#allocation10 + $0x12a4] sm:$0xf0] }
 0x3d6   :  { %6038 = vmatpush.bf16.msrb.mxu1 %v15026_v3  ;;  %v12690_v3 = vor.u32 %v18150_v28, %v12687_v50  ;;  %v14666_v60 = vor.u32 %v18644_v11, %v14663_v62  ;;  %v18436_v28 = vld [vmem:[#allocation10 + $0xcc4] sm:$0xf]  ;;  %v13831_v50 = vld [vmem:[#allocation10 + $0xcf4] sm:$0xf0]  ;;  %v1335_v11 = vperm.slane %v20114_v2, 0 }
 0x3d7   :  { %6066 = vmatpush.bf16.msra.mxu3 %v12846_v20  ;;  %v12531_v20 = vld [vmem:[#allocation10 + $0x2cc] sm:$0xf0] }
 0x3d8   :  { %6079 = vmatpush.bf16.msra.mxu0 %v13262_v10  ;;  %v12635_v10 = vld [vmem:[#allocation10 + $0x39c] sm:$0xf0]  ;;  %v12534_v24 = vor.u32 %v18111_v18, %v12531_v20  ;;  %v12375_v18 = vld [vmem:[#allocation10 + $0x194] sm:$0xf0]  ;;  %v14562_v20 = vor.u32 %v18618_v59, %v14559_v63  ;;  %v18683_v59 = vld [vmem:[#allocation10 + $0x147c] sm:$0xf] }
 0x3d9   :  { %6004 = vmatpush.bf16.msrb.mxu2 %v13518_v47  ;;  %v12638_v21 = vor.u32 %v18137_v43, %v12635_v10  ;;  %v13779_v43 = vld [vmem:[#allocation10 + $0xc8c] sm:$0xf0]  ;;  %v12378_v62 = vor.u32 %v18072_v29, %v12375_v18  ;;  %v13623_v18 = vld [vmem:[#allocation10 + $0xb54] sm:$0xf0] }
 0x3da   :  { %6039 = vmatpush.bf16.msrb.mxu1 %v14974_v25  ;;  %v18748_v25 = vld [vmem:[#allocation10 + $0x1684] sm:$0xf]  ;;  %v14819_v63 = vld [vmem:[#allocation10 + $0x14ac] sm:$0xf0] }
 0x3db   :  { %6067 = vmatpush.bf16.msra.mxu3 %v12794_v35  ;;  %v18676_v35 = vld [vmem:[#allocation10 + $0x1440] sm:$0xf0]  ;;  %v5788_v15 = vpop.f32.mrf.mxu1  ;;  %v15082_v47 = vor.u32 %v18748_v25, %v15079_v8  ;;  %v18059_v8 = vld [vmem:[#allocation10 + $0xfc] sm:$0xf] }
 0x3dc   :  { %6080 = vmatpush.bf16.msra.mxu0 %v13210_v42  ;;  %v13054_v42 = vor.u32 %v18241_v6, %v13051_v7  ;;  %v18605_v6 = vld [vmem:[#allocation10 + $0x120c] sm:$0xf]  ;;  %v14507_v7 = vld [vmem:[#allocation10 + $0x123c] sm:$0xf0]  ;;  %v5787_v15 = vadd.f32 %v20109_v52, %v1335_v11  ;;  %v14403_v52 = vld [vmem:[#allocation10 + $0x116c] sm:$0xf0] }
 0x3dd   :  { %6005 = vmatpush.bf16.msrb.mxu2 %v13466_v46  ;;  %v15030_v46 = vor.u32 %v18735_v53, %v15027_v37  ;;  %v12271_v53 = vld [vmem:[#allocation10 + $0xc4] sm:$0xf0] }
 0x3de   :  { %6040 = vmatpush.bf16.msrb.mxu1 %v14922_v48  ;;  %v14766_v48 = vor.u32 %v18676_v35, %v14765_v33  ;;  %v12323_v33 = vld [vmem:[#allocation10 + $0x12c] sm:$0xf0]  ;;  %v18410_v35 = vld [vmem:[#allocation10 + $0xbf4] sm:$0xf] }
 0x3df   :  { %6068 = vmatpush.bf16.msra.mxu3 %v12742_v34  ;;  %v14713_v34 = vld [vmem:[#allocation10 + $0x13a8] sm:$0xf]  ;;  %v12326_v41 = vor.u32 %v18059_v8, %v12323_v33  ;;  %v18371_v33 = vld [vmem:[#allocation10 + $0xabc] sm:$0xf] }
 0x3e0   :  { %6081 = vmatpush.bf16.msra.mxu0 %v13158_v49  ;;  %6006 = vmatmul.bf16.vlgmr.msrb.gmra.mxu2 %v19872_v1  ;;  %v14614_v49 = vor.u32 %v18631_v31, %v14611_v55  ;;  %v14714_v5 = vor.u32 %v18663_v58, %v14713_v34  ;;  %v14871_v31 = vld [vmem:[#allocation10 + $0x1514] sm:$0xf0] }
 0x3e1   :  { %6050 = vmatpush.bf16.msra.mxu2 %v12586_v0  ;;  %v18722_v0 = vld [vmem:[#allocation10 + $0x15b4] sm:$0xf] }
 0x3e2   :  { %6041 = vmatpush.bf16.msrb.mxu1 %v14870_v36  ;;  %v12430_v36 = vor.u32 %v18085_v4, %v12427_v44  ;;  %v14978_v10 = vor.u32 %v18722_v0, %v14975_v9  ;;  %v18397_v4 = vld [vmem:[#allocation10 + $0xb8c] sm:$0xf]  ;;  %v13675_v44 = vld [vmem:[#allocation10 + $0xbbc] sm:$0xf0]  ;;  %v18384_v9 = vld [vmem:[#allocation10 + $0xb24] sm:$0xf] }
 0x3e3   :  { %6069 = vmatpush.bf16.msra.mxu3 %v12690_v3  ;;  %v13834_v3 = vor.u32 %v18436_v28, %v13831_v50  ;;  %v5799_v55 = vpop.f32.mrf.mxu2  ;;  %v18579_v28 = vld [vmem:[#allocation10 + $0x113c] sm:$0xf]  ;;  %v12219_v0 = vld [vmem:[#allocation10 + $0x5c] sm:$0xf0] }
 0x3e4   :  { %6082 = vmatpush.bf16.msra.mxu0 %v13106_v17  ;;  %v18423_v17 = vld [vmem:[#allocation10 + $0xc5c] sm:$0xf]  ;;  %v5800_v37 = vadd.f32 %v5799_v55, %v5787_v15  ;;  %v14406_v29 = vor.u32 %v18579_v28, %v14403_v52  ;;  %v18553_v15 = vld [vmem:[#allocation10 + $0x106c] sm:$0xf]  ;;  %v13421_v55 = vld [vmem:[#allocation10 + $0x988] sm:$0xf] }
 0x3e5   :  { %6051 = vmatpush.bf16.msra.mxu2 %v12534_v24  ;;  %v14923_v24 = vld [vmem:[#allocation10 + $0x157c] sm:$0xf0]  ;;  %v13782_v25 = vor.u32 %v18423_v17, %v13779_v43  ;;  %v14247_v17 = vld [vmem:[#allocation10 + $0x1034] sm:$0xf0]  ;;  %v14822_v43 = vor.u32 %v18683_v59, %v14819_v63  ;;  %v18514_v28 = vld [vmem:[#allocation10 + $0xf34] sm:$0xf] }
 0x3e6   :  { %6042 = vmatpush.bf16.msrb.mxu1 %v14818_v13  ;;  %v18709_v13 = vld [vmem:[#allocation10 + $0x154c] sm:$0xf]  ;;  %v5813_v50 = vadd.f32 %v20111_v57, %v5800_v37  ;;  %v14351_v57 = vld [vmem:[#allocation10 + $0x1104] sm:$0xf0] }
 0x3e7   :  { %6070 = vmatpush.bf16.msra.mxu3 %v12638_v21  ;;  %v14510_v21 = vor.u32 %v18605_v6, %v14507_v7  ;;  %v14926_v30 = vor.u32 %v18709_v13, %v14923_v24  ;;  %v14767_v13 = vld [vmem:[#allocation10 + $0x1444] sm:$0xf0] }
 0x3e8   :  { %6083 = vmatpush.bf16.msra.mxu0 %v13054_v42  ;;  %v18592_v42 = vld [vmem:[#allocation10 + $0x11a4] sm:$0xf]  ;;  %v20121_v34 = vpop.f32.mrf.mxu0  ;;  %v13837_v37 = vld [vmem:[#allocation10 + $0xcc8] sm:$0xf] }
 0x3e9   :  { %6052 = vmatpush.bf16.msra.mxu2 %v12482_v32  ;;  %v18046_v32 = vld [vmem:[#allocation10 + $0x94] sm:$0xf]  ;;  %v14143_v52 = vld [vmem:[#allocation10 + $0xf64] sm:$0xf0] }
 0x3ea   :  { %6043 = vmatpush.bf16.msrb.mxu1 %v14766_v48  ;;  %6071 = vmatmul.bf16.vlgmr.msra.gmra.mxu3 %v19886_v12  ;;  %v13730_v48 = vor.u32 %v18410_v35, %v13727_v45  ;;  %v13571_v45 = vld [vmem:[#allocation10 + $0xaec] sm:$0xf0] }
 0x3eb   :  { %6115 = vmatpush.bf16.msrb.mxu3 %v14666_v60  ;;  %6084 = vmatmul.bf16.vlgmr.msra.gmra.mxu0 %v19870_v61  ;;  %v14455_v60 = vld [vmem:[#allocation10 + $0x11d4] sm:$0xf0] }
 0x3ec   :  { %6128 = vmatpush.bf16.msrb.mxu0 %v15082_v47  ;;  %v18696_v47 = vld [vmem:[#allocation10 + $0x14e4] sm:$0xf]  ;;  %v14458_v58 = vor.u32 %v18592_v42, %v14455_v60  ;;  %v14195_v42 = vld [vmem:[#allocation10 + $0xfcc] sm:$0xf0] }
 0x3ed   :  { %6053 = vmatpush.bf16.msra.mxu2 %v12430_v36  ;;  %v18033_v36 = vld [vmem:[#allocation10 + $0x2c] sm:$0xf]  ;;  %v20125_v7 = vpop.f32.mrf.mxu3 }
 0x3ee   :  { %6044 = vmatpush.bf16.msrb.mxu1 %v14714_v5  ;;  %v13678_v5 = vor.u32 %v18397_v4, %v13675_v44  ;;  %v5838_v6 = vpop.f32.mrf.mxu1  ;;  %v12222_v11 = vor.u32 %v18033_v36, %v12219_v0  ;;  %v18358_v4 = vld [vmem:[#allocation10 + $0xa54] sm:$0xf]  ;;  %v13369_v36 = vld [vmem:[#allocation10 + $0x920] sm:$0xf] }
 0x3ef   :  { %6116 = vmatpush.bf16.msrb.mxu3 %v14614_v49  ;;  %v14874_v49 = vor.u32 %v18696_v47, %v14871_v31  ;;  %v18657_v47 = vld [vmem:[#allocation10 + $0x13ac] sm:$0xf]  ;;  %v14715_v31 = vld [vmem:[#allocation10 + $0x13dc] sm:$0xf0]  ;;  %v18326_v0 = vld [vmem:[#allocation10 + $0x950] sm:$0xf0] }
 0x3f0   :  { %6129 = vmatpush.bf16.msrb.mxu0 %v15030_v46  ;;  %v12274_v46 = vor.u32 %v18046_v32, %v12271_v53  ;;  %v13574_v32 = vor.u32 %v18371_v33, %v13571_v45  ;;  %v13733_v33 = vld [vmem:[#allocation10 + $0xbf8] sm:$0xf]  ;;  %v18488_v45 = vld [vmem:[#allocation10 + $0xe64] sm:$0xf] }
 0x3f1   :  { %6045 = vmatmul.bf16.vlgmr.msrb.gmra.mxu1 %v19882_v51  ;;  %6054 = vmatpush.bf16.msra.mxu2 %v12378_v62  ;;  %v18670_v62 = vld [vmem:[#allocation10 + $0x1414] sm:$0xf] }
 0x3f2   :  { %6089 = vmatpush.bf16.msra.mxu1 %v13834_v3  ;;  %v5826_v3 = vadd.f32 %v20103_v23, %v5813_v50  ;;  %v13626_v23 = vor.u32 %v18384_v9, %v13623_v18  ;;  %v14770_v60 = vor.u32 %v18670_v62, %v14767_v13  ;;  %v14718_v50 = vor.u32 %v18657_v47, %v14715_v31  ;;  %v18430_v18 = vld [vmem:[#allocation10 + $0xc90] sm:$0xf0]  ;;  %v13317_v13 = vld [vmem:[#allocation10 + $0x8b8] sm:$0xf]  ;;  %v13265_v47 = vld [vmem:[#allocation10 + $0x850] sm:$0xf] }
 0x3f3   :  { %6117 = vmatpush.bf16.msrb.mxu3 %v14562_v20  ;;  %v18540_v20 = vld [vmem:[#allocation10 + $0x1004] sm:$0xf] }
 0x3f4   :  { %6130 = vmatpush.bf16.msrb.mxu0 %v14978_v10  ;;  %v18566_v10 = vld [vmem:[#allocation10 + $0x10d4] sm:$0xf]  ;;  %v20127_v24 = vadd.f32 %v5838_v6, %v5826_v3  ;;  %v14250_v8 = vor.u32 %v18540_v20, %v14247_v17  ;;  %v14146_v3 = vor.u32 %v18514_v28, %v14143_v52  ;;  %v18345_v20 = vld [vmem:[#allocation10 + $0x9ec] sm:$0xf]  ;;  %v13467_v17 = vld [vmem:[#allocation10 + $0xa1c] sm:$0xf0] }
 0x3f5   :  { %6055 = vmatpush.bf16.msra.mxu2 %v12326_v41  ;;  %v14354_v35 = vor.u32 %v18566_v10, %v14351_v57  ;;  %v14299_v41 = vld [vmem:[#allocation10 + $0x109c] sm:$0xf0]  ;;  %v5866_v63 = vpop.f32.mrf.mxu3  ;;  %v13370_v57 = vor.u32 %v18326_v0, %v13369_v36  ;;  %v12589_v6 = vld [vmem:[#allocation10 + $0x308] sm:$0xf]  ;;  %v18300_v31 = vld [vmem:[#allocation10 + $0x880] sm:$0xf0] }
 0x3f6   :  { %6090 = vmatpush.bf16.msra.mxu1 %v13782_v25  ;;  %v5801_v25 = vpop.f32.mrf.mxu2  ;;  %v14302_v44 = vor.u32 %v18553_v15, %v14299_v41  ;;  %v5840_v59 = vpop.f32.mrf.mxu1  ;;  %v14091_v10 = vld [vmem:[#allocation10 + $0xefc] sm:$0xf0]  ;;  %v18118_v15 = vld [vmem:[#allocation10 + $0x2d0] sm:$0xf0]  ;;  %v13213_v52 = vld [vmem:[#allocation10 + $0x7e8] sm:$0xf] }
 0x3f7   :  { %6118 = vmatpush.bf16.msrb.mxu3 %v14510_v21  ;;  %v5879_v21 = vpop.f32.mrf.mxu0  ;;  %v18313_v25 = vld [vmem:[#allocation10 + $0x8e8] sm:$0xf0]  ;;  %v13629_v59 = vld [vmem:[#allocation10 + $0xb28] sm:$0xf]  ;;  %v18391_v63 = vld [vmem:[#allocation10 + $0xb58] sm:$0xf0] }
 0x3f8   :  { %6131 = vmatpush.bf16.msrb.mxu0 %v14926_v30  ;;  %v18527_v30 = vld [vmem:[#allocation10 + $0xf9c] sm:$0xf]  ;;  %v18417_v21 = vld [vmem:[#allocation10 + $0xc28] sm:$0xf0]  ;;  %v18462_v0 = vld [vmem:[#allocation10 + $0xd94] sm:$0xf] }
 0x3f9   :  { %6056 = vmatpush.bf16.msra.mxu2 %v12274_v46  ;;  %v14198_v53 = vor.u32 %v18527_v30, %v14195_v42  ;;  %v14039_v30 = vld [vmem:[#allocation10 + $0xe94] sm:$0xf0]  ;;  %v13318_v42 = vor.u32 %v18313_v25, %v13317_v13  ;;  %v13734_v41 = vor.u32 %v18417_v21, %v13733_v33  ;;  %v13577_v13 = vld [vmem:[#allocation10 + $0xac0] sm:$0xf]  ;;  %v18378_v25 = vld [vmem:[#allocation10 + $0xaf0] sm:$0xf0] }
 0x3fa   :  { %6091 = vmatpush.bf16.msra.mxu1 %v13730_v48  ;;  %v18339_v48 = vld [vmem:[#allocation10 + $0x9b8] sm:$0xf0]  ;;  %v12381_v33 = vld [vmem:[#allocation10 + $0x168] sm:$0xf] }
 0x3fb   :  { %6119 = vmatpush.bf16.msrb.mxu3 %v14458_v58  ;;  %v18443_v58 = vld [vmem:[#allocation10 + $0xcf8] sm:$0xf0]  ;;  %v13422_v46 = vor.u32 %v18339_v48, %v13421_v55  ;;  %v14042_v55 = vor.u32 %v18488_v45, %v14039_v30  ;;  %v13681_v48 = vld [vmem:[#allocation10 + $0xb90] sm:$0xf]  ;;  %v13005_v45 = vld [vmem:[#allocation10 + $0x648] sm:$0xf] }
 0x3fc   :  { %6132 = vmatpush.bf16.msrb.mxu0 %v14874_v49  ;;  %v13519_v49 = vld [vmem:[#allocation10 + $0xa84] sm:$0xf0]  ;;  %v18235_v30 = vld [vmem:[#allocation10 + $0x678] sm:$0xf0] }
 0x3fd   :  { %6057 = vmatpush.bf16.msra.mxu2 %v12222_v11  ;;  %v13522_v9 = vor.u32 %v18358_v4, %v13519_v49  ;;  %v18131_v11 = vld [vmem:[#allocation10 + $0x338] sm:$0xf0]  ;;  %v13266_v4 = vor.u32 %v18300_v31, %v13265_v47  ;;  %v18105_v49 = vld [vmem:[#allocation10 + $0x268] sm:$0xf0] }
 0x3fe   :  { %6092 = vmatpush.bf16.msra.mxu1 %v13678_v5  ;;  %v13838_v5 = vor.u32 %v18443_v58, %v13837_v37  ;;  %v18475_v37 = vld [vmem:[#allocation10 + $0xdfc] sm:$0xf]  ;;  %v13987_v58 = vld [vmem:[#allocation10 + $0xe2c] sm:$0xf0] }
 0x3ff   :  { %6120 = vmatpush.bf16.msrb.mxu3 %v14406_v29  ;;  %v13785_v29 = vld [vmem:[#allocation10 + $0xc60] sm:$0xf] }
 0x400   :  { %6133 = vmatpush.bf16.msrb.mxu0 %v14822_v43  ;;  %6058 = vmatmul.bf16.vlgmr.msra.gmra.mxu2 %v19876_v19  ;;  %v18501_v43 = vld [vmem:[#allocation10 + $0xecc] sm:$0xf]  ;;  %v13786_v62 = vor.u32 %v18430_v18, %v13785_v29 }
 0x401   :  { %6102 = vmatpush.bf16.msrb.mxu2 %v14250_v8  ;;  %v14094_v8 = vor.u32 %v18501_v43, %v14091_v10  ;;  %v1336_v43 = vperm.slane %v20114_v2, 1  ;;  %v13630_v10 = vor.u32 %v18391_v63, %v13629_v59  ;;  %v18248_v59 = vld [vmem:[#allocation10 + $0x6e0] sm:$0xf0]  ;;  %v13473_v63 = vld [vmem:[#allocation10 + $0x9f0] sm:$0xf] }
 0x402   :  { %6093 = vmatpush.bf16.msra.mxu1 %v13626_v23  ;;  %v13470_v23 = vor.u32 %v18345_v20, %v13467_v17  ;;  %v12433_v20 = vld [vmem:[#allocation10 + $0x1d0] sm:$0xf]  ;;  %v18092_v17 = vld [vmem:[#allocation10 + $0x200] sm:$0xf0] }
 0x403   :  { %6121 = vmatpush.bf16.msrb.mxu3 %v14354_v35  ;;  %v12590_v35 = vor.u32 %v18131_v11, %v12589_v6  ;;  %v18274_v6 = vld [vmem:[#allocation10 + $0x7b0] sm:$0xf0] }
 0x404   :  { %6134 = vmatpush.bf16.msrb.mxu0 %v14770_v60  ;;  %v12537_v60 = vld [vmem:[#allocation10 + $0x2a0] sm:$0xf] }
 0x405   :  { %6103 = vmatpush.bf16.msrb.mxu2 %v14198_v53  ;;  %v12538_v53 = vor.u32 %v18118_v15, %v12537_v60  ;;  %v13578_v60 = vor.u32 %v18378_v25, %v13577_v13  ;;  %v18261_v15 = vld [vmem:[#allocation10 + $0x748] sm:$0xf0] }
 0x406   :  { %6094 = vmatpush.bf16.msra.mxu1 %v13574_v32  ;;  %v18404_v32 = vld [vmem:[#allocation10 + $0xbc0] sm:$0xf0] }
 0x407   :  { %6122 = vmatpush.bf16.msrb.mxu3 %v14302_v44  ;;  %v12485_v44 = vld [vmem:[#allocation10 + $0x238] sm:$0xf]  ;;  %v13682_v28 = vor.u32 %v18404_v32, %v13681_v48  ;;  %v18365_v48 = vld [vmem:[#allocation10 + $0xa88] sm:$0xf0] }
 0x408   :  { %6135 = vmatpush.bf16.msrb.mxu0 %v14718_v50  ;;  %v18287_v50 = vld [vmem:[#allocation10 + $0x818] sm:$0xf0]  ;;  %v12486_v36 = vor.u32 %v18105_v49, %v12485_v44  ;;  %v20134_v29 = vpop.f32.mrf.mxu0  ;;  %v18066_v49 = vld [vmem:[#allocation10 + $0x130] sm:$0xf0] }
 0x409   :  { %6104 = vmatpush.bf16.msrb.mxu2 %v14146_v3  ;;  %v13214_v18 = vor.u32 %v18287_v50, %v13213_v52  ;;  %v18222_v52 = vld [vmem:[#allocation10 + $0x610] sm:$0xf0] }
 0x40a   :  { %6095 = vmatpush.bf16.msra.mxu1 %v13522_v9  ;;  %6123 = vmatmul.bf16.vlgmr.msrb.gmra.mxu3 %v19895_v14  ;;  %v13935_v9 = vld [vmem:[#allocation10 + $0xdc4] sm:$0xf0] }
 0x40b   :  { %6167 = vmatpush.bf16.msra.mxu3 %v13422_v46  ;;  %6136 = vmatmul.bf16.vlgmr.msrb.gmra.mxu0 %v19882_v51  ;;  %v13990_v46 = vor.u32 %v18475_v37, %v13987_v58  ;;  %v13006_v58 = vor.u32 %v18235_v30, %v13005_v45  ;;  %v15257_v45 = vld [vmem:[#allocation13 + $0x150] sm:$0xf]  ;;  %v18801_v30 = vld [vmem:[#allocation13 + $0x168] sm:$0xf0] }
 0x40c   :  { %6180 = vmatpush.bf16.msra.mxu0 %v13838_v5  ;;  %v5851_v5 = vpop.f32.mrf.mxu2 }
 0x40d   :  { %6105 = vmatpush.bf16.msrb.mxu2 %v14094_v8  ;;  %v5852_v3 = vadd.f32 %v5851_v5, %v20127_v24  ;;  %v12434_v24 = vor.u32 %v18092_v17, %v12433_v20  ;;  %v13883_v8 = vld [vmem:[#allocation10 + $0xd5c] sm:$0xf0]  ;;  %v20141_v47 = vpop.f32.mrf.mxu3  ;;  %v18352_v5 = vld [vmem:[#allocation10 + $0xa20] sm:$0xf0]  ;;  %v18808_v20 = vld [vmem:[#allocation13 + $0x1a0] sm:$0xf0] }
 0x40e   :  { %6096 = vmatpush.bf16.msra.mxu1 %v13470_v23  ;;  %v18449_v23 = vld [vmem:[#allocation10 + $0xd2c] sm:$0xf]  ;;  %v12277_v17 = vld [vmem:[#allocation10 + $0x98] sm:$0xf] }
 0x40f   :  { %6168 = vmatpush.bf16.msra.mxu3 %v13370_v57  ;;  %v13161_v57 = vld [vmem:[#allocation10 + $0x780] sm:$0xf]  ;;  %v20138_v11 = vadd.f32 %v20125_v7, %v5852_v3  ;;  %v13109_v7 = vld [vmem:[#allocation10 + $0x718] sm:$0xf]  ;;  %v13886_v31 = vor.u32 %v18449_v23, %v13883_v8 }
 0x410   :  { %6181 = vmatpush.bf16.msra.mxu0 %v13786_v62  ;;  %v13938_v62 = vor.u32 %v18462_v0, %v13935_v9  ;;  %v13162_v21 = vor.u32 %v18274_v6, %v13161_v57  ;;  %v5931_v44 = vpop.f32.mrf.mxu0  ;;  %v18755_v0 = vld [vmem:[#allocation10 + $0x16b8] sm:$0xf0]  ;;  %v12901_v57 = vld [vmem:[#allocation10 + $0x578] sm:$0xf]  ;;  %v18209_v6 = vld [vmem:[#allocation10 + $0x5a8] sm:$0xf0] }
 0x411   :  { %6097 = vmatmul.bf16.vlgmr.msra.gmra.mxu1 %v19872_v1  ;;  %6106 = vmatpush.bf16.msrb.mxu2 %v14042_v55  ;;  %v13525_v55 = vld [vmem:[#allocation10 + $0xa58] sm:$0xf]  ;;  %v15033_v8 = vld [vmem:[#allocation10 + $0x1620] sm:$0xf]  ;;  %v15229_v44 = vld [vmem:[#allocation13 + $0x118] sm:$0xf] }
 0x412   :  { %6141 = vmatpush.bf16.msrb.mxu1 %v12590_v35  ;;  %v18079_v35 = vld [vmem:[#allocation10 + $0x198] sm:$0xf0]  ;;  %v13526_v50 = vor.u32 %v18365_v48, %v13525_v55  ;;  %v15258_v48 = vor.u32 %v18801_v30, %v15257_v45  ;;  %v14097_v30 = vld [vmem:[#allocation10 + $0xed0] sm:$0xf] }
 0x413   :  { %6169 = vmatpush.bf16.msra.mxu3 %v13318_v42  ;;  %v5878_v42 = vadd.f32 %v20121_v34, %v1336_v43  ;;  %v12382_v37 = vor.u32 %v18079_v35, %v12381_v33  ;;  %v13110_v34 = vor.u32 %v18261_v15, %v13109_v7  ;;  %v18742_v33 = vld [vmem:[#allocation10 + $0x1650] sm:$0xf0]  ;;  %v12902_v35 = vor.u32 %v18209_v6, %v12901_v57  ;;  %v12849_v7 = vld [vmem:[#allocation10 + $0x510] sm:$0xf]  ;;  %v18196_v15 = vld [vmem:[#allocation10 + $0x540] sm:$0xf0] }
 0x414   :  { %6182 = vmatpush.bf16.msra.mxu0 %v13734_v41  ;;  %v5890_v41 = vpop.f32.mrf.mxu1  ;;  %v18547_v55 = vld [vmem:[#allocation10 + $0x1038] sm:$0xf0]  ;;  %v14877_v57 = vld [vmem:[#allocation10 + $0x14e8] sm:$0xf] }
 0x415   :  { %6107 = vmatpush.bf16.msrb.mxu2 %v13990_v46  ;;  %v20143_v32 = vadd.f32 %v5890_v41, %v5878_v42  ;;  %v13057_v46 = vld [vmem:[#allocation10 + $0x6b0] sm:$0xf]  ;;  %v15034_v41 = vor.u32 %v18742_v33, %v15033_v8  ;;  %v18703_v6 = vld [vmem:[#allocation10 + $0x1518] sm:$0xf0]  ;;  %v12693_v8 = vld [vmem:[#allocation10 + $0x3d8] sm:$0xf] }
 0x416   :  { %6142 = vmatpush.bf16.msrb.mxu1 %v12538_v53  ;;  %v5853_v53 = vpop.f32.mrf.mxu2  ;;  %v13058_v43 = vor.u32 %v18248_v59, %v13057_v46  ;;  %v12225_v42 = vld [vmem:[#allocation10 + $0x30] sm:$0xf]  ;;  %v14201_v46 = vld [vmem:[#allocation10 + $0xfa0] sm:$0xf]  ;;  %v18534_v59 = vld [vmem:[#allocation10 + $0xfd0] sm:$0xf0]  ;;  %v14878_v45 = vor.u32 %v18703_v6, %v14877_v57 }
 0x417   :  { %6170 = vmatpush.bf16.msra.mxu3 %v13266_v4  ;;  %v12329_v4 = vld [vmem:[#allocation10 + $0x100] sm:$0xf]  ;;  %v14981_v53 = vld [vmem:[#allocation10 + $0x15b8] sm:$0xf]  ;;  %v18157_v33 = vld [vmem:[#allocation10 + $0x408] sm:$0xf0] }
 0x418   :  { %6183 = vmatpush.bf16.msra.mxu0 %v13682_v28  ;;  %v12953_v28 = vld [vmem:[#allocation10 + $0x5e0] sm:$0xf]  ;;  %v12330_v9 = vor.u32 %v18066_v49, %v12329_v4  ;;  %v12850_v4 = vor.u32 %v18196_v15, %v12849_v7  ;;  %v18690_v7 = vld [vmem:[#allocation10 + $0x14b0] sm:$0xf0]  ;;  %v14721_v57 = vld [vmem:[#allocation10 + $0x13b0] sm:$0xf] }
 0x419   :  { %6108 = vmatpush.bf16.msrb.mxu2 %v13938_v62  ;;  %v12954_v3 = vor.u32 %v18222_v52, %v12953_v28  ;;  %v13474_v62 = vor.u32 %v18352_v5, %v13473_v63  ;;  %v12797_v28 = vld [vmem:[#allocation10 + $0x4a8] sm:$0xf]  ;;  %v18183_v52 = vld [vmem:[#allocation10 + $0x4d8] sm:$0xf0]  ;;  %v14929_v5 = vld [vmem:[#allocation10 + $0x1550] sm:$0xf] }
 0x41a   :  { %6143 = vmatpush.bf16.msrb.mxu1 %v12486_v36  ;;  %v15085_v36 = vld [vmem:[#allocation10 + $0x1688] sm:$0xf]  ;;  %v18664_v6 = vld [vmem:[#allocation10 + $0x13e0] sm:$0xf0] }
 0x41b   :  { %6171 = vmatpush.bf16.msra.mxu3 %v13214_v18  ;;  %v15285_v18 = vld [vmem:[#allocation13 + $0x188] sm:$0xf]  ;;  %v15086_v13 = vor.u32 %v18755_v0, %v15085_v36  ;;  %v18716_v36 = vld [vmem:[#allocation10 + $0x1580] sm:$0xf0]  ;;  %v12798_v0 = vor.u32 %v18183_v52, %v12797_v28  ;;  %v18651_v28 = vld [vmem:[#allocation10 + $0x1378] sm:$0xf0] }
 0x41c   :  { %6184 = vmatpush.bf16.msra.mxu0 %v13630_v10  ;;  %v18053_v10 = vld [vmem:[#allocation10 + $0xc8] sm:$0xf0]  ;;  %v5892_v25 = vpop.f32.mrf.mxu1  ;;  %v15286_v23 = vor.u32 %v18808_v20, %v15285_v18  ;;  %v12745_v18 = vld [vmem:[#allocation10 + $0x440] sm:$0xf]  ;;  %v14930_v20 = vor.u32 %v18716_v36, %v14929_v5  ;;  %v14773_v52 = vld [vmem:[#allocation10 + $0x1418] sm:$0xf] }
 0x41d   :  { %6109 = vmatpush.bf16.msrb.mxu2 %v13886_v31  ;;  %v14253_v31 = vld [vmem:[#allocation10 + $0x1008] sm:$0xf]  ;;  %v18780_v25 = vld [vmem:[#allocation13 + $0xc0] sm:$0xf0]  ;;  %v18766_v5 = vld [vmem:[#allocation13 + $0x50] sm:$0xf0] }
 0x41e   :  { %6144 = vmatpush.bf16.msrb.mxu1 %v12434_v24  ;;  %v5918_v24 = vpop.f32.mrf.mxu3  ;;  %v14254_v49 = vor.u32 %v18547_v55, %v14253_v31  ;;  %v12694_v31 = vor.u32 %v18157_v33, %v12693_v8  ;;  %v15145_v55 = vld [vmem:[#allocation13 + $0x70] sm:$0xf] }
 0x41f   :  { %6172 = vmatpush.bf16.msra.mxu3 %v13162_v21  ;;  %v12278_v21 = vor.u32 %v18053_v10, %v12277_v17  ;;  %v14149_v17 = vld [vmem:[#allocation10 + $0xf38] sm:$0xf] }
 0x420   :  { %6185 = vmatpush.bf16.msra.mxu0 %v13578_v60  ;;  %6110 = vmatmul.bf16.vlgmr.msrb.gmra.mxu2 %v19888_v16  ;;  %v18040_v60 = vld [vmem:[#allocation10 + $0x60] sm:$0xf0] }
 0x421   :  { %6154 = vmatpush.bf16.msra.mxu2 %v13006_v58  ;;  %v12226_v58 = vor.u32 %v18040_v60, %v12225_v42  ;;  %v14825_v60 = vld [vmem:[#allocation10 + $0x1480] sm:$0xf] }
 0x422   :  { %6145 = vmatpush.bf16.msrb.mxu1 %v12382_v37  ;;  %v18729_v37 = vld [vmem:[#allocation10 + $0x15e8] sm:$0xf0] }
 0x423   :  { %6173 = vmatpush.bf16.msra.mxu3 %v13110_v34  ;;  %v18794_v34 = vld [vmem:[#allocation13 + $0x130] sm:$0xf0]  ;;  %v5903_v24 = vpop.f32.mrf.mxu2 }
 0x424   :  { %6186 = vmatpush.bf16.msra.mxu0 %v13526_v50  ;;  %v14982_v50 = vor.u32 %v18729_v37, %v14981_v53  ;;  %v15230_v63 = vor.u32 %v18794_v34, %v15229_v44  ;;  %v18144_v37 = vld [vmem:[#allocation10 + $0x3a0] sm:$0xf0]  ;;  %v14826_v44 = vor.u32 %v18690_v7, %v14825_v60  ;;  %v18495_v34 = vld [vmem:[#allocation10 + $0xe98] sm:$0xf0]  ;;  %v14565_v60 = vld [vmem:[#allocation10 + $0x1278] sm:$0xf] }
 0x425   :  { %6155 = vmatpush.bf16.msra.mxu2 %v12954_v3  ;;  %v18787_v3 = vld [vmem:[#allocation13 + $0xf8] sm:$0xf0] }
 0x426   :  { %6146 = vmatpush.bf16.msrb.mxu1 %v12330_v9  ;;  %v15201_v9 = vld [vmem:[#allocation13 + $0xe0] sm:$0xf] }
 0x427   :  { %6174 = vmatpush.bf16.msra.mxu3 %v13058_v43  ;;  %v18521_v43 = vld [vmem:[#allocation10 + $0xf68] sm:$0xf0]  ;;  %v15202_v10 = vor.u32 %v18787_v3, %v15201_v9 }
 0x428   :  { %6187 = vmatpush.bf16.msra.mxu0 %v13474_v62  ;;  %v18625_v7 = vld [vmem:[#allocation10 + $0x12a8] sm:$0xf0] }
 0x429   :  { %6156 = vmatpush.bf16.msra.mxu2 %v12902_v35  ;;  %v5981_v35 = vpop.f32.mrf.mxu0 }
 0x42a   :  { %6147 = vmatpush.bf16.msrb.mxu1 %v12278_v21  ;;  %6175 = vmatmul.bf16.vlgmr.msra.gmra.mxu3 %v19870_v61  ;;  %v14202_v61 = vor.u32 %v18534_v59, %v14201_v46  ;;  %v5904_v21 = vadd.f32 %v5903_v24, %v20143_v32  ;;  %v12641_v32 = vld [vmem:[#allocation10 + $0x370] sm:$0xf]  ;;  %v15957_v24 = vld [vmem:[#allocation13 + $0x6c8] sm:$0xf] }
 0x42b   :  { %6219 = vmatpush.bf16.msrb.mxu3 %v15086_v13  ;;  %6188 = vmatmul.bf16.vlgmr.msra.gmra.mxu0 %v19872_v1  ;;  %v18170_v1 = vld [vmem:[#allocation10 + $0x470] sm:$0xf0]  ;;  %v12642_v59 = vor.u32 %v18144_v37, %v12641_v32  ;;  %v5905_v9 = vpop.f32.mrf.mxu2  ;;  %v18969_v32 = vld [vmem:[#allocation13 + $0x6a8] sm:$0xf0] }
 0x42c   :  { %10850 = vmatpush.bf16.msrb.mxu0 %v15286_v23  ;;  %v12746_v62 = vor.u32 %v18170_v1, %v12745_v18  ;;  %v15173_v13 = vld [vmem:[#allocation13 + $0xa8] sm:$0xf]  ;;  %v14150_v23 = vor.u32 %v18521_v43, %v14149_v17  ;;  %v5917_v15 = vadd.f32 %v20141_v47, %v5904_v21  ;;  %v14617_v17 = vld [vmem:[#allocation10 + $0x12e0] sm:$0xf] }
 0x42d   :  { %6157 = vmatpush.bf16.msra.mxu2 %v12850_v4  ;;  %v15174_v42 = vor.u32 %v18780_v25, %v15173_v13  ;;  %v5968_v46 = vpop.f32.mrf.mxu3  ;;  %v18638_v43 = vld [vmem:[#allocation10 + $0x1310] sm:$0xf0]  ;;  %v18759_v25 = vld [vmem:[#allocation13 + $0x18] sm:$0xf0]  ;;  %v19018_v9 = vld [vmem:[#allocation13 + $0x830] sm:$0xf0] }
 0x42e   :  { %6148 = vmatpush.bf16.msrb.mxu1 %v12226_v58  ;;  %v14045_v58 = vld [vmem:[#allocation10 + $0xe68] sm:$0xf]  ;;  %v5930_v4 = vadd.f32 %v20134_v29, %v5917_v15  ;;  %v14618_v33 = vor.u32 %v18638_v43, %v14617_v17  ;;  %v16181_v21 = vld [vmem:[#allocation13 + $0x888] sm:$0xf]  ;;  %v15873_v43 = vld [vmem:[#allocation13 + $0x620] sm:$0xf] }
 0x42f   :  { %6220 = vmatpush.bf16.msrb.mxu3 %v15034_v41  ;;  %v1337_v41 = vperm.slane %v20114_v2, 2  ;;  %v5942_v2 = vpop.f32.mrf.mxu1  ;;  %v14046_v29 = vor.u32 %v18495_v34, %v14045_v58  ;;  %v14566_v58 = vor.u32 %v18625_v7, %v14565_v60  ;;  %v13889_v34 = vld [vmem:[#allocation10 + $0xd30] sm:$0xf] }
 0x430   :  { %10851 = vmatpush.bf16.msrb.mxu0 %v15258_v48  ;;  %v18773_v48 = vld [vmem:[#allocation13 + $0x88] sm:$0xf0]  ;;  %v20153_v36 = vadd.f32 %v5942_v2, %v5930_v4  ;;  %v16153_v4 = vld [vmem:[#allocation13 + $0x850] sm:$0xf]  ;;  %v19004_v60 = vld [vmem:[#allocation13 + $0x7c0] sm:$0xf0] }
 0x431   :  { %6149 = vmatmul.bf16.vlgmr.msrb.gmra.mxu1 %v19876_v19  ;;  %6158 = vmatpush.bf16.msra.mxu2 %v12798_v0  ;;  %v18508_v19 = vld [vmem:[#allocation10 + $0xf00] sm:$0xf0]  ;;  %v15146_v47 = vor.u32 %v18773_v48, %v15145_v55  ;;  %v5969_v0 = vadd.f32 %v5968_v46, %v1337_v41  ;;  %v5983_v18 = vpop.f32.mrf.mxu0  ;;  %v6232_v41 = vmax.f32 %v19944_v54, 0.0  ;;  %v15509_v54 = vld [vmem:[#allocation13 + $0x348] sm:$0xf] }
 0x432   :  { %6193 = vmatpush.bf16.msra.mxu1 %v14254_v49  ;;  %v14098_v53 = vor.u32 %v18508_v19, %v14097_v30  ;;  %v14669_v49 = vld [vmem:[#allocation10 + $0x1348] sm:$0xf]  ;;  %v13941_v30 = vld [vmem:[#allocation10 + $0xd98] sm:$0xf]  ;;  %v14722_v19 = vor.u32 %v18664_v6, %v14721_v57  ;;  %v16097_v6 = vld [vmem:[#allocation13 + $0x7e0] sm:$0xf] }
 0x433   :  { %6221 = vmatpush.bf16.msrb.mxu3 %v14982_v50  ;;  %v18677_v50 = vld [vmem:[#allocation10 + $0x1448] sm:$0xf0]  ;;  %v14670_v3 = vor.u32 %v18651_v28, %v14669_v49  ;;  %v20155_v13 = vadd.f32 %v5981_v35, %v5969_v0  ;;  %v18456_v49 = vld [vmem:[#allocation10 + $0xd60] sm:$0xf0] }
 0x434   :  { %10852 = vmatpush.bf16.msrb.mxu0 %v15230_v63  ;;  %v15117_v63 = vld [vmem:[#allocation13 + $0x38] sm:$0xf]  ;;  %v14774_v1 = vor.u32 %v18677_v50, %v14773_v52  ;;  %v18864_v52 = vld [vmem:[#allocation13 + $0x360] sm:$0xf0]  ;;  %v20159_v50 = vpack.c.bf16 %v6232_v41, %v6232_v41  ;;  %v18573_v41 = vld [vmem:[#allocation10 + $0x1108] sm:$0xf0] }
 0x435   :  { %6159 = vmatpush.bf16.msra.mxu2 %v12746_v62  ;;  %v15089_v62 = vld [vmem:[#allocation13] sm:$0xf]  ;;  %v5970_v55 = vpop.f32.mrf.mxu3  ;;  %v18612_v28 = vld [vmem:[#allocation10 + $0x1240] sm:$0xf0] }
 0x436   :  { %6194 = vmatpush.bf16.msra.mxu1 %v14202_v61  ;;  %v13993_v61 = vld [vmem:[#allocation10 + $0xe00] sm:$0xf]  ;;  %v15090_v35 = vor.u32 %v18759_v25, %v15089_v62  ;;  %v15901_v46 = vld [vmem:[#allocation13 + $0x658] sm:$0xf]  ;;  %v19011_v62 = vld [vmem:[#allocation13 + $0x7f8] sm:$0xf0] }
 0x437   :  { %6222 = vmatpush.bf16.msrb.mxu3 %v14930_v20  ;;  %v18482_v20 = vld [vmem:[#allocation10 + $0xe30] sm:$0xf0]  ;;  %v16125_v0 = vld [vmem:[#allocation13 + $0x818] sm:$0xf]  ;;  %v14409_v25 = vld [vmem:[#allocation10 + $0x1140] sm:$0xf] }
 0x438   :  { %10853 = vmatpush.bf16.msrb.mxu0 %v15202_v10  ;;  %v15118_v10 = vor.u32 %v18766_v5, %v15117_v63  ;;  %v13994_v8 = vor.u32 %v18482_v20, %v13993_v61  ;;  %v13890_v63 = vor.u32 %v18456_v49, %v13889_v34  ;;  %v18599_v61 = vld [vmem:[#allocation10 + $0x11d8] sm:$0xf0]  ;;  %v16126_v17 = vor.u32 %v19018_v9, %v16125_v0 }
 0x439   :  { %6160 = vmatpush.bf16.msra.mxu2 %v12694_v31  ;;  %v5944_v31 = vpop.f32.mrf.mxu1  ;;  %v18857_v20 = vld [vmem:[#allocation13 + $0x328] sm:$0xf0] }
 0x43a   :  { %6195 = vmatpush.bf16.msra.mxu1 %v14150_v23  ;;  %v18976_v23 = vld [vmem:[#allocation13 + $0x6e0] sm:$0xf0]  ;;  %v18997_v34 = vld [vmem:[#allocation13 + $0x788] sm:$0xf0] }
 0x43b   :  { %6223 = vmatpush.bf16.msrb.mxu3 %v14878_v45  ;;  %v19032_v45 = vld [vmem:[#allocation13 + $0x8a0] sm:$0xf0]  ;;  %v15958_v15 = vor.u32 %v18976_v23, %v15957_v24 }
 0x43c   :  { %10854 = vmatpush.bf16.msrb.mxu0 %v15174_v42  ;;  %v18469_v42 = vld [vmem:[#allocation10 + $0xdc8] sm:$0xf0]  ;;  %v16182_v48 = vor.u32 %v19032_v45, %v16181_v21  ;;  %v18586_v24 = vld [vmem:[#allocation10 + $0x1170] sm:$0xf0]  ;;  %v16098_v21 = vor.u32 %v19011_v62, %v16097_v6  ;;  %v15705_v6 = vld [vmem:[#allocation13 + $0x4d0] sm:$0xf] }
 0x43d   :  { %6161 = vmatpush.bf16.msra.mxu2 %v12642_v59  ;;  %v13942_v37 = vor.u32 %v18469_v42, %v13941_v30  ;;  %v18962_v59 = vld [vmem:[#allocation13 + $0x670] sm:$0xf0]  ;;  %v15845_v45 = vld [vmem:[#allocation13 + $0x5e8] sm:$0xf]  ;;  %v18948_v30 = vld [vmem:[#allocation13 + $0x600] sm:$0xf0] }
 0x43e   :  { %6196 = vmatpush.bf16.msra.mxu1 %v14098_v53  ;;  %v15929_v53 = vld [vmem:[#allocation13 + $0x690] sm:$0xf]  ;;  %v15902_v18 = vor.u32 %v18962_v59, %v15901_v46  ;;  %v16069_v42 = vld [vmem:[#allocation13 + $0x7a8] sm:$0xf]  ;;  %v15789_v59 = vld [vmem:[#allocation13 + $0x578] sm:$0xf] }
 0x43f   :  { %6224 = vmatpush.bf16.msrb.mxu3 %v14826_v44  ;;  %v19025_v44 = vld [vmem:[#allocation13 + $0x868] sm:$0xf0] }
 0x440   :  { %10855 = vmatpush.bf16.msrb.mxu0 %v15146_v47  ;;  %6162 = vmatmul.bf16.vlgmr.msra.gmra.mxu2 %v19886_v12  ;;  %v14513_v12 = vld [vmem:[#allocation10 + $0x1210] sm:$0xf]  ;;  %v15930_v47 = vor.u32 %v18969_v32, %v15929_v53  ;;  %v16154_v2 = vor.u32 %v19025_v44, %v16153_v4  ;;  %v18843_v53 = vld [vmem:[#allocation13 + $0x2b8] sm:$0xf0]  ;;  %v16070_v32 = vor.u32 %v19004_v60, %v16069_v42  ;;  %v16041_v44 = vld [vmem:[#allocation13 + $0x770] sm:$0xf] }
 0x441   :  { %6206 = vmatpush.bf16.msrb.mxu2 %v14670_v3  ;;  %v14514_v5 = vor.u32 %v18612_v28, %v14513_v12  ;;  %v14461_v3 = vld [vmem:[#allocation10 + $0x11a8] sm:$0xf]  ;;  %v14305_v12 = vld [vmem:[#allocation10 + $0x1070] sm:$0xf]  ;;  %v18560_v28 = vld [vmem:[#allocation10 + $0x10a0] sm:$0xf0]  ;;  %v16042_v46 = vor.u32 %v18997_v34, %v16041_v44 }
 0x442   :  { %6197 = vmatpush.bf16.msra.mxu1 %v14046_v29  ;;  %v15510_v29 = vor.u32 %v18864_v52, %v15509_v54  ;;  %v14462_v57 = vor.u32 %v18599_v61, %v14461_v3  ;;  %v18836_v54 = vld [vmem:[#allocation13 + $0x280] sm:$0xf0]  ;;  %v15733_v52 = vld [vmem:[#allocation13 + $0x508] sm:$0xf]  ;;  %v14306_v9 = vor.u32 %v18560_v28, %v14305_v12  ;;  %v18990_v3 = vld [vmem:[#allocation13 + $0x750] sm:$0xf0] }
 0x443   :  { %6225 = vmatpush.bf16.msrb.mxu3 %v14774_v1  ;;  %v15481_v1 = vld [vmem:[#allocation13 + $0x310] sm:$0xf]  ;;  %v5955_v7 = vpop.f32.mrf.mxu2  ;;  %v18913_v62 = vld [vmem:[#allocation13 + $0x4e8] sm:$0xf0]  ;;  %v15341_v42 = vld [vmem:[#allocation13 + $0x1f8] sm:$0xf] }
 0x444   :  { %10856 = vmatpush.bf16.msrb.mxu0 %v15118_v10  ;;  %v18955_v10 = vld [vmem:[#allocation13 + $0x638] sm:$0xf0]  ;;  %v20165_v31 = vadd.f32 %v5955_v7, %v20153_v36  ;;  %v15397_v36 = vld [vmem:[#allocation13 + $0x268] sm:$0xf]  ;;  %v18822_v7 = vld [vmem:[#allocation13 + $0x210] sm:$0xf0] }
 0x445   :  { %6207 = vmatpush.bf16.msrb.mxu2 %v14618_v33  ;;  %v15874_v23 = vor.u32 %v18955_v10, %v15873_v43  ;;  %v18850_v33 = vld [vmem:[#allocation13 + $0x2f0] sm:$0xf0]  ;;  %v19193_v44 = vld [vmem:[#allocation13 + $0xda8] sm:$0xf0]  ;;  %v15342_v34 = vor.u32 %v18822_v7, %v15341_v42  ;;  %v17049_v12 = vld [vmem:[#allocation13 + $0xf50] sm:$0xf] }
 0x446   :  { %6198 = vmatpush.bf16.msra.mxu1 %v13994_v8  ;;  %v15453_v8 = vld [vmem:[#allocation13 + $0x2d8] sm:$0xf]  ;;  %v19249_v28 = vld [vmem:[#allocation13 + $0xf68] sm:$0xf0]  ;;  %v19172_v7 = vld [vmem:[#allocation13 + $0xd00] sm:$0xf0] }
 0x447   :  { %6226 = vmatpush.bf16.msrb.mxu3 %v14722_v19  ;;  %v14410_v19 = vor.u32 %v18586_v24, %v14409_v25  ;;  %v15761_v25 = vld [vmem:[#allocation13 + $0x540] sm:$0xf]  ;;  %v18927_v24 = vld [vmem:[#allocation13 + $0x558] sm:$0xf0] }
 0x448   :  { %10857 = vmatpush.bf16.msrb.mxu0 %v15090_v35  ;;  %v15454_v35 = vor.u32 %v18850_v33, %v15453_v8  ;;  %v20167_v55 = vpop.f32.mrf.mxu0  ;;  %v18983_v8 = vld [vmem:[#allocation13 + $0x718] sm:$0xf0]  ;;  %v19200_v33 = vld [vmem:[#allocation13 + $0xde0] sm:$0xf0]  ;;  %v15762_v60 = vor.u32 %v18927_v24, %v15761_v25 }
 0x449   :  { %6208 = vmatpush.bf16.msrb.mxu2 %v14566_v58  ;;  %v18941_v58 = vld [vmem:[#allocation13 + $0x5c8] sm:$0xf0]  ;;  %v19179_v25 = vld [vmem:[#allocation13 + $0xd38] sm:$0xf0] }
 0x44a   :  { %6199 = vmatpush.bf16.msra.mxu1 %v13942_v37  ;;  %6227 = vmatmul.bf16.vlgmr.msrb.gmra.mxu3 %v19882_v51  ;;  %v15482_v51 = vor.u32 %v18857_v20, %v15481_v1  ;;  %v15817_v37 = vld [vmem:[#allocation13 + $0x5b0] sm:$0xf]  ;;  %v15398_v1 = vor.u32 %v18836_v54, %v15397_v36  ;;  %v15313_v36 = vld [vmem:[#allocation13 + $0x1c0] sm:$0xf]  ;;  %v18899_v54 = vld [vmem:[#allocation13 + $0x478] sm:$0xf0] }
 0x44b   :  { %10889 = vmatpush.bf16.msra.mxu3 %v15958_v15  ;;  %10858 = vmatmul.bf16.vlgmr.msrb.gmra.mxu0 %v20159_v50  ;;  %v14357_v15 = vld [vmem:[#allocation10 + $0x10d8] sm:$0xf] }
 0x44c   :  { %10902 = vmatpush.bf16.msra.mxu0 %v16182_v48  ;;  %v15425_v48 = vld [vmem:[#allocation13 + $0x2a0] sm:$0xf]  ;;  %v14358_v4 = vor.u32 %v18573_v41, %v14357_v15  ;;  %v18906_v15 = vld [vmem:[#allocation13 + $0x4b0] sm:$0xf0] }
 0x44d   :  { %6209 = vmatpush.bf16.msrb.mxu2 %v14514_v5  ;;  %v15426_v49 = vor.u32 %v18843_v53, %v15425_v48  ;;  %v20169_v0 = vpop.f32.mrf.mxu3  ;;  %v6235_v48 = vmax.f32 %v20008_v38, 0.0  ;;  %v6236_v53 = vmax.f32 %v20037_v27, 0.0  ;;  %v16405_v27 = vld [vmem:[#allocation13 + $0xa48] sm:$0xf] }
 0x44e   :  { %6200 = vmatpush.bf16.msra.mxu1 %v13890_v63  ;;  %v18934_v63 = vld [vmem:[#allocation13 + $0x590] sm:$0xf0]  ;;  %v5994_v5 = vpop.f32.mrf.mxu1 }
 0x44f   :  { %10890 = vmatpush.bf16.msra.mxu3 %v15930_v47  ;;  %v15818_v47 = vor.u32 %v18941_v58, %v15817_v37  ;;  %v20172_v61 = vadd.f32 %v5994_v5, %v20155_v13  ;;  %v15790_v10 = vor.u32 %v18934_v63, %v15789_v59  ;;  %v16853_v13 = vld [vmem:[#allocation13 + $0xdc8] sm:$0xf]  ;;  %v17050_v59 = vor.u32 %v19249_v28, %v17049_v12  ;;  %v16797_v63 = vld [vmem:[#allocation13 + $0xd58] sm:$0xf]  ;;  %v19186_v5 = vld [vmem:[#allocation13 + $0xd70] sm:$0xf0] }
 0x450   :  { %10903 = vmatpush.bf16.msra.mxu0 %v16154_v2  ;;  %v18920_v2 = vld [vmem:[#allocation13 + $0x520] sm:$0xf0]  ;;  %v6035_v43 = vpop.f32.mrf.mxu0  ;;  %v16713_v12 = vld [vmem:[#allocation13 + $0xcb0] sm:$0xf]  ;;  %v19165_v28 = vld [vmem:[#allocation13 + $0xcc8] sm:$0xf0] }
 0x451   :  { %6201 = vmatmul.bf16.vlgmr.msra.gmra.mxu1 %v19888_v16  ;;  %6210 = vmatpush.bf16.msrb.mxu2 %v14462_v57  ;;  %v15846_v16 = vor.u32 %v18948_v30, %v15845_v45  ;;  %v15734_v20 = vor.u32 %v18920_v2, %v15733_v52  ;;  %v18829_v57 = vld [vmem:[#allocation13 + $0x248] sm:$0xf0]  ;;  %v15706_v45 = vor.u32 %v18913_v62, %v15705_v6  ;;  %v17077_v30 = vld [vmem:[#allocation13 + $0xf88] sm:$0xf]  ;;  %v19088_v52 = vld [vmem:[#allocation13 + $0xa60] sm:$0xf0] }
 0x452   :  { %10863 = vmatpush.bf16.msrb.mxu1 %v15510_v29  ;;  %v16013_v29 = vld [vmem:[#allocation13 + $0x738] sm:$0xf]  ;;  %v20177_v2 = vpack.c.bf16 %v6235_v48, %v6235_v48  ;;  %v18892_v43 = vld [vmem:[#allocation13 + $0x440] sm:$0xf0]  ;;  %v19081_v6 = vld [vmem:[#allocation13 + $0xa28] sm:$0xf0] }
 0x453   :  { %10891 = vmatpush.bf16.msra.mxu3 %v15902_v18  ;;  %v5957_v18 = vpop.f32.mrf.mxu2 }
 0x454   :  { %10904 = vmatpush.bf16.msra.mxu0 %v16126_v17  ;;  %v15369_v17 = vld [vmem:[#allocation13 + $0x230] sm:$0xf]  ;;  %v19242_v18 = vld [vmem:[#allocation13 + $0xf30] sm:$0xf0] }
 0x455   :  { %6211 = vmatpush.bf16.msrb.mxu2 %v14410_v19  ;;  %v19256_v19 = vld [vmem:[#allocation13 + $0xfa0] sm:$0xf0]  ;;  %v6022_v37 = vpop.f32.mrf.mxu3 }
 0x456   :  { %10864 = vmatpush.bf16.msrb.mxu1 %v15482_v51  ;;  %v16014_v51 = vor.u32 %v18990_v3, %v16013_v29  ;;  %v17078_v58 = vor.u32 %v19256_v19, %v17077_v30  ;;  %v17021_v3 = vld [vmem:[#allocation13 + $0xf18] sm:$0xf]  ;;  %v19074_v19 = vld [vmem:[#allocation13 + $0x9f0] sm:$0xf0] }
 0x457   :  { %10892 = vmatpush.bf16.msra.mxu3 %v15874_v23  ;;  %v15985_v23 = vld [vmem:[#allocation13 + $0x700] sm:$0xf]  ;;  %v17022_v62 = vor.u32 %v19242_v18, %v17021_v3  ;;  %v16349_v30 = vld [vmem:[#allocation13 + $0x9d8] sm:$0xf]  ;;  %v19158_v18 = vld [vmem:[#allocation13 + $0xc90] sm:$0xf0] }
 0x458   :  { %10905 = vmatpush.bf16.msra.mxu0 %v16098_v21  ;;  %v15370_v21 = vor.u32 %v18829_v57, %v15369_v17  ;;  %v15986_v41 = vor.u32 %v18983_v8, %v15985_v23  ;;  %v15621_v17 = vld [vmem:[#allocation13 + $0x428] sm:$0xf]  ;;  %v16377_v57 = vld [vmem:[#allocation13 + $0xa10] sm:$0xf]  ;;  %v16993_v23 = vld [vmem:[#allocation13 + $0xee0] sm:$0xf]  ;;  %v16350_v48 = vor.u32 %v19074_v19, %v16349_v30 }
 0x459   :  { %6212 = vmatpush.bf16.msrb.mxu2 %v14358_v4  ;;  %v16825_v4 = vld [vmem:[#allocation13 + $0xd90] sm:$0xf]  ;;  %v15622_v24 = vor.u32 %v18892_v43, %v15621_v17  ;;  %v16909_v43 = vld [vmem:[#allocation13 + $0xe38] sm:$0xf]  ;;  %v16881_v30 = vld [vmem:[#allocation13 + $0xe00] sm:$0xf] }
 0x45a   :  { %10865 = vmatpush.bf16.msrb.mxu1 %v15454_v35  ;;  %v15677_v35 = vld [vmem:[#allocation13 + $0x498] sm:$0xf]  ;;  %v16826_v38 = vor.u32 %v19193_v44, %v16825_v4  ;;  %v16321_v44 = vld [vmem:[#allocation13 + $0x9a0] sm:$0xf]  ;;  %v19207_v19 = vld [vmem:[#allocation13 + $0xe18] sm:$0xf0] }
 0x45b   :  { %10893 = vmatpush.bf16.msra.mxu3 %v15846_v16  ;;  %v16854_v16 = vor.u32 %v19200_v33, %v16853_v13  ;;  %v16378_v13 = vor.u32 %v19081_v6, %v16377_v57  ;;  %v15593_v33 = vld [vmem:[#allocation13 + $0x3f0] sm:$0xf]  ;;  %v6234_v57 = vmax.f32 %v19982_v22, 0.0  ;;  %v19424_v22 = vld [vmem:[#allocation13 + $0x14e0] sm:$0xf0] }
 0x45c   :  { %10906 = vmatpush.bf16.msra.mxu0 %v16070_v32  ;;  %v5996_v32 = vpop.f32.mrf.mxu1 }
 0x45d   :  { %6213 = vmatpush.bf16.msrb.mxu2 %v14306_v9  ;;  %v18878_v32 = vld [vmem:[#allocation13 + $0x3d0] sm:$0xf0] }
 0x45e   :  { %10866 = vmatpush.bf16.msrb.mxu1 %v15426_v49  ;;  %v15678_v49 = vor.u32 %v18906_v15, %v15677_v35  ;;  %v16965_v15 = vld [vmem:[#allocation13 + $0xea8] sm:$0xf] }
 0x45f   :  { %10894 = vmatpush.bf16.msra.mxu3 %v15818_v47  ;;  %v15649_v47 = vld [vmem:[#allocation13 + $0x460] sm:$0xf] }
 0x460   :  { %10907 = vmatpush.bf16.msra.mxu0 %v16042_v46  ;;  %6214 = vmatmul.bf16.vlgmr.msrb.gmra.mxu2 %v19895_v14  ;;  %v18815_v14 = vld [vmem:[#allocation13 + $0x1d8] sm:$0xf0]  ;;  %v20179_v46 = vpack.c.bf16 %v6236_v53, %v6236_v53  ;;  %v15650_v29 = vor.u32 %v18899_v54, %v15649_v47  ;;  %v15565_v53 = vld [vmem:[#allocation13 + $0x3b8] sm:$0xf]  ;;  %v16937_v47 = vld [vmem:[#allocation13 + $0xe70] sm:$0xf] }
 0x461   :  { %10876 = vmatpush.bf16.msra.mxu2 %v15734_v20  ;;  %v15314_v9 = vor.u32 %v18815_v14, %v15313_v36  ;;  %v16406_v20 = vor.u32 %v19088_v52, %v16405_v27  ;;  %v15566_v14 = vor.u32 %v18878_v32, %v15565_v53  ;;  %v19221_v54 = vld [vmem:[#allocation13 + $0xe88] sm:$0xf0]  ;;  %v15537_v27 = vld [vmem:[#allocation13 + $0x380] sm:$0xf]  ;;  %v16293_v52 = vld [vmem:[#allocation13 + $0x968] sm:$0xf]  ;;  %v16882_v32 = vor.u32 %v19207_v19, %v16881_v30 }
 0x462   :  { %10867 = vmatpush.bf16.msrb.mxu1 %v15398_v1  ;;  %v6233_v1 = vmax.f32 %v19962_v56, 0.0  ;;  %v19235_v56 = vld [vmem:[#allocation13 + $0xef8] sm:$0xf0]  ;;  %v16938_v3 = vor.u32 %v19221_v54, %v16937_v47  ;;  %v19130_v53 = vld [vmem:[#allocation13 + $0xbb0] sm:$0xf0] }
 0x463   :  { %10895 = vmatpush.bf16.msra.mxu3 %v15790_v10  ;;  %v16798_v10 = vor.u32 %v19186_v5, %v16797_v63  ;;  %v16994_v42 = vor.u32 %v19235_v56, %v16993_v23  ;;  %v16714_v63 = vor.u32 %v19165_v28, %v16713_v12  ;;  %v19060_v5 = vld [vmem:[#allocation13 + $0x980] sm:$0xf0]  ;;  %v19053_v23 = vld [vmem:[#allocation13 + $0x948] sm:$0xf0]  ;;  %v16601_v56 = vld [vmem:[#allocation13 + $0xbd0] sm:$0xf] }
 0x464   :  { %10908 = vmatpush.bf16.msra.mxu0 %v16014_v51  ;;  %v16769_v51 = vld [vmem:[#allocation13 + $0xd20] sm:$0xf]  ;;  %v20184_v8 = vpack.c.bf16 %v6233_v1, %v6233_v1  ;;  %v16294_v6 = vor.u32 %v19060_v5, %v16293_v52  ;;  %v17721_v12 = vld [vmem:[#allocation13 + $0x1490] sm:$0xf]  ;;  %v19417_v28 = vld [vmem:[#allocation13 + $0x14a8] sm:$0xf0] }
 0x465   :  { %10877 = vmatpush.bf16.msra.mxu2 %v15706_v45  ;;  %v16770_v45 = vor.u32 %v19179_v25, %v16769_v51  ;;  %v16265_v51 = vld [vmem:[#allocation13 + $0x930] sm:$0xf]  ;;  %v16209_v47 = vld [vmem:[#allocation13 + $0x8c0] sm:$0xf]  ;;  %v19039_v54 = vld [vmem:[#allocation13 + $0x8d8] sm:$0xf0] }
 0x466   :  { %10868 = vmatpush.bf16.msrb.mxu1 %v15370_v21  ;;  %v18885_v21 = vld [vmem:[#allocation13 + $0x408] sm:$0xf0]  ;;  %v17301_v52 = vld [vmem:[#allocation13 + $0x1148] sm:$0xf]  ;;  %v17693_v5 = vld [vmem:[#allocation13 + $0x1458] sm:$0xf] }
 0x467   :  { %10896 = vmatpush.bf16.msra.mxu3 %v15762_v60  ;;  %v16741_v60 = vld [vmem:[#allocation13 + $0xce8] sm:$0xf]  ;;  %v15594_v35 = vor.u32 %v18885_v21, %v15593_v33  ;;  %v16657_v21 = vld [vmem:[#allocation13 + $0xc40] sm:$0xf] }
 0x468   :  { %10909 = vmatpush.bf16.msra.mxu0 %v15986_v41  ;;  %v19228_v41 = vld [vmem:[#allocation13 + $0xec0] sm:$0xf0]  ;;  %v16742_v4 = vor.u32 %v19172_v7, %v16741_v60  ;;  %v20199_v60 = vpack.c.bf16 %v6234_v57, %v6234_v57  ;;  %v16266_v7 = vor.u32 %v19053_v23, %v16265_v51  ;;  %v17273_v57 = vld [vmem:[#allocation13 + $0x1110] sm:$0xf]  ;;  %v19109_v23 = vld [vmem:[#allocation13 + $0xb08] sm:$0xf0] }
 0x469   :  { %10878 = vmatpush.bf16.msra.mxu2 %v15678_v49  ;;  %v16966_v49 = vor.u32 %v19228_v41, %v16965_v15  ;;  %v16237_v15 = vld [vmem:[#allocation13 + $0x8f8] sm:$0xf] }
 0x46a   :  { %10869 = vmatpush.bf16.msrb.mxu1 %v15342_v34  ;;  %10897 = vmatmul.bf16.vlgmr.msra.gmra.mxu3 %v20177_v2  ;;  %v19067_v34 = vld [vmem:[#allocation13 + $0x9b8] sm:$0xf0] }
 0x46b   :  { %10941 = vmatpush.bf16.msrb.mxu3 %v16854_v16  ;;  %10910 = vmatmul.bf16.vlgmr.msra.gmra.mxu0 %v20179_v46  ;;  %v6007_v16 = vpop.f32.mrf.mxu2 }
 0x46c   :  { %10954 = vmatpush.bf16.msrb.mxu0 %v17078_v58  ;;  %v6008_v37 = vadd.f32 %v6007_v16, %v20172_v61  ;;  %v20188_v58 = vpop.f32.mrf.mxu0  ;;  %v18871_v61 = vld [vmem:[#allocation13 + $0x398] sm:$0xf0]  ;;  %v19046_v16 = vld [vmem:[#allocation13 + $0x910] sm:$0xf0] }
 0x46d   :  { %10879 = vmatpush.bf16.msra.mxu2 %v15650_v29  ;;  %v19144_v29 = vld [vmem:[#allocation13 + $0xc20] sm:$0xf0]  ;;  %v15538_v17 = vor.u32 %v18871_v61, %v15537_v27  ;;  %v19123_v27 = vld [vmem:[#allocation13 + $0xb78] sm:$0xf0]  ;;  %v17722_v61 = vor.u32 %v19417_v28, %v17721_v12  ;;  %v17189_v12 = vld [vmem:[#allocation13 + $0x1068] sm:$0xf] }
 0x46e   :  { %10870 = vmatpush.bf16.msrb.mxu1 %v15314_v9  ;;  %v6021_v36 = vadd.f32 %v20169_v0, %v6008_v37  ;;  %v16629_v9 = vld [vmem:[#allocation13 + $0xc08] sm:$0xf]  ;;  %v16685_v0 = vld [vmem:[#allocation13 + $0xc78] sm:$0xf]  ;;  %v20194_v1 = vpop.f32.mrf.mxu1 }
 0x46f   :  { %10942 = vmatpush.bf16.msrb.mxu3 %v16826_v38  ;;  %v16322_v38 = vor.u32 %v19067_v34, %v16321_v44  ;;  %v6240_v44 = vmax.f32 %v20138_v11, 0.0 }
 0x470   :  { %10955 = vmatpush.bf16.msrb.mxu0 %v17050_v59  ;;  %v20192_v59 = vadd.f32 %v20167_v55, %v6021_v36  ;;  %v16238_v36 = vor.u32 %v19046_v16, %v16237_v15  ;;  %v19291_v16 = vld [vmem:[#allocation13 + $0x10b8] sm:$0xf0] }
 0x471   :  { %10871 = vmatmul.bf16.vlgmr.msrb.gmra.mxu1 %v20184_v8  ;;  %10880 = vmatpush.bf16.msra.mxu2 %v15622_v24  ;;  %v16686_v24 = vor.u32 %v19158_v18, %v16685_v0  ;;  %v20206_v11 = vpack.c.bf16 %v6240_v44, %v6240_v44  ;;  %v6237_v0 = vmax.f32 %v20063_v40, 0.0 }
 0x472   :  { %10915 = vmatpush.bf16.msra.mxu1 %v16406_v20  ;;  %v20196_v20 = vpop.f32.mrf.mxu3 }
 0x473   :  { %10943 = vmatpush.bf16.msrb.mxu3 %v16798_v10  ;;  %v19214_v10 = vld [vmem:[#allocation13 + $0xe50] sm:$0xf0]  ;;  %v6009_v55 = vpop.f32.mrf.mxu2 }
 0x474   :  { %10956 = vmatpush.bf16.msrb.mxu0 %v17022_v62  ;;  %v16630_v62 = vor.u32 %v19144_v29, %v16629_v9  ;;  %v6087_v25 = vpop.f32.mrf.mxu0  ;;  %v16910_v33 = vor.u32 %v19214_v10, %v16909_v43  ;;  %v19410_v9 = vld [vmem:[#allocation13 + $0x1470] sm:$0xf0]  ;;  %v16210_v29 = vor.u32 %v19039_v54, %v16209_v47  ;;  %v19116_v43 = vld [vmem:[#allocation13 + $0xb40] sm:$0xf0]  ;;  %v19305_v55 = vld [vmem:[#allocation13 + $0x1128] sm:$0xf0] }
 0x475   :  { %10881 = vmatpush.bf16.msra.mxu2 %v15594_v35  ;;  %v17694_v10 = vor.u32 %v19410_v9, %v17693_v5  ;;  %v20211_v25 = vpack.c.bf16 %v6237_v0, %v6237_v0  ;;  %v17274_v40 = vor.u32 %v19305_v55, %v17273_v57  ;;  %v17525_v47 = vld [vmem:[#allocation13 + $0x1308] sm:$0xf]  ;;  %v19368_v54 = vld [vmem:[#allocation13 + $0x1320] sm:$0xf0]  ;;  %v17945_v9 = vld [vmem:[#allocation13 + $0x1650] sm:$0xf] }
 0x476   :  { %10916 = vmatpush.bf16.msra.mxu1 %v16378_v13  ;;  %v19137_v13 = vld [vmem:[#allocation13 + $0xbe8] sm:$0xf0]  ;;  %v6048_v34 = vpop.f32.mrf.mxu1 }
 0x477   :  { %10944 = vmatpush.bf16.msrb.mxu3 %v16770_v45  ;;  %v19151_v45 = vld [vmem:[#allocation13 + $0xc58] sm:$0xf0]  ;;  %v16602_v35 = vor.u32 %v19137_v13, %v16601_v56  ;;  %v17245_v13 = vld [vmem:[#allocation13 + $0x10d8] sm:$0xf]  ;;  %v16433_v34 = vld [vmem:[#allocation13 + $0xa80] sm:$0xf] }
 0x478   :  { %10957 = vmatpush.bf16.msrb.mxu0 %v16994_v42  ;;  %v17749_v42 = vld [vmem:[#allocation13 + $0x14c8] sm:$0xf]  ;;  %v16658_v41 = vor.u32 %v19151_v45, %v16657_v21  ;;  %v19396_v45 = vld [vmem:[#allocation13 + $0x1400] sm:$0xf0]  ;;  %v19277_v55 = vld [vmem:[#allocation13 + $0x1048] sm:$0xf0] }
 0x479   :  { %10882 = vmatpush.bf16.msra.mxu2 %v15566_v14  ;;  %v17750_v37 = vor.u32 %v19424_v22, %v17749_v42  ;;  %v17637_v21 = vld [vmem:[#allocation13 + $0x13e8] sm:$0xf]  ;;  %v16461_v22 = vld [vmem:[#allocation13 + $0xab8] sm:$0xf] }
 0x47a   :  { %10917 = vmatpush.bf16.msra.mxu1 %v16350_v48  ;;  %v16573_v48 = vld [vmem:[#allocation13 + $0xb98] sm:$0xf]  ;;  %v17638_v15 = vor.u32 %v19396_v45, %v17637_v21 }
 0x47b   :  { %10945 = vmatpush.bf16.msrb.mxu3 %v16742_v4  ;;  %v6239_v4 = vmax.f32 %v20107_v39, 0.0  ;;  %v16574_v14 = vor.u32 %v19130_v53, %v16573_v48  ;;  %v19312_v39 = vld [vmem:[#allocation13 + $0x1160] sm:$0xf0]  ;;  %v17609_v48 = vld [vmem:[#allocation13 + $0x13b0] sm:$0xf] }
 0x47c   :  { %10958 = vmatpush.bf16.msrb.mxu0 %v16966_v49  ;;  %v6074_v49 = vpop.f32.mrf.mxu3  ;;  %v17302_v18 = vor.u32 %v19312_v39, %v17301_v52  ;;  %v19389_v53 = vld [vmem:[#allocation13 + $0x13c8] sm:$0xf0] }
 0x47d   :  { %10883 = vmatpush.bf16.msra.mxu2 %v15538_v17  ;;  %v16517_v17 = vld [vmem:[#allocation13 + $0xb28] sm:$0xf]  ;;  %v19095_v49 = vld [vmem:[#allocation13 + $0xa98] sm:$0xf0] }
 0x47e   :  { %10918 = vmatpush.bf16.msra.mxu1 %v16322_v38  ;;  %v16545_v38 = vld [vmem:[#allocation13 + $0xb60] sm:$0xf]  ;;  %v16518_v51 = vor.u32 %v19116_v43, %v16517_v17  ;;  %v16434_v5 = vor.u32 %v19095_v49, %v16433_v34  ;;  %v17161_v17 = vld [vmem:[#allocation13 + $0x1030] sm:$0xf]  ;;  %v19459_v49 = vld [vmem:[#allocation13 + $0x15f8] sm:$0xf0] }
 0x47f   :  { %10946 = vmatpush.bf16.msrb.mxu3 %v16714_v63  ;;  %v20204_v63 = vpack.c.bf16 %v6239_v4, %v6239_v4  ;;  %v19480_v4 = vld [vmem:[#allocation13 + $0x16a0] sm:$0xf0]  ;;  %v17162_v45 = vor.u32 %v19277_v55, %v17161_v17  ;;  %v17889_v34 = vld [vmem:[#allocation13 + $0x15e0] sm:$0xf]  ;;  %v17413_v55 = vld [vmem:[#allocation13 + $0x1228] sm:$0xf] }
 0x480   :  { %10959 = vmatpush.bf16.msrb.mxu0 %v16938_v3  ;;  %10884 = vmatmul.bf16.vlgmr.msra.gmra.mxu2 %v20199_v60  ;;  %v16546_v3 = vor.u32 %v19123_v27, %v16545_v38  ;;  %v17581_v38 = vld [vmem:[#allocation13 + $0x1378] sm:$0xf]  ;;  %v19382_v27 = vld [vmem:[#allocation13 + $0x1390] sm:$0xf0] }
 0x481   :  { %10928 = vmatpush.bf16.msrb.mxu2 %v16630_v62  ;;  %v19403_v62 = vld [vmem:[#allocation13 + $0x1438] sm:$0xf0]  ;;  %v17582_v57 = vor.u32 %v19382_v27, %v17581_v38 }
 0x482   :  { %10919 = vmatpush.bf16.msra.mxu1 %v16294_v6  ;;  %v17665_v6 = vld [vmem:[#allocation13 + $0x1420] sm:$0xf]  ;;  %v19347_v38 = vld [vmem:[#allocation13 + $0x1278] sm:$0xf0] }
 0x483   :  { %10947 = vmatpush.bf16.msrb.mxu3 %v16686_v24  ;;  %v16489_v24 = vld [vmem:[#allocation13 + $0xaf0] sm:$0xf]  ;;  %v17666_v56 = vor.u32 %v19403_v62, %v17665_v6  ;;  %v20214_v19 = vpop.f32.mrf.mxu2  ;;  %v17553_v62 = vld [vmem:[#allocation13 + $0x1340] sm:$0xf] }
 0x484   :  { %10960 = vmatpush.bf16.msrb.mxu0 %v16910_v33  ;;  %v19298_v33 = vld [vmem:[#allocation13 + $0x10f0] sm:$0xf0]  ;;  %v16490_v30 = vor.u32 %v19109_v23, %v16489_v24  ;;  %v17497_v6 = vld [vmem:[#allocation13 + $0x12d0] sm:$0xf]  ;;  %v15735_v23 = vld [vmem:[#allocation13 + $0x524] sm:$0xf0] }
 0x485   :  { %10929 = vmatpush.bf16.msrb.mxu2 %v16602_v35  ;;  %v17246_v42 = vor.u32 %v19298_v33, %v17245_v13  ;;  %v19466_v13 = vld [vmem:[#allocation13 + $0x1630] sm:$0xf0]  ;;  %v20225_v33 = vld [vmem:[#allocation12 + $0x8] sm:$0x1f] }
 0x486   :  { %10920 = vmatpush.bf16.msra.mxu1 %v16266_v7  ;;  %v19102_v7 = vld [vmem:[#allocation13 + $0xad0] sm:$0xf0]  ;;  %v1338_v21 = vperm.slane %v20225_v33, 3 }
 0x487   :  { %10948 = vmatpush.bf16.msrb.mxu3 %v16658_v41  ;;  %v17217_v41 = vld [vmem:[#allocation13 + $0x10a0] sm:$0xf] }
 0x488   :  { %10961 = vmatpush.bf16.msrb.mxu0 %v16882_v32  ;;  %v20216_v35 = vpop.f32.mrf.mxu0  ;;  %v16462_v32 = vor.u32 %v19102_v7, %v16461_v22  ;;  %v17218_v44 = vor.u32 %v19291_v16, %v17217_v41  ;;  %v19270_v22 = vld [vmem:[#allocation13 + $0x1010] sm:$0xf0]  ;;  %v17469_v41 = vld [vmem:[#allocation13 + $0x1298] sm:$0xf] }
 0x489   :  { %10930 = vmatpush.bf16.msrb.mxu2 %v16574_v14  ;;  %v19284_v14 = vld [vmem:[#allocation13 + $0x1080] sm:$0xf0]  ;;  %v19354_v16 = vld [vmem:[#allocation13 + $0x12b0] sm:$0xf0] }
 0x48a   :  { %10921 = vmatpush.bf16.msra.mxu1 %v16238_v36  ;;  %10949 = vmatmul.bf16.vlgmr.msrb.gmra.mxu3 %v20204_v63  ;;  %v17610_v36 = vor.u32 %v19389_v53, %v17609_v48  ;;  %v17190_v0 = vor.u32 %v19284_v14, %v17189_v12  ;;  %v18910_v53 = vld [vmem:[#allocation13 + $0x4d4] sm:$0xf]  ;;  %v6060_v12 = vadd.f32 %v20214_v19, %v1338_v21  ;;  %v19263_v14 = vld [vmem:[#allocation13 + $0xfd8] sm:$0xf0] }
 0x48b   :  { %10993 = vmatpush.bf16.msra.mxu3 %v17750_v37  ;;  %10962 = vmatmul.bf16.vlgmr.msrb.gmra.mxu0 %v20206_v11  ;;  %v17973_v37 = vld [vmem:[#allocation13 + $0x1688] sm:$0xf] }
 0x48c   :  { %v17974_v28 = vor.u32 %v19480_v4, %v17973_v37  ;;  %v6073_v19 = vadd.f32 %v20196_v20, %v6060_v12  ;;  %v19326_v12 = vld [vmem:[#allocation13 + $0x11d0] sm:$0xf0] }
 0x48d   :  { %10931 = vmatpush.bf16.msrb.mxu2 %v16546_v3  ;;  %v20221_v39 = vpop.f32.mrf.mxu3  ;;  %v6061_v3 = vpop.f32.mrf.mxu2 }
 0x48e   :  { %10922 = vmatpush.bf16.msra.mxu1 %v16210_v29  ;;  %11006 = vmatpush.bf16.msra.mxu0 %v17974_v28  ;;  %v20219_v52 = vpop.f32.mrf.mxu1  ;;  %v19473_v29 = vld [vmem:[#allocation13 + $0x1668] sm:$0xf0]  ;;  %v17470_v28 = vor.u32 %v19354_v16, %v17469_v41  ;;  %v15679_v3 = vld [vmem:[#allocation13 + $0x4b4] sm:$0xf0]  ;;  %v6086_v20 = vadd.f32 %v20188_v58, %v6073_v19 }
 0x48f   :  { %10994 = vmatpush.bf16.msra.mxu3 %v17722_v61  ;;  %v6238_v61 = vmax.f32 %v20083_v26, 0.0  ;;  %v17946_v43 = vor.u32 %v19473_v29, %v17945_v9  ;;  %v19361_v26 = vld [vmem:[#allocation13 + $0x12e8] sm:$0xf0]  ;;  %v18903_v9 = vld [vmem:[#allocation13 + $0x49c] sm:$0xf] }
 0x490   :  { %v15231_v41 = vld [vmem:[#allocation13 + $0x134] sm:$0xf0]  ;;  %v18889_v16 = vld [vmem:[#allocation13 + $0x42c] sm:$0xf] }
 0x491   :  { %10923 = vmatmul.bf16.vlgmr.msra.gmra.mxu1 %v20211_v25  ;;  %10932 = vmatpush.bf16.msrb.mxu2 %v16518_v51  ;;  %v19375_v51 = vld [vmem:[#allocation13 + $0x1358] sm:$0xf0]  ;;  %v20223_v24 = vpack.c.bf16 %v6238_v61, %v6238_v61  ;;  %v18805_v61 = vld [vmem:[#allocation13 + $0x18c] sm:$0xf]  ;;  %v17805_v58 = vld [vmem:[#allocation13 + $0x1538] sm:$0xf] }
 0x492   :  { %10967 = vmatpush.bf16.msrb.mxu1 %v17302_v18  ;;  %v17526_v18 = vor.u32 %v19368_v54, %v17525_v47  ;;  %11007 = vmatpush.bf16.msra.mxu0 %v17946_v43  ;;  %v17890_v47 = vor.u32 %v19459_v49, %v17889_v34  ;;  %v17441_v54 = vld [vmem:[#allocation13 + $0x1260] sm:$0xf]  ;;  %v17357_v49 = vld [vmem:[#allocation13 + $0x11b8] sm:$0xf] }
 0x493   :  { %10995 = vmatpush.bf16.msra.mxu3 %v17694_v10  ;;  %v6139_v10 = vpop.f32.mrf.mxu0  ;;  %v17442_v17 = vor.u32 %v19347_v38, %v17441_v54  ;;  %v15203_v54 = vld [vmem:[#allocation13 + $0xfc] sm:$0xf0]  ;;  %v18882_v38 = vld [vmem:[#allocation13 + $0x3f4] sm:$0xf] }
 0x494   :  { %v6241_v10 = vmax.f32 %v20165_v31, 0.0 }
 0x495   :  { %10933 = vmatpush.bf16.msrb.mxu2 %v16490_v30  ;;  %v17498_v30 = vor.u32 %v19361_v26, %v17497_v6  ;;  %v6126_v37 = vpop.f32.mrf.mxu3  ;;  %v19340_v6 = vld [vmem:[#allocation13 + $0x1240] sm:$0xf0]  ;;  %v15682_v26 = vor.u32 %v18903_v9, %v15679_v3  ;;  %v17358_v9 = vor.u32 %v19326_v12, %v17357_v49  ;;  %v18973_v3 = vld [vmem:[#allocation13 + $0x6cc] sm:$0xf] }
 0x496   :  { %10968 = vmatpush.bf16.msrb.mxu1 %v17274_v40  ;;  %v18917_v40 = vld [vmem:[#allocation13 + $0x50c] sm:$0xf]  ;;  %v17414_v21 = vor.u32 %v19340_v6, %v17413_v55 }
 0x497   :  { %10996 = vmatpush.bf16.msra.mxu3 %v17666_v56  ;;  %v17917_v56 = vld [vmem:[#allocation13 + $0x1618] sm:$0xf]  ;;  %v15738_v48 = vor.u32 %v18917_v40, %v15735_v23  ;;  %v18896_v40 = vld [vmem:[#allocation13 + $0x464] sm:$0xf]  ;;  %v15651_v23 = vld [vmem:[#allocation13 + $0x47c] sm:$0xf0] }
 0x498   :  { %v17918_v7 = vor.u32 %v19466_v13, %v17917_v56  ;;  %v17833_v56 = vld [vmem:[#allocation13 + $0x1570] sm:$0xf]  ;;  %v19445_v13 = vld [vmem:[#allocation13 + $0x1588] sm:$0xf0] }
 0x499   :  { %10934 = vmatpush.bf16.msrb.mxu2 %v16462_v32  ;;  %v6100_v32 = vpop.f32.mrf.mxu1 }
 0x49a   :  { %10969 = vmatpush.bf16.msrb.mxu1 %v17246_v42  ;;  %v17133_v42 = vld [vmem:[#allocation13 + $0xff8] sm:$0xf]  ;;  %11008 = vmatpush.bf16.msra.mxu0 %v17918_v7  ;;  %v15654_v7 = vor.u32 %v18896_v40, %v15651_v23  ;;  %v6099_v32 = vadd.f32 %v20219_v52, %v6086_v20  ;;  %v19431_v52 = vld [vmem:[#allocation13 + $0x1518] sm:$0xf0] }
 0x49b   :  { %10997 = vmatpush.bf16.msra.mxu3 %v17638_v15  ;;  %v17554_v15 = vor.u32 %v19375_v51, %v17553_v62  ;;  %v17134_v4 = vor.u32 %v19270_v22, %v17133_v42  ;;  %v18798_v62 = vld [vmem:[#allocation13 + $0x154] sm:$0xf]  ;;  %v15259_v51 = vld [vmem:[#allocation13 + $0x16c] sm:$0xf0]  ;;  %v19333_v22 = vld [vmem:[#allocation13 + $0x1208] sm:$0xf0] }
 0x49c   :  { %v15262_v31 = vor.u32 %v18798_v62, %v15259_v51  ;;  %v17385_v42 = vld [vmem:[#allocation13 + $0x11f0] sm:$0xf]  ;;  %v15511_v62 = vld [vmem:[#allocation13 + $0x364] sm:$0xf0]  ;;  %v18875_v51 = vld [vmem:[#allocation13 + $0x3bc] sm:$0xf] }
 0x49d   :  { %10935 = vmatpush.bf16.msrb.mxu2 %v16434_v5  ;;  %v15287_v5 = vld [vmem:[#allocation13 + $0x1a4] sm:$0xf0]  ;;  %v17386_v37 = vor.u32 %v19333_v22, %v17385_v42  ;;  %v15567_v40 = vld [vmem:[#allocation13 + $0x3d4] sm:$0xf0]  ;;  %v15931_v42 = vld [vmem:[#allocation13 + $0x6ac] sm:$0xf0] }
 0x49e   :  { %10970 = vmatpush.bf16.msrb.mxu1 %v17218_v44  ;;  %v15707_v44 = vld [vmem:[#allocation13 + $0x4ec] sm:$0xf0]  ;;  %11009 = vmatpush.bf16.msra.mxu0 %v17890_v47  ;;  %v18784_v47 = vld [vmem:[#allocation13 + $0xe4] sm:$0xf] }
 0x49f   :  { %10998 = vmatpush.bf16.msra.mxu3 %v17610_v36  ;;  %v17105_v36 = vld [vmem:[#allocation13 + $0xfc0] sm:$0xf]  ;;  %v15710_v27 = vor.u32 %v18910_v53, %v15707_v44  ;;  %v19438_v53 = vld [vmem:[#allocation13 + $0x1550] sm:$0xf0]  ;;  %v15206_v19 = vor.u32 %v18784_v47, %v15203_v54  ;;  %v15119_v54 = vld [vmem:[#allocation13 + $0x54] sm:$0xf0] }
 0x4a0   :  { %10936 = vmatmul.bf16.vlgmr.msrb.gmra.mxu2 %v20223_v24  ;;  %v17106_v29 = vor.u32 %v19263_v14, %v17105_v36 }
 0x4a1   :  { %10980 = vmatpush.bf16.msra.mxu2 %v17526_v18  ;;  %v19452_v18 = vld [vmem:[#allocation13 + $0x15c0] sm:$0xf0] }
 0x4a2   :  { %10971 = vmatpush.bf16.msrb.mxu1 %v17190_v0  ;;  %v17861_v0 = vld [vmem:[#allocation13 + $0x15a8] sm:$0xf] }
 0x4a3   :  { %10999 = vmatpush.bf16.msra.mxu3 %v17582_v57  ;;  %v17862_v43 = vor.u32 %v19452_v18, %v17861_v0  ;;  %v15290_v57 = vor.u32 %v18805_v61, %v15287_v5  ;;  %v6111_v44 = vpop.f32.mrf.mxu2  ;;  %v17777_v61 = vld [vmem:[#allocation13 + $0x1500] sm:$0xf]  ;;  %v15959_v0 = vld [vmem:[#allocation13 + $0x6e4] sm:$0xf0]  ;;  %v6047_v18 = vadd.f32 %v20194_v1, %v20192_v59 }
 0x4a5   :  { %10981 = vmatpush.bf16.msra.mxu2 %v17498_v30  ;;  %11010 = vmatpush.bf16.msra.mxu0 %v17862_v43  ;;  %v20233_v30 = vpack.c.bf16 %v6241_v10, %v6241_v10  ;;  %v19319_v43 = vld [vmem:[#allocation13 + $0x1198] sm:$0xf0]  ;;  %v18777_v10 = vld [vmem:[#allocation13 + $0xac] sm:$0xf]  ;;  %v6242_v20 = vmax.f32 %v6047_v18, 0.0 }
 0x4a6   :  { %10972 = vmatpush.bf16.msrb.mxu1 %v17162_v45  ;;  %v17834_v45 = vor.u32 %v19445_v13, %v17833_v56  ;;  %v18966_v13 = vld [vmem:[#allocation13 + $0x694] sm:$0xf]  ;;  %v15875_v18 = vld [vmem:[#allocation13 + $0x63c] sm:$0xf0] }
 0x4a7   :  { %11000 = vmatpush.bf16.msra.mxu3 %v17554_v15  ;;  %v18791_v15 = vld [vmem:[#allocation13 + $0x11c] sm:$0xf]  ;;  %v20250_v49 = vpack.c.bf16 %v6242_v20, %v6242_v20 }
 0x4a8   :  { %v15234_v34 = vor.u32 %v18791_v15, %v15231_v41  ;;  %v20237_v36 = vpop.f32.mrf.mxu0  ;;  %v15570_v15 = vor.u32 %v18875_v51, %v15567_v40  ;;  %v15147_v41 = vld [vmem:[#allocation13 + $0x8c] sm:$0xf0]  ;;  %v19127_v51 = vld [vmem:[#allocation13 + $0xb9c] sm:$0xf]  ;;  %v16575_v40 = vld [vmem:[#allocation13 + $0xbb4] sm:$0xf0] }
 0x4a9   :  { %10982 = vmatpush.bf16.msra.mxu2 %v17470_v28  ;;  %11011 = vmatpush.bf16.msra.mxu0 %v17834_v45  ;;  %v6112_v28 = vadd.f32 %v6111_v44, %v6099_v32  ;;  %v15539_v32 = vld [vmem:[#allocation13 + $0x39c] sm:$0xf0]  ;;  %v18959_v44 = vld [vmem:[#allocation13 + $0x65c] sm:$0xf] }
 0x4aa   :  { %10973 = vmatpush.bf16.msrb.mxu1 %v17134_v4  ;;  %v17806_v4 = vor.u32 %v19438_v53, %v17805_v58  ;;  %v15934_v58 = vor.u32 %v18966_v13, %v15931_v42  ;;  %v18868_v53 = vld [vmem:[#allocation13 + $0x384] sm:$0xf]  ;;  %v16578_v42 = vor.u32 %v19127_v51, %v16575_v40 }
 0x4ab   :  { %11045 = vmatpush.bf16.msrb.mxu3 %v15738_v48  ;;  %v15623_v48 = vld [vmem:[#allocation13 + $0x444] sm:$0xf0]  ;;  %v6125_v5 = vadd.f32 %v20221_v39, %v6112_v28  ;;  %v18861_v39 = vld [vmem:[#allocation13 + $0x34c] sm:$0xf]  ;;  %v15542_v47 = vor.u32 %v18868_v53, %v15539_v32 }
 0x4ac   :  { %v15626_v14 = vor.u32 %v18889_v16, %v15623_v48  ;;  %v15514_v45 = vor.u32 %v18861_v39, %v15511_v62  ;;  %v18854_v16 = vld [vmem:[#allocation13 + $0x314] sm:$0xf]  ;;  %v15483_v48 = vld [vmem:[#allocation13 + $0x32c] sm:$0xf0]  ;;  %v19029_v39 = vld [vmem:[#allocation13 + $0x88c] sm:$0xf] }
 0x4ad   :  { %10983 = vmatpush.bf16.msra.mxu2 %v17442_v17  ;;  %11012 = vmatpush.bf16.msra.mxu0 %v17806_v4  ;;  %v17329_v17 = vld [vmem:[#allocation13 + $0x1180] sm:$0xf]  ;;  %v6138_v55 = vadd.f32 %v20216_v35, %v6125_v5  ;;  %v20245_v59 = vpop.f32.mrf.mxu3  ;;  %v16631_v4 = vld [vmem:[#allocation13 + $0xc24] sm:$0xf0]  ;;  %v15486_v28 = vor.u32 %v18854_v16, %v15483_v48  ;;  %v19134_v5 = vld [vmem:[#allocation13 + $0xbd4] sm:$0xf] }
 0x4ae   :  { %10974 = vmatpush.bf16.msrb.mxu1 %v17106_v29  ;;  %v17778_v29 = vor.u32 %v19431_v52, %v17777_v61  ;;  %v20243_v56 = vpop.f32.mrf.mxu1  ;;  %v17330_v1 = vor.u32 %v19319_v43, %v17329_v17  ;;  %v18756_v43 = vld [vmem:[#allocation13 + $0x4] sm:$0xf]  ;;  %v16183_v62 = vld [vmem:[#allocation13 + $0x8a4] sm:$0xf0]  ;;  %v16547_v16 = vld [vmem:[#allocation13 + $0xb7c] sm:$0xf0] }
 0x4af   :  { %11046 = vmatpush.bf16.msrb.mxu3 %v15710_v27  ;;  %v15595_v27 = vld [vmem:[#allocation13 + $0x40c] sm:$0xf0]  ;;  %v6243_v23 = vmax.f32 %v6138_v55, 0.0  ;;  %v15427_v55 = vld [vmem:[#allocation13 + $0x2bc] sm:$0xf0] }
 0x4b0   :  { %v15598_v6 = vor.u32 %v18882_v38, %v15595_v27  ;;  %v18847_v38 = vld [vmem:[#allocation13 + $0x2dc] sm:$0xf]  ;;  %v15455_v27 = vld [vmem:[#allocation13 + $0x2f4] sm:$0xf0]  ;;  %v18938_v48 = vld [vmem:[#allocation13 + $0x5b4] sm:$0xf] }
 0x4b1   :  { %10975 = vmatmul.bf16.vlgmr.msrb.gmra.mxu1 %v20233_v30  ;;  %10984 = vmatpush.bf16.msra.mxu2 %v17414_v21  ;;  %v6113_v21 = vpop.f32.mrf.mxu2  ;;  %v20247_v22 = vpack.c.bf16 %v6243_v23, %v6243_v23  ;;  %v15458_v17 = vor.u32 %v18847_v38, %v15455_v27  ;;  %v18945_v23 = vld [vmem:[#allocation13 + $0x5ec] sm:$0xf]  ;;  %v15791_v38 = vld [vmem:[#allocation13 + $0x594] sm:$0xf0] }
 0x4b2   :  { %11019 = vmatpush.bf16.msra.mxu1 %v15290_v57  ;;  %v15962_v57 = vor.u32 %v18973_v3, %v15959_v0  ;;  %11013 = vmatpush.bf16.msra.mxu0 %v17778_v29  ;;  %v16603_v3 = vld [vmem:[#allocation13 + $0xbec] sm:$0xf0]  ;;  %v18952_v0 = vld [vmem:[#allocation13 + $0x624] sm:$0xf]  ;;  %v16186_v21 = vor.u32 %v19029_v39, %v16183_v62  ;;  %v15315_v39 = vld [vmem:[#allocation13 + $0x1dc] sm:$0xf0] }
 0x4b3   :  { %11047 = vmatpush.bf16.msrb.mxu3 %v15682_v26  ;;  %v15175_v26 = vld [vmem:[#allocation13 + $0xc4] sm:$0xf0]  ;;  %v19001_v62 = vld [vmem:[#allocation13 + $0x7ac] sm:$0xf] }
 0x4b4   :  { %v15178_v35 = vor.u32 %v18777_v10, %v15175_v26  ;;  %11001 = vmatmul.bf16.vlgmr.msra.gmra.mxu3 %v20247_v22  ;;  %v15091_v10 = vld [vmem:[#allocation13 + $0x1c] sm:$0xf0]  ;;  %v16606_v26 = vor.u32 %v19134_v5, %v16603_v3  ;;  %v18819_v5 = vld [vmem:[#allocation13 + $0x1fc] sm:$0xf] }
 0x4b5   :  { %10985 = vmatpush.bf16.msra.mxu2 %v17386_v37  ;;  %v19141_v37 = vld [vmem:[#allocation13 + $0xc0c] sm:$0xf]  ;;  %v6178_v29 = vpop.f32.mrf.mxu3  ;;  %v15094_v13 = vor.u32 %v18756_v43, %v15091_v10  ;;  %v16491_v43 = vld [vmem:[#allocation13 + $0xb0c] sm:$0xf0]  ;;  %v18924_v10 = vld [vmem:[#allocation13 + $0x544] sm:$0xf] }
 0x4b6   :  { %11020 = vmatpush.bf16.msra.mxu1 %v15262_v31  ;;  %11058 = vmatpush.bf16.msrb.mxu0 %v15962_v57  ;;  %v18770_v31 = vld [vmem:[#allocation13 + $0x74] sm:$0xf]  ;;  %v16634_v52 = vor.u32 %v19141_v37, %v16631_v4  ;;  %v18840_v57 = vld [vmem:[#allocation13 + $0x2a4] sm:$0xf]  ;;  %v15371_v4 = vld [vmem:[#allocation13 + $0x24c] sm:$0xf0] }
 0x4b7   :  { %11048 = vmatpush.bf16.msrb.mxu3 %v15654_v7  ;;  %v6191_v7 = vpop.f32.mrf.mxu0  ;;  %v15150_v12 = vor.u32 %v18770_v31, %v15147_v41  ;;  %v15430_v20 = vor.u32 %v18840_v57, %v15427_v55  ;;  %v19120_v41 = vld [vmem:[#allocation13 + $0xb64] sm:$0xf]  ;;  %v18826_v37 = vld [vmem:[#allocation13 + $0x234] sm:$0xf]  ;;  %v15763_v57 = vld [vmem:[#allocation13 + $0x55c] sm:$0xf0] }
 0x4b8   :  { %v19022_v7 = vld [vmem:[#allocation13 + $0x854] sm:$0xf]  ;;  %v15374_v27 = vor.u32 %v18826_v37, %v15371_v4  ;;  %v15766_v51 = vor.u32 %v18924_v10, %v15763_v57  ;;  %v1339_v37 = vperm.slane %v20225_v33, 4  ;;  %v19092_v4 = vld [vmem:[#allocation13 + $0xa84] sm:$0xf] }
 0x4b9   :  { %10986 = vmatpush.bf16.msra.mxu2 %v17358_v9  ;;  %v6152_v9 = vpop.f32.mrf.mxu1  ;;  %v18980_v10 = vld [vmem:[#allocation13 + $0x704] sm:$0xf]  ;;  %v15987_v57 = vld [vmem:[#allocation13 + $0x71c] sm:$0xf0] }
 0x4ba   :  { %11021 = vmatpush.bf16.msra.mxu1 %v15234_v34  ;;  %v15903_v34 = vld [vmem:[#allocation13 + $0x674] sm:$0xf0]  ;;  %11059 = vmatpush.bf16.msrb.mxu0 %v15934_v58  ;;  %v15819_v58 = vld [vmem:[#allocation13 + $0x5cc] sm:$0xf0] }
 0x4bb   :  { %11049 = vmatpush.bf16.msrb.mxu3 %v15626_v14  ;;  %v18763_v14 = vld [vmem:[#allocation13 + $0x3c] sm:$0xf]  ;;  %v15906_v61 = vor.u32 %v18959_v44, %v15903_v34  ;;  %v15822_v44 = vor.u32 %v18938_v48, %v15819_v58  ;;  %v16550_v34 = vor.u32 %v19120_v41, %v16547_v16  ;;  %v15343_v9 = vld [vmem:[#allocation13 + $0x214] sm:$0xf0]  ;;  %v18994_v41 = vld [vmem:[#allocation13 + $0x774] sm:$0xf] }
 0x4bc   :  { %v15346_v55 = vor.u32 %v18819_v5, %v15343_v9  ;;  %v16043_v58 = vld [vmem:[#allocation13 + $0x78c] sm:$0xf0]  ;;  %v6151_v5 = vadd.f32 %v20243_v56, %v1339_v37  ;;  %v17023_v37 = vld [vmem:[#allocation13 + $0xf34] sm:$0xf0] }
 0x4bd   :  { %10987 = vmatpush.bf16.msra.mxu2 %v17330_v1  ;;  %v15847_v1 = vld [vmem:[#allocation13 + $0x604] sm:$0xf0] }
 0x4be   :  { %11022 = vmatpush.bf16.msra.mxu1 %v15206_v19  ;;  %v15122_v19 = vor.u32 %v18763_v14, %v15119_v54  ;;  %11060 = vmatpush.bf16.msrb.mxu0 %v15906_v61  ;;  %v15850_v31 = vor.u32 %v18945_v23, %v15847_v1  ;;  %v19113_v14 = vld [vmem:[#allocation13 + $0xb2c] sm:$0xf]  ;;  %v18931_v54 = vld [vmem:[#allocation13 + $0x57c] sm:$0xf]  ;;  %v16071_v23 = vld [vmem:[#allocation13 + $0x7c4] sm:$0xf0] }
 0x4bf   :  { %11050 = vmatpush.bf16.msrb.mxu3 %v15598_v6  ;;  %v15878_v6 = vor.u32 %v18952_v0, %v15875_v18  ;;  %v15794_v29 = vor.u32 %v18931_v54, %v15791_v38  ;;  %v19008_v18 = vld [vmem:[#allocation13 + $0x7e4] sm:$0xf]  ;;  %v19085_v1 = vld [vmem:[#allocation13 + $0xa4c] sm:$0xf]  ;;  %v16015_v38 = vld [vmem:[#allocation13 + $0x754] sm:$0xf0] }
 0x4c0   :  { %10988 = vmatmul.bf16.vlgmr.msra.gmra.mxu2 %v20250_v49 }
 0x4c1   :  { %11032 = vmatpush.bf16.msrb.mxu2 %v15514_v45  ;;  %v15399_v45 = vld [vmem:[#allocation13 + $0x284] sm:$0xf0] }
 0x4c2   :  { %11023 = vmatpush.bf16.msra.mxu1 %v15178_v35  ;;  %v18833_v35 = vld [vmem:[#allocation13 + $0x26c] sm:$0xf]  ;;  %11061 = vmatpush.bf16.msrb.mxu0 %v15878_v6 }
 0x4c3   :  { %11051 = vmatpush.bf16.msrb.mxu3 %v15570_v15  ;;  %v16155_v15 = vld [vmem:[#allocation13 + $0x86c] sm:$0xf0]  ;;  %v15402_v53 = vor.u32 %v18833_v35, %v15399_v45  ;;  %v20255_v61 = vpop.f32.mrf.mxu2 }
 0x4c4   :  { %v16158_v32 = vor.u32 %v19022_v7, %v16155_v15  ;;  %v16074_v7 = vor.u32 %v19001_v62, %v16071_v23  ;;  %v19351_v62 = vld [vmem:[#allocation13 + $0x129c] sm:$0xf] }
 0x4c5   :  { %11033 = vmatpush.bf16.msrb.mxu2 %v15486_v28  ;;  %v16127_v28 = vld [vmem:[#allocation13 + $0x834] sm:$0xf0] }
 0x4c6   :  { %11024 = vmatpush.bf16.msra.mxu1 %v15150_v12  ;;  %11062 = vmatpush.bf16.msrb.mxu0 %v15850_v31  ;;  %v19015_v12 = vld [vmem:[#allocation13 + $0x81c] sm:$0xf] }
 0x4c7   :  { %11052 = vmatpush.bf16.msrb.mxu3 %v15542_v47  ;;  %v16519_v47 = vld [vmem:[#allocation13 + $0xb44] sm:$0xf0] }
 0x4c8   :  { %v20257_v3 = vpop.f32.mrf.mxu0  ;;  %v16522_v0 = vor.u32 %v19113_v14, %v16519_v47  ;;  %v18987_v47 = vld [vmem:[#allocation13 + $0x73c] sm:$0xf] }
 0x4c9   :  { %11034 = vmatpush.bf16.msrb.mxu2 %v15458_v17  ;;  %v19106_v17 = vld [vmem:[#allocation13 + $0xaf4] sm:$0xf] }
 0x4ca   :  { %11025 = vmatpush.bf16.msra.mxu1 %v15122_v19  ;;  %11053 = vmatmul.bf16.vlgmr.msrb.gmra.mxu3 %v20199_v60  ;;  %v16099_v19 = vld [vmem:[#allocation13 + $0x7fc] sm:$0xf0]  ;;  %v16494_v40 = vor.u32 %v19106_v17, %v16491_v43  ;;  %v16018_v17 = vor.u32 %v18987_v47, %v16015_v38  ;;  %v19043_v47 = vld [vmem:[#allocation13 + $0x8fc] sm:$0xf] }
 0x4cb   :  { %11097 = vmatpush.bf16.msra.mxu3 %v16634_v52  ;;  %v16130_v52 = vor.u32 %v19015_v12, %v16127_v28  ;;  %11063 = vmatpush.bf16.msrb.mxu0 %v15822_v44  ;;  %v16102_v6 = vor.u32 %v19008_v18, %v16099_v19  ;;  %v16435_v44 = vld [vmem:[#allocation13 + $0xa9c] sm:$0xf0]  ;;  %v17527_v12 = vld [vmem:[#allocation13 + $0x1324] sm:$0xf0]  ;;  %v16046_v28 = vor.u32 %v18994_v41, %v16043_v58  ;;  %v17499_v18 = vld [vmem:[#allocation13 + $0x12ec] sm:$0xf0] }
 0x4cc   :  { %v16438_v54 = vor.u32 %v19092_v4, %v16435_v44  ;;  %v6164_v19 = vadd.f32 %v20255_v61, %v6151_v5  ;;  %v15990_v61 = vor.u32 %v18980_v10, %v15987_v57  ;;  %v16267_v58 = vld [vmem:[#allocation13 + $0x94c] sm:$0xf0]  ;;  %v19337_v4 = vld [vmem:[#allocation13 + $0x122c] sm:$0xf]  ;;  %v17415_v44 = vld [vmem:[#allocation13 + $0x1244] sm:$0xf0] }
 0x4cd   :  { %11035 = vmatpush.bf16.msrb.mxu2 %v15430_v20  ;;  %v19099_v20 = vld [vmem:[#allocation13 + $0xabc] sm:$0xf]  ;;  %v20261_v45 = vpop.f32.mrf.mxu3  ;;  %v19232_v5 = vld [vmem:[#allocation13 + $0xee4] sm:$0xf]  ;;  %v16211_v57 = vld [vmem:[#allocation13 + $0x8dc] sm:$0xf0] }
 0x4ce   :  { %11026 = vmatpush.bf16.msra.mxu1 %v15094_v13  ;;  %v16407_v13 = vld [vmem:[#allocation13 + $0xa64] sm:$0xf0]  ;;  %v20259_v35 = vpop.f32.mrf.mxu1 }
 0x4cf   :  { %11098 = vmatpush.bf16.msra.mxu3 %v16606_v26  ;;  %v18812_v26 = vld [vmem:[#allocation13 + $0x1c4] sm:$0xf]  ;;  %11064 = vmatpush.bf16.msrb.mxu0 %v15794_v29  ;;  %v16410_v15 = vor.u32 %v19085_v1, %v16407_v13  ;;  %v19057_v13 = vld [vmem:[#allocation13 + $0x96c] sm:$0xf] }
 0x4d0   :  { %v15318_v31 = vor.u32 %v18812_v26, %v15315_v39  ;;  %v10861_v16 = vpop.f32.mrf.mxu0  ;;  %v19253_v26 = vld [vmem:[#allocation13 + $0xf8c] sm:$0xf]  ;;  %v17079_v39 = vld [vmem:[#allocation13 + $0xfa4] sm:$0xf0] }
 0x4d1   :  { %11027 = vmatmul.bf16.vlgmr.msra.gmra.mxu1 %v20159_v50  ;;  %11036 = vmatpush.bf16.msrb.mxu2 %v15402_v53  ;;  %v19078_v53 = vld [vmem:[#allocation13 + $0xa14] sm:$0xf]  ;;  %v17082_v1 = vor.u32 %v19253_v26, %v17079_v39  ;;  %v19309_v39 = vld [vmem:[#allocation13 + $0x114c] sm:$0xf] }
 0x4d2   :  { %11071 = vmatpush.bf16.msrb.mxu1 %v16186_v21  ;;  %v16463_v21 = vld [vmem:[#allocation13 + $0xad4] sm:$0xf0] }
 0x4d3   :  { %11099 = vmatpush.bf16.msra.mxu3 %v16578_v42  ;;  %v6165_v42 = vpop.f32.mrf.mxu2  ;;  %11065 = vmatpush.bf16.msrb.mxu0 %v15766_v51  ;;  %v16466_v48 = vor.u32 %v19099_v20, %v16463_v21  ;;  %v17471_v51 = vld [vmem:[#allocation13 + $0x12b4] sm:$0xf0]  ;;  %v16295_v20 = vld [vmem:[#allocation13 + $0x984] sm:$0xf0] }
 0x4d4   :  { %v17474_v21 = vor.u32 %v19351_v62, %v17471_v51  ;;  %v17051_v42 = vld [vmem:[#allocation13 + $0xf6c] sm:$0xf0]  ;;  %v17303_v62 = vld [vmem:[#allocation13 + $0x1164] sm:$0xf0] }
 0x4d5   :  { %11037 = vmatpush.bf16.msrb.mxu2 %v15374_v27  ;;  %v19071_v27 = vld [vmem:[#allocation13 + $0x9dc] sm:$0xf]  ;;  %v6230_v29 = vpop.f32.mrf.mxu3 }
 0x4d6   :  { %11072 = vmatpush.bf16.msrb.mxu1 %v16158_v32  ;;  %v16379_v32 = vld [vmem:[#allocation13 + $0xa2c] sm:$0xf0]  ;;  %v6204_v9 = vpop.f32.mrf.mxu1  ;;  %v19330_v29 = vld [vmem:[#allocation13 + $0x11f4] sm:$0xf] }
 0x4d7   :  { %11100 = vmatpush.bf16.msra.mxu3 %v16550_v34  ;;  %v19365_v34 = vld [vmem:[#allocation13 + $0x130c] sm:$0xf]  ;;  %v16382_v14 = vor.u32 %v19078_v53, %v16379_v32  ;;  %v19239_v32 = vld [vmem:[#allocation13 + $0xf1c] sm:$0xf] }
 0x4d8   :  { %v17530_v33 = vor.u32 %v19365_v34, %v17527_v12  ;;  %v7090_v34 = vld [vmem:[#allocation15] sm:$0xff] }
 0x4d9   :  { %11038 = vmatpush.bf16.msrb.mxu2 %v15346_v55  ;;  %v19064_v55 = vld [vmem:[#allocation13 + $0x9a4] sm:$0xf]  ;;  %v7092_v9 = vperm.slane %v7090_v34, 0  ;;  %v16799_v34 = vld [vmem:[#allocation13 + $0xd74] sm:$0xf0] }
 0x4da   :  { %11073 = vmatpush.bf16.msrb.mxu1 %v16130_v52  ;;  %v16351_v52 = vld [vmem:[#allocation13 + $0x9f4] sm:$0xf0] }
 0x4db   :  { %11101 = vmatpush.bf16.msra.mxu3 %v16522_v0  ;;  %v19358_v0 = vld [vmem:[#allocation13 + $0x12d4] sm:$0xf]  ;;  %v16354_v43 = vor.u32 %v19071_v27, %v16351_v52  ;;  %v17418_v52 = vor.u32 %v19337_v4, %v17415_v44  ;;  %v10860_v51 = vadd.f32 %v20257_v3, %v7092_v9  ;;  %v19316_v4 = vld [vmem:[#allocation13 + $0x1184] sm:$0xf]  ;;  %v17331_v44 = vld [vmem:[#allocation13 + $0x119c] sm:$0xf0] }
 0x4dc   :  { %v17502_v56 = vor.u32 %v19358_v0, %v17499_v18  ;;  %v17387_v0 = vld [vmem:[#allocation13 + $0x120c] sm:$0xf0] }
 0x4dd   :  { %11039 = vmatpush.bf16.msrb.mxu2 %v15318_v31  ;;  %v19246_v31 = vld [vmem:[#allocation13 + $0xf54] sm:$0xf]  ;;  %v17390_v26 = vor.u32 %v19330_v29, %v17387_v0  ;;  %v19176_v29 = vld [vmem:[#allocation13 + $0xd24] sm:$0xf] }
 0x4de   :  { %11074 = vmatpush.bf16.msrb.mxu1 %v16102_v6  ;;  %v16323_v6 = vld [vmem:[#allocation13 + $0x9bc] sm:$0xf0]  ;;  %v17054_v16 = vor.u32 %v19246_v31, %v17051_v42  ;;  %v16827_v31 = vld [vmem:[#allocation13 + $0xdac] sm:$0xf0] }
 0x4df   :  { %11102 = vmatpush.bf16.msra.mxu3 %v16494_v40  ;;  %v6177_v40 = vadd.f32 %v20245_v59, %v6164_v19  ;;  %v16326_v23 = vor.u32 %v19064_v55, %v16323_v6  ;;  %v16298_v59 = vor.u32 %v19057_v13, %v16295_v20  ;;  %v19197_v19 = vld [vmem:[#allocation13 + $0xdcc] sm:$0xf]  ;;  %v16967_v6 = vld [vmem:[#allocation13 + $0xec4] sm:$0xf0] }
 0x4e0   :  { %11040 = vmatmul.bf16.vlgmr.msrb.gmra.mxu2 %v20184_v8  ;;  %v19225_v55 = vld [vmem:[#allocation13 + $0xeac] sm:$0xf] }
 0x4e1   :  { %11084 = vmatpush.bf16.msra.mxu2 %v16410_v15  ;;  %v17443_v15 = vld [vmem:[#allocation13 + $0x127c] sm:$0xf0]  ;;  %v6190_v41 = vadd.f32 %v20237_v36, %v6177_v40 }
 0x4e2   :  { %11075 = vmatpush.bf16.msrb.mxu1 %v16074_v7  ;;  %v19344_v7 = vld [vmem:[#allocation13 + $0x1264] sm:$0xf] }
 0x4e3   :  { %11103 = vmatpush.bf16.msra.mxu3 %v16466_v48  ;;  %v19050_v48 = vld [vmem:[#allocation13 + $0x934] sm:$0xf]  ;;  %v17446_v53 = vor.u32 %v19344_v7, %v17443_v15  ;;  %v6203_v12 = vadd.f32 %v20259_v35, %v6190_v41  ;;  %v16970_v15 = vor.u32 %v19225_v55, %v16967_v6  ;;  %v17306_v41 = vor.u32 %v19309_v39, %v17303_v62  ;;  %v16883_v55 = vld [vmem:[#allocation13 + $0xe1c] sm:$0xf0]  ;;  %v19288_v6 = vld [vmem:[#allocation13 + $0x10a4] sm:$0xf] }
 0x4e4   :  { %v16270_v36 = vor.u32 %v19050_v48, %v16267_v58  ;;  %v16939_v48 = vld [vmem:[#allocation13 + $0xe8c] sm:$0xf0]  ;;  %v19302_v58 = vld [vmem:[#allocation13 + $0x1114] sm:$0xf]  ;;  %v19169_v62 = vld [vmem:[#allocation13 + $0xcec] sm:$0xf] }
 0x4e5   :  { %11085 = vmatpush.bf16.msra.mxu2 %v16382_v14  ;;  %v17026_v14 = vor.u32 %v19239_v32, %v17023_v37  ;;  %v19183_v37 = vld [vmem:[#allocation13 + $0xd5c] sm:$0xf] }
 0x4e6   :  { %11076 = vmatpush.bf16.msrb.mxu1 %v16046_v28  ;;  %v6215_v28 = vpop.f32.mrf.mxu2 }
 0x4e7   :  { %11104 = vmatpush.bf16.msra.mxu3 %v16438_v54  ;;  %v16239_v54 = vld [vmem:[#allocation13 + $0x914] sm:$0xf0]  ;;  %v6216_v38 = vadd.f32 %v6215_v28, %v6203_v12  ;;  %v15517_v12 = vld [vmem:[#allocation13 + $0x350] sm:$0xf] }
 0x4e8   :  { %v20272_v27 = vpop.f32.mrf.mxu0  ;;  %v16242_v35 = vor.u32 %v19043_v47, %v16239_v54  ;;  %v19211_v47 = vld [vmem:[#allocation13 + $0xe3c] sm:$0xf]  ;;  %v17334_v54 = vor.u32 %v19316_v4, %v17331_v44  ;;  %v19274_v44 = vld [vmem:[#allocation13 + $0x1034] sm:$0xf] }
 0x4e9   :  { %11086 = vmatpush.bf16.msra.mxu2 %v16354_v43  ;;  %v6229_v18 = vadd.f32 %v20261_v45, %v6216_v38  ;;  %v19036_v43 = vld [vmem:[#allocation13 + $0x8c4] sm:$0xf]  ;;  %v17359_v45 = vld [vmem:[#allocation13 + $0x11d4] sm:$0xf0] }
 0x4ea   :  { %11077 = vmatpush.bf16.msrb.mxu1 %v16018_v17  ;;  %11105 = vmatmul.bf16.vlgmr.msra.gmra.mxu3 %v20223_v24  ;;  %v16855_v17 = vld [vmem:[#allocation13 + $0xde4] sm:$0xf0]  ;;  %v16214_v20 = vor.u32 %v19036_v43, %v16211_v57  ;;  %v16911_v38 = vld [vmem:[#allocation13 + $0xe54] sm:$0xf0]  ;;  %v19204_v57 = vld [vmem:[#allocation13 + $0xe04] sm:$0xf] }
 0x4eb   :  { %11149 = vmatpush.bf16.msrb.mxu3 %v17530_v33  ;;  %v16995_v33 = vld [vmem:[#allocation13 + $0xefc] sm:$0xf0]  ;;  %v16858_v40 = vor.u32 %v19197_v19, %v16855_v17  ;;  %v15489_v19 = vld [vmem:[#allocation13 + $0x318] sm:$0xf]  ;;  %v18858_v17 = vld [vmem:[#allocation13 + $0x330] sm:$0xf0]  ;;  %v16914_v43 = vor.u32 %v19211_v47, %v16911_v38 }
 0x4ec   :  { %v16998_v10 = vor.u32 %v19232_v5, %v16995_v33  ;;  %v17247_v5 = vld [vmem:[#allocation13 + $0x10f4] sm:$0xf0]  ;;  %v16802_v33 = vor.u32 %v19183_v37, %v16799_v34  ;;  %v15490_v39 = vor.u32 %v18858_v17, %v15489_v19  ;;  %v17163_v34 = vld [vmem:[#allocation13 + $0x104c] sm:$0xf0] }
 0x4ed   :  { %11087 = vmatpush.bf16.msra.mxu2 %v16326_v23  ;;  %v20278_v13 = vpop.f32.mrf.mxu3  ;;  %v17919_v47 = vld [vmem:[#allocation13 + $0x1634] sm:$0xf0]  ;;  %v15405_v38 = vld [vmem:[#allocation13 + $0x270] sm:$0xf] }
 0x4ee   :  { %11078 = vmatpush.bf16.msrb.mxu1 %v15990_v61  ;;  %v19323_v61 = vld [vmem:[#allocation13 + $0x11bc] sm:$0xf]  ;;  %v6217_v7 = vpop.f32.mrf.mxu2 }
 0x4ef   :  { %11150 = vmatpush.bf16.msrb.mxu3 %v17502_v56  ;;  %v6244_v56 = vmax.f32 %v6229_v18, 0.0  ;;  %v19281_v7 = vld [vmem:[#allocation13 + $0x106c] sm:$0xf] }
 0x4f0   :  { %v10913_v3 = vpop.f32.mrf.mxu0 }
 0x4f1   :  { %11079 = vmatmul.bf16.vlgmr.msrb.gmra.mxu1 %v20179_v46  ;;  %11088 = vmatpush.bf16.msra.mxu2 %v16298_v59  ;;  %v20276_v23 = vpack.c.bf16 %v6244_v56, %v6244_v56  ;;  %v19218_v59 = vld [vmem:[#allocation13 + $0xe74] sm:$0xf]  ;;  %v17219_v56 = vld [vmem:[#allocation13 + $0x10bc] sm:$0xf0] }
 0x4f2   :  { %11123 = vmatpush.bf16.msra.mxu1 %v17082_v1  ;;  %v10872_v1 = vpop.f32.mrf.mxu1  ;;  %v16942_v28 = vor.u32 %v19218_v59, %v16939_v48  ;;  %v19162_v3 = vld [vmem:[#allocation13 + $0xcb4] sm:$0xf]  ;;  %v17947_v48 = vld [vmem:[#allocation13 + $0x166c] sm:$0xf0] }
 0x4f3   :  { %11151 = vmatpush.bf16.msrb.mxu3 %v17474_v21  ;;  %v19190_v21 = vld [vmem:[#allocation13 + $0xd94] sm:$0xf]  ;;  %v20280_v42 = vadd.f32 %v10872_v1, %v10860_v51  ;;  %11014 = vmatmul.bf16.vlgmr.msra.gmra.mxu0 %v20276_v23  ;;  %v19477_v51 = vld [vmem:[#allocation13 + $0x168c] sm:$0xf]  ;;  %v18851_v1 = vld [vmem:[#allocation13 + $0x2f8] sm:$0xf0] }
 0x4f4   :  { %11110 = vmatpush.bf16.msra.mxu0 %v16858_v40  ;;  %v16830_v32 = vor.u32 %v19190_v21, %v16827_v31  ;;  %v17975_v40 = vld [vmem:[#allocation13 + $0x16a4] sm:$0xf0]  ;;  %v17222_v21 = vor.u32 %v19288_v6, %v17219_v56  ;;  %v15377_v6 = vld [vmem:[#allocation13 + $0x238] sm:$0xf]  ;;  %v18830_v56 = vld [vmem:[#allocation13 + $0x250] sm:$0xf0] }
 0x4f5   :  { %11089 = vmatpush.bf16.msra.mxu2 %v16270_v36  ;;  %v18865_v36 = vld [vmem:[#allocation13 + $0x368] sm:$0xf0]  ;;  %v10900_v18 = vpop.f32.mrf.mxu3  ;;  %v17978_v31 = vor.u32 %v19477_v51, %v17975_v40  ;;  %v17751_v51 = vld [vmem:[#allocation13 + $0x14e4] sm:$0xf0]  ;;  %v19260_v40 = vld [vmem:[#allocation13 + $0xfc4] sm:$0xf] }
 0x4f6   :  { %11124 = vmatpush.bf16.msra.mxu1 %v17054_v16  ;;  %v17362_v16 = vor.u32 %v19323_v61, %v17359_v45  ;;  %v15518_v9 = vor.u32 %v18865_v36, %v15517_v12  ;;  %v16743_v61 = vld [vmem:[#allocation13 + $0xd04] sm:$0xf0]  ;;  %v15461_v45 = vld [vmem:[#allocation13 + $0x2e0] sm:$0xf] }
 0x4f7   :  { %11152 = vmatpush.bf16.msrb.mxu3 %v17446_v53  ;;  %v17275_v53 = vld [vmem:[#allocation13 + $0x112c] sm:$0xf0]  ;;  %v15462_v59 = vor.u32 %v18851_v1, %v15461_v45 }
 0x4f8   :  { %11111 = vmatpush.bf16.msra.mxu0 %v16830_v32  ;;  %v18844_v32 = vld [vmem:[#allocation13 + $0x2c0] sm:$0xf0] }
 0x4f9   :  { %11090 = vmatpush.bf16.msra.mxu2 %v16242_v35  ;;  %v16771_v35 = vld [vmem:[#allocation13 + $0xd3c] sm:$0xf0] }
 0x4fa   :  { %11125 = vmatpush.bf16.msra.mxu1 %v17026_v14  ;;  %v17278_v14 = vor.u32 %v19302_v58, %v17275_v53  ;;  %v10874_v0 = vpop.f32.mrf.mxu1  ;;  %v16715_v58 = vld [vmem:[#allocation13 + $0xccc] sm:$0xf0]  ;;  %v15433_v53 = vld [vmem:[#allocation13 + $0x2a8] sm:$0xf] }
 0x4fb   :  { %11153 = vmatpush.bf16.msrb.mxu3 %v17418_v52  ;;  %v19295_v52 = vld [vmem:[#allocation13 + $0x10dc] sm:$0xf]  ;;  %v16718_v12 = vor.u32 %v19162_v3, %v16715_v58  ;;  %v15434_v36 = vor.u32 %v18844_v32, %v15433_v53  ;;  %v17135_v0 = vld [vmem:[#allocation13 + $0x1014] sm:$0xf0]  ;;  %v19414_v58 = vld [vmem:[#allocation13 + $0x1494] sm:$0xf] }
 0x4fc   :  { %11112 = vmatpush.bf16.msra.mxu0 %v16802_v33  ;;  %v17723_v53 = vld [vmem:[#allocation13 + $0x14ac] sm:$0xf0] }
 0x4fd   :  { %11091 = vmatpush.bf16.msra.mxu2 %v16214_v20  ;;  %v16886_v20 = vor.u32 %v19204_v57, %v16883_v55  ;;  %v17891_v57 = vld [vmem:[#allocation13 + $0x15fc] sm:$0xf0] }
 0x4fe   :  { %11126 = vmatpush.bf16.msra.mxu1 %v16998_v10  ;;  %v17250_v10 = vor.u32 %v19295_v52, %v17247_v5  ;;  %v18837_v52 = vld [vmem:[#allocation13 + $0x288] sm:$0xf0]  ;;  %v17166_v5 = vor.u32 %v19274_v44, %v17163_v34  ;;  %v16659_v55 = vld [vmem:[#allocation13 + $0xc5c] sm:$0xf0] }
 0x4ff   :  { %11154 = vmatpush.bf16.msrb.mxu3 %v17390_v26  ;;  %v16774_v26 = vor.u32 %v19176_v29, %v16771_v35  ;;  %v19267_v29 = vld [vmem:[#allocation13 + $0xffc] sm:$0xf]  ;;  %v15406_v17 = vor.u32 %v18837_v52, %v15405_v38  ;;  %v15321_v38 = vld [vmem:[#allocation13 + $0x1c8] sm:$0xf]  ;;  %v18816_v52 = vld [vmem:[#allocation13 + $0x1e0] sm:$0xf0] }
 0x500   :  { %11092 = vmatmul.bf16.vlgmr.msra.gmra.mxu2 %v20211_v25 }
 0x501   :  { %11136 = vmatpush.bf16.msrb.mxu2 %v17306_v41  ;;  %11113 = vmatpush.bf16.msra.mxu0 %v16774_v26  ;;  %v16746_v41 = vor.u32 %v19169_v62, %v16743_v61  ;;  %v19421_v62 = vld [vmem:[#allocation13 + $0x14cc] sm:$0xf]  ;;  %v17107_v61 = vld [vmem:[#allocation13 + $0xfdc] sm:$0xf0] }
 0x502   :  { %11127 = vmatpush.bf16.msra.mxu1 %v16970_v15  ;;  %v17191_v15 = vld [vmem:[#allocation13 + $0x1084] sm:$0xf0] }
 0x503   :  { %11155 = vmatpush.bf16.msrb.mxu3 %v17362_v16  ;;  %v19470_v16 = vld [vmem:[#allocation13 + $0x1654] sm:$0xf]  ;;  %v17194_v37 = vor.u32 %v19281_v7, %v17191_v15  ;;  %11066 = vmatmul.bf16.vlgmr.msrb.gmra.mxu0 %v20177_v2  ;;  %v10885_v33 = vpop.f32.mrf.mxu2  ;;  %v15293_v7 = vld [vmem:[#allocation13 + $0x190] sm:$0xf]  ;;  %v17754_v15 = vor.u32 %v19421_v62, %v17751_v51  ;;  %v16385_v62 = vld [vmem:[#allocation13 + $0xa18] sm:$0xf] }
 0x504   :  { %v17950_v4 = vor.u32 %v19470_v16, %v17947_v48  ;;  %v10886_v18 = vadd.f32 %v10885_v33, %v20280_v42  ;;  %v17110_v48 = vor.u32 %v19260_v40, %v17107_v61  ;;  %v16413_v33 = vld [vmem:[#allocation13 + $0xa50] sm:$0xf]  ;;  %v19082_v51 = vld [vmem:[#allocation13 + $0xa30] sm:$0xf0]  ;;  %v19428_v40 = vld [vmem:[#allocation13 + $0x1504] sm:$0xf] }
 0x505   :  { %11137 = vmatpush.bf16.msrb.mxu2 %v17278_v14  ;;  %11114 = vmatpush.bf16.msra.mxu0 %v16746_v41  ;;  %v19463_v14 = vld [vmem:[#allocation13 + $0x161c] sm:$0xf]  ;;  %v18809_v41 = vld [vmem:[#allocation13 + $0x1a8] sm:$0xf0] }
 0x506   :  { %11128 = vmatpush.bf16.msra.mxu1 %v16942_v28  ;;  %v19155_v28 = vld [vmem:[#allocation13 + $0xc7c] sm:$0xf]  ;;  %v10899_v26 = vadd.f32 %v20278_v13, %v10886_v18  ;;  %v15349_v13 = vld [vmem:[#allocation13 + $0x200] sm:$0xf]  ;;  %v15294_v34 = vor.u32 %v18809_v41, %v15293_v7  ;;  %v15322_v18 = vor.u32 %v18816_v52, %v15321_v38  ;;  %v19393_v7 = vld [vmem:[#allocation13 + $0x13ec] sm:$0xf] }
 0x507   :  { %11156 = vmatpush.bf16.msrb.mxu3 %v17334_v54  ;;  %v16687_v54 = vld [vmem:[#allocation13 + $0xc94] sm:$0xf0]  ;;  %v18977_v41 = vld [vmem:[#allocation13 + $0x6e8] sm:$0xf0] }
 0x508   :  { %v20288_v35 = vpop.f32.mrf.mxu0  ;;  %v16690_v19 = vor.u32 %v19155_v28, %v16687_v54  ;;  %v10912_v45 = vadd.f32 %v20272_v27, %v10899_v26  ;;  %v15265_v28 = vld [vmem:[#allocation13 + $0x158] sm:$0xf]  ;;  %v19407_v54 = vld [vmem:[#allocation13 + $0x145c] sm:$0xf] }
 0x509   :  { %11138 = vmatpush.bf16.msrb.mxu2 %v17250_v10  ;;  %11115 = vmatpush.bf16.msra.mxu0 %v16718_v12  ;;  %v19456_v10 = vld [vmem:[#allocation13 + $0x15e4] sm:$0xf]  ;;  %v15153_v52 = vld [vmem:[#allocation13 + $0x78] sm:$0xf] }
 0x50a   :  { %11129 = vmatpush.bf16.msra.mxu1 %v16914_v43  ;;  %11157 = vmatmul.bf16.vlgmr.msrb.gmra.mxu3 %v20250_v49  ;;  %v19148_v43 = vld [vmem:[#allocation13 + $0xc44] sm:$0xf]  ;;  %v17894_v42 = vor.u32 %v19456_v10, %v17891_v57  ;;  %v15237_v57 = vld [vmem:[#allocation13 + $0x120] sm:$0xf] }
 0x50b   :  { %11201 = vmatpush.bf16.msra.mxu3 %v15518_v9  ;;  %v17922_v9 = vor.u32 %v19463_v14, %v17919_v47  ;;  %v16662_v1 = vor.u32 %v19148_v43, %v16659_v55  ;;  %v18802_v14 = vld [vmem:[#allocation13 + $0x170] sm:$0xf0]  ;;  %v17726_v47 = vor.u32 %v19414_v58, %v17723_v53  ;;  %v18795_v55 = vld [vmem:[#allocation13 + $0x138] sm:$0xf0] }
 0x50c   :  { %v15238_v61 = vor.u32 %v18795_v55, %v15237_v57 }
 0x50d   :  { %11139 = vmatpush.bf16.msrb.mxu2 %v17222_v21  ;;  %11116 = vmatpush.bf16.msra.mxu0 %v16690_v19  ;;  %v19449_v21 = vld [vmem:[#allocation13 + $0x15ac] sm:$0xf]  ;;  %v20292_v16 = vpop.f32.mrf.mxu3  ;;  %v19435_v19 = vld [vmem:[#allocation13 + $0x153c] sm:$0xf] }
 0x50e   :  { %11130 = vmatpush.bf16.msra.mxu1 %v16886_v20  ;;  %v15378_v20 = vor.u32 %v18830_v56, %v15377_v6  ;;  %v10924_v3 = vpop.f32.mrf.mxu1  ;;  %v19400_v6 = vld [vmem:[#allocation13 + $0x1424] sm:$0xf] }
 0x50f   :  { %11202 = vmatpush.bf16.msra.mxu3 %v15490_v39  ;;  %v17138_v39 = vor.u32 %v19267_v29, %v17135_v0  ;;  %v20294_v32 = vadd.f32 %v10924_v3, %v10912_v45  ;;  %v15266_v0 = vor.u32 %v18802_v14, %v15265_v28  ;;  %v17779_v45 = vld [vmem:[#allocation13 + $0x151c] sm:$0xf0]  ;;  %v19075_v3 = vld [vmem:[#allocation13 + $0x9f8] sm:$0xf0]  ;;  %v17611_v28 = vld [vmem:[#allocation13 + $0x13cc] sm:$0xf0] }
 0x510   :  { %v10965_v44 = vpop.f32.mrf.mxu0  ;;  %v16329_v14 = vld [vmem:[#allocation13 + $0x9a8] sm:$0xf] }
 0x511   :  { %11131 = vmatmul.bf16.vlgmr.msra.gmra.mxu1 %v20206_v11  ;;  %11140 = vmatpush.bf16.msrb.mxu2 %v17194_v37  ;;  %v10887_v37 = vpop.f32.mrf.mxu2 }
 0x512   :  { %11175 = vmatpush.bf16.msrb.mxu1 %v17978_v31  ;;  %v17863_v31 = vld [vmem:[#allocation13 + $0x15c4] sm:$0xf0]  ;;  %11117 = vmatpush.bf16.msra.mxu0 %v16662_v1  ;;  %v15181_v37 = vld [vmem:[#allocation13 + $0xb0] sm:$0xf] }
 0x513   :  { %11203 = vmatpush.bf16.msra.mxu3 %v15462_v59  ;;  %v18823_v59 = vld [vmem:[#allocation13 + $0x218] sm:$0xf0]  ;;  %v17866_v27 = vor.u32 %v19449_v21, %v17863_v31  ;;  %v15209_v1 = vld [vmem:[#allocation13 + $0xe8] sm:$0xf]  ;;  %v16386_v31 = vor.u32 %v19082_v51, %v16385_v62  ;;  %v19372_v51 = vld [vmem:[#allocation13 + $0x1344] sm:$0xf] }
 0x514   :  { %v15350_v12 = vor.u32 %v18823_v59, %v15349_v13  ;;  %v17639_v13 = vld [vmem:[#allocation13 + $0x1404] sm:$0xf0]  ;;  %v16357_v59 = vld [vmem:[#allocation13 + $0x9e0] sm:$0xf] }
 0x515   :  { %11141 = vmatpush.bf16.msrb.mxu2 %v17166_v5  ;;  %v17695_v5 = vld [vmem:[#allocation13 + $0x1474] sm:$0xf0]  ;;  %11118 = vmatmul.bf16.vlgmr.msra.gmra.mxu0 %v20204_v63  ;;  %v10952_v26 = vpop.f32.mrf.mxu3  ;;  %v16358_v44 = vor.u32 %v19075_v3, %v16357_v59  ;;  %v18760_v3 = vld [vmem:[#allocation13 + $0x20] sm:$0xf0] }
 0x516   :  { %11176 = vmatpush.bf16.msrb.mxu1 %v17950_v4  ;;  %v19442_v4 = vld [vmem:[#allocation13 + $0x1574] sm:$0xf]  ;;  %11162 = vmatpush.bf16.msrb.mxu0 %v17754_v15  ;;  %v17698_v43 = vor.u32 %v19407_v54, %v17695_v5  ;;  %v10926_v56 = vpop.f32.mrf.mxu1  ;;  %v15965_v15 = vld [vmem:[#allocation13 + $0x6d0] sm:$0xf] }
 0x517   :  { %11204 = vmatpush.bf16.msra.mxu3 %v15434_v36  ;;  %v17835_v36 = vld [vmem:[#allocation13 + $0x158c] sm:$0xf0]  ;;  %v15966_v53 = vor.u32 %v18977_v41, %v15965_v15  ;;  %v18774_v5 = vld [vmem:[#allocation13 + $0x90] sm:$0xf0]  ;;  %v18767_v56 = vld [vmem:[#allocation13 + $0x58] sm:$0xf0] }
 0x518   :  { %v17838_v29 = vor.u32 %v19442_v4, %v17835_v36  ;;  %v17642_v4 = vor.u32 %v19393_v7, %v17639_v13  ;;  %v18970_v36 = vld [vmem:[#allocation13 + $0x6b0] sm:$0xf0]  ;;  %v15154_v57 = vor.u32 %v18774_v5, %v15153_v52  ;;  %v15097_v41 = vld [vmem:[#allocation13 + $0x8] sm:$0xf]  ;;  %v16161_v5 = vld [vmem:[#allocation13 + $0x858] sm:$0xf] }
 0x519   :  { %11142 = vmatpush.bf16.msrb.mxu2 %v17138_v39  ;;  %v17667_v39 = vld [vmem:[#allocation13 + $0x143c] sm:$0xf0] }
 0x51a   :  { %11177 = vmatpush.bf16.msrb.mxu1 %v17922_v9  ;;  %v19089_v9 = vld [vmem:[#allocation13 + $0xa68] sm:$0xf0]  ;;  %11163 = vmatpush.bf16.msrb.mxu0 %v17726_v47  ;;  %v17670_v21 = vor.u32 %v19400_v6, %v17667_v39  ;;  %v19068_v47 = vld [vmem:[#allocation13 + $0x9c0] sm:$0xf0]  ;;  %v15125_v6 = vld [vmem:[#allocation13 + $0x40] sm:$0xf] }
 0x51b   :  { %11205 = vmatpush.bf16.msra.mxu3 %v15406_v17  ;;  %v17807_v17 = vld [vmem:[#allocation13 + $0x1554] sm:$0xf0]  ;;  %v16414_v10 = vor.u32 %v19089_v9, %v16413_v33  ;;  %v16330_v9 = vor.u32 %v19068_v47, %v16329_v14  ;;  %v15126_v7 = vor.u32 %v18767_v56, %v15125_v6  ;;  %v18935_v56 = vld [vmem:[#allocation13 + $0x598] sm:$0xf0] }
 0x51c   :  { %v15825_v47 = vld [vmem:[#allocation13 + $0x5b8] sm:$0xf] }
 0x51d   :  { %11143 = vmatpush.bf16.msrb.mxu2 %v17110_v48  ;;  %v17782_v48 = vor.u32 %v19428_v40, %v17779_v45  ;;  %v18956_v40 = vld [vmem:[#allocation13 + $0x640] sm:$0xf0]  ;;  %v16273_v45 = vld [vmem:[#allocation13 + $0x938] sm:$0xf] }
 0x51e   :  { %11178 = vmatpush.bf16.msrb.mxu1 %v17894_v42  ;;  %v17810_v42 = vor.u32 %v19435_v19, %v17807_v17  ;;  %11164 = vmatpush.bf16.msrb.mxu0 %v17698_v43  ;;  %v17583_v19 = vld [vmem:[#allocation13 + $0x1394] sm:$0xf0]  ;;  %v16301_v17 = vld [vmem:[#allocation13 + $0x970] sm:$0xf]  ;;  %v19061_v43 = vld [vmem:[#allocation13 + $0x988] sm:$0xf0] }
 0x51f   :  { %11206 = vmatpush.bf16.msra.mxu3 %v15378_v20  ;;  %v18788_v20 = vld [vmem:[#allocation13 + $0x100] sm:$0xf0]  ;;  %v16302_v62 = vor.u32 %v19061_v43, %v16301_v17  ;;  %v19313_v17 = vld [vmem:[#allocation13 + $0x1168] sm:$0xf0] }
 0x520   :  { %11144 = vmatmul.bf16.vlgmr.msrb.gmra.mxu2 %v20233_v30  ;;  %v15210_v58 = vor.u32 %v18788_v20, %v15209_v1  ;;  %v19054_v1 = vld [vmem:[#allocation13 + $0x950] sm:$0xf0] }
 0x521   :  { %11188 = vmatpush.bf16.msra.mxu2 %v15294_v34  ;;  %v19386_v34 = vld [vmem:[#allocation13 + $0x13b4] sm:$0xf]  ;;  %v16274_v59 = vor.u32 %v19054_v1, %v16273_v45 }
 0x522   :  { %11179 = vmatpush.bf16.msrb.mxu1 %v17866_v27  ;;  %v18781_v27 = vld [vmem:[#allocation13 + $0xc8] sm:$0xf0]  ;;  %11165 = vmatpush.bf16.msrb.mxu0 %v17670_v21  ;;  %v17614_v33 = vor.u32 %v19386_v34, %v17611_v28  ;;  %v15741_v21 = vld [vmem:[#allocation13 + $0x510] sm:$0xf]  ;;  %v16245_v34 = vld [vmem:[#allocation13 + $0x900] sm:$0xf]  ;;  %v15098_v28 = vor.u32 %v18760_v3, %v15097_v41 }
 0x523   :  { %11207 = vmatpush.bf16.msra.mxu3 %v15350_v12  ;;  %v15937_v12 = vld [vmem:[#allocation13 + $0x698] sm:$0xf]  ;;  %v15182_v54 = vor.u32 %v18781_v27, %v15181_v37  ;;  %v16189_v37 = vld [vmem:[#allocation13 + $0x890] sm:$0xf]  ;;  %v19306_v45 = vld [vmem:[#allocation13 + $0x1130] sm:$0xf0] }
 0x524   :  { %v15938_v38 = vor.u32 %v18970_v36, %v15937_v12  ;;  %v15713_v27 = vld [vmem:[#allocation13 + $0x4d8] sm:$0xf]  ;;  %v19047_v12 = vld [vmem:[#allocation13 + $0x918] sm:$0xf0]  ;;  %v19012_v41 = vld [vmem:[#allocation13 + $0x800] sm:$0xf0] }
 0x525   :  { %11189 = vmatpush.bf16.msra.mxu2 %v15266_v0  ;;  %v15909_v0 = vld [vmem:[#allocation13 + $0x660] sm:$0xf]  ;;  %v16246_v52 = vor.u32 %v19047_v12, %v16245_v34  ;;  %v18893_v3 = vld [vmem:[#allocation13 + $0x448] sm:$0xf0]  ;;  %v16077_v12 = vld [vmem:[#allocation13 + $0x7b0] sm:$0xf] }
 0x526   :  { %11180 = vmatpush.bf16.msrb.mxu1 %v17838_v29  ;;  %11166 = vmatpush.bf16.msrb.mxu0 %v17642_v4  ;;  %v19379_v29 = vld [vmem:[#allocation13 + $0x137c] sm:$0xf] }
 0x527   :  { %11208 = vmatpush.bf16.msra.mxu3 %v15322_v18  ;;  %v18963_v18 = vld [vmem:[#allocation13 + $0x678] sm:$0xf0]  ;;  %v17586_v39 = vor.u32 %v19379_v29, %v17583_v19  ;;  %v17309_v19 = vld [vmem:[#allocation13 + $0x1150] sm:$0xf] }
 0x528   :  { %v15910_v55 = vor.u32 %v18963_v18, %v15909_v0  ;;  %v18907_v29 = vld [vmem:[#allocation13 + $0x4b8] sm:$0xf0]  ;;  %v16217_v0 = vld [vmem:[#allocation13 + $0x8c8] sm:$0xf]  ;;  %v19040_v18 = vld [vmem:[#allocation13 + $0x8e0] sm:$0xf0] }
 0x529   :  { %11190 = vmatpush.bf16.msra.mxu2 %v15238_v61  ;;  %v17555_v61 = vld [vmem:[#allocation13 + $0x135c] sm:$0xf0]  ;;  %v16218_v6 = vor.u32 %v19040_v18, %v16217_v0  ;;  %v16049_v0 = vld [vmem:[#allocation13 + $0x778] sm:$0xf]  ;;  %v18998_v18 = vld [vmem:[#allocation13 + $0x790] sm:$0xf0] }
 0x52a   :  { %11181 = vmatpush.bf16.msrb.mxu1 %v17810_v42  ;;  %11209 = vmatmul.bf16.vlgmr.msra.gmra.mxu3 %v20184_v8  ;;  %v15881_v42 = vld [vmem:[#allocation13 + $0x628] sm:$0xf]  ;;  %v17558_v13 = vor.u32 %v19372_v51, %v17555_v61  ;;  %v17310_v51 = vor.u32 %v19313_v17, %v17309_v19  ;;  %v17281_v61 = vld [vmem:[#allocation13 + $0x1118] sm:$0xf]  ;;  %v15573_v19 = vld [vmem:[#allocation13 + $0x3c0] sm:$0xf] }
 0x52b   :  { %11253 = vmatpush.bf16.msrb.mxu3 %v16414_v10  ;;  %v10937_v10 = vpop.f32.mrf.mxu2  ;;  %11167 = vmatpush.bf16.msrb.mxu0 %v17614_v33  ;;  %v15882_v15 = vor.u32 %v18956_v40, %v15881_v42  ;;  %v19026_v33 = vld [vmem:[#allocation13 + $0x870] sm:$0xf0]  ;;  %v15657_v42 = vld [vmem:[#allocation13 + $0x468] sm:$0xf]  ;;  %v18900_v40 = vld [vmem:[#allocation13 + $0x480] sm:$0xf0] }
 0x52c   :  { %v10938_v26 = vadd.f32 %v10937_v10, %v20294_v32  ;;  %v16162_v10 = vor.u32 %v19026_v33, %v16161_v5 }
 0x52d   :  { %11191 = vmatpush.bf16.msra.mxu2 %v15210_v58  ;;  %v18949_v58 = vld [vmem:[#allocation13 + $0x608] sm:$0xf0] }
 0x52e   :  { %11182 = vmatpush.bf16.msrb.mxu1 %v17782_v48  ;;  %v10951_v20 = vadd.f32 %v20292_v16, %v10938_v26  ;;  %v15853_v48 = vld [vmem:[#allocation13 + $0x5f0] sm:$0xf]  ;;  %v19033_v16 = vld [vmem:[#allocation13 + $0x8a8] sm:$0xf0]  ;;  %v20305_v4 = vpop.f32.mrf.mxu1  ;;  %v16133_v26 = vld [vmem:[#allocation13 + $0x820] sm:$0xf] }
 0x52f   :  { %11254 = vmatpush.bf16.msrb.mxu3 %v16386_v31  ;;  %v18921_v31 = vld [vmem:[#allocation13 + $0x528] sm:$0xf0]  ;;  %11168 = vmatpush.bf16.msrb.mxu0 %v17586_v39  ;;  %v16190_v14 = vor.u32 %v19033_v16, %v16189_v37  ;;  %v19019_v39 = vld [vmem:[#allocation13 + $0x838] sm:$0xf0] }
 0x530   :  { %v20303_v32 = vadd.f32 %v20288_v35, %v10951_v20  ;;  %v15854_v35 = vor.u32 %v18949_v58, %v15853_v48  ;;  %v16134_v20 = vor.u32 %v19019_v39, %v16133_v26  ;;  %v16861_v48 = vld [vmem:[#allocation13 + $0xdd0] sm:$0xf]  ;;  %v19201_v58 = vld [vmem:[#allocation13 + $0xde8] sm:$0xf0]  ;;  %v19299_v37 = vld [vmem:[#allocation13 + $0x10f8] sm:$0xf0]  ;;  %v16050_v26 = vor.u32 %v18998_v18, %v16049_v0 }
 0x531   :  { %11183 = vmatmul.bf16.vlgmr.msrb.gmra.mxu1 %v20276_v23  ;;  %11192 = vmatpush.bf16.msra.mxu2 %v15182_v54  ;;  %v18942_v54 = vld [vmem:[#allocation13 + $0x5d0] sm:$0xf0]  ;;  %v16862_v34 = vor.u32 %v19201_v58, %v16861_v48  ;;  %v16021_v39 = vld [vmem:[#allocation13 + $0x740] sm:$0xf]  ;;  %v18984_v58 = vld [vmem:[#allocation13 + $0x720] sm:$0xf0] }
 0x532   :  { %11227 = vmatpush.bf16.msra.mxu1 %v15966_v53  ;;  %v15742_v53 = vor.u32 %v18921_v31, %v15741_v21  ;;  %v15826_v43 = vor.u32 %v18942_v54, %v15825_v47  ;;  %v15769_v21 = vld [vmem:[#allocation13 + $0x548] sm:$0xf]  ;;  %v18928_v31 = vld [vmem:[#allocation13 + $0x560] sm:$0xf0]  ;;  %v16833_v47 = vld [vmem:[#allocation13 + $0xd98] sm:$0xf] }
 0x533   :  { %11255 = vmatpush.bf16.msrb.mxu3 %v16358_v44  ;;  %v18914_v44 = vld [vmem:[#allocation13 + $0x4f0] sm:$0xf0]  ;;  %v10939_v36 = vpop.f32.mrf.mxu2  ;;  %11169 = vmatpush.bf16.msrb.mxu0 %v17558_v13  ;;  %v15629_v13 = vld [vmem:[#allocation13 + $0x430] sm:$0xf]  ;;  %v15770_v16 = vor.u32 %v18928_v31, %v15769_v21  ;;  %v19145_v31 = vld [vmem:[#allocation13 + $0xc28] sm:$0xf0] }
 0x534   :  { %v19005_v36 = vld [vmem:[#allocation13 + $0x7c8] sm:$0xf0]  ;;  %v19194_v54 = vld [vmem:[#allocation13 + $0xdb0] sm:$0xf0]  ;;  %v16637_v21 = vld [vmem:[#allocation13 + $0xc10] sm:$0xf] }
 0x535   :  { %11193 = vmatpush.bf16.msra.mxu2 %v15154_v57  ;;  %v15797_v57 = vld [vmem:[#allocation13 + $0x580] sm:$0xf]  ;;  %v16078_v5 = vor.u32 %v19005_v36, %v16077_v12  ;;  %v16609_v12 = vld [vmem:[#allocation13 + $0xbd8] sm:$0xf] }
 0x536   :  { %11228 = vmatpush.bf16.msra.mxu1 %v15938_v38  ;;  %v15714_v38 = vor.u32 %v18914_v44, %v15713_v27  ;;  %11170 = vmatmul.bf16.vlgmr.msrb.gmra.mxu0 %v20247_v22  ;;  %v15798_v1 = vor.u32 %v18935_v56, %v15797_v57  ;;  %v15630_v44 = vor.u32 %v18893_v3, %v15629_v13  ;;  %v19187_v57 = vld [vmem:[#allocation13 + $0xd78] sm:$0xf0]  ;;  %v15993_v13 = vld [vmem:[#allocation13 + $0x708] sm:$0xf]  ;;  %v17057_v18 = vld [vmem:[#allocation13 + $0xf58] sm:$0xf] }
 0x537   :  { %11256 = vmatpush.bf16.msrb.mxu3 %v16330_v9  ;;  %11214 = vmatpush.bf16.msra.mxu0 %v15742_v53  ;;  %v15685_v9 = vld [vmem:[#allocation13 + $0x4a0] sm:$0xf]  ;;  %v20310_v33 = vpop.f32.mrf.mxu3 }
 0x538   :  { %v17253_v53 = vld [vmem:[#allocation13 + $0x10e0] sm:$0xf] }
 0x539   :  { %11194 = vmatpush.bf16.msra.mxu2 %v15126_v7  ;;  %v15658_v7 = vor.u32 %v18900_v40, %v15657_v42  ;;  %v18991_v42 = vld [vmem:[#allocation13 + $0x758] sm:$0xf0]  ;;  %v15545_v40 = vld [vmem:[#allocation13 + $0x388] sm:$0xf] }
 0x53a   :  { %11229 = vmatpush.bf16.msra.mxu1 %v15910_v55  ;;  %v15686_v55 = vor.u32 %v18907_v29, %v15685_v9  ;;  %v16834_v29 = vor.u32 %v19194_v54, %v16833_v47  ;;  %v15994_v54 = vor.u32 %v18984_v58, %v15993_v13 }
 0x53b   :  { %11257 = vmatpush.bf16.msrb.mxu3 %v16302_v62  ;;  %11215 = vmatpush.bf16.msra.mxu0 %v15714_v38  ;;  %v10978_v62 = vpop.f32.mrf.mxu1  ;;  %v17225_v38 = vld [vmem:[#allocation13 + $0x10a8] sm:$0xf] }
 0x53d   :  { %11195 = vmatpush.bf16.msra.mxu2 %v15098_v28  ;;  %v15601_v28 = vld [vmem:[#allocation13 + $0x3f8] sm:$0xf] }
 0x53e   :  { %11230 = vmatpush.bf16.msra.mxu1 %v15882_v15  ;;  %v16105_v15 = vld [vmem:[#allocation13 + $0x7e8] sm:$0xf] }
 0x53f   :  { %11258 = vmatpush.bf16.msrb.mxu3 %v16274_v59  ;;  %11216 = vmatpush.bf16.msra.mxu0 %v15686_v55  ;;  %v17282_v59 = vor.u32 %v19306_v45, %v17281_v61  ;;  %v16106_v27 = vor.u32 %v19012_v41, %v16105_v15  ;;  %v17197_v55 = vld [vmem:[#allocation13 + $0x1070] sm:$0xf]  ;;  %v18872_v61 = vld [vmem:[#allocation13 + $0x3a0] sm:$0xf0]  ;;  %v19278_v15 = vld [vmem:[#allocation13 + $0x1050] sm:$0xf0]  ;;  %v16022_v41 = vor.u32 %v18991_v42, %v16021_v39 }
 0x540   :  { %11196 = vmatmul.bf16.vlgmr.msra.gmra.mxu2 %v20159_v50  ;;  %v15546_v3 = vor.u32 %v18872_v61, %v15545_v40  ;;  %v19159_v61 = vld [vmem:[#allocation13 + $0xc98] sm:$0xf0] }
 0x541   :  { %11240 = vmatpush.bf16.msrb.mxu2 %v16190_v14  ;;  %v18886_v14 = vld [vmem:[#allocation13 + $0x410] sm:$0xf0] }
 0x542   :  { %11231 = vmatpush.bf16.msra.mxu1 %v15854_v35  ;;  %v17254_v35 = vor.u32 %v19299_v37, %v17253_v53  ;;  %v15602_v9 = vor.u32 %v18886_v14, %v15601_v28  ;;  %v16749_v53 = vld [vmem:[#allocation13 + $0xcf0] sm:$0xf]  ;;  %v19173_v37 = vld [vmem:[#allocation13 + $0xd08] sm:$0xf0]  ;;  %v19138_v28 = vld [vmem:[#allocation13 + $0xbf0] sm:$0xf0] }
 0x543   :  { %11259 = vmatpush.bf16.msrb.mxu3 %v16246_v52  ;;  %11217 = vmatpush.bf16.msra.mxu0 %v15658_v7  ;;  %v19292_v52 = vld [vmem:[#allocation13 + $0x10c0] sm:$0xf0]  ;;  %v20313_v56 = vpop.f32.mrf.mxu2  ;;  %v17169_v7 = vld [vmem:[#allocation13 + $0x1038] sm:$0xf]  ;;  %v19271_v14 = vld [vmem:[#allocation13 + $0x1018] sm:$0xf0] }
 0x544   :  { %v17226_v17 = vor.u32 %v19292_v52, %v17225_v38  ;;  %v16750_v38 = vor.u32 %v19173_v37, %v16749_v53  ;;  %v17001_v53 = vld [vmem:[#allocation13 + $0xee8] sm:$0xf]  ;;  %v19236_v37 = vld [vmem:[#allocation13 + $0xf00] sm:$0xf0] }
 0x545   :  { %11241 = vmatpush.bf16.msrb.mxu2 %v16162_v10  ;;  %v16805_v10 = vld [vmem:[#allocation13 + $0xd60] sm:$0xf] }
 0x546   :  { %11232 = vmatpush.bf16.msra.mxu1 %v15826_v43  ;;  %v18879_v43 = vld [vmem:[#allocation13 + $0x3d8] sm:$0xf0] }
 0x547   :  { %11260 = vmatpush.bf16.msrb.mxu3 %v16218_v6  ;;  %11218 = vmatpush.bf16.msra.mxu0 %v15630_v44  ;;  %v19285_v6 = vld [vmem:[#allocation13 + $0x1088] sm:$0xf0]  ;;  %v15574_v62 = vor.u32 %v18879_v43, %v15573_v19  ;;  %v17085_v44 = vld [vmem:[#allocation13 + $0xf90] sm:$0xf]  ;;  %v19250_v19 = vld [vmem:[#allocation13 + $0xf70] sm:$0xf0] }
 0x548   :  { %v17198_v45 = vor.u32 %v19285_v6, %v17197_v55  ;;  %v19131_v43 = vld [vmem:[#allocation13 + $0xbb8] sm:$0xf0]  ;;  %v18806_v55 = vld [vmem:[#allocation13 + $0x194] sm:$0xf]  ;;  %v15295_v6 = vld [vmem:[#allocation13 + $0x1ac] sm:$0xf0] }
 0x549   :  { %11242 = vmatpush.bf16.msrb.mxu2 %v16134_v20  ;;  %v19180_v20 = vld [vmem:[#allocation13 + $0xd40] sm:$0xf0] }
 0x54a   :  { %11233 = vmatpush.bf16.msra.mxu1 %v15798_v1  ;;  %11261 = vmatmul.bf16.vlgmr.msrb.gmra.mxu3 %v20211_v25  ;;  %v16777_v1 = vld [vmem:[#allocation13 + $0xd28] sm:$0xf] }
 0x54b   :  { %11305 = vmatpush.bf16.msra.mxu3 %v17310_v51  ;;  %11219 = vmatpush.bf16.msra.mxu0 %v15602_v9  ;;  %v16806_v51 = vor.u32 %v19187_v57, %v16805_v10  ;;  %v16778_v48 = vor.u32 %v19180_v20, %v16777_v1  ;;  %v10991_v47 = vpop.f32.mrf.mxu2  ;;  %v19166_v9 = vld [vmem:[#allocation13 + $0xcd0] sm:$0xf0]  ;;  %v17113_v10 = vld [vmem:[#allocation13 + $0xfc8] sm:$0xf]  ;;  %v19264_v57 = vld [vmem:[#allocation13 + $0xfe0] sm:$0xf0] }
 0x54c   :  { %v17114_v40 = vor.u32 %v19264_v57, %v17113_v10  ;;  %v19243_v1 = vld [vmem:[#allocation13 + $0xf38] sm:$0xf0]  ;;  %v18785_v57 = vld [vmem:[#allocation13 + $0xec] sm:$0xf] }
 0x54d   :  { %11243 = vmatpush.bf16.msrb.mxu2 %v16106_v27  ;;  %v17170_v27 = vor.u32 %v19278_v15, %v17169_v7  ;;  %v19124_v7 = vld [vmem:[#allocation13 + $0xb80] sm:$0xf0]  ;;  %v18799_v15 = vld [vmem:[#allocation13 + $0x15c] sm:$0xf] }
 0x54e   :  { %11234 = vmatpush.bf16.msra.mxu1 %v15770_v16  ;;  %v16638_v16 = vor.u32 %v19145_v31, %v16637_v21  ;;  %v20315_v36 = vpop.f32.mrf.mxu1  ;;  %v15298_v21 = vor.u32 %v18806_v55, %v15295_v6  ;;  %v16553_v31 = vld [vmem:[#allocation13 + $0xb68] sm:$0xf] }
 0x54f   :  { %11306 = vmatpush.bf16.msra.mxu3 %v17282_v59  ;;  %11220 = vmatpush.bf16.msra.mxu0 %v15574_v62  ;;  %v11004_v59 = vpop.f32.mrf.mxu3  ;;  %v17058_v62 = vor.u32 %v19250_v19, %v17057_v18  ;;  %v16554_v58 = vor.u32 %v19124_v7, %v16553_v31  ;;  %v19110_v18 = vld [vmem:[#allocation13 + $0xb10] sm:$0xf0]  ;;  %v17729_v19 = vld [vmem:[#allocation13 + $0x1498] sm:$0xf]  ;;  %v15211_v55 = vld [vmem:[#allocation13 + $0x104] sm:$0xf0] }
 0x550   :  { %v18778_v31 = vld [vmem:[#allocation13 + $0xb4] sm:$0xf]  ;;  %v15183_v7 = vld [vmem:[#allocation13 + $0xcc] sm:$0xf0] }
 0x551   :  { %11235 = vmatmul.bf16.vlgmr.msra.gmra.mxu1 %v20177_v2  ;;  %11244 = vmatpush.bf16.msrb.mxu2 %v16078_v5  ;;  %v16721_v5 = vld [vmem:[#allocation13 + $0xcb8] sm:$0xf] }
 0x552   :  { %11279 = vmatpush.bf16.msrb.mxu1 %v16862_v34  ;;  %v19257_v34 = vld [vmem:[#allocation13 + $0xfa8] sm:$0xf0]  ;;  %v16722_v39 = vor.u32 %v19166_v9, %v16721_v5  ;;  %v16973_v5 = vld [vmem:[#allocation13 + $0xeb0] sm:$0xf] }
 0x553   :  { %11307 = vmatpush.bf16.msra.mxu3 %v17254_v35  ;;  %v17141_v35 = vld [vmem:[#allocation13 + $0x1000] sm:$0xf]  ;;  %11221 = vmatpush.bf16.msra.mxu0 %v15546_v3  ;;  %v17086_v52 = vor.u32 %v19257_v34, %v17085_v44  ;;  %v16665_v3 = vld [vmem:[#allocation13 + $0xc48] sm:$0xf]  ;;  %v19117_v44 = vld [vmem:[#allocation13 + $0xb48] sm:$0xf0] }
 0x554   :  { %v17142_v0 = vor.u32 %v19271_v14, %v17141_v35  ;;  %v17757_v34 = vld [vmem:[#allocation13 + $0x14d0] sm:$0xf]  ;;  %v15239_v35 = vld [vmem:[#allocation13 + $0x13c] sm:$0xf0]  ;;  %v19229_v9 = vld [vmem:[#allocation13 + $0xec8] sm:$0xf0] }
 0x555   :  { %11245 = vmatpush.bf16.msrb.mxu2 %v16050_v26  ;;  %v16974_v6 = vor.u32 %v19229_v9, %v16973_v5  ;;  %v17645_v5 = vld [vmem:[#allocation13 + $0x13f0] sm:$0xf]  ;;  %v19397_v9 = vld [vmem:[#allocation13 + $0x1408] sm:$0xf0] }
 0x556   :  { %11280 = vmatpush.bf16.msrb.mxu1 %v16834_v29  ;;  %v16610_v29 = vor.u32 %v19138_v28, %v16609_v12  ;;  %11222 = vmatmul.bf16.vlgmr.msra.gmra.mxu0 %v20199_v60  ;;  %v11030_v20 = vpop.f32.mrf.mxu1  ;;  %v19425_v12 = vld [vmem:[#allocation13 + $0x14e8] sm:$0xf0]  ;;  %v18792_v28 = vld [vmem:[#allocation13 + $0x124] sm:$0xf] }
 0x557   :  { %11308 = vmatpush.bf16.msra.mxu3 %v17226_v17  ;;  %11266 = vmatpush.bf16.msrb.mxu0 %v16638_v16  ;;  %v16581_v17 = vld [vmem:[#allocation13 + $0xba0] sm:$0xf]  ;;  %v20318_v26 = vpop.f32.mrf.mxu3  ;;  %v16525_v16 = vld [vmem:[#allocation13 + $0xb30] sm:$0xf]  ;;  %v19411_v20 = vld [vmem:[#allocation13 + $0x1478] sm:$0xf0] }
 0x558   :  { %v16582_v42 = vor.u32 %v19131_v43, %v16581_v17  ;;  %v19418_v17 = vld [vmem:[#allocation13 + $0x14b0] sm:$0xf0]  ;;  %v19506_v43 = vld [vmem:[#allocation15] sm:$0xff] }
 0x559   :  { %11246 = vmatpush.bf16.msrb.mxu2 %v16022_v41  ;;  %v15267_v41 = vld [vmem:[#allocation13 + $0x174] sm:$0xf0]  ;;  %v7093_v10 = vperm.slane %v19506_v43, 1 }
 0x55a   :  { %11281 = vmatpush.bf16.msrb.mxu1 %v16806_v51  ;;  %v16693_v51 = vld [vmem:[#allocation13 + $0xc80] sm:$0xf] }
 0x55b   :  { %11309 = vmatpush.bf16.msra.mxu3 %v17198_v45  ;;  %11267 = vmatpush.bf16.msrb.mxu0 %v16610_v29  ;;  %v17029_v45 = vld [vmem:[#allocation13 + $0xf20] sm:$0xf]  ;;  %v16694_v13 = vor.u32 %v19159_v61, %v16693_v51  ;;  %v16497_v29 = vld [vmem:[#allocation13 + $0xaf8] sm:$0xf]  ;;  %v15214_v61 = vor.u32 %v18785_v57, %v15211_v55  ;;  %v18764_v57 = vld [vmem:[#allocation13 + $0x44] sm:$0xf] }
 0x55c   :  { %v17030_v59 = vor.u32 %v19243_v1, %v17029_v45  ;;  %v16945_v51 = vld [vmem:[#allocation13 + $0xe78] sm:$0xf]  ;;  %v19103_v45 = vld [vmem:[#allocation13 + $0xad8] sm:$0xf0]  ;;  %v17701_v1 = vld [vmem:[#allocation13 + $0x1460] sm:$0xf] }
 0x55d   :  { %11247 = vmatpush.bf16.msrb.mxu2 %v15994_v54  ;;  %v17002_v54 = vor.u32 %v19236_v37, %v17001_v53  ;;  %v16441_v53 = vld [vmem:[#allocation13 + $0xa88] sm:$0xf]  ;;  %v19096_v37 = vld [vmem:[#allocation13 + $0xaa0] sm:$0xf0]  ;;  %v15127_v55 = vld [vmem:[#allocation13 + $0x5c] sm:$0xf0] }
 0x55e   :  { %11282 = vmatpush.bf16.msrb.mxu1 %v16778_v48  ;;  %v19152_v48 = vld [vmem:[#allocation13 + $0xc60] sm:$0xf0] }
 0x55f   :  { %11310 = vmatpush.bf16.msra.mxu3 %v17170_v27  ;;  %11268 = vmatpush.bf16.msrb.mxu0 %v16582_v42  ;;  %v15270_v27 = vor.u32 %v18799_v15, %v15267_v41  ;;  %v11056_v14 = vpop.f32.mrf.mxu3  ;;  %v16666_v47 = vor.u32 %v19152_v48, %v16665_v3  ;;  %v19222_v42 = vld [vmem:[#allocation13 + $0xe90] sm:$0xf0]  ;;  %v17702_v48 = vor.u32 %v19411_v20, %v17701_v1  ;;  %v17953_v1 = vld [vmem:[#allocation13 + $0x1658] sm:$0xf] }
 0x560   :  { %11248 = vmatmul.bf16.vlgmr.msrb.gmra.mxu2 %v20179_v46  ;;  %v16946_v41 = vor.u32 %v19222_v42, %v16945_v51  ;;  %v17617_v42 = vld [vmem:[#allocation13 + $0x13b8] sm:$0xf]  ;;  %v19474_v20 = vld [vmem:[#allocation13 + $0x1670] sm:$0xf0] }
 0x561   :  { %11292 = vmatpush.bf16.msra.mxu2 %v17086_v52  ;;  %v17758_v52 = vor.u32 %v19425_v12, %v17757_v34  ;;  %v19369_v34 = vld [vmem:[#allocation13 + $0x1328] sm:$0xf0]  ;;  %v18771_v12 = vld [vmem:[#allocation13 + $0x7c] sm:$0xf] }
 0x562   :  { %11283 = vmatpush.bf16.msrb.mxu1 %v16750_v38  ;;  %v16526_v38 = vor.u32 %v19117_v44, %v16525_v16  ;;  %v15186_v16 = vor.u32 %v18778_v31, %v15183_v7  ;;  %v17533_v44 = vld [vmem:[#allocation13 + $0x1310] sm:$0xf]  ;;  %v10977_v31 = vadd.f32 %v20305_v4, %v20303_v32  ;;  %v19355_v7 = vld [vmem:[#allocation13 + $0x12b8] sm:$0xf0]  ;;  %v17925_v4 = vld [vmem:[#allocation13 + $0x1620] sm:$0xf] }
 0x563   :  { %11311 = vmatpush.bf16.msra.mxu3 %v17142_v0  ;;  %11269 = vmatpush.bf16.msrb.mxu0 %v16554_v58  ;;  %v15242_v0 = vor.u32 %v18792_v28, %v15239_v35  ;;  %v11041_v15 = vpop.f32.mrf.mxu2  ;;  %v19215_v58 = vld [vmem:[#allocation13 + $0xe58] sm:$0xf0]  ;;  %v15155_v28 = vld [vmem:[#allocation13 + $0x94] sm:$0xf0] }
 0x564   :  { %v19383_v32 = vld [vmem:[#allocation13 + $0x1398] sm:$0xf0] }
 0x565   :  { %11293 = vmatpush.bf16.msra.mxu2 %v17058_v62  ;;  %v17730_v62 = vor.u32 %v19418_v17, %v17729_v19  ;;  %v19481_v19 = vld [vmem:[#allocation13 + $0x16a8] sm:$0xf0]  ;;  %v17505_v17 = vld [vmem:[#allocation13 + $0x12d8] sm:$0xf] }
 0x566   :  { %11284 = vmatpush.bf16.msrb.mxu1 %v16722_v39  ;;  %v16498_v39 = vor.u32 %v19110_v18, %v16497_v29  ;;  %v17534_v29 = vor.u32 %v19369_v34, %v17533_v44  ;;  %v17981_v18 = vld [vmem:[#allocation13 + $0x1690] sm:$0xf] }
 0x567   :  { %11312 = vmatpush.bf16.msra.mxu3 %v17114_v40  ;;  %11270 = vmatpush.bf16.msrb.mxu0 %v16526_v38  ;;  %v16469_v40 = vld [vmem:[#allocation13 + $0xac0] sm:$0xf]  ;;  %v17982_v51 = vor.u32 %v19481_v19, %v17981_v18  ;;  %v19460_v18 = vld [vmem:[#allocation13 + $0x1600] sm:$0xf0]  ;;  %v17421_v19 = vld [vmem:[#allocation13 + $0x1230] sm:$0xf] }
 0x568   :  { %v16470_v3 = vor.u32 %v19103_v45, %v16469_v40  ;;  %v19390_v40 = vld [vmem:[#allocation13 + $0x13d0] sm:$0xf0]  ;;  %v15130_v45 = vor.u32 %v18764_v57, %v15127_v55  ;;  %v19341_v57 = vld [vmem:[#allocation13 + $0x1248] sm:$0xf0] }
 0x569   :  { %11294 = vmatpush.bf16.msra.mxu2 %v17030_v59  ;;  %v18918_v55 = vld [vmem:[#allocation13 + $0x514] sm:$0xf] }
 0x56a   :  { %11285 = vmatpush.bf16.msrb.mxu1 %v16694_v13  ;;  %11313 = vmatmul.bf16.vlgmr.msra.gmra.mxu3 %v20233_v30  ;;  %v16917_v13 = vld [vmem:[#allocation13 + $0xe40] sm:$0xf] }
 0x56b   :  { %11357 = vmatpush.bf16.msrb.mxu3 %v15298_v21  ;;  %v11029_v21 = vadd.f32 %v20315_v36, %v7093_v10  ;;  %11271 = vmatpush.bf16.msrb.mxu0 %v16498_v39  ;;  %v19404_v36 = vld [vmem:[#allocation13 + $0x1440] sm:$0xf0]  ;;  %v16918_v14 = vor.u32 %v19215_v58, %v16917_v13  ;;  %v19362_v10 = vld [vmem:[#allocation13 + $0x12f0] sm:$0xf0]  ;;  %v17954_v58 = vor.u32 %v19474_v20, %v17953_v1  ;;  %v17393_v1 = vld [vmem:[#allocation13 + $0x11f8] sm:$0xf] }
 0x56c   :  { %v19030_v13 = vld [vmem:[#allocation13 + $0x894] sm:$0xf] }
 0x56d   :  { %11295 = vmatpush.bf16.msra.mxu2 %v17002_v54  ;;  %v11042_v59 = vadd.f32 %v11041_v15, %v11029_v21  ;;  %v16442_v54 = vor.u32 %v19096_v37, %v16441_v53  ;;  %v17477_v21 = vld [vmem:[#allocation13 + $0x12a0] sm:$0xf]  ;;  %v18757_v15 = vld [vmem:[#allocation13 + $0xc] sm:$0xf] }
 0x56e   :  { %11286 = vmatpush.bf16.msrb.mxu1 %v16666_v47  ;;  %v16889_v47 = vld [vmem:[#allocation13 + $0xe08] sm:$0xf]  ;;  %v20327_v43 = vpop.f32.mrf.mxu1  ;;  %v17589_v53 = vld [vmem:[#allocation13 + $0x1380] sm:$0xf]  ;;  %v17478_v37 = vor.u32 %v19355_v7, %v17477_v21  ;;  %v19334_v21 = vld [vmem:[#allocation13 + $0x1210] sm:$0xf0] }
 0x56f   :  { %11358 = vmatpush.bf16.msrb.mxu3 %v15270_v27  ;;  %v17673_v27 = vld [vmem:[#allocation13 + $0x1428] sm:$0xf]  ;;  %v20325_v35 = vadd.f32 %v20318_v26, %v11042_v59  ;;  %11272 = vmatpush.bf16.msrb.mxu0 %v16470_v3  ;;  %v20329_v26 = vpop.f32.mrf.mxu3  ;;  %v16191_v59 = vld [vmem:[#allocation13 + $0x8ac] sm:$0xf0]  ;;  %v10990_v3 = vadd.f32 %v20313_v56, %v10977_v31  ;;  %v19023_v56 = vld [vmem:[#allocation13 + $0x85c] sm:$0xf] }
 0x570   :  { %v17674_v38 = vor.u32 %v19404_v36, %v17673_v27  ;;  %v19467_v27 = vld [vmem:[#allocation13 + $0x1638] sm:$0xf0]  ;;  %v16194_v34 = vor.u32 %v19030_v13, %v16191_v59  ;;  %v15715_v7 = vld [vmem:[#allocation13 + $0x4f4] sm:$0xf0] }
 0x571   :  { %11287 = vmatmul.bf16.vlgmr.msrb.gmra.mxu1 %v20204_v63  ;;  %11296 = vmatpush.bf16.msra.mxu2 %v16974_v6  ;;  %v11043_v6 = vpop.f32.mrf.mxu2  ;;  %v18911_v31 = vld [vmem:[#allocation13 + $0x4dc] sm:$0xf] }
 0x572   :  { %11331 = vmatpush.bf16.msra.mxu1 %v17758_v52  ;;  %v19208_v52 = vld [vmem:[#allocation13 + $0xe20] sm:$0xf0]  ;;  %v15743_v6 = vld [vmem:[#allocation13 + $0x52c] sm:$0xf0] }
 0x573   :  { %11359 = vmatpush.bf16.msrb.mxu3 %v15242_v0  ;;  %v15158_v0 = vor.u32 %v18771_v12, %v15155_v28  ;;  %v16890_v39 = vor.u32 %v19208_v52, %v16889_v47  ;;  %11273 = vmatpush.bf16.msrb.mxu0 %v16442_v54  ;;  %v17449_v12 = vld [vmem:[#allocation13 + $0x1268] sm:$0xf]  ;;  %v19348_v28 = vld [vmem:[#allocation13 + $0x1280] sm:$0xf0]  ;;  %v11003_v47 = vadd.f32 %v20310_v33, %v10990_v3 }
 0x574   :  { %v17590_v54 = vor.u32 %v19383_v32, %v17589_v53  ;;  %v17561_v52 = vld [vmem:[#allocation13 + $0x1348] sm:$0xf]  ;;  %v17394_v3 = vor.u32 %v19334_v21, %v17393_v1  ;;  %v19446_v53 = vld [vmem:[#allocation13 + $0x1590] sm:$0xf0]  ;;  %v19327_v32 = vld [vmem:[#allocation13 + $0x11d8] sm:$0xf0] }
 0x575   :  { %11297 = vmatpush.bf16.msra.mxu2 %v16946_v41  ;;  %v15099_v41 = vld [vmem:[#allocation13 + $0x24] sm:$0xf0]  ;;  %v15491_v21 = vld [vmem:[#allocation13 + $0x334] sm:$0xf0] }
 0x576   :  { %11332 = vmatpush.bf16.msra.mxu1 %v17730_v62  ;;  %v17646_v62 = vor.u32 %v19397_v9, %v17645_v5  ;;  %11274 = vmatmul.bf16.vlgmr.msrb.gmra.mxu0 %v20223_v24  ;;  %v11082_v36 = vpop.f32.mrf.mxu1  ;;  %v19376_v5 = vld [vmem:[#allocation13 + $0x1360] sm:$0xf0]  ;;  %v11015_v9 = vpop.f32.mrf.mxu0 }
 0x577   :  { %11360 = vmatpush.bf16.msrb.mxu3 %v15214_v61  ;;  %11318 = vmatpush.bf16.msra.mxu0 %v17534_v29  ;;  %v17506_v61 = vor.u32 %v19362_v10, %v17505_v17  ;;  %v11108_v44 = vpop.f32.mrf.mxu3  ;;  %v17450_v29 = vor.u32 %v19348_v28, %v17449_v12  ;;  %v11016_v17 = vadd.f32 %v11015_v9, %v11003_v47  ;;  %v19002_v36 = vld [vmem:[#allocation13 + $0x7b4] sm:$0xf]  ;;  %v17813_v28 = vld [vmem:[#allocation13 + $0x1540] sm:$0xf]  ;;  %v19439_v47 = vld [vmem:[#allocation13 + $0x1558] sm:$0xf0] }
 0x578   :  { %v17562_v33 = vor.u32 %v19376_v5, %v17561_v52  ;;  %v16079_v44 = vld [vmem:[#allocation13 + $0x7cc] sm:$0xf0]  ;;  %v18897_v5 = vld [vmem:[#allocation13 + $0x46c] sm:$0xf]  ;;  %v15659_v9 = vld [vmem:[#allocation13 + $0x484] sm:$0xf0] }
 0x579   :  { %11298 = vmatpush.bf16.msra.mxu2 %v16918_v14  ;;  %v16163_v14 = vld [vmem:[#allocation13 + $0x874] sm:$0xf0]  ;;  %12033 = vst [vmem:[%s20564_s11] sm:$0xff] %v11016_v17  ;;  %v16082_v52 = vor.u32 %v19002_v36, %v16079_v44  ;;  %v17814_v17 = vor.u32 %v19439_v47, %v17813_v28  ;;  %v15995_v36 = vld [vmem:[#allocation13 + $0x724] sm:$0xf0]  ;;  %v19254_v44 = vld [vmem:[#allocation13 + $0xf94] sm:$0xf] }
 0x57a   :  { %11333 = vmatpush.bf16.msra.mxu1 %v17702_v48  ;;  %v17618_v48 = vor.u32 %v19390_v40, %v17617_v42  ;;  %v16166_v10 = vor.u32 %v19023_v56, %v16163_v14  ;;  %v17422_v42 = vor.u32 %v19341_v57, %v17421_v19  ;;  %v15746_v40 = vor.u32 %v18918_v55, %v15743_v6  ;;  %v16051_v19 = vld [vmem:[#allocation13 + $0x794] sm:$0xf0]  ;;  %v18876_v47 = vld [vmem:[#allocation13 + $0x3c4] sm:$0xf] }
 0x57b   :  { %11361 = vmatpush.bf16.msrb.mxu3 %v15186_v16  ;;  %11319 = vmatpush.bf16.msra.mxu0 %v17506_v61  ;;  %v15102_v16 = vor.u32 %v18757_v15, %v15099_v41  ;;  %v17869_v61 = vld [vmem:[#allocation13 + $0x15b0] sm:$0xf]  ;;  %v19009_v15 = vld [vmem:[#allocation13 + $0x7ec] sm:$0xf]  ;;  %v16107_v41 = vld [vmem:[#allocation13 + $0x804] sm:$0xf0]  ;;  %v15662_v6 = vor.u32 %v18897_v5, %v15659_v9 }
 0x57c   :  { %v18960_v5 = vld [vmem:[#allocation13 + $0x664] sm:$0xf]  ;;  %v15911_v9 = vld [vmem:[#allocation13 + $0x67c] sm:$0xf0] }
 0x57d   :  { %11299 = vmatpush.bf16.msra.mxu2 %v16890_v39  ;;  %v19016_v39 = vld [vmem:[#allocation13 + $0x824] sm:$0xf] }
 0x57e   :  { %11334 = vmatpush.bf16.msra.mxu1 %v17674_v38  ;;  %v17926_v38 = vor.u32 %v19467_v27, %v17925_v4  ;;  %v11017_v59 = vpop.f32.mrf.mxu0  ;;  %v18904_v4 = vld [vmem:[#allocation13 + $0x4a4] sm:$0xf]  ;;  %v15687_v27 = vld [vmem:[#allocation13 + $0x4bc] sm:$0xf0] }
 0x57f   :  { %11362 = vmatpush.bf16.msrb.mxu3 %v15158_v0  ;;  %11320 = vmatpush.bf16.msra.mxu0 %v17478_v37  ;;  %v17897_v0 = vld [vmem:[#allocation13 + $0x15e8] sm:$0xf]  ;;  %v17365_v37 = vld [vmem:[#allocation13 + $0x11c0] sm:$0xf]  ;;  %v15690_v14 = vor.u32 %v18904_v4, %v15687_v27  ;;  %v18981_v27 = vld [vmem:[#allocation13 + $0x70c] sm:$0xf] }
 0x580   :  { %11300 = vmatmul.bf16.vlgmr.msra.gmra.mxu2 %v20206_v11  ;;  %v17366_v56 = vor.u32 %v19327_v32, %v17365_v37  ;;  %v18967_v37 = vld [vmem:[#allocation13 + $0x69c] sm:$0xf]  ;;  %v18848_v32 = vld [vmem:[#allocation13 + $0x2e4] sm:$0xf]  ;;  %v15463_v4 = vld [vmem:[#allocation13 + $0x2fc] sm:$0xf0] }
 0x581   :  { %11344 = vmatpush.bf16.msrb.mxu2 %v17982_v51  ;;  %v17898_v51 = vor.u32 %v19460_v18, %v17897_v0  ;;  %v15519_v0 = vld [vmem:[#allocation13 + $0x36c] sm:$0xf0]  ;;  %v18995_v18 = vld [vmem:[#allocation13 + $0x77c] sm:$0xf] }
 0x582   :  { %11335 = vmatpush.bf16.msra.mxu1 %v17646_v62  ;;  %v16135_v62 = vld [vmem:[#allocation13 + $0x83c] sm:$0xf0] }
 0x583   :  { %11363 = vmatpush.bf16.msrb.mxu3 %v15130_v45  ;;  %11321 = vmatpush.bf16.msra.mxu0 %v17450_v29  ;;  %v19453_v45 = vld [vmem:[#allocation13 + $0x15c8] sm:$0xf0]  ;;  %v16138_v20 = vor.u32 %v19016_v39, %v16135_v62  ;;  %v18862_v29 = vld [vmem:[#allocation13 + $0x354] sm:$0xf]  ;;  %v19432_v39 = vld [vmem:[#allocation13 + $0x1520] sm:$0xf0] }
 0x584   :  { %v17870_v13 = vor.u32 %v19453_v45, %v17869_v61  ;;  %v18890_v62 = vld [vmem:[#allocation13 + $0x434] sm:$0xf]  ;;  %v15967_v61 = vld [vmem:[#allocation13 + $0x6ec] sm:$0xf0]  ;;  %v18855_v45 = vld [vmem:[#allocation13 + $0x31c] sm:$0xf] }
 0x585   :  { %11345 = vmatpush.bf16.msrb.mxu2 %v17954_v58  ;;  %v17841_v58 = vld [vmem:[#allocation13 + $0x1578] sm:$0xf] }
 0x586   :  { %11336 = vmatpush.bf16.msra.mxu1 %v17618_v48  ;;  %v15718_v48 = vor.u32 %v18911_v31, %v15715_v7  ;;  %v17842_v12 = vor.u32 %v19446_v53, %v17841_v58  ;;  %v20344_v57 = vpop.f32.mrf.mxu0  ;;  %v18988_v31 = vld [vmem:[#allocation13 + $0x744] sm:$0xf]  ;;  %v16023_v7 = vld [vmem:[#allocation13 + $0x75c] sm:$0xf0]  ;;  %v15494_v58 = vor.u32 %v18855_v45, %v15491_v21  ;;  %v15407_v21 = vld [vmem:[#allocation13 + $0x28c] sm:$0xf0] }
 0x587   :  { %11364 = vmatpush.bf16.msrb.mxu3 %v15102_v16  ;;  %11322 = vmatpush.bf16.msra.mxu0 %v17422_v42  ;;  %v16110_v16 = vor.u32 %v19009_v15, %v16107_v41  ;;  %v16054_v42 = vor.u32 %v18995_v18, %v16051_v19  ;;  %v16026_v53 = vor.u32 %v18988_v31, %v16023_v7  ;;  %v18841_v19 = vld [vmem:[#allocation13 + $0x2ac] sm:$0xf]  ;;  %v19142_v31 = vld [vmem:[#allocation13 + $0xc14] sm:$0xf]  ;;  %v16639_v7 = vld [vmem:[#allocation13 + $0xc2c] sm:$0xf0] }
 0x589   :  { %11346 = vmatpush.bf16.msrb.mxu2 %v17926_v38  ;;  %v19320_v38 = vld [vmem:[#allocation13 + $0x11a0] sm:$0xf0] }
 0x58a   :  { %11337 = vmatpush.bf16.msra.mxu1 %v17590_v54  ;;  %11365 = vmatmul.bf16.vlgmr.msrb.gmra.mxu3 %v20159_v50  ;;  %v17337_v54 = vld [vmem:[#allocation13 + $0x1188] sm:$0xf] }
 0x58b   :  { %11409 = vmatpush.bf16.msra.mxu3 %v16194_v34  ;;  %v20342_v34 = vpop.f32.mrf.mxu2  ;;  %11323 = vmatpush.bf16.msra.mxu0 %v17394_v3  ;;  %v17338_v55 = vor.u32 %v19320_v38, %v17337_v54  ;;  %v18883_v3 = vld [vmem:[#allocation13 + $0x3fc] sm:$0xf]  ;;  %v15466_v54 = vor.u32 %v18848_v32, %v15463_v4  ;;  %v15998_v38 = vor.u32 %v18981_v27, %v15995_v36  ;;  %v15379_v4 = vld [vmem:[#allocation13 + $0x254] sm:$0xf0] }
 0x58c   :  { %v19135_v27 = vld [vmem:[#allocation13 + $0xbdc] sm:$0xf]  ;;  %v16611_v36 = vld [vmem:[#allocation13 + $0xbf4] sm:$0xf0] }
 0x58d   :  { %11347 = vmatpush.bf16.msrb.mxu2 %v17898_v51  ;;  %v15522_v51 = vor.u32 %v18862_v29, %v15519_v0 }
 0x58e   :  { %11338 = vmatpush.bf16.msra.mxu1 %v17562_v33  ;;  %v15631_v33 = vld [vmem:[#allocation13 + $0x44c] sm:$0xf0]  ;;  %v20346_v1 = vpop.f32.mrf.mxu1  ;;  %v11069_v28 = vpop.f32.mrf.mxu0 }
 0x58f   :  { %11410 = vmatpush.bf16.msra.mxu3 %v16166_v10  ;;  %v17785_v10 = vld [vmem:[#allocation13 + $0x1508] sm:$0xf]  ;;  %11324 = vmatpush.bf16.msra.mxu0 %v17366_v56  ;;  %v11068_v28 = vadd.f32 %v20344_v57, %v20325_v35 }
 0x590   :  { %v17786_v41 = vor.u32 %v19432_v39, %v17785_v10  ;;  %v19247_v10 = vld [vmem:[#allocation13 + $0xf5c] sm:$0xf]  ;;  %v15914_v39 = vor.u32 %v18960_v5, %v15911_v9  ;;  %v15351_v9 = vld [vmem:[#allocation13 + $0x21c] sm:$0xf0] }
 0x591   :  { %11339 = vmatmul.bf16.vlgmr.msra.gmra.mxu1 %v20247_v22  ;;  %11348 = vmatpush.bf16.msrb.mxu2 %v17870_v13  ;;  %v15634_v13 = vor.u32 %v18890_v62, %v15631_v33  ;;  %v18869_v62 = vld [vmem:[#allocation13 + $0x38c] sm:$0xf]  ;;  %v15547_v33 = vld [vmem:[#allocation13 + $0x3a4] sm:$0xf0]  ;;  %v11081_v35 = vadd.f32 %v20327_v43, %v11068_v28  ;;  %v19219_v43 = vld [vmem:[#allocation13 + $0xe7c] sm:$0xf] }
 0x592   :  { %11383 = vmatpush.bf16.msrb.mxu1 %v15746_v40  ;;  %v18974_v40 = vld [vmem:[#allocation13 + $0x6d4] sm:$0xf]  ;;  %v16919_v28 = vld [vmem:[#allocation13 + $0xe5c] sm:$0xf0] }
 0x593   :  { %11411 = vmatpush.bf16.msra.mxu3 %v16138_v20  ;;  %v20348_v20 = vpop.f32.mrf.mxu3  ;;  %v11095_v15 = vpop.f32.mrf.mxu2  ;;  %11325 = vmatpush.bf16.msra.mxu0 %v17338_v55  ;;  %v15970_v59 = vor.u32 %v18974_v40, %v15967_v61  ;;  %v17059_v55 = vld [vmem:[#allocation13 + $0xf74] sm:$0xf0]  ;;  %v15883_v40 = vld [vmem:[#allocation13 + $0x644] sm:$0xf0]  ;;  %v18834_v61 = vld [vmem:[#allocation13 + $0x274] sm:$0xf] }
 0x594   :  { %v17062_v45 = vor.u32 %v19247_v10, %v17059_v55  ;;  %v19240_v15 = vld [vmem:[#allocation13 + $0xf24] sm:$0xf] }
 0x595   :  { %11349 = vmatpush.bf16.msrb.mxu2 %v17842_v12  ;;  %v17087_v12 = vld [vmem:[#allocation13 + $0xfac] sm:$0xf0]  ;;  %v18932_v55 = vld [vmem:[#allocation13 + $0x584] sm:$0xf] }
 0x596   :  { %11384 = vmatpush.bf16.msrb.mxu1 %v15718_v48  ;;  %v15603_v48 = vld [vmem:[#allocation13 + $0x414] sm:$0xf0]  ;;  %11326 = vmatmul.bf16.vlgmr.msra.gmra.mxu0 %v20250_v49  ;;  %v11134_v29 = vpop.f32.mrf.mxu1  ;;  %v17090_v18 = vor.u32 %v19254_v44, %v17087_v12  ;;  %v19233_v44 = vld [vmem:[#allocation13 + $0xeec] sm:$0xf]  ;;  %v17003_v12 = vld [vmem:[#allocation13 + $0xf04] sm:$0xf0] }
 0x597   :  { %11412 = vmatpush.bf16.msra.mxu3 %v16110_v16  ;;  %11370 = vmatpush.bf16.msrb.mxu0 %v15522_v51  ;;  %v15939_v16 = vld [vmem:[#allocation13 + $0x6b4] sm:$0xf0]  ;;  %v15606_v56 = vor.u32 %v18883_v3, %v15603_v48  ;;  %v15410_v48 = vor.u32 %v18834_v61, %v15407_v21  ;;  %v17006_v5 = vor.u32 %v19233_v44, %v17003_v12  ;;  %v19128_v29 = vld [vmem:[#allocation13 + $0xba4] sm:$0xf]  ;;  %v16555_v61 = vld [vmem:[#allocation13 + $0xb84] sm:$0xf0] }
 0x598   :  { %v16415_v21 = vld [vmem:[#allocation13 + $0xa6c] sm:$0xf0]  ;;  %v19212_v12 = vld [vmem:[#allocation13 + $0xe44] sm:$0xf] }
 0x599   :  { %11350 = vmatpush.bf16.msrb.mxu2 %v17814_v17  ;;  %v15435_v17 = vld [vmem:[#allocation13 + $0x2c4] sm:$0xf0] }
 0x59a   :  { %11385 = vmatpush.bf16.msrb.mxu1 %v15690_v14  ;;  %v15942_v14 = vor.u32 %v18967_v37, %v15939_v16  ;;  %v15438_v51 = vor.u32 %v18841_v19, %v15435_v17  ;;  %v15855_v37 = vld [vmem:[#allocation13 + $0x60c] sm:$0xf0]  ;;  %v18827_v16 = vld [vmem:[#allocation13 + $0x23c] sm:$0xf] }
 0x59b   :  { %11413 = vmatpush.bf16.msra.mxu3 %v16082_v52  ;;  %11371 = vmatpush.bf16.msrb.mxu0 %v15494_v58  ;;  %v15575_v52 = vld [vmem:[#allocation13 + $0x3dc] sm:$0xf0]  ;;  %v11160_v0 = vpop.f32.mrf.mxu3  ;;  %v16642_v58 = vor.u32 %v19142_v31, %v16639_v7  ;;  %v16975_v19 = vld [vmem:[#allocation13 + $0xecc] sm:$0xf0]  ;;  %v16947_v31 = vld [vmem:[#allocation13 + $0xe94] sm:$0xf0]  ;;  %v11094_v7 = vadd.f32 %v20342_v34, %v11081_v35 }
 0x59c   :  { %v16583_v0 = vld [vmem:[#allocation13 + $0xbbc] sm:$0xf0]  ;;  %v16387_v34 = vld [vmem:[#allocation13 + $0xa34] sm:$0xf0]  ;;  %v19072_v35 = vld [vmem:[#allocation13 + $0x9e4] sm:$0xf] }
 0x59d   :  { %11351 = vmatpush.bf16.msrb.mxu2 %v17786_v41  ;;  %v17031_v41 = vld [vmem:[#allocation13 + $0xf3c] sm:$0xf0] }
 0x59e   :  { %11386 = vmatpush.bf16.msrb.mxu1 %v15662_v6  ;;  %v15578_v6 = vor.u32 %v18876_v47, %v15575_v52  ;;  %v17034_v32 = vor.u32 %v19240_v15, %v17031_v41  ;;  %v16614_v47 = vor.u32 %v19135_v27, %v16611_v36  ;;  %v18820_v52 = vld [vmem:[#allocation13 + $0x204] sm:$0xf]  ;;  %v18925_v41 = vld [vmem:[#allocation13 + $0x54c] sm:$0xf]  ;;  %v16863_v27 = vld [vmem:[#allocation13 + $0xdec] sm:$0xf0] }
 0x59f   :  { %11414 = vmatpush.bf16.msra.mxu3 %v16054_v42  ;;  %11372 = vmatpush.bf16.msrb.mxu0 %v15466_v54  ;;  %v18953_v42 = vld [vmem:[#allocation13 + $0x62c] sm:$0xf]  ;;  %v18939_v54 = vld [vmem:[#allocation13 + $0x5bc] sm:$0xf] }
 0x5a0   :  { %11352 = vmatmul.bf16.vlgmr.msrb.gmra.mxu2 %v20276_v23  ;;  %v15886_v3 = vor.u32 %v18953_v42, %v15883_v40  ;;  %v19121_v40 = vld [vmem:[#allocation13 + $0xb6c] sm:$0xf]  ;;  %v19079_v36 = vld [vmem:[#allocation13 + $0xa1c] sm:$0xf] }
 0x5a1   :  { %11396 = vmatpush.bf16.msra.mxu2 %v15970_v59  ;;  %v15550_v59 = vor.u32 %v18869_v62, %v15547_v33  ;;  %v15799_v62 = vld [vmem:[#allocation13 + $0x59c] sm:$0xf0]  ;;  %v18813_v33 = vld [vmem:[#allocation13 + $0x1cc] sm:$0xf] }
 0x5a2   :  { %11387 = vmatpush.bf16.msrb.mxu1 %v15634_v13  ;;  %v20352_v13 = vpop.f32.mrf.mxu0  ;;  %v15802_v15 = vor.u32 %v18932_v55, %v15799_v62  ;;  %v19478_v55 = vld [vmem:[#allocation13 + $0x1694] sm:$0xf] }
 0x5a3   :  { %11415 = vmatpush.bf16.msra.mxu3 %v16026_v53  ;;  %11373 = vmatpush.bf16.msrb.mxu0 %v15438_v51  ;;  %v18946_v53 = vld [vmem:[#allocation13 + $0x5f4] sm:$0xf]  ;;  %v20359_v17 = vpop.f32.mrf.mxu2  ;;  %v15323_v51 = vld [vmem:[#allocation13 + $0x1e4] sm:$0xf0] }
 0x5a5   :  { %11397 = vmatpush.bf16.msra.mxu2 %v15942_v14  ;;  %v15382_v14 = vor.u32 %v18827_v16, %v15379_v4  ;;  %v19198_v4 = vld [vmem:[#allocation13 + $0xdd4] sm:$0xf] }
 0x5a6   :  { %11388 = vmatpush.bf16.msrb.mxu1 %v15606_v56  ;;  %v15858_v56 = vor.u32 %v18946_v53, %v15855_v37  ;;  %v16527_v53 = vld [vmem:[#allocation13 + $0xb4c] sm:$0xf0] }
 0x5a7   :  { %11416 = vmatpush.bf16.msra.mxu3 %v15998_v38  ;;  %11374 = vmatpush.bf16.msrb.mxu0 %v15410_v48  ;;  %v15827_v38 = vld [vmem:[#allocation13 + $0x5d4] sm:$0xf0]  ;;  %v15771_v48 = vld [vmem:[#allocation13 + $0x564] sm:$0xf0] }
 0x5a8   :  { %v15830_v10 = vor.u32 %v18939_v54, %v15827_v38  ;;  %v16866_v38 = vor.u32 %v19198_v4, %v16863_v27  ;;  %v16779_v4 = vld [vmem:[#allocation13 + $0xd44] sm:$0xf0]  ;;  %v19058_v27 = vld [vmem:[#allocation13 + $0x974] sm:$0xf] }
 0x5a9   :  { %11398 = vmatpush.bf16.msra.mxu2 %v15914_v39  ;;  %v16586_v39 = vor.u32 %v19128_v29, %v16583_v0  ;;  %v16390_v29 = vor.u32 %v19079_v36, %v16387_v34  ;;  %v16922_v0 = vor.u32 %v19212_v12, %v16919_v28  ;;  %v16303_v34 = vld [vmem:[#allocation13 + $0x98c] sm:$0xf0]  ;;  %v19366_v12 = vld [vmem:[#allocation13 + $0x1314] sm:$0xf] }
 0x5aa   :  { %11389 = vmatpush.bf16.msrb.mxu1 %v15578_v6  ;;  %11417 = vmatmul.bf16.vlgmr.msra.gmra.mxu3 %v20179_v46  ;;  %v11121_v57 = vpop.f32.mrf.mxu0  ;;  %v15354_v6 = vor.u32 %v18820_v52, %v15351_v9  ;;  %v19107_v52 = vld [vmem:[#allocation13 + $0xafc] sm:$0xf]  ;;  %v17535_v28 = vld [vmem:[#allocation13 + $0x132c] sm:$0xf0] }
 0x5ab   :  { %11461 = vmatpush.bf16.msrb.mxu3 %v17090_v18  ;;  %v19226_v18 = vld [vmem:[#allocation13 + $0xeb4] sm:$0xf]  ;;  %11375 = vmatpush.bf16.msrb.mxu0 %v15382_v14  ;;  %v11147_v14 = vpop.f32.mrf.mxu2  ;;  %v16359_v57 = vld [vmem:[#allocation13 + $0x9fc] sm:$0xf0] }
 0x5ac   :  { %v16978_v42 = vor.u32 %v19226_v18, %v16975_v19  ;;  %v19191_v18 = vld [vmem:[#allocation13 + $0xd9c] sm:$0xf]  ;;  %v16835_v19 = vld [vmem:[#allocation13 + $0xdb4] sm:$0xf0]  ;;  %v17927_v14 = vld [vmem:[#allocation13 + $0x163c] sm:$0xf0] }
 0x5ad   :  { %11399 = vmatpush.bf16.msra.mxu2 %v15886_v3  ;;  %v16558_v3 = vor.u32 %v19121_v40, %v16555_v61  ;;  %v20362_v37 = vpop.f32.mrf.mxu3  ;;  %v16838_v62 = vor.u32 %v19191_v18, %v16835_v19  ;;  %v16471_v61 = vld [vmem:[#allocation13 + $0xadc] sm:$0xf0]  ;;  %v19051_v18 = vld [vmem:[#allocation13 + $0x93c] sm:$0xf] }
 0x5ae   :  { %11390 = vmatpush.bf16.msrb.mxu1 %v15550_v59  ;;  %v15326_v59 = vor.u32 %v18813_v33, %v15323_v51  ;;  %v20364_v44 = vpop.f32.mrf.mxu1 }
 0x5af   :  { %11462 = vmatpush.bf16.msrb.mxu3 %v17062_v45  ;;  %v19086_v45 = vld [vmem:[#allocation13 + $0xa54] sm:$0xf]  ;;  %11376 = vmatpush.bf16.msrb.mxu0 %v15354_v6  ;;  %v17983_v6 = vld [vmem:[#allocation13 + $0x16ac] sm:$0xf0] }
 0x5b0   :  { %v16418_v16 = vor.u32 %v19086_v45, %v16415_v21  ;;  %v19184_v45 = vld [vmem:[#allocation13 + $0xd64] sm:$0xf]  ;;  %v16807_v21 = vld [vmem:[#allocation13 + $0xd7c] sm:$0xf0] }
 0x5b1   :  { %11391 = vmatmul.bf16.vlgmr.msrb.gmra.mxu1 %v20199_v60  ;;  %11400 = vmatpush.bf16.msra.mxu2 %v15858_v56  ;;  %v11107_v56 = vadd.f32 %v20329_v26, %v11094_v7  ;;  %v19205_v26 = vld [vmem:[#allocation13 + $0xe0c] sm:$0xf] }
 0x5b2   :  { %11435 = vmatpush.bf16.msra.mxu1 %v16642_v58  ;;  %v19114_v58 = vld [vmem:[#allocation13 + $0xb34] sm:$0xf]  ;;  %v19065_v7 = vld [vmem:[#allocation13 + $0x9ac] sm:$0xf] }
 0x5b3   :  { %11463 = vmatpush.bf16.msrb.mxu3 %v17034_v32  ;;  %v16950_v32 = vor.u32 %v19219_v43, %v16947_v31  ;;  %11377 = vmatpush.bf16.msrb.mxu0 %v15326_v59  ;;  %v16530_v54 = vor.u32 %v19114_v58, %v16527_v53  ;;  %v11120_v9 = vadd.f32 %v20352_v13, %v11107_v56  ;;  %v19100_v13 = vld [vmem:[#allocation13 + $0xac4] sm:$0xf]  ;;  %v19471_v59 = vld [vmem:[#allocation13 + $0x165c] sm:$0xf]  ;;  %v19093_v58 = vld [vmem:[#allocation13 + $0xa8c] sm:$0xf] }
 0x5b4   :  { %v17986_v31 = vor.u32 %v19478_v55, %v17983_v6  ;;  %v16443_v53 = vld [vmem:[#allocation13 + $0xaa4] sm:$0xf0]  ;;  %v19464_v56 = vld [vmem:[#allocation13 + $0x1624] sm:$0xf] }
 0x5b5   :  { %11401 = vmatpush.bf16.msra.mxu2 %v15830_v10  ;;  %v16891_v10 = vld [vmem:[#allocation13 + $0xe24] sm:$0xf0]  ;;  %v11133_v33 = vadd.f32 %v20346_v1, %v11120_v9  ;;  %v11212_v51 = vpop.f32.mrf.mxu3  ;;  %v16474_v1 = vor.u32 %v19100_v13, %v16471_v61  ;;  %v17538_v9 = vor.u32 %v19366_v12, %v17535_v28  ;;  %v17930_v19 = vor.u32 %v19464_v56, %v17927_v14  ;;  %v17479_v61 = vld [vmem:[#allocation13 + $0x12bc] sm:$0xf0]  ;;  %v19149_v12 = vld [vmem:[#allocation13 + $0xc4c] sm:$0xf] }
 0x5b6   :  { %11436 = vmatpush.bf16.msra.mxu1 %v16614_v47  ;;  %v15774_v47 = vor.u32 %v18925_v41, %v15771_v48  ;;  %11378 = vmatmul.bf16.vlgmr.msrb.gmra.mxu0 %v20184_v8  ;;  %v16894_v40 = vor.u32 %v19205_v26, %v16891_v10  ;;  %v11186_v43 = vpop.f32.mrf.mxu1  ;;  %v16810_v48 = vor.u32 %v19184_v45, %v16807_v21  ;;  %v19457_v10 = vld [vmem:[#allocation13 + $0x15ec] sm:$0xf]  ;;  %v17899_v55 = vld [vmem:[#allocation13 + $0x1604] sm:$0xf0]  ;;  %v19044_v51 = vld [vmem:[#allocation13 + $0x904] sm:$0xf] }
 0x5b7   :  { %11464 = vmatpush.bf16.msrb.mxu3 %v17006_v5  ;;  %v16499_v5 = vld [vmem:[#allocation13 + $0xb14] sm:$0xf0]  ;;  %11422 = vmatpush.bf16.msra.mxu0 %v16418_v16  ;;  %v11146_v41 = vadd.f32 %v20359_v17, %v11133_v33  ;;  %v19450_v45 = vld [vmem:[#allocation13 + $0x15b4] sm:$0xf]  ;;  %v17871_v21 = vld [vmem:[#allocation13 + $0x15cc] sm:$0xf0] }
 0x5b8   :  { %v16723_v33 = vld [vmem:[#allocation13 + $0xcd4] sm:$0xf0]  ;;  %v16667_v56 = vld [vmem:[#allocation13 + $0xc64] sm:$0xf0]  ;;  %v19338_v14 = vld [vmem:[#allocation13 + $0x1234] sm:$0xf] }
 0x5b9   :  { %11402 = vmatpush.bf16.msra.mxu2 %v15802_v15  ;;  %v16331_v15 = vld [vmem:[#allocation13 + $0x9c4] sm:$0xf0]  ;;  %v11159_v17 = vadd.f32 %v20348_v20, %v11146_v41  ;;  %v19359_v20 = vld [vmem:[#allocation13 + $0x12dc] sm:$0xf] }
 0x5ba   :  { %11437 = vmatpush.bf16.msra.mxu1 %v16586_v39  ;;  %v16502_v39 = vor.u32 %v19107_v52, %v16499_v5  ;;  %v16334_v16 = vor.u32 %v19065_v7, %v16331_v15  ;;  %v16306_v5 = vor.u32 %v19058_v27, %v16303_v34  ;;  %v19156_v7 = vld [vmem:[#allocation13 + $0xc84] sm:$0xf]  ;;  %v19443_v27 = vld [vmem:[#allocation13 + $0x157c] sm:$0xf] }
 0x5bb   :  { %11465 = vmatpush.bf16.msrb.mxu3 %v16978_v42  ;;  %11423 = vmatpush.bf16.msra.mxu0 %v16390_v29  ;;  %v16362_v42 = vor.u32 %v19072_v35, %v16359_v57  ;;  %v19170_v29 = vld [vmem:[#allocation13 + $0xcf4] sm:$0xf]  ;;  %v16275_v35 = vld [vmem:[#allocation13 + $0x954] sm:$0xf0] }
 0x5bc   :  { %v17507_v57 = vld [vmem:[#allocation13 + $0x12f4] sm:$0xf0] }
 0x5bd   :  { %11403 = vmatpush.bf16.msra.mxu2 %v15774_v47  ;;  %v11171_v47 = vpop.f32.mrf.mxu0  ;;  %v17510_v13 = vor.u32 %v19359_v20, %v17507_v57  ;;  %v16670_v20 = vor.u32 %v19149_v12, %v16667_v56  ;;  %v17339_v56 = vld [vmem:[#allocation13 + $0x11a4] sm:$0xf0] }
 0x5be   :  { %11438 = vmatpush.bf16.msra.mxu1 %v16558_v3  ;;  %v17955_v3 = vld [vmem:[#allocation13 + $0x1674] sm:$0xf0]  ;;  %v11172_v52 = vadd.f32 %v11171_v47, %v11159_v17  ;;  %v17423_v47 = vld [vmem:[#allocation13 + $0x124c] sm:$0xf0] }
 0x5bf   :  { %11466 = vmatpush.bf16.msrb.mxu3 %v16950_v32  ;;  %11424 = vmatpush.bf16.msra.mxu0 %v16362_v42  ;;  %v19177_v32 = vld [vmem:[#allocation13 + $0xd2c] sm:$0xf]  ;;  %v17958_v36 = vor.u32 %v19471_v59, %v17955_v3  ;;  %v17902_v42 = vor.u32 %v19457_v10, %v17899_v55  ;;  %v16695_v3 = vld [vmem:[#allocation13 + $0xc9c] sm:$0xf0]  ;;  %v19331_v55 = vld [vmem:[#allocation13 + $0x11fc] sm:$0xf] }
 0x5c0   :  { %11404 = vmatmul.bf16.vlgmr.msra.gmra.mxu2 %v20177_v2  ;;  %v11185_v26 = vadd.f32 %v20364_v44, %v11172_v52  ;;  %v19352_v44 = vld [vmem:[#allocation13 + $0x12a4] sm:$0xf]  ;;  %v16698_v34 = vor.u32 %v19156_v7, %v16695_v3  ;;  %v19422_v52 = vld [vmem:[#allocation13 + $0x14d4] sm:$0xf] }
 0x5c1   :  { %11448 = vmatpush.bf16.msrb.mxu2 %v16866_v38  ;;  %v16782_v38 = vor.u32 %v19177_v32, %v16779_v4  ;;  %v17482_v59 = vor.u32 %v19352_v44, %v17479_v61  ;;  %v19310_v32 = vld [vmem:[#allocation13 + $0x1154] sm:$0xf]  ;;  %v17311_v4 = vld [vmem:[#allocation13 + $0x116c] sm:$0xf0]  ;;  %v17787_v44 = vld [vmem:[#allocation13 + $0x1524] sm:$0xf0] }
 0x5c2   :  { %11439 = vmatpush.bf16.msra.mxu1 %v16530_v54  ;;  %v16446_v54 = vor.u32 %v19093_v58, %v16443_v53  ;;  %12034 = vst [vmem:[%s20564_s11 + $0x8] sm:$0xff] %v11185_v26  ;;  %v17874_v58 = vor.u32 %v19450_v45, %v17871_v21  ;;  %v19345_v53 = vld [vmem:[#allocation13 + $0x126c] sm:$0xf]  ;;  %v17426_v26 = vor.u32 %v19338_v14, %v17423_v47  ;;  %v15973_v61 = vld [vmem:[#allocation13 + $0x6d8] sm:$0xf] }
 0x5c3   :  { %11467 = vmatpush.bf16.msrb.mxu3 %v16922_v0  ;;  %11425 = vmatpush.bf16.msra.mxu0 %v16334_v16  ;;  %v16751_v0 = vld [vmem:[#allocation13 + $0xd0c] sm:$0xf0]  ;;  %v20379_v15 = vpop.f32.mrf.mxu2  ;;  %v17451_v16 = vld [vmem:[#allocation13 + $0x1284] sm:$0xf0]  ;;  %v18978_v45 = vld [vmem:[#allocation13 + $0x6f0] sm:$0xf0] }
 0x5c4   :  { %v16754_v6 = vor.u32 %v19170_v29, %v16751_v0  ;;  %v17454_v17 = vor.u32 %v19345_v53, %v17451_v16  ;;  %v17283_v29 = vld [vmem:[#allocation13 + $0x1134] sm:$0xf0]  ;;  %v19436_v0 = vld [vmem:[#allocation13 + $0x1544] sm:$0xf]  ;;  %v15974_v53 = vor.u32 %v18978_v45, %v15973_v61  ;;  %v19289_v16 = vld [vmem:[#allocation13 + $0x10ac] sm:$0xf] }
 0x5c5   :  { %11449 = vmatpush.bf16.msrb.mxu2 %v16838_v62  ;;  %v16278_v62 = vor.u32 %v19051_v18, %v16275_v35  ;;  %v11173_v43 = vpop.f32.mrf.mxu0  ;;  %v17815_v18 = vld [vmem:[#allocation13 + $0x155c] sm:$0xf0]  ;;  %v19408_v3 = vld [vmem:[#allocation13 + $0x1464] sm:$0xf]  ;;  %v19401_v47 = vld [vmem:[#allocation13 + $0x142c] sm:$0xf] }
 0x5c6   :  { %11440 = vmatpush.bf16.msra.mxu1 %v16502_v39  ;;  %v19163_v39 = vld [vmem:[#allocation13 + $0xcbc] sm:$0xf]  ;;  %v18957_v61 = vld [vmem:[#allocation13 + $0x648] sm:$0xf0] }
 0x5c7   :  { %11468 = vmatpush.bf16.msrb.mxu3 %v16894_v40  ;;  %11426 = vmatpush.bf16.msra.mxu0 %v16306_v5  ;;  %v16247_v40 = vld [vmem:[#allocation13 + $0x91c] sm:$0xf0]  ;;  %v17759_v5 = vld [vmem:[#allocation13 + $0x14ec] sm:$0xf0] }
 0x5c8   :  { %v16250_v41 = vor.u32 %v19044_v51, %v16247_v40  ;;  %v17762_v10 = vor.u32 %v19422_v52, %v17759_v5  ;;  %v19296_v51 = vld [vmem:[#allocation13 + $0x10e4] sm:$0xf]  ;;  %v19429_v40 = vld [vmem:[#allocation13 + $0x150c] sm:$0xf] }
 0x5c9   :  { %11450 = vmatpush.bf16.msrb.mxu2 %v16810_v48  ;;  %v16219_v48 = vld [vmem:[#allocation13 + $0x8e4] sm:$0xf0] }
 0x5ca   :  { %11441 = vmatpush.bf16.msra.mxu1 %v16474_v1  ;;  %11469 = vmatmul.bf16.vlgmr.msrb.gmra.mxu3 %v20206_v11  ;;  %v19037_v1 = vld [vmem:[#allocation13 + $0x8cc] sm:$0xf] }
 0x5cb   :  { %11513 = vmatpush.bf16.msra.mxu3 %v17986_v31  ;;  %v16726_v31 = vor.u32 %v19163_v39, %v16723_v33  ;;  %11427 = vmatpush.bf16.msra.mxu0 %v16278_v62  ;;  %v16222_v28 = vor.u32 %v19037_v1, %v16219_v48  ;;  %v11199_v57 = vpop.f32.mrf.mxu2  ;;  %v17818_v62 = vor.u32 %v19436_v0, %v17815_v18  ;;  %v17731_v33 = vld [vmem:[#allocation13 + $0x14b4] sm:$0xf0]  ;;  %v17703_v1 = vld [vmem:[#allocation13 + $0x147c] sm:$0xf0]  ;;  %v18866_v0 = vld [vmem:[#allocation13 + $0x370] sm:$0xf0] }
 0x5cc   :  { %v20386_v48 = vld [vmem:[#allocation15] sm:$0xff]  ;;  %v15917_v18 = vld [vmem:[#allocation13 + $0x668] sm:$0xf] }
 0x5cd   :  { %11451 = vmatpush.bf16.msrb.mxu2 %v16782_v38  ;;  %v20383_v35 = vpop.f32.mrf.mxu3 }
 0x5ce   :  { %11442 = vmatpush.bf16.msra.mxu1 %v16446_v54  ;;  %v17314_v54 = vor.u32 %v19310_v32, %v17311_v4  ;;  %v17227_v32 = vld [vmem:[#allocation13 + $0x10c4] sm:$0xf0] }
 0x5cf   :  { %11514 = vmatpush.bf16.msra.mxu3 %v17958_v36  ;;  %v17843_v36 = vld [vmem:[#allocation13 + $0x1594] sm:$0xf0]  ;;  %11428 = vmatpush.bf16.msra.mxu0 %v16250_v41  ;;  %v17790_v41 = vor.u32 %v19429_v40, %v17787_v44  ;;  %v17230_v14 = vor.u32 %v19289_v16, %v17227_v32  ;;  %v18859_v40 = vld [vmem:[#allocation13 + $0x338] sm:$0xf0]  ;;  %v15889_v44 = vld [vmem:[#allocation13 + $0x630] sm:$0xf] }
 0x5d0   :  { %v17846_v38 = vor.u32 %v19443_v27, %v17843_v36  ;;  %v15945_v36 = vld [vmem:[#allocation13 + $0x6a0] sm:$0xf]  ;;  %v18950_v16 = vld [vmem:[#allocation13 + $0x610] sm:$0xf0] }
 0x5d1   :  { %11443 = vmatmul.bf16.vlgmr.msra.gmra.mxu1 %v20223_v24  ;;  %11452 = vmatpush.bf16.msrb.mxu2 %v16754_v6  ;;  %v17395_v6 = vld [vmem:[#allocation13 + $0x1214] sm:$0xf0] }
 0x5d2   :  { %11487 = vmatpush.bf16.msrb.mxu1 %v17538_v9  ;;  %v19303_v9 = vld [vmem:[#allocation13 + $0x111c] sm:$0xf]  ;;  %v17398_v21 = vor.u32 %v19331_v55, %v17395_v6 }
 0x5d3   :  { %11515 = vmatpush.bf16.msra.mxu3 %v17930_v19  ;;  %v20381_v19 = vpop.f32.mrf.mxu1  ;;  %11429 = vmatpush.bf16.msra.mxu0 %v16222_v28  ;;  %v17286_v39 = vor.u32 %v19303_v9, %v17283_v29  ;;  %v17706_v28 = vor.u32 %v19408_v3, %v17703_v1  ;;  %v17199_v9 = vld [vmem:[#allocation13 + $0x108c] sm:$0xf0]  ;;  %v15525_v29 = vld [vmem:[#allocation13 + $0x358] sm:$0xf]  ;;  %v11223_v57 = vpop.f32.mrf.mxu0  ;;  %v17143_v3 = vld [vmem:[#allocation13 + $0x101c] sm:$0xf0] }
 0x5d4   :  { %v15526_v6 = vor.u32 %v18866_v0, %v15525_v29  ;;  %v15469_v1 = vld [vmem:[#allocation13 + $0x2e8] sm:$0xf]  ;;  %v15833_v29 = vld [vmem:[#allocation13 + $0x5c0] sm:$0xf]  ;;  %v18943_v0 = vld [vmem:[#allocation13 + $0x5d8] sm:$0xf0] }
 0x5d5   :  { %11453 = vmatpush.bf16.msrb.mxu2 %v16726_v31  ;;  %v19324_v31 = vld [vmem:[#allocation13 + $0x11c4] sm:$0xf]  ;;  %v11264_v27 = vpop.f32.mrf.mxu3 }
 0x5d6   :  { %11488 = vmatpush.bf16.msrb.mxu1 %v17510_v13  ;;  %v19415_v13 = vld [vmem:[#allocation13 + $0x149c] sm:$0xf]  ;;  %11430 = vmatmul.bf16.vlgmr.msra.gmra.mxu0 %v20211_v25 }
 0x5d7   :  { %11516 = vmatpush.bf16.msra.mxu3 %v17902_v42  ;;  %11474 = vmatpush.bf16.msrb.mxu0 %v17314_v54  ;;  %v17255_v42 = vld [vmem:[#allocation13 + $0x10fc] sm:$0xf0]  ;;  %v17734_v43 = vor.u32 %v19415_v13, %v17731_v33  ;;  %v17675_v54 = vld [vmem:[#allocation13 + $0x1444] sm:$0xf0] }
 0x5d8   :  { %v17258_v7 = vor.u32 %v19296_v51, %v17255_v42  ;;  %v17171_v51 = vld [vmem:[#allocation13 + $0x1054] sm:$0xf0]  ;;  %v15497_v42 = vld [vmem:[#allocation13 + $0x320] sm:$0xf] }
 0x5d9   :  { %11454 = vmatpush.bf16.msrb.mxu2 %v16698_v34  ;;  %v18971_v34 = vld [vmem:[#allocation13 + $0x6b8] sm:$0xf0] }
 0x5da   :  { %11489 = vmatpush.bf16.msrb.mxu1 %v17482_v59  ;;  %v17367_v59 = vld [vmem:[#allocation13 + $0x11dc] sm:$0xf0]  ;;  %v15946_v5 = vor.u32 %v18971_v34, %v15945_v36  ;;  %v19380_v36 = vld [vmem:[#allocation13 + $0x1384] sm:$0xf] }
 0x5db   :  { %11517 = vmatpush.bf16.msra.mxu3 %v17874_v58  ;;  %11475 = vmatpush.bf16.msrb.mxu0 %v17286_v39  ;;  %v7094_v58 = vperm.slane %v20386_v48, 2  ;;  %v11238_v4 = vpop.f32.mrf.mxu1  ;;  %v17370_v12 = vor.u32 %v19324_v31, %v17367_v59  ;;  %v19394_v39 = vld [vmem:[#allocation13 + $0x13f4] sm:$0xf]  ;;  %v15498_v31 = vor.u32 %v18859_v40, %v15497_v42  ;;  %v19268_v59 = vld [vmem:[#allocation13 + $0x1004] sm:$0xf]  ;;  %v11225_v32 = vpop.f32.mrf.mxu0 }
 0x5dc   :  { %v15805_v42 = vld [vmem:[#allocation13 + $0x588] sm:$0xf]  ;;  %v18936_v40 = vld [vmem:[#allocation13 + $0x5a0] sm:$0xf0]  ;;  %v16869_v32 = vld [vmem:[#allocation13 + $0xdd8] sm:$0xf] }
 0x5dd   :  { %11455 = vmatpush.bf16.msrb.mxu2 %v16670_v20  ;;  %v11198_v52 = vadd.f32 %v20379_v15, %v7094_v58  ;;  %v18964_v20 = vld [vmem:[#allocation13 + $0x680] sm:$0xf0]  ;;  %v19275_v15 = vld [vmem:[#allocation13 + $0x103c] sm:$0xf] }
 0x5de   :  { %11490 = vmatpush.bf16.msrb.mxu1 %v17454_v17  ;;  %v19317_v17 = vld [vmem:[#allocation13 + $0x118c] sm:$0xf]  ;;  %v15918_v33 = vor.u32 %v18964_v20, %v15917_v18  ;;  %v18852_v58 = vld [vmem:[#allocation13 + $0x300] sm:$0xf0] }
 0x5df   :  { %11518 = vmatpush.bf16.msra.mxu3 %v17846_v38  ;;  %11476 = vmatpush.bf16.msrb.mxu0 %v17258_v7  ;;  %v19282_v38 = vld [vmem:[#allocation13 + $0x1074] sm:$0xf]  ;;  %v11211_v13 = vadd.f32 %v20362_v37, %v11198_v52  ;;  %v19387_v7 = vld [vmem:[#allocation13 + $0x13bc] sm:$0xf]  ;;  %v15890_v37 = vor.u32 %v18957_v61, %v15889_v44  ;;  %v18845_v52 = vld [vmem:[#allocation13 + $0x2c8] sm:$0xf0] }
 0x5e0   :  { %11456 = vmatmul.bf16.vlgmr.msrb.gmra.mxu2 %v20204_v63  ;;  %v17202_v55 = vor.u32 %v19282_v38, %v17199_v9  ;;  %v15441_v38 = vld [vmem:[#allocation13 + $0x2b0] sm:$0xf]  ;;  %v18810_v9 = vld [vmem:[#allocation13 + $0x1b0] sm:$0xf0]  ;;  %v19373_v18 = vld [vmem:[#allocation13 + $0x134c] sm:$0xf] }
 0x5e1   :  { %11500 = vmatpush.bf16.msra.mxu2 %v17762_v10  ;;  %v17678_v10 = vor.u32 %v19401_v47, %v17675_v54  ;;  %v11224_v45 = vadd.f32 %v11223_v57, %v11211_v13  ;;  %v18922_v13 = vld [vmem:[#allocation13 + $0x530] sm:$0xf0] }
 0x5e2   :  { %11491 = vmatpush.bf16.msrb.mxu1 %v17426_v26  ;;  %v17342_v26 = vor.u32 %v19317_v17, %v17339_v56  ;;  %v17591_v17 = vld [vmem:[#allocation13 + $0x139c] sm:$0xf0]  ;;  %v19261_v56 = vld [vmem:[#allocation13 + $0xfcc] sm:$0xf] }
 0x5e3   :  { %11519 = vmatpush.bf16.msra.mxu3 %v17818_v62  ;;  %11477 = vmatpush.bf16.msrb.mxu0 %v17230_v14  ;;  %v17647_v62 = vld [vmem:[#allocation13 + $0x140c] sm:$0xf0]  ;;  %v11237_v4 = vadd.f32 %v20381_v19, %v11224_v45  ;;  %v11249_v34 = vpop.f32.mrf.mxu2  ;;  %v17115_v14 = vld [vmem:[#allocation13 + $0xfe4] sm:$0xf0]  ;;  %v17594_v19 = vor.u32 %v19380_v36, %v17591_v17  ;;  %v18824_v17 = vld [vmem:[#allocation13 + $0x220] sm:$0xf0] }
 0x5e4   :  { %v17118_v57 = vor.u32 %v19261_v56, %v17115_v14  ;;  %v15693_v56 = vld [vmem:[#allocation13 + $0x4a8] sm:$0xf]  ;;  %v18908_v14 = vld [vmem:[#allocation13 + $0x4c0] sm:$0xf0] }
 0x5e5   :  { %11501 = vmatpush.bf16.msra.mxu2 %v17734_v43  ;;  %v17174_v43 = vor.u32 %v19275_v15, %v17171_v51  ;;  %v11250_v47 = vadd.f32 %v11249_v34, %v11237_v4  ;;  %v15749_v15 = vld [vmem:[#allocation13 + $0x518] sm:$0xf]  ;;  %v18803_v51 = vld [vmem:[#allocation13 + $0x178] sm:$0xf0]  ;;  %v19202_v4 = vld [vmem:[#allocation13 + $0xdf0] sm:$0xf0] }
 0x5e6   :  { %11492 = vmatpush.bf16.msrb.mxu1 %v17398_v21  ;;  %v17650_v21 = vor.u32 %v19394_v39, %v17647_v62  ;;  %v15834_v62 = vor.u32 %v18943_v0, %v15833_v29  ;;  %v15357_v34 = vld [vmem:[#allocation13 + $0x208] sm:$0xf]  ;;  %v19195_v29 = vld [vmem:[#allocation13 + $0xdb8] sm:$0xf0] }
 0x5e7   :  { %11520 = vmatpush.bf16.msra.mxu3 %v17790_v41  ;;  %11478 = vmatpush.bf16.msrb.mxu0 %v17202_v55  ;;  %v17619_v41 = vld [vmem:[#allocation13 + $0x13d4] sm:$0xf0]  ;;  %v20396_v20 = vadd.f32 %v20383_v35, %v11250_v47  ;;  %v16870_v47 = vor.u32 %v19202_v4, %v16869_v32  ;;  %v15358_v0 = vor.u32 %v18824_v17, %v15357_v34  ;;  %v15609_v4 = vld [vmem:[#allocation13 + $0x400] sm:$0xf]  ;;  %v19076_v17 = vld [vmem:[#allocation13 + $0xa00] sm:$0xf0] }
 0x5e8   :  { %v17622_v27 = vor.u32 %v19387_v7, %v17619_v41  ;;  %v15413_v55 = vld [vmem:[#allocation13 + $0x278] sm:$0xf]  ;;  %v18831_v7 = vld [vmem:[#allocation13 + $0x258] sm:$0xf0] }
 0x5e9   :  { %11502 = vmatpush.bf16.msra.mxu2 %v17706_v28  ;;  %v15470_v28 = vor.u32 %v18852_v58, %v15469_v1  ;;  %v15245_v1 = vld [vmem:[#allocation13 + $0x128] sm:$0xf]  ;;  %v18796_v58 = vld [vmem:[#allocation13 + $0x140] sm:$0xf0] }
 0x5ea   :  { %11493 = vmatpush.bf16.msrb.mxu1 %v17370_v12  ;;  %11521 = vmatmul.bf16.vlgmr.msra.gmra.mxu3 %v20276_v23  ;;  %v17146_v12 = vor.u32 %v19268_v59, %v17143_v3  ;;  %v15806_v59 = vor.u32 %v18936_v40, %v15805_v42  ;;  %v18915_v3 = vld [vmem:[#allocation13 + $0x4f8] sm:$0xf0] }
 0x5eb   :  { %11565 = vmatpush.bf16.msrb.mxu3 %v15974_v53  ;;  %v15861_v53 = vld [vmem:[#allocation13 + $0x5f8] sm:$0xf]  ;;  %11479 = vmatpush.bf16.msrb.mxu0 %v17174_v43  ;;  %v11251_v45 = vpop.f32.mrf.mxu2  ;;  %v15750_v43 = vor.u32 %v18922_v13, %v15749_v15  ;;  %v19090_v13 = vld [vmem:[#allocation13 + $0xa70] sm:$0xf0] }
 0x5ec   :  { %v15862_v54 = vor.u32 %v18950_v16, %v15861_v53  ;;  %v15777_v53 = vld [vmem:[#allocation13 + $0x550] sm:$0xf]  ;;  %v18929_v16 = vld [vmem:[#allocation13 + $0x568] sm:$0xf0]  ;;  %v16421_v15 = vld [vmem:[#allocation13 + $0xa58] sm:$0xf] }
 0x5ed   :  { %11503 = vmatpush.bf16.msra.mxu2 %v17678_v10  ;;  %v17563_v10 = vld [vmem:[#allocation13 + $0x1364] sm:$0xf0]  ;;  %v20400_v35 = vpop.f32.mrf.mxu3 }
 0x5ee   :  { %11494 = vmatpush.bf16.msrb.mxu1 %v17342_v26  ;;  %v15442_v26 = vor.u32 %v18845_v52, %v15441_v38  ;;  %v20398_v44 = vpop.f32.mrf.mxu1  ;;  %v17566_v61 = vor.u32 %v19373_v18, %v17563_v10  ;;  %v18789_v38 = vld [vmem:[#allocation13 + $0x108] sm:$0xf0]  ;;  %v15329_v18 = vld [vmem:[#allocation13 + $0x1d0] sm:$0xf] }
 0x5ef   :  { %11566 = vmatpush.bf16.msrb.mxu3 %v15946_v5  ;;  %v15301_v5 = vld [vmem:[#allocation13 + $0x198] sm:$0xf]  ;;  %11480 = vmatpush.bf16.msrb.mxu0 %v17146_v12  ;;  %v15246_v12 = vor.u32 %v18796_v58, %v15245_v1  ;;  %v15665_v10 = vld [vmem:[#allocation13 + $0x470] sm:$0xf]  ;;  %v19181_v58 = vld [vmem:[#allocation13 + $0xd48] sm:$0xf0] }
 0x5f0   :  { %v15302_v39 = vor.u32 %v18810_v9, %v15301_v5  ;;  %v16841_v9 = vld [vmem:[#allocation13 + $0xda0] sm:$0xf]  ;;  %v16785_v1 = vld [vmem:[#allocation13 + $0xd30] sm:$0xf] }
 0x5f1   :  { %11495 = vmatmul.bf16.vlgmr.msrb.gmra.mxu1 %v20250_v49  ;;  %11504 = vmatpush.bf16.msra.mxu2 %v17650_v21  ;;  %v16786_v34 = vor.u32 %v19181_v58, %v16785_v1 }
 0x5f2   :  { %11539 = vmatpush.bf16.msra.mxu1 %v15526_v6  ;;  %v18838_v6 = vld [vmem:[#allocation13 + $0x290] sm:$0xf0] }
 0x5f3   :  { %11567 = vmatpush.bf16.msrb.mxu3 %v15918_v33  ;;  %v15273_v33 = vld [vmem:[#allocation13 + $0x160] sm:$0xf]  ;;  %11481 = vmatpush.bf16.msrb.mxu0 %v17118_v57  ;;  %v15414_v21 = vor.u32 %v18838_v6, %v15413_v55  ;;  %v18817_v57 = vld [vmem:[#allocation13 + $0x1e8] sm:$0xf0]  ;;  %v15189_v6 = vld [vmem:[#allocation13 + $0xb8] sm:$0xf]  ;;  %v20404_v42 = vpop.f32.mrf.mxu0 }
 0x5f4   :  { %v15274_v41 = vor.u32 %v18803_v51, %v15273_v33  ;;  %v18901_v55 = vld [vmem:[#allocation13 + $0x488] sm:$0xf0]  ;;  %v16813_v33 = vld [vmem:[#allocation13 + $0xd68] sm:$0xf]  ;;  %v19188_v51 = vld [vmem:[#allocation13 + $0xd80] sm:$0xf0]  ;;  %v15330_v40 = vor.u32 %v18817_v57, %v15329_v18 }
 0x5f5   :  { %11505 = vmatpush.bf16.msra.mxu2 %v17622_v27  ;;  %v11316_v5 = vpop.f32.mrf.mxu3  ;;  %v16337_v57 = vld [vmem:[#allocation13 + $0x9b0] sm:$0xf] }
 0x5f6   :  { %11540 = vmatpush.bf16.msra.mxu1 %v15498_v31  ;;  %v15385_v31 = vld [vmem:[#allocation13 + $0x240] sm:$0xf]  ;;  %11482 = vmatmul.bf16.vlgmr.msrb.gmra.mxu0 %v20233_v30  ;;  %v11290_v52 = vpop.f32.mrf.mxu1 }
 0x5f7   :  { %11568 = vmatpush.bf16.msrb.mxu3 %v15890_v37  ;;  %11526 = vmatpush.bf16.msra.mxu0 %v15302_v39  ;;  %v15721_v37 = vld [vmem:[#allocation13 + $0x4e0] sm:$0xf]  ;;  %v15386_v27 = vor.u32 %v18831_v7, %v15385_v31  ;;  %v16842_v39 = vor.u32 %v19195_v29, %v16841_v9  ;;  %v18894_v31 = vld [vmem:[#allocation13 + $0x450] sm:$0xf0]  ;;  %v18880_v29 = vld [vmem:[#allocation13 + $0x3e0] sm:$0xf0] }
 0x5f8   :  { %v15722_v36 = vor.u32 %v18915_v3, %v15721_v37  ;;  %v15161_v7 = vld [vmem:[#allocation13 + $0x80] sm:$0xf]  ;;  %v19083_v3 = vld [vmem:[#allocation13 + $0xa38] sm:$0xf0] }
 0x5f9   :  { %11506 = vmatpush.bf16.msra.mxu2 %v17594_v19  ;;  %v15694_v19 = vor.u32 %v18908_v14, %v15693_v56  ;;  %v16393_v37 = vld [vmem:[#allocation13 + $0xa20] sm:$0xf]  ;;  %v16757_v56 = vld [vmem:[#allocation13 + $0xcf8] sm:$0xf]  ;;  %v19174_v14 = vld [vmem:[#allocation13 + $0xd10] sm:$0xf0] }
 0x5fa   :  { %11541 = vmatpush.bf16.msra.mxu1 %v15470_v28  ;;  %v15778_v28 = vor.u32 %v18929_v16, %v15777_v53  ;;  %v16394_v32 = vor.u32 %v19083_v3, %v16393_v37  ;;  %v16758_v18 = vor.u32 %v19174_v14, %v16757_v56  ;;  %v19160_v37 = vld [vmem:[#allocation13 + $0xca0] sm:$0xf0]  ;;  %v16673_v14 = vld [vmem:[#allocation13 + $0xc50] sm:$0xf] }
 0x5fb   :  { %11569 = vmatpush.bf16.msrb.mxu3 %v15862_v54  ;;  %11527 = vmatpush.bf16.msra.mxu0 %v15274_v41  ;;  %v15217_v54 = vld [vmem:[#allocation13 + $0xf0] sm:$0xf]  ;;  %v16814_v41 = vor.u32 %v19188_v51, %v16813_v33  ;;  %v18873_v51 = vld [vmem:[#allocation13 + $0x3a8] sm:$0xf0]  ;;  %v19020_v56 = vld [vmem:[#allocation13 + $0x840] sm:$0xf0] }
 0x5fd   :  { %11507 = vmatpush.bf16.msra.mxu2 %v17566_v61  ;;  %v15666_v61 = vor.u32 %v18901_v55, %v15665_v10  ;;  %v16197_v10 = vld [vmem:[#allocation13 + $0x898] sm:$0xf]  ;;  %v19034_v55 = vld [vmem:[#allocation13 + $0x8b0] sm:$0xf0] }
 0x5fe   :  { %11542 = vmatpush.bf16.msra.mxu1 %v15442_v26  ;;  %v15218_v26 = vor.u32 %v18789_v38, %v15217_v54  ;;  %v15581_v38 = vld [vmem:[#allocation13 + $0x3c8] sm:$0xf] }
 0x5ff   :  { %11570 = vmatpush.bf16.msrb.mxu3 %v15834_v62  ;;  %11528 = vmatpush.bf16.msra.mxu0 %v15246_v12  ;;  %v18782_v62 = vld [vmem:[#allocation13 + $0xd0] sm:$0xf0]  ;;  %v18768_v12 = vld [vmem:[#allocation13 + $0x60] sm:$0xf0] }
 0x600   :  { %11508 = vmatmul.bf16.vlgmr.msra.gmra.mxu2 %v20247_v22  ;;  %v15190_v45 = vor.u32 %v18782_v62, %v15189_v6  ;;  %v16729_v6 = vld [vmem:[#allocation13 + $0xcc0] sm:$0xf]  ;;  %v15582_v62 = vor.u32 %v18880_v29, %v15581_v38  ;;  %v19426_v38 = vld [vmem:[#allocation13 + $0x14f0] sm:$0xf0] }
 0x601   :  { %11552 = vmatpush.bf16.msrb.mxu2 %v15750_v43  ;;  %v15637_v43 = vld [vmem:[#allocation13 + $0x438] sm:$0xf] }
 0x602   :  { %11543 = vmatpush.bf16.msra.mxu1 %v15414_v21  ;;  %v16422_v21 = vor.u32 %v19090_v13, %v16421_v15  ;;  %v15638_v53 = vor.u32 %v18894_v31, %v15637_v43  ;;  %v15553_v15 = vld [vmem:[#allocation13 + $0x390] sm:$0xf]  ;;  %v16645_v43 = vld [vmem:[#allocation13 + $0xc18] sm:$0xf]  ;;  %v19146_v31 = vld [vmem:[#allocation13 + $0xc30] sm:$0xf0] }
 0x603   :  { %11571 = vmatpush.bf16.msrb.mxu3 %v15806_v59  ;;  %11529 = vmatpush.bf16.msra.mxu0 %v15218_v26  ;;  %v18775_v59 = vld [vmem:[#allocation13 + $0x98] sm:$0xf0]  ;;  %v20408_v52 = vpop.f32.mrf.mxu2  ;;  %v19069_v26 = vld [vmem:[#allocation13 + $0x9c8] sm:$0xf0]  ;;  %v15554_v58 = vor.u32 %v18873_v51, %v15553_v15 }
 0x604   :  { %v15162_v16 = vor.u32 %v18775_v59, %v15161_v7  ;;  %v16338_v33 = vor.u32 %v19069_v26, %v16337_v57  ;;  %v16169_v7 = vld [vmem:[#allocation13 + $0x860] sm:$0xf]  ;;  %v16701_v59 = vld [vmem:[#allocation13 + $0xc88] sm:$0xf]  ;;  %v19048_v57 = vld [vmem:[#allocation13 + $0x920] sm:$0xf0] }
 0x605   :  { %11553 = vmatpush.bf16.msrb.mxu2 %v15722_v36  ;;  %v15133_v36 = vld [vmem:[#allocation13 + $0x48] sm:$0xf] }
 0x606   :  { %11544 = vmatpush.bf16.msra.mxu1 %v15386_v27  ;;  %v18887_v27 = vld [vmem:[#allocation13 + $0x418] sm:$0xf0]  ;;  %v15134_v5 = vor.u32 %v18768_v12, %v15133_v36  ;;  %v16617_v12 = vld [vmem:[#allocation13 + $0xbe0] sm:$0xf]  ;;  %v16589_v26 = vld [vmem:[#allocation13 + $0xba8] sm:$0xf] }
 0x607   :  { %11572 = vmatpush.bf16.msrb.mxu3 %v15778_v28  ;;  %11530 = vmatpush.bf16.msra.mxu0 %v15190_v45  ;;  %v16365_v28 = vld [vmem:[#allocation13 + $0x9e8] sm:$0xf]  ;;  %v15610_v54 = vor.u32 %v18887_v27, %v15609_v4  ;;  %v16198_v45 = vor.u32 %v19034_v55, %v16197_v10  ;;  %v16281_v4 = vld [vmem:[#allocation13 + $0x940] sm:$0xf]  ;;  %v19055_v27 = vld [vmem:[#allocation13 + $0x958] sm:$0xf0] }
 0x608   :  { %v16366_v9 = vor.u32 %v19076_v17, %v16365_v28  ;;  %v19139_v28 = vld [vmem:[#allocation13 + $0xbf8] sm:$0xf0]  ;;  %v16141_v17 = vld [vmem:[#allocation13 + $0x828] sm:$0xf]  ;;  %v19132_v10 = vld [vmem:[#allocation13 + $0xbc0] sm:$0xf0] }
 0x609   :  { %11554 = vmatpush.bf16.msrb.mxu2 %v15694_v19  ;;  %v18761_v19 = vld [vmem:[#allocation13 + $0x28] sm:$0xf0]  ;;  %v16618_v29 = vor.u32 %v19139_v28, %v16617_v12  ;;  %v16590_v51 = vor.u32 %v19132_v10, %v16589_v26  ;;  %v19118_v12 = vld [vmem:[#allocation13 + $0xb50] sm:$0xf0]  ;;  %v18992_v26 = vld [vmem:[#allocation13 + $0x760] sm:$0xf0] }
 0x60a   :  { %11545 = vmatpush.bf16.msra.mxu1 %v15358_v0  ;;  %11573 = vmatmul.bf16.vlgmr.msrb.gmra.mxu3 %v20177_v2  ;;  %v15105_v0 = vld [vmem:[#allocation13 + $0x10] sm:$0xf]  ;;  %v17261_v10 = vld [vmem:[#allocation13 + $0x10e8] sm:$0xf] }
 0x60b   :  { %11617 = vmatpush.bf16.msra.mxu3 %v16870_v47  ;;  %v11277_v47 = vpop.f32.mrf.mxu0  ;;  %11531 = vmatpush.bf16.msra.mxu0 %v15162_v16  ;;  %v15106_v13 = vor.u32 %v18761_v19, %v15105_v0  ;;  %v16253_v0 = vld [vmem:[#allocation13 + $0x908] sm:$0xf]  ;;  %v16142_v19 = vor.u32 %v19020_v56, %v16141_v17  ;;  %v18999_v56 = vld [vmem:[#allocation13 + $0x798] sm:$0xf0] }
 0x60c   :  { %v19153_v47 = vld [vmem:[#allocation13 + $0xc68] sm:$0xf0] }
 0x60d   :  { %11555 = vmatpush.bf16.msrb.mxu2 %v15666_v61  ;;  %v19062_v61 = vld [vmem:[#allocation13 + $0x990] sm:$0xf0]  ;;  %v20412_v1 = vpop.f32.mrf.mxu3 }
 0x60e   :  { %11546 = vmatpush.bf16.msra.mxu1 %v15330_v40  ;;  %v16309_v40 = vld [vmem:[#allocation13 + $0x978] sm:$0xf]  ;;  %v20410_v3 = vpop.f32.mrf.mxu1 }
 0x60f   :  { %11618 = vmatpush.bf16.msra.mxu3 %v16842_v39  ;;  %v19167_v39 = vld [vmem:[#allocation13 + $0xcd8] sm:$0xf0]  ;;  %11532 = vmatpush.bf16.msra.mxu0 %v15134_v5  ;;  %v16310_v16 = vor.u32 %v19062_v61, %v16309_v40  ;;  %v11276_v5 = vadd.f32 %v20404_v42, %v20396_v20  ;;  %v17737_v20 = vld [vmem:[#allocation13 + $0x14a0] sm:$0xf]  ;;  %v16225_v40 = vld [vmem:[#allocation13 + $0x8d0] sm:$0xf] }
 0x610   :  { %v19419_v42 = vld [vmem:[#allocation13 + $0x14b8] sm:$0xf0]  ;;  %v19041_v61 = vld [vmem:[#allocation13 + $0x8e8] sm:$0xf0] }
 0x611   :  { %11547 = vmatmul.bf16.vlgmr.msra.gmra.mxu1 %v20184_v8  ;;  %11556 = vmatpush.bf16.msrb.mxu2 %v15638_v53  ;;  %v11303_v53 = vpop.f32.mrf.mxu2 }
 0x612   :  { %11591 = vmatpush.bf16.msrb.mxu1 %v16422_v21  ;;  %v16730_v21 = vor.u32 %v19167_v39, %v16729_v6  ;;  %v16113_v6 = vld [vmem:[#allocation13 + $0x7f0] sm:$0xf]  ;;  %v19013_v39 = vld [vmem:[#allocation13 + $0x808] sm:$0xf0]  ;;  %v19412_v53 = vld [vmem:[#allocation13 + $0x1480] sm:$0xf0] }
 0x613   :  { %11619 = vmatpush.bf16.msra.mxu3 %v16814_v41  ;;  %v19027_v41 = vld [vmem:[#allocation13 + $0x878] sm:$0xf0]  ;;  %11533 = vmatpush.bf16.msra.mxu0 %v15106_v13  ;;  %v11289_v13 = vadd.f32 %v20398_v44, %v11276_v5  ;;  %v17709_v44 = vld [vmem:[#allocation13 + $0x1468] sm:$0xf] }
 0x614   :  { %v16170_v36 = vor.u32 %v19027_v41, %v16169_v7  ;;  %v17738_v41 = vor.u32 %v19419_v42, %v17737_v20  ;;  %v17710_v17 = vor.u32 %v19412_v53, %v17709_v44  ;;  %v16477_v42 = vld [vmem:[#allocation13 + $0xac8] sm:$0xf]  ;;  %v16449_v44 = vld [vmem:[#allocation13 + $0xa90] sm:$0xf] }
 0x615   :  { %11557 = vmatpush.bf16.msrb.mxu2 %v15610_v54  ;;  %v17765_v54 = vld [vmem:[#allocation13 + $0x14d8] sm:$0xf]  ;;  %v11368_v15 = vpop.f32.mrf.mxu3  ;;  %v11302_v7 = vadd.f32 %v20408_v52, %v11289_v13  ;;  %v16057_v52 = vld [vmem:[#allocation13 + $0x780] sm:$0xf] }
 0x616   :  { %11592 = vmatpush.bf16.msrb.mxu1 %v16394_v32  ;;  %v16646_v32 = vor.u32 %v19146_v31, %v16645_v43  ;;  %11534 = vmatmul.bf16.vlgmr.msra.gmra.mxu0 %v20159_v50  ;;  %v17766_v55 = vor.u32 %v19426_v38, %v17765_v54  ;;  %v19125_v43 = vld [vmem:[#allocation13 + $0xb88] sm:$0xf0]  ;;  %v16085_v31 = vld [vmem:[#allocation13 + $0x7b8] sm:$0xf]  ;;  %v17681_v54 = vld [vmem:[#allocation13 + $0x1430] sm:$0xf] }
 0x617   :  { %11620 = vmatpush.bf16.msra.mxu3 %v16786_v34  ;;  %11578 = vmatpush.bf16.msrb.mxu0 %v16198_v45  ;;  %v16702_v34 = vor.u32 %v19160_v37, %v16701_v59  ;;  %v16114_v45 = vor.u32 %v19013_v39, %v16113_v6  ;;  %v19006_v59 = vld [vmem:[#allocation13 + $0x7d0] sm:$0xf0]  ;;  %v17317_v37 = vld [vmem:[#allocation13 + $0x1158] sm:$0xf]  ;;  %v11315_v28 = vadd.f32 %v20400_v35, %v11302_v7  ;;  %v19405_v38 = vld [vmem:[#allocation13 + $0x1448] sm:$0xf0] }
 0x618   :  { %v17682_v35 = vor.u32 %v19405_v38, %v17681_v54  ;;  %v17653_v6 = vld [vmem:[#allocation13 + $0x13f8] sm:$0xf]  ;;  %v19398_v39 = vld [vmem:[#allocation13 + $0x1410] sm:$0xf0]  ;;  %v19293_v7 = vld [vmem:[#allocation13 + $0x10c8] sm:$0xf0] }
 0x619   :  { %11558 = vmatpush.bf16.msrb.mxu2 %v15582_v62  ;;  %v11342_v62 = vpop.f32.mrf.mxu1 }
 0x61a   :  { %11593 = vmatpush.bf16.msrb.mxu1 %v16366_v9  ;;  %v16282_v9 = vor.u32 %v19055_v27, %v16281_v4  ;;  %v16086_v27 = vor.u32 %v19006_v59, %v16085_v31  ;;  %v17233_v31 = vld [vmem:[#allocation13 + $0x10b0] sm:$0xf]  ;;  %v19258_v59 = vld [vmem:[#allocation13 + $0xfb0] sm:$0xf0] }
 0x61b   :  { %11621 = vmatpush.bf16.msra.mxu3 %v16758_v18  ;;  %11579 = vmatpush.bf16.msrb.mxu0 %v16170_v36  ;;  %v16674_v18 = vor.u32 %v19153_v47, %v16673_v14  ;;  %v17289_v14 = vld [vmem:[#allocation13 + $0x1120] sm:$0xf]  ;;  %v19307_v47 = vld [vmem:[#allocation13 + $0x1138] sm:$0xf0] }
 0x61d   :  { %11559 = vmatpush.bf16.msrb.mxu2 %v15554_v58  ;;  %v19314_v58 = vld [vmem:[#allocation13 + $0x1170] sm:$0xf0] }
 0x61e   :  { %11594 = vmatpush.bf16.msrb.mxu1 %v16338_v33  ;;  %v16254_v33 = vor.u32 %v19048_v57, %v16253_v0  ;;  %v17318_v36 = vor.u32 %v19314_v58, %v17317_v37  ;;  %v17290_v0 = vor.u32 %v19307_v47, %v17289_v14  ;;  %v16029_v57 = vld [vmem:[#allocation13 + $0x748] sm:$0xf]  ;;  %v17625_v37 = vld [vmem:[#allocation13 + $0x13c0] sm:$0xf]  ;;  %v19391_v58 = vld [vmem:[#allocation13 + $0x13d8] sm:$0xf0] }
 0x61f   :  { %11622 = vmatpush.bf16.msra.mxu3 %v16730_v21  ;;  %11580 = vmatpush.bf16.msrb.mxu0 %v16142_v19  ;;  %v16561_v21 = vld [vmem:[#allocation13 + $0xb70] sm:$0xf]  ;;  %v16505_v19 = vld [vmem:[#allocation13 + $0xb00] sm:$0xf]  ;;  %v19384_v14 = vld [vmem:[#allocation13 + $0x13a0] sm:$0xf0] }
 0x620   :  { %11560 = vmatmul.bf16.vlgmr.msrb.gmra.mxu2 %v20199_v60  ;;  %v16562_v4 = vor.u32 %v19125_v43, %v16561_v21  ;;  %v17654_v43 = vor.u32 %v19398_v39, %v17653_v6  ;;  %v17569_v6 = vld [vmem:[#allocation13 + $0x1350] sm:$0xf]  ;;  %v19377_v39 = vld [vmem:[#allocation13 + $0x1368] sm:$0xf0] }
 0x621   :  { %11604 = vmatpush.bf16.msra.mxu2 %v16646_v32  ;;  %v16226_v32 = vor.u32 %v19041_v61, %v16225_v40  ;;  %v19104_v40 = vld [vmem:[#allocation13 + $0xae0] sm:$0xf0]  ;;  %v16001_v61 = vld [vmem:[#allocation13 + $0x710] sm:$0xf] }
 0x622   :  { %11595 = vmatpush.bf16.msrb.mxu1 %v16310_v16  ;;  %v11327_v16 = vpop.f32.mrf.mxu0 }
 0x623   :  { %11623 = vmatpush.bf16.msra.mxu3 %v16702_v34  ;;  %11581 = vmatpush.bf16.msrb.mxu0 %v16114_v45  ;;  %v16533_v34 = vld [vmem:[#allocation13 + $0xb38] sm:$0xf]  ;;  %v11328_v5 = vadd.f32 %v11327_v16, %v11315_v28  ;;  %v11353_v13 = vpop.f32.mrf.mxu2  ;;  %v18985_v45 = vld [vmem:[#allocation13 + $0x728] sm:$0xf0]  ;;  %v17234_v16 = vor.u32 %v19293_v7, %v17233_v31  ;;  %v17065_v28 = vld [vmem:[#allocation13 + $0xf60] sm:$0xf] }
 0x624   :  { %v16002_v53 = vor.u32 %v18985_v45, %v16001_v61  ;;  %v17485_v61 = vld [vmem:[#allocation13 + $0x12a8] sm:$0xf]  ;;  %v19356_v45 = vld [vmem:[#allocation13 + $0x12c0] sm:$0xf0]  ;;  %v19237_v31 = vld [vmem:[#allocation13 + $0xf08] sm:$0xf0] }
 0x625   :  { %11605 = vmatpush.bf16.msra.mxu2 %v16618_v29  ;;  %v16058_v29 = vor.u32 %v18999_v56, %v16057_v52  ;;  %v11341_v15 = vadd.f32 %v20410_v3, %v11328_v5  ;;  %v16478_v3 = vor.u32 %v19104_v40, %v16477_v42  ;;  %v19370_v52 = vld [vmem:[#allocation13 + $0x1330] sm:$0xf0]  ;;  %v17597_v56 = vld [vmem:[#allocation13 + $0x1388] sm:$0xf]  ;;  %v19272_v40 = vld [vmem:[#allocation13 + $0x1020] sm:$0xf0] }
 0x626   :  { %11596 = vmatpush.bf16.msrb.mxu1 %v16282_v9  ;;  %v16534_v9 = vor.u32 %v19118_v12, %v16533_v34  ;;  %v17626_v34 = vor.u32 %v19391_v58, %v17625_v37  ;;  %v17541_v12 = vld [vmem:[#allocation13 + $0x1318] sm:$0xf]  ;;  %v15723_v37 = vld [vmem:[#allocation13 + $0x4fc] sm:$0xf0]  ;;  %v7095_v58 = vperm.slane %v20386_v48, 3 }
 0x627   :  { %11624 = vmatpush.bf16.msra.mxu3 %v16674_v18  ;;  %11582 = vmatpush.bf16.msrb.mxu0 %v16086_v27  ;;  %v19111_v18 = vld [vmem:[#allocation13 + $0xb18] sm:$0xf0]  ;;  %v11354_v21 = vadd.f32 %v11353_v13, %v11341_v15  ;;  %v19286_v27 = vld [vmem:[#allocation13 + $0x1090] sm:$0xf0]  ;;  %v15751_v15 = vld [vmem:[#allocation13 + $0x534] sm:$0xf0] }
 0x628   :  { %v16506_v20 = vor.u32 %v19111_v18, %v16505_v19  ;;  %v19279_v19 = vld [vmem:[#allocation13 + $0x1058] sm:$0xf0]  ;;  %v17149_v13 = vld [vmem:[#allocation13 + $0x1008] sm:$0xf] }
 0x629   :  { %11606 = vmatpush.bf16.msra.mxu2 %v16590_v51  ;;  %12035 = vst [vmem:[%s20564_s11 + $0x10] sm:$0xff] %v11354_v21 }
 0x62a   :  { %11597 = vmatpush.bf16.msrb.mxu1 %v16254_v33  ;;  %11625 = vmatmul.bf16.vlgmr.msra.gmra.mxu3 %v20204_v63  ;;  %v11329_v62 = vpop.f32.mrf.mxu0  ;;  %v16030_v33 = vor.u32 %v18992_v26, %v16029_v57  ;;  %v17598_v57 = vor.u32 %v19384_v14, %v17597_v56  ;;  %v19363_v26 = vld [vmem:[#allocation13 + $0x12f8] sm:$0xf0]  ;;  %v15695_v56 = vld [vmem:[#allocation13 + $0x4c4] sm:$0xf0] }
 0x62b   :  { %11669 = vmatpush.bf16.msrb.mxu3 %v17766_v55  ;;  %v19300_v55 = vld [vmem:[#allocation13 + $0x1100] sm:$0xf0]  ;;  %11583 = vmatpush.bf16.msrb.mxu0 %v16058_v29  ;;  %v11355_v5 = vpop.f32.mrf.mxu2  ;;  %v17542_v29 = vor.u32 %v19370_v52, %v17541_v12  ;;  %v18919_v62 = vld [vmem:[#allocation13 + $0x51c] sm:$0xf]  ;;  %v19230_v12 = vld [vmem:[#allocation13 + $0xed0] sm:$0xf0] }
 0x62c   :  { %v17262_v51 = vor.u32 %v19300_v55, %v17261_v10  ;;  %v17037_v10 = vld [vmem:[#allocation13 + $0xf28] sm:$0xf]  ;;  %v19244_v55 = vld [vmem:[#allocation13 + $0xf40] sm:$0xf0]  ;;  %v15754_v21 = vor.u32 %v18919_v62, %v15751_v15  ;;  %v18807_v52 = vld [vmem:[#allocation13 + $0x19c] sm:$0xf] }
 0x62d   :  { %11607 = vmatpush.bf16.msra.mxu2 %v16562_v4  ;;  %v17205_v4 = vld [vmem:[#allocation13 + $0x1078] sm:$0xf]  ;;  %v20429_v54 = vpop.f32.mrf.mxu3 }
 0x62e   :  { %11598 = vmatpush.bf16.msrb.mxu1 %v16226_v32  ;;  %v19097_v32 = vld [vmem:[#allocation13 + $0xaa8] sm:$0xf0]  ;;  %v20427_v47 = vpop.f32.mrf.mxu1 }
 0x62f   :  { %11670 = vmatpush.bf16.msrb.mxu3 %v17738_v41  ;;  %v17093_v41 = vld [vmem:[#allocation13 + $0xf98] sm:$0xf]  ;;  %11584 = vmatpush.bf16.msrb.mxu0 %v16030_v33  ;;  %v16450_v38 = vor.u32 %v19097_v32, %v16449_v44  ;;  %v17038_v33 = vor.u32 %v19244_v55, %v17037_v10  ;;  %v17486_v44 = vor.u32 %v19356_v45, %v17485_v61  ;;  %v15275_v10 = vld [vmem:[#allocation13 + $0x17c] sm:$0xf0]  ;;  %v18898_v55 = vld [vmem:[#allocation13 + $0x474] sm:$0xf] }
 0x630   :  { %v15247_v61 = vld [vmem:[#allocation13 + $0x144] sm:$0xf0]  ;;  %v18891_v45 = vld [vmem:[#allocation13 + $0x43c] sm:$0xf] }
 0x631   :  { %11599 = vmatmul.bf16.vlgmr.msrb.gmra.mxu1 %v20211_v25  ;;  %11608 = vmatpush.bf16.msra.mxu2 %v16534_v9  ;;  %v17206_v9 = vor.u32 %v19286_v27, %v17205_v4  ;;  %v17457_v4 = vld [vmem:[#allocation13 + $0x1270] sm:$0xf]  ;;  %v19349_v27 = vld [vmem:[#allocation13 + $0x1288] sm:$0xf0] }
 0x632   :  { %11643 = vmatpush.bf16.msra.mxu1 %v17318_v36  ;;  %v17094_v36 = vor.u32 %v19258_v59, %v17093_v41  ;;  %v18912_v59 = vld [vmem:[#allocation13 + $0x4e4] sm:$0xf] }
 0x633   :  { %11671 = vmatpush.bf16.msrb.mxu3 %v17710_v17  ;;  %v19251_v17 = vld [vmem:[#allocation13 + $0xf78] sm:$0xf0]  ;;  %11585 = vmatpush.bf16.msrb.mxu0 %v16002_v53  ;;  %v17121_v53 = vld [vmem:[#allocation13 + $0xfd0] sm:$0xf]  ;;  %v11379_v48 = vpop.f32.mrf.mxu0 }
 0x634   :  { %v17066_v18 = vor.u32 %v19251_v17, %v17065_v28  ;;  %v15303_v28 = vld [vmem:[#allocation13 + $0x1b4] sm:$0xf0]  ;;  %v18905_v17 = vld [vmem:[#allocation13 + $0x4ac] sm:$0xf] }
 0x635   :  { %11609 = vmatpush.bf16.msra.mxu2 %v16506_v20  ;;  %v11420_v41 = vpop.f32.mrf.mxu3 }
 0x636   :  { %11644 = vmatpush.bf16.msra.mxu1 %v17290_v0  ;;  %v17177_v0 = vld [vmem:[#allocation13 + $0x1040] sm:$0xf]  ;;  %11586 = vmatmul.bf16.vlgmr.msrb.gmra.mxu0 %v20179_v46  ;;  %v11394_v7 = vpop.f32.mrf.mxu1  ;;  %v17373_v41 = vld [vmem:[#allocation13 + $0x11c8] sm:$0xf] }
 0x637   :  { %11672 = vmatpush.bf16.msrb.mxu3 %v17682_v35  ;;  %11630 = vmatpush.bf16.msra.mxu0 %v17094_v36  ;;  %v17513_v35 = vld [vmem:[#allocation13 + $0x12e0] sm:$0xf]  ;;  %v17178_v20 = vor.u32 %v19279_v19, %v17177_v0  ;;  %v16981_v36 = vld [vmem:[#allocation13 + $0xeb8] sm:$0xf]  ;;  %v19342_v0 = vld [vmem:[#allocation13 + $0x1250] sm:$0xf0] }
 0x638   :  { %v17514_v42 = vor.u32 %v19363_v26, %v17513_v35  ;;  %v16982_v5 = vor.u32 %v19230_v12, %v16981_v36  ;;  %v16953_v19 = vld [vmem:[#allocation13 + $0xe80] sm:$0xf]  ;;  %v19223_v35 = vld [vmem:[#allocation13 + $0xe98] sm:$0xf0]  ;;  %v18800_v26 = vld [vmem:[#allocation13 + $0x164] sm:$0xf] }
 0x639   :  { %11610 = vmatpush.bf16.msra.mxu2 %v16478_v3  ;;  %v17150_v3 = vor.u32 %v19272_v40, %v17149_v13  ;;  %v16954_v15 = vor.u32 %v19223_v35, %v16953_v19  ;;  %v19335_v13 = vld [vmem:[#allocation13 + $0x1218] sm:$0xf0]  ;;  %v18793_v40 = vld [vmem:[#allocation13 + $0x12c] sm:$0xf]  ;;  %v17989_v36 = vld [vmem:[#allocation13 + $0x1698] sm:$0xf] }
 0x63a   :  { %11645 = vmatpush.bf16.msra.mxu1 %v17262_v51  ;;  %v17570_v51 = vor.u32 %v19377_v39, %v17569_v6  ;;  %v15667_v6 = vld [vmem:[#allocation13 + $0x48c] sm:$0xf0]  ;;  %v18884_v12 = vld [vmem:[#allocation13 + $0x404] sm:$0xf]  ;;  %v15527_v19 = vld [vmem:[#allocation13 + $0x374] sm:$0xf0] }
 0x63b   :  { %11673 = vmatpush.bf16.msrb.mxu3 %v17654_v43  ;;  %11631 = vmatpush.bf16.msra.mxu0 %v17066_v18  ;;  %v17009_v43 = vld [vmem:[#allocation13 + $0xef0] sm:$0xf]  ;;  %v11367_v18 = vadd.f32 %v20412_v1, %v7095_v58  ;;  %v15670_v1 = vor.u32 %v18898_v55, %v15667_v6  ;;  %v15250_v58 = vor.u32 %v18793_v40, %v15247_v61  ;;  %v18877_v35 = vld [vmem:[#allocation13 + $0x3cc] sm:$0xf]  ;;  %v19468_v40 = vld [vmem:[#allocation13 + $0x1640] sm:$0xf0] }
 0x63c   :  { %v17010_v32 = vor.u32 %v19237_v31, %v17009_v43  ;;  %v11381_v43 = vpop.f32.mrf.mxu0  ;;  %v18870_v61 = vld [vmem:[#allocation13 + $0x394] sm:$0xf] }
 0x63d   :  { %11611 = vmatpush.bf16.msra.mxu2 %v16450_v38  ;;  %v17458_v38 = vor.u32 %v19349_v27, %v17457_v4  ;;  %v11380_v39 = vadd.f32 %v11379_v48, %v11367_v18  ;;  %v18786_v4 = vld [vmem:[#allocation13 + $0xf4] sm:$0xf]  ;;  %v15219_v27 = vld [vmem:[#allocation13 + $0x10c] sm:$0xf0]  ;;  %v17961_v18 = vld [vmem:[#allocation13 + $0x1660] sm:$0xf] }
 0x63e   :  { %11646 = vmatpush.bf16.msra.mxu1 %v17234_v16  ;;  %v19265_v16 = vld [vmem:[#allocation13 + $0xfe8] sm:$0xf0]  ;;  %v15222_v48 = vor.u32 %v18786_v4, %v15219_v27  ;;  %v16647_v43 = vld [vmem:[#allocation13 + $0xc34] sm:$0xf0] }
 0x63f   :  { %11674 = vmatpush.bf16.msrb.mxu3 %v17626_v34  ;;  %11632 = vmatpush.bf16.msra.mxu0 %v17038_v33  ;;  %v15726_v34 = vor.u32 %v18912_v59, %v15723_v37  ;;  %v17122_v14 = vor.u32 %v19265_v16, %v17121_v53  ;;  %v16925_v33 = vld [vmem:[#allocation13 + $0xe48] sm:$0xf]  ;;  %v11393_v31 = vadd.f32 %v20427_v47, %v11380_v39  ;;  %v19209_v53 = vld [vmem:[#allocation13 + $0xe28] sm:$0xf0] }
 0x640   :  { %11612 = vmatmul.bf16.vlgmr.msra.gmra.mxu2 %v20223_v24 }
 0x641   :  { %11656 = vmatpush.bf16.msrb.mxu2 %v17542_v29  ;;  %v17429_v29 = vld [vmem:[#allocation13 + $0x1238] sm:$0xf] }
 0x642   :  { %11647 = vmatpush.bf16.msra.mxu1 %v17206_v9  ;;  %v15306_v9 = vor.u32 %v18807_v52, %v15303_v28  ;;  %v17430_v62 = vor.u32 %v19342_v0, %v17429_v29  ;;  %v15611_v52 = vld [vmem:[#allocation13 + $0x41c] sm:$0xf0]  ;;  %v17345_v28 = vld [vmem:[#allocation13 + $0x1190] sm:$0xf]  ;;  %v18863_v0 = vld [vmem:[#allocation13 + $0x35c] sm:$0xf] }
 0x643   :  { %11675 = vmatpush.bf16.msrb.mxu3 %v17598_v57  ;;  %11633 = vmatpush.bf16.msra.mxu0 %v17010_v32  ;;  %v15698_v57 = vor.u32 %v18905_v17, %v15695_v56  ;;  %v11405_v59 = vpop.f32.mrf.mxu2  ;;  %v15614_v29 = vor.u32 %v18884_v12, %v15611_v52 }
 0x644   :  { %v11406_v16 = vadd.f32 %v11405_v59, %v11393_v31 }
 0x645   :  { %11657 = vmatpush.bf16.msrb.mxu2 %v17514_v42  ;;  %v17401_v42 = vld [vmem:[#allocation13 + $0x1200] sm:$0xf] }
 0x646   :  { %11648 = vmatpush.bf16.msra.mxu1 %v17178_v20  ;;  %v15278_v20 = vor.u32 %v18800_v26, %v15275_v10  ;;  %v17402_v7 = vor.u32 %v19335_v13, %v17401_v42  ;;  %v20439_v17 = vadd.f32 %v20429_v54, %v11406_v16  ;;  %v15583_v26 = vld [vmem:[#allocation13 + $0x3e4] sm:$0xf0]  ;;  %v17905_v16 = vld [vmem:[#allocation13 + $0x15f0] sm:$0xf] }
 0x647   :  { %11676 = vmatpush.bf16.msrb.mxu3 %v17570_v51  ;;  %11634 = vmatpush.bf16.msra.mxu0 %v16982_v5  ;;  %v19216_v51 = vld [vmem:[#allocation13 + $0xe60] sm:$0xf0]  ;;  %v15191_v5 = vld [vmem:[#allocation13 + $0xd4] sm:$0xf0]  ;;  %v15586_v13 = vor.u32 %v18877_v35, %v15583_v26 }
 0x648   :  { %v16926_v37 = vor.u32 %v19216_v51, %v16925_v33  ;;  %v18856_v33 = vld [vmem:[#allocation13 + $0x324] sm:$0xf]  ;;  %v17933_v51 = vld [vmem:[#allocation13 + $0x1628] sm:$0xf] }
 0x649   :  { %11658 = vmatpush.bf16.msrb.mxu2 %v17486_v44  ;;  %v16897_v44 = vld [vmem:[#allocation13 + $0xe10] sm:$0xf]  ;;  %v17934_v59 = vor.u32 %v19468_v40, %v17933_v51 }
 0x64a   :  { %11649 = vmatpush.bf16.msra.mxu1 %v17150_v3  ;;  %11677 = vmatmul.bf16.vlgmr.msrb.gmra.mxu3 %v20247_v22  ;;  %v19328_v3 = vld [vmem:[#allocation13 + $0x11e0] sm:$0xf0]  ;;  %v16898_v56 = vor.u32 %v19209_v53, %v16897_v44  ;;  %v15471_v44 = vld [vmem:[#allocation13 + $0x304] sm:$0xf0]  ;;  %v16563_v51 = vld [vmem:[#allocation13 + $0xb8c] sm:$0xf0] }
 0x64b   :  { %11721 = vmatpush.bf16.msra.mxu3 %v15754_v21  ;;  %v15639_v21 = vld [vmem:[#allocation13 + $0x454] sm:$0xf0]  ;;  %11635 = vmatpush.bf16.msra.mxu0 %v16954_v15  ;;  %v17374_v47 = vor.u32 %v19328_v3, %v17373_v41  ;;  %v11407_v6 = vpop.f32.mrf.mxu2  ;;  %v18772_v15 = vld [vmem:[#allocation13 + $0x84] sm:$0xf]  ;;  %v18765_v41 = vld [vmem:[#allocation13 + $0x4c] sm:$0xf] }
 0x64c   :  { %v15642_v32 = vor.u32 %v18891_v45, %v15639_v21  ;;  %v15555_v45 = vld [vmem:[#allocation13 + $0x3ac] sm:$0xf0]  ;;  %v19143_v21 = vld [vmem:[#allocation13 + $0xc1c] sm:$0xf]  ;;  %v18849_v3 = vld [vmem:[#allocation13 + $0x2ec] sm:$0xf] }
 0x64d   :  { %11659 = vmatpush.bf16.msrb.mxu2 %v17458_v38  ;;  %v18779_v38 = vld [vmem:[#allocation13 + $0xbc] sm:$0xf]  ;;  %v20443_v54 = vpop.f32.mrf.mxu3  ;;  %v16650_v53 = vor.u32 %v19143_v21, %v16647_v43  ;;  %v15474_v52 = vor.u32 %v18849_v3, %v15471_v44  ;;  %v18828_v21 = vld [vmem:[#allocation13 + $0x244] sm:$0xf]  ;;  %v15387_v43 = vld [vmem:[#allocation13 + $0x25c] sm:$0xf0] }
 0x64e   :  { %11650 = vmatpush.bf16.msra.mxu1 %v17122_v14  ;;  %v19321_v14 = vld [vmem:[#allocation13 + $0x11a8] sm:$0xf0]  ;;  %v20441_v10 = vpop.f32.mrf.mxu1  ;;  %v15194_v39 = vor.u32 %v18779_v38, %v15191_v5  ;;  %v17877_v38 = vld [vmem:[#allocation13 + $0x15b8] sm:$0xf] }
 0x64f   :  { %11722 = vmatpush.bf16.msra.mxu3 %v15726_v34  ;;  %v19482_v34 = vld [vmem:[#allocation13 + $0x16b0] sm:$0xf0]  ;;  %11636 = vmatpush.bf16.msra.mxu0 %v16926_v37  ;;  %v17346_v55 = vor.u32 %v19321_v14, %v17345_v28  ;;  %v15558_v37 = vor.u32 %v18870_v61, %v15555_v45  ;;  %v15107_v28 = vld [vmem:[#allocation13 + $0x2c] sm:$0xf0]  ;;  %v16535_v3 = vld [vmem:[#allocation13 + $0xb54] sm:$0xf0] }
 0x650   :  { %v15443_v14 = vld [vmem:[#allocation13 + $0x2cc] sm:$0xf0] }
 0x651   :  { %11651 = vmatmul.bf16.vlgmr.msra.gmra.mxu1 %v20233_v30  ;;  %11660 = vmatpush.bf16.msrb.mxu2 %v17430_v62  ;;  %v15530_v62 = vor.u32 %v18863_v0, %v15527_v19  ;;  %v16199_v0 = vld [vmem:[#allocation13 + $0x8b4] sm:$0xf0]  ;;  %v19129_v19 = vld [vmem:[#allocation13 + $0xbac] sm:$0xf] }
 0x652   :  { %11695 = vmatpush.bf16.msrb.mxu1 %v15306_v9  ;;  %v17990_v9 = vor.u32 %v19482_v34, %v17989_v36  ;;  %v19136_v36 = vld [vmem:[#allocation13 + $0xbe4] sm:$0xf]  ;;  %v16619_v34 = vld [vmem:[#allocation13 + $0xbfc] sm:$0xf0] }
 0x653   :  { %11723 = vmatpush.bf16.msra.mxu3 %v15698_v57  ;;  %v19475_v57 = vld [vmem:[#allocation13 + $0x1678] sm:$0xf0]  ;;  %11637 = vmatpush.bf16.msra.mxu0 %v16898_v56  ;;  %v16622_v5 = vor.u32 %v19136_v36, %v16619_v34  ;;  %v15359_v36 = vld [vmem:[#allocation13 + $0x224] sm:$0xf0]  ;;  %v17793_v34 = vld [vmem:[#allocation13 + $0x1510] sm:$0xf] }
 0x654   :  { %v17962_v42 = vor.u32 %v19475_v57, %v17961_v18  ;;  %v16591_v18 = vld [vmem:[#allocation13 + $0xbc4] sm:$0xf0]  ;;  %v20447_v57 = vpop.f32.mrf.mxu0 }
 0x655   :  { %11661 = vmatpush.bf16.msrb.mxu2 %v17402_v7  ;;  %v11472_v27 = vpop.f32.mrf.mxu3 }
 0x656   :  { %11696 = vmatpush.bf16.msrb.mxu1 %v15278_v20  ;;  %v15163_v20 = vld [vmem:[#allocation13 + $0x9c] sm:$0xf0]  ;;  %11638 = vmatmul.bf16.vlgmr.msra.gmra.mxu0 %v20206_v11  ;;  %v11446_v4 = vpop.f32.mrf.mxu1 }
 0x657   :  { %11724 = vmatpush.bf16.msra.mxu3 %v15670_v1  ;;  %11682 = vmatpush.bf16.msrb.mxu0 %v17990_v9  ;;  %v15499_v1 = vld [vmem:[#allocation13 + $0x33c] sm:$0xf0]  ;;  %v15166_v31 = vor.u32 %v18772_v15, %v15163_v20  ;;  %v19454_v9 = vld [vmem:[#allocation13 + $0x15d0] sm:$0xf0]  ;;  %v16594_v20 = vor.u32 %v19129_v19, %v16591_v18  ;;  %v15331_v19 = vld [vmem:[#allocation13 + $0x1ec] sm:$0xf0] }
 0x658   :  { %v15502_v7 = vor.u32 %v18856_v33, %v15499_v1  ;;  %v17849_v15 = vld [vmem:[#allocation13 + $0x1580] sm:$0xf]  ;;  %v19122_v1 = vld [vmem:[#allocation13 + $0xb74] sm:$0xf]  ;;  %v19003_v18 = vld [vmem:[#allocation13 + $0x7bc] sm:$0xf] }
 0x659   :  { %11662 = vmatpush.bf16.msrb.mxu2 %v17374_v47  ;;  %v18758_v47 = vld [vmem:[#allocation13 + $0x14] sm:$0xf]  ;;  %v16171_v33 = vld [vmem:[#allocation13 + $0x87c] sm:$0xf0] }
 0x65a   :  { %11697 = vmatpush.bf16.msrb.mxu1 %v15250_v58  ;;  %v15135_v58 = vld [vmem:[#allocation13 + $0x64] sm:$0xf0]  ;;  %v15110_v35 = vor.u32 %v18758_v47, %v15107_v28  ;;  %v19010_v47 = vld [vmem:[#allocation13 + $0x7f4] sm:$0xf]  ;;  %v16115_v28 = vld [vmem:[#allocation13 + $0x80c] sm:$0xf0] }
 0x65b   :  { %11725 = vmatpush.bf16.msra.mxu3 %v15642_v32  ;;  %11683 = vmatpush.bf16.msrb.mxu0 %v17962_v42  ;;  %v19461_v32 = vld [vmem:[#allocation13 + $0x1608] sm:$0xf0]  ;;  %v15138_v12 = vor.u32 %v18765_v41, %v15135_v58  ;;  %v19447_v42 = vld [vmem:[#allocation13 + $0x1598] sm:$0xf0]  ;;  %v19440_v41 = vld [vmem:[#allocation13 + $0x1560] sm:$0xf0] }
 0x65c   :  { %v17906_v56 = vor.u32 %v19461_v32, %v17905_v16  ;;  %v17850_v61 = vor.u32 %v19447_v42, %v17849_v15  ;;  %v19115_v58 = vld [vmem:[#allocation13 + $0xb3c] sm:$0xf]  ;;  %v11433_v44 = vpop.f32.mrf.mxu0  ;;  %v18821_v16 = vld [vmem:[#allocation13 + $0x20c] sm:$0xf]  ;;  %v15947_v15 = vld [vmem:[#allocation13 + $0x6bc] sm:$0xf0] }
 0x65d   :  { %11663 = vmatpush.bf16.msrb.mxu2 %v17346_v55  ;;  %v17878_v55 = vor.u32 %v19454_v9, %v17877_v38  ;;  %v16507_v38 = vld [vmem:[#allocation13 + $0xb1c] sm:$0xf0]  ;;  %v18814_v9 = vld [vmem:[#allocation13 + $0x1d4] sm:$0xf]  ;;  %v16479_v42 = vld [vmem:[#allocation13 + $0xae4] sm:$0xf0] }
 0x65e   :  { %11698 = vmatpush.bf16.msrb.mxu1 %v15222_v48  ;;  %v18842_v48 = vld [vmem:[#allocation13 + $0x2b4] sm:$0xf]  ;;  %v19367_v44 = vld [vmem:[#allocation13 + $0x131c] sm:$0xf] }
 0x65f   :  { %11726 = vmatpush.bf16.msra.mxu3 %v15614_v29  ;;  %11684 = vmatpush.bf16.msrb.mxu0 %v17934_v59  ;;  %v19031_v29 = vld [vmem:[#allocation13 + $0x89c] sm:$0xf]  ;;  %v15446_v26 = vor.u32 %v18842_v48, %v15443_v14  ;;  %v19017_v59 = vld [vmem:[#allocation13 + $0x82c] sm:$0xf]  ;;  %v15975_v48 = vld [vmem:[#allocation13 + $0x6f4] sm:$0xf0] }
 0x660   :  { %11664 = vmatmul.bf16.vlgmr.msrb.gmra.mxu2 %v20250_v49  ;;  %v16202_v6 = vor.u32 %v19031_v29, %v16199_v0  ;;  %v19108_v14 = vld [vmem:[#allocation13 + $0xb04] sm:$0xf]  ;;  %v16118_v0 = vor.u32 %v19010_v47, %v16115_v28  ;;  %v19073_v47 = vld [vmem:[#allocation13 + $0x9ec] sm:$0xf]  ;;  %v16367_v28 = vld [vmem:[#allocation13 + $0xa04] sm:$0xf0] }
 0x661   :  { %11708 = vmatpush.bf16.msra.mxu2 %v15530_v62  ;;  %v15415_v62 = vld [vmem:[#allocation13 + $0x294] sm:$0xf0] }
 0x662   :  { %11699 = vmatpush.bf16.msrb.mxu1 %v15194_v39  ;;  %v18835_v39 = vld [vmem:[#allocation13 + $0x27c] sm:$0xf] }
 0x663   :  { %11727 = vmatpush.bf16.msra.mxu3 %v15586_v13  ;;  %11685 = vmatpush.bf16.msrb.mxu0 %v17906_v56  ;;  %v19024_v13 = vld [vmem:[#allocation13 + $0x864] sm:$0xf]  ;;  %v15418_v40 = vor.u32 %v18835_v39, %v15415_v62  ;;  %v20451_v32 = vpop.f32.mrf.mxu2  ;;  %v18975_v56 = vld [vmem:[#allocation13 + $0x6dc] sm:$0xf]  ;;  %v16423_v39 = vld [vmem:[#allocation13 + $0xa74] sm:$0xf0] }
 0x664   :  { %v16174_v45 = vor.u32 %v19024_v13, %v16171_v33  ;;  %v18968_v62 = vld [vmem:[#allocation13 + $0x6a4] sm:$0xf] }
 0x665   :  { %11709 = vmatpush.bf16.msra.mxu2 %v15502_v7  ;;  %v16566_v7 = vor.u32 %v19122_v1, %v16563_v51  ;;  %v15334_v1 = vor.u32 %v18814_v9, %v15331_v19  ;;  %v18982_v19 = vld [vmem:[#allocation13 + $0x714] sm:$0xf] }
 0x666   :  { %11700 = vmatpush.bf16.msrb.mxu1 %v15166_v31  ;;  %v17821_v31 = vld [vmem:[#allocation13 + $0x1548] sm:$0xf] }
 0x667   :  { %11728 = vmatpush.bf16.msra.mxu3 %v15558_v37  ;;  %11686 = vmatpush.bf16.msrb.mxu0 %v17878_v55  ;;  %v16143_v37 = vld [vmem:[#allocation13 + $0x844] sm:$0xf0]  ;;  %v17822_v4 = vor.u32 %v19440_v41, %v17821_v31  ;;  %v16510_v55 = vor.u32 %v19108_v14, %v16507_v38  ;;  %v16395_v41 = vld [vmem:[#allocation13 + $0xa3c] sm:$0xf0]  ;;  %v15891_v14 = vld [vmem:[#allocation13 + $0x64c] sm:$0xf0] }
 0x668   :  { %v16146_v27 = vor.u32 %v19017_v59, %v16143_v37  ;;  %v18961_v59 = vld [vmem:[#allocation13 + $0x66c] sm:$0xf]  ;;  %v15919_v37 = vld [vmem:[#allocation13 + $0x684] sm:$0xf0] }
 0x669   :  { %11710 = vmatpush.bf16.msra.mxu2 %v15474_v52  ;;  %v16538_v52 = vor.u32 %v19115_v58, %v16535_v3  ;;  %v19094_v58 = vld [vmem:[#allocation13 + $0xa94] sm:$0xf]  ;;  %v16451_v3 = vld [vmem:[#allocation13 + $0xaac] sm:$0xf0] }
 0x66a   :  { %11701 = vmatpush.bf16.msrb.mxu1 %v15138_v12  ;;  %11729 = vmatmul.bf16.vlgmr.msra.gmra.mxu3 %v20199_v60  ;;  %v19433_v12 = vld [vmem:[#allocation13 + $0x1528] sm:$0xf0] }
 0x66b   :  { %11773 = vmatpush.bf16.msrb.mxu3 %v16650_v53  ;;  %v15390_v53 = vor.u32 %v18828_v21, %v15387_v43  ;;  %11687 = vmatpush.bf16.msrb.mxu0 %v17850_v61  ;;  %v17794_v29 = vor.u32 %v19433_v12, %v17793_v34  ;;  %v11459_v51 = vpop.f32.mrf.mxu2  ;;  %v16059_v21 = vld [vmem:[#allocation13 + $0x79c] sm:$0xf0]  ;;  %v15950_v43 = vor.u32 %v18968_v62, %v15947_v15  ;;  %v15863_v15 = vld [vmem:[#allocation13 + $0x614] sm:$0xf0] }
 0x66c   :  { %v15922_v34 = vor.u32 %v18961_v59, %v15919_v37  ;;  %v16454_v12 = vor.u32 %v19094_v58, %v16451_v3  ;;  %v15835_v59 = vld [vmem:[#allocation13 + $0x5dc] sm:$0xf0]  ;;  %v19248_v37 = vld [vmem:[#allocation13 + $0xf64] sm:$0xf]  ;;  %v19346_v3 = vld [vmem:[#allocation13 + $0x1274] sm:$0xf] }
 0x66d   :  { %11711 = vmatpush.bf16.msra.mxu2 %v15446_v26  ;;  %v15978_v26 = vor.u32 %v18975_v56, %v15975_v48  ;;  %v20455_v33 = vpop.f32.mrf.mxu3  ;;  %v18954_v48 = vld [vmem:[#allocation13 + $0x634] sm:$0xf]  ;;  %v17067_v58 = vld [vmem:[#allocation13 + $0xf7c] sm:$0xf0] }
 0x66e   :  { %11702 = vmatpush.bf16.msrb.mxu1 %v15110_v35  ;;  %v16087_v35 = vld [vmem:[#allocation13 + $0x7d4] sm:$0xf0]  ;;  %v20453_v13 = vpop.f32.mrf.mxu1 }
 0x66f   :  { %11774 = vmatpush.bf16.msrb.mxu3 %v16622_v5  ;;  %v15362_v5 = vor.u32 %v18821_v16, %v15359_v36  ;;  %11688 = vmatpush.bf16.msrb.mxu0 %v17822_v4  ;;  %v11432_v16 = vadd.f32 %v20447_v57, %v20439_v17  ;;  %v18989_v36 = vld [vmem:[#allocation13 + $0x74c] sm:$0xf]  ;;  %v19360_v17 = vld [vmem:[#allocation13 + $0x12e4] sm:$0xf]  ;;  %v17515_v57 = vld [vmem:[#allocation13 + $0x12fc] sm:$0xf0] }
 0x670   :  { %v17518_v62 = vor.u32 %v19360_v17, %v17515_v57  ;;  %v19045_v17 = vld [vmem:[#allocation13 + $0x90c] sm:$0xf] }
 0x671   :  { %11703 = vmatmul.bf16.vlgmr.msrb.gmra.mxu1 %v20159_v50  ;;  %11712 = vmatpush.bf16.msra.mxu2 %v15418_v40  ;;  %v16090_v40 = vor.u32 %v19003_v18, %v16087_v35  ;;  %v11445_v9 = vadd.f32 %v20441_v10, %v11432_v16  ;;  %v16003_v18 = vld [vmem:[#allocation13 + $0x72c] sm:$0xf0]  ;;  %v15894_v35 = vor.u32 %v18954_v48, %v15891_v14  ;;  %v19353_v10 = vld [vmem:[#allocation13 + $0x12ac] sm:$0xf]  ;;  %v17431_v48 = vld [vmem:[#allocation13 + $0x1254] sm:$0xf0] }
 0x672   :  { %11747 = vmatpush.bf16.msra.mxu1 %v16202_v6  ;;  %v19087_v6 = vld [vmem:[#allocation13 + $0xa5c] sm:$0xf] }
 0x673   :  { %11775 = vmatpush.bf16.msrb.mxu3 %v16594_v20  ;;  %v19101_v20 = vld [vmem:[#allocation13 + $0xacc] sm:$0xf]  ;;  %11689 = vmatpush.bf16.msrb.mxu0 %v17794_v29  ;;  %v16426_v61 = vor.u32 %v19087_v6, %v16423_v39  ;;  %v18947_v6 = vld [vmem:[#allocation13 + $0x5fc] sm:$0xf]  ;;  %v11458_v39 = vadd.f32 %v20451_v32, %v11445_v9  ;;  %v11483_v51 = vpop.f32.mrf.mxu0  ;;  %v18940_v32 = vld [vmem:[#allocation13 + $0x5c4] sm:$0xf] }
 0x674   :  { %v16482_v31 = vor.u32 %v19101_v20, %v16479_v42  ;;  %v19255_v20 = vld [vmem:[#allocation13 + $0xf9c] sm:$0xf]  ;;  %v17095_v42 = vld [vmem:[#allocation13 + $0xfb4] sm:$0xf0] }
 0x675   :  { %11713 = vmatpush.bf16.msra.mxu2 %v15390_v53  ;;  %v17543_v53 = vld [vmem:[#allocation13 + $0x1334] sm:$0xf0] }
 0x676   :  { %11748 = vmatpush.bf16.msra.mxu1 %v16174_v45  ;;  %v18996_v45 = vld [vmem:[#allocation13 + $0x784] sm:$0xf]  ;;  %11690 = vmatmul.bf16.vlgmr.msrb.gmra.mxu0 %v20276_v23  ;;  %v17546_v56 = vor.u32 %v19367_v44, %v17543_v53  ;;  %v11498_v38 = vpop.f32.mrf.mxu1  ;;  %v17459_v44 = vld [vmem:[#allocation13 + $0x128c] sm:$0xf0] }
 0x677   :  { %11776 = vmatpush.bf16.msrb.mxu3 %v16566_v7  ;;  %11734 = vmatpush.bf16.msra.mxu0 %v15978_v26  ;;  %v19080_v7 = vld [vmem:[#allocation13 + $0xa24] sm:$0xf]  ;;  %v16062_v4 = vor.u32 %v18996_v45, %v16059_v21  ;;  %v19066_v26 = vld [vmem:[#allocation13 + $0x9b4] sm:$0xf]  ;;  %v15866_v45 = vor.u32 %v18947_v6, %v15863_v15  ;;  %v17098_v21 = vor.u32 %v19255_v20, %v17095_v42  ;;  %v17011_v6 = vld [vmem:[#allocation13 + $0xf0c] sm:$0xf0] }
 0x678   :  { %v19332_v15 = vld [vmem:[#allocation13 + $0x1204] sm:$0xf]  ;;  %v17403_v20 = vld [vmem:[#allocation13 + $0x121c] sm:$0xf0] }
 0x679   :  { %11714 = vmatpush.bf16.msra.mxu2 %v15362_v5  ;;  %v11524_v5 = vpop.f32.mrf.mxu3 }
 0x67a   :  { %11749 = vmatpush.bf16.msra.mxu1 %v16146_v27  ;;  %v16398_v27 = vor.u32 %v19080_v7, %v16395_v41  ;;  %v11471_v7 = vadd.f32 %v20443_v54, %v11458_v39  ;;  %v17462_v54 = vor.u32 %v19346_v3, %v17459_v44  ;;  %v19199_v39 = vld [vmem:[#allocation13 + $0xddc] sm:$0xf] }
 0x67b   :  { %11777 = vmatpush.bf16.msrb.mxu3 %v16538_v52  ;;  %11735 = vmatpush.bf16.msra.mxu0 %v15950_v43  ;;  %v16031_v52 = vld [vmem:[#allocation13 + $0x764] sm:$0xf0]  ;;  %v19059_v43 = vld [vmem:[#allocation13 + $0x97c] sm:$0xf]  ;;  %v11485_v14 = vpop.f32.mrf.mxu0 }
 0x67c   :  { %v16034_v29 = vor.u32 %v18989_v36, %v16031_v52  ;;  %v11484_v53 = vadd.f32 %v11483_v51, %v11471_v7  ;;  %v19052_v36 = vld [vmem:[#allocation13 + $0x944] sm:$0xf]  ;;  %v15807_v52 = vld [vmem:[#allocation13 + $0x5a4] sm:$0xf0]  ;;  %v16843_v7 = vld [vmem:[#allocation13 + $0xdbc] sm:$0xf0] }
 0x67d   :  { %11715 = vmatpush.bf16.msra.mxu2 %v15334_v1  ;;  %v17487_v1 = vld [vmem:[#allocation13 + $0x12c4] sm:$0xf0]  ;;  %v18867_v14 = vld [vmem:[#allocation13 + $0x378] sm:$0xf0] }
 0x67e   :  { %11750 = vmatpush.bf16.msra.mxu1 %v16118_v0  ;;  %v16370_v0 = vor.u32 %v19073_v47, %v16367_v28  ;;  %v17490_v41 = vor.u32 %v19353_v10, %v17487_v1  ;;  %v19241_v47 = vld [vmem:[#allocation13 + $0xf2c] sm:$0xf]  ;;  %v17039_v28 = vld [vmem:[#allocation13 + $0xf44] sm:$0xf0]  ;;  %v11497_v38 = vadd.f32 %v20453_v13, %v11484_v53  ;;  %v19038_v10 = vld [vmem:[#allocation13 + $0x8d4] sm:$0xf] }
 0x67f   :  { %11778 = vmatpush.bf16.msrb.mxu3 %v16510_v55  ;;  %11736 = vmatpush.bf16.msra.mxu0 %v15922_v34  ;;  %v16339_v55 = vld [vmem:[#allocation13 + $0x9cc] sm:$0xf0]  ;;  %v16283_v34 = vld [vmem:[#allocation13 + $0x95c] sm:$0xf0] }
 0x680   :  { %11716 = vmatmul.bf16.vlgmr.msra.gmra.mxu2 %v20184_v8  ;;  %v16286_v5 = vor.u32 %v19052_v36, %v16283_v34  ;;  %v16227_v1 = vld [vmem:[#allocation13 + $0x8ec] sm:$0xf0] }
 0x681   :  { %11760 = vmatpush.bf16.msrb.mxu2 %v16426_v61  ;;  %v16342_v61 = vor.u32 %v19066_v26, %v16339_v55  ;;  %v19234_v55 = vld [vmem:[#allocation13 + $0xef4] sm:$0xf]  ;;  %v16230_v3 = vor.u32 %v19038_v10, %v16227_v1 }
 0x682   :  { %11751 = vmatpush.bf16.msra.mxu1 %v16090_v40  ;;  %v16006_v40 = vor.u32 %v18982_v19, %v16003_v18  ;;  %v18926_v19 = vld [vmem:[#allocation13 + $0x554] sm:$0xf]  ;;  %v15779_v18 = vld [vmem:[#allocation13 + $0x56c] sm:$0xf0] }
 0x683   :  { %11779 = vmatpush.bf16.msrb.mxu3 %v16482_v31  ;;  %11737 = vmatpush.bf16.msra.mxu0 %v15894_v35  ;;  %v16311_v31 = vld [vmem:[#allocation13 + $0x994] sm:$0xf0]  ;;  %v11509_v57 = vpop.f32.mrf.mxu2  ;;  %v15782_v51 = vor.u32 %v18926_v19, %v15779_v18  ;;  %v17263_v19 = vld [vmem:[#allocation13 + $0x1104] sm:$0xf0]  ;;  %v19290_v1 = vld [vmem:[#allocation13 + $0x10b4] sm:$0xf] }
 0x684   :  { %v16314_v16 = vor.u32 %v19059_v43, %v16311_v31  ;;  %v11510_v35 = vadd.f32 %v11509_v57, %v11497_v38  ;;  %v17406_v31 = vor.u32 %v19332_v15, %v17403_v20 }
 0x685   :  { %11761 = vmatpush.bf16.msrb.mxu2 %v16398_v27  ;;  %v17070_v27 = vor.u32 %v19248_v37, %v17067_v58 }
 0x686   :  { %11752 = vmatpush.bf16.msra.mxu1 %v16062_v4  ;;  %v15838_v4 = vor.u32 %v18940_v32, %v15835_v59  ;;  %v11523_v13 = vadd.f32 %v20455_v33, %v11510_v35  ;;  %v17319_v32 = vld [vmem:[#allocation13 + $0x1174] sm:$0xf0]  ;;  %v19192_v33 = vld [vmem:[#allocation13 + $0xda4] sm:$0xf]  ;;  %v17375_v59 = vld [vmem:[#allocation13 + $0x11e4] sm:$0xf0] }
 0x687   :  { %11780 = vmatpush.bf16.msrb.mxu3 %v16454_v12  ;;  %11738 = vmatpush.bf16.msra.mxu0 %v15866_v45  ;;  %v18933_v12 = vld [vmem:[#allocation13 + $0x58c] sm:$0xf]  ;;  %v16983_v45 = vld [vmem:[#allocation13 + $0xed4] sm:$0xf0]  ;;  %v16846_v36 = vor.u32 %v19192_v33, %v16843_v7  ;;  %v19178_v35 = vld [vmem:[#allocation13 + $0xd34] sm:$0xf] }
 0x688   :  { %v15810_v9 = vor.u32 %v18933_v12, %v15807_v52  ;;  %12036 = vst [vmem:[%s20564_s11 + $0x18] sm:$0xff] %v11523_v13  ;;  %v19304_v12 = vld [vmem:[#allocation13 + $0x1124] sm:$0xf]  ;;  %v19185_v52 = vld [vmem:[#allocation13 + $0xd6c] sm:$0xf] }
 0x689   :  { %11762 = vmatpush.bf16.msrb.mxu2 %v16370_v0  ;;  %v16255_v0 = vld [vmem:[#allocation13 + $0x924] sm:$0xf0]  ;;  %v19206_v13 = vld [vmem:[#allocation13 + $0xe14] sm:$0xf]  ;;  %v20477_v33 = vld [vmem:[#allocation15] sm:$0xff] }
 0x68a   :  { %11753 = vmatpush.bf16.msra.mxu1 %v16034_v29  ;;  %11781 = vmatmul.bf16.vlgmr.msrb.gmra.mxu3 %v20223_v24  ;;  %v17042_v29 = vor.u32 %v19241_v47, %v17039_v28  ;;  %v16258_v42 = vor.u32 %v19045_v17, %v16255_v0  ;;  %v16815_v47 = vld [vmem:[#allocation13 + $0xd84] sm:$0xf0]  ;;  %v19318_v28 = vld [vmem:[#allocation13 + $0x1194] sm:$0xf]  ;;  %v19213_v17 = vld [vmem:[#allocation13 + $0xe4c] sm:$0xf] }
 0x68b   :  { %11825 = vmatpush.bf16.msra.mxu3 %v17546_v56  ;;  %v19339_v56 = vld [vmem:[#allocation13 + $0x123c] sm:$0xf]  ;;  %11739 = vmatpush.bf16.msra.mxu0 %v15838_v4  ;;  %v11511_v44 = vpop.f32.mrf.mxu2  ;;  %v19220_v4 = vld [vmem:[#allocation13 + $0xe84] sm:$0xf]  ;;  %v16818_v57 = vor.u32 %v19185_v52, %v16815_v47  ;;  %v19297_v0 = vld [vmem:[#allocation13 + $0x10ec] sm:$0xf] }
 0x68c   :  { %v17434_v26 = vor.u32 %v19339_v56, %v17431_v48  ;;  %v17347_v56 = vld [vmem:[#allocation13 + $0x11ac] sm:$0xf0]  ;;  %v15533_v48 = vld [vmem:[#allocation13 + $0x360] sm:$0xf]  ;;  %v17266_v20 = vor.u32 %v19297_v0, %v17263_v19  ;;  %v7096_v7 = vperm.slane %v20477_v33, 4 }
 0x68d   :  { %11763 = vmatpush.bf16.msrb.mxu2 %v16342_v61  ;;  %v19227_v61 = vld [vmem:[#allocation13 + $0xebc] sm:$0xf]  ;;  %v20473_v58 = vpop.f32.mrf.mxu3  ;;  %v15534_v18 = vor.u32 %v18867_v14, %v15533_v48  ;;  %v15449_v52 = vld [vmem:[#allocation13 + $0x2b8] sm:$0xf]  ;;  %v18846_v47 = vld [vmem:[#allocation13 + $0x2d0] sm:$0xf0] }
 0x68e   :  { %11754 = vmatpush.bf16.msra.mxu1 %v16006_v40  ;;  %v17014_v40 = vor.u32 %v19234_v55, %v17011_v6  ;;  %v20471_v37 = vpop.f32.mrf.mxu1  ;;  %v16986_v53 = vor.u32 %v19227_v61, %v16983_v45  ;;  %v16759_v45 = vld [vmem:[#allocation13 + $0xd14] sm:$0xf0]  ;;  %v17935_v0 = vld [vmem:[#allocation13 + $0x1644] sm:$0xf0]  ;;  %v15421_v19 = vld [vmem:[#allocation13 + $0x280] sm:$0xf] }
 0x68f   :  { %11826 = vmatpush.bf16.msra.mxu3 %v17518_v62  ;;  %v16871_v62 = vld [vmem:[#allocation13 + $0xdf4] sm:$0xf0]  ;;  %11740 = vmatpush.bf16.msra.mxu0 %v15810_v9  ;;  %v17350_v9 = vor.u32 %v19318_v28, %v17347_v56 }
 0x690   :  { %v16874_v43 = vor.u32 %v19199_v39, %v16871_v62  ;;  %v15505_v39 = vld [vmem:[#allocation13 + $0x328] sm:$0xf]  ;;  %v18860_v62 = vld [vmem:[#allocation13 + $0x340] sm:$0xf0] }
 0x691   :  { %11755 = vmatmul.bf16.vlgmr.msra.gmra.mxu1 %v20179_v46  ;;  %11764 = vmatpush.bf16.msrb.mxu2 %v16314_v16  ;;  %v15506_v61 = vor.u32 %v18860_v62, %v15505_v39 }
 0x692   :  { %11799 = vmatpush.bf16.msrb.mxu1 %v17098_v21  ;;  %v19311_v21 = vld [vmem:[#allocation13 + $0x115c] sm:$0xf] }
 0x693   :  { %11827 = vmatpush.bf16.msra.mxu3 %v17490_v41  ;;  %v19325_v41 = vld [vmem:[#allocation13 + $0x11cc] sm:$0xf]  ;;  %11741 = vmatpush.bf16.msra.mxu0 %v15782_v51  ;;  %v17322_v16 = vor.u32 %v19311_v21, %v17319_v32  ;;  %v17235_v51 = vld [vmem:[#allocation13 + $0x10cc] sm:$0xf0]  ;;  %v19479_v21 = vld [vmem:[#allocation13 + $0x169c] sm:$0xf] }
 0x694   :  { %v17378_v34 = vor.u32 %v19325_v41, %v17375_v59  ;;  %v18853_v32 = vld [vmem:[#allocation13 + $0x308] sm:$0xf0]  ;;  %v11535_v41 = vpop.f32.mrf.mxu0 }
 0x695   :  { %11765 = vmatpush.bf16.msrb.mxu2 %v16286_v5  ;;  %v11576_v6 = vpop.f32.mrf.mxu3  ;;  %v11536_v28 = vadd.f32 %v11535_v41, %v7096_v7 }
 0x696   :  { %11800 = vmatpush.bf16.msrb.mxu1 %v17070_v27  ;;  %v16955_v27 = vld [vmem:[#allocation13 + $0xe9c] sm:$0xf0]  ;;  %11742 = vmatmul.bf16.vlgmr.msra.gmra.mxu0 %v20177_v2  ;;  %v11550_v55 = vpop.f32.mrf.mxu1  ;;  %v19269_v6 = vld [vmem:[#allocation13 + $0x100c] sm:$0xf] }
 0x697   :  { %11828 = vmatpush.bf16.msra.mxu3 %v17462_v54  ;;  %11786 = vmatpush.bf16.msrb.mxu0 %v16874_v43  ;;  %v17291_v54 = vld [vmem:[#allocation13 + $0x113c] sm:$0xf0]  ;;  %v16958_v38 = vor.u32 %v19220_v4, %v16955_v27  ;;  %v17991_v43 = vld [vmem:[#allocation13 + $0x16b4] sm:$0xf0]  ;;  %v19164_v27 = vld [vmem:[#allocation13 + $0xcc4] sm:$0xf] }
 0x698   :  { %v17294_v5 = vor.u32 %v19304_v12, %v17291_v54  ;;  %v17207_v4 = vld [vmem:[#allocation13 + $0x1094] sm:$0xf0]  ;;  %v19472_v12 = vld [vmem:[#allocation13 + $0x1664] sm:$0xf]  ;;  %v17963_v54 = vld [vmem:[#allocation13 + $0x167c] sm:$0xf0] }
 0x699   :  { %11766 = vmatpush.bf16.msrb.mxu2 %v16258_v42  ;;  %v16899_v42 = vld [vmem:[#allocation13 + $0xe2c] sm:$0xf0]  ;;  %v17966_v14 = vor.u32 %v19472_v12, %v17963_v54  ;;  %v18825_v54 = vld [vmem:[#allocation13 + $0x228] sm:$0xf0] }
 0x69a   :  { %11801 = vmatpush.bf16.msrb.mxu1 %v17042_v29  ;;  %v16927_v29 = vld [vmem:[#allocation13 + $0xe64] sm:$0xf0]  ;;  %v16902_v59 = vor.u32 %v19206_v13, %v16899_v42  ;;  %v19150_v13 = vld [vmem:[#allocation13 + $0xc54] sm:$0xf]  ;;  %v16675_v42 = vld [vmem:[#allocation13 + $0xc6c] sm:$0xf0] }
 0x69b   :  { %11829 = vmatpush.bf16.msra.mxu3 %v17434_v26  ;;  %11787 = vmatpush.bf16.msrb.mxu0 %v16846_v36  ;;  %v16787_v26 = vld [vmem:[#allocation13 + $0xd4c] sm:$0xf0]  ;;  %v16930_v15 = vor.u32 %v19213_v17, %v16927_v29  ;;  %v19157_v17 = vld [vmem:[#allocation13 + $0xc8c] sm:$0xf]  ;;  %v16678_v7 = vor.u32 %v19150_v13, %v16675_v42 }
 0x69c   :  { %v16790_v10 = vor.u32 %v19178_v35, %v16787_v26  ;;  %v19465_v29 = vld [vmem:[#allocation13 + $0x162c] sm:$0xf]  ;;  %v11537_v35 = vpop.f32.mrf.mxu0  ;;  %v11549_v26 = vadd.f32 %v20471_v37, %v11536_v28  ;;  %v15365_v12 = vld [vmem:[#allocation13 + $0x210] sm:$0xf] }
 0x69d   :  { %11767 = vmatpush.bf16.msrb.mxu2 %v16230_v3  ;;  %v17238_v3 = vor.u32 %v19290_v1, %v17235_v51  ;;  %v19458_v51 = vld [vmem:[#allocation13 + $0x15f4] sm:$0xf]  ;;  %v16429_v35 = vld [vmem:[#allocation13 + $0xa60] sm:$0xf]  ;;  %v15253_v13 = vld [vmem:[#allocation13 + $0x130] sm:$0xf] }
 0x69e   :  { %11802 = vmatpush.bf16.msrb.mxu1 %v17014_v40  ;;  %v19171_v40 = vld [vmem:[#allocation13 + $0xcfc] sm:$0xf]  ;;  %v18797_v42 = vld [vmem:[#allocation13 + $0x148] sm:$0xf0] }
 0x69f   :  { %11830 = vmatpush.bf16.msra.mxu3 %v17406_v31  ;;  %11788 = vmatpush.bf16.msrb.mxu0 %v16818_v57  ;;  %v15477_v31 = vld [vmem:[#allocation13 + $0x2f0] sm:$0xf]  ;;  %v16762_v44 = vor.u32 %v19171_v40, %v16759_v45  ;;  %v15450_v57 = vor.u32 %v18846_v47, %v15449_v52  ;;  %v17767_v45 = vld [vmem:[#allocation13 + $0x14f4] sm:$0xf0] }
 0x6a0   :  { %11768 = vmatmul.bf16.vlgmr.msrb.gmra.mxu2 %v20211_v25  ;;  %v15478_v36 = vor.u32 %v18853_v32, %v15477_v31  ;;  %v17907_v40 = vld [vmem:[#allocation13 + $0x160c] sm:$0xf0]  ;;  %v19262_v31 = vld [vmem:[#allocation13 + $0xfd4] sm:$0xf] }
 0x6a1   :  { %11812 = vmatpush.bf16.msra.mxu2 %v17322_v16  ;;  %v19283_v16 = vld [vmem:[#allocation13 + $0x107c] sm:$0xf]  ;;  %v17910_v41 = vor.u32 %v19458_v51, %v17907_v40  ;;  %v17683_v51 = vld [vmem:[#allocation13 + $0x144c] sm:$0xf0] }
 0x6a2   :  { %11803 = vmatpush.bf16.msrb.mxu1 %v16986_v53  ;;  %v17994_v53 = vor.u32 %v19479_v21, %v17991_v43  ;;  %v17210_v56 = vor.u32 %v19283_v16, %v17207_v4  ;;  %v15393_v21 = vld [vmem:[#allocation13 + $0x248] sm:$0xf]  ;;  %v18832_v43 = vld [vmem:[#allocation13 + $0x260] sm:$0xf0]  ;;  %v15309_v4 = vld [vmem:[#allocation13 + $0x1a0] sm:$0xf] }
 0x6a3   :  { %11831 = vmatpush.bf16.msra.mxu3 %v17378_v34  ;;  %11789 = vmatpush.bf16.msrb.mxu0 %v16790_v10  ;;  %v16731_v34 = vld [vmem:[#allocation13 + $0xcdc] sm:$0xf0]  ;;  %v11561_v39 = vpop.f32.mrf.mxu2  ;;  %v15394_v16 = vor.u32 %v18832_v43, %v15393_v21  ;;  %v19084_v21 = vld [vmem:[#allocation13 + $0xa40] sm:$0xf0] }
 0x6a4   :  { %v16734_v48 = vor.u32 %v19164_v27, %v16731_v34  ;;  %v11562_v10 = vadd.f32 %v11561_v39, %v11549_v26  ;;  %v18811_v27 = vld [vmem:[#allocation13 + $0x1b8] sm:$0xf0]  ;;  %v17739_v34 = vld [vmem:[#allocation13 + $0x14bc] sm:$0xf0]  ;;  %v19437_v39 = vld [vmem:[#allocation13 + $0x154c] sm:$0xf] }
 0x6a5   :  { %11813 = vmatpush.bf16.msra.mxu2 %v17294_v5  ;;  %v17179_v5 = vld [vmem:[#allocation13 + $0x105c] sm:$0xf0]  ;;  %v19091_v26 = vld [vmem:[#allocation13 + $0xa78] sm:$0xf0] }
 0x6a6   :  { %11804 = vmatpush.bf16.msrb.mxu1 %v16958_v38  ;;  %v19276_v38 = vld [vmem:[#allocation13 + $0x1044] sm:$0xf]  ;;  %v20484_v32 = vadd.f32 %v20473_v58, %v11562_v10  ;;  %v16430_v10 = vor.u32 %v19091_v26, %v16429_v35 }
 0x6a7   :  { %11832 = vmatpush.bf16.msra.mxu3 %v17350_v9  ;;  %11790 = vmatpush.bf16.msrb.mxu0 %v16762_v44  ;;  %v16703_v9 = vld [vmem:[#allocation13 + $0xca4] sm:$0xf0]  ;;  %v17182_v55 = vor.u32 %v19276_v38, %v17179_v5  ;;  %v17879_v44 = vld [vmem:[#allocation13 + $0x15d4] sm:$0xf0]  ;;  %v17851_v38 = vld [vmem:[#allocation13 + $0x159c] sm:$0xf0] }
 0x6a8   :  { %v16706_v62 = vor.u32 %v19157_v17, %v16703_v9  ;;  %v15366_v17 = vor.u32 %v18825_v54, %v15365_v12  ;;  %v18804_v9 = vld [vmem:[#allocation13 + $0x180] sm:$0xf0] }
 0x6a9   :  { %11814 = vmatpush.bf16.msra.mxu2 %v17266_v20  ;;  %v17151_v20 = vld [vmem:[#allocation13 + $0x1024] sm:$0xf0]  ;;  %v18776_v26 = vld [vmem:[#allocation13 + $0xa0] sm:$0xf0] }
 0x6aa   :  { %11805 = vmatpush.bf16.msrb.mxu1 %v16930_v15  ;;  %11833 = vmatmul.bf16.vlgmr.msra.gmra.mxu3 %v20250_v49  ;;  %v17938_v15 = vor.u32 %v19465_v29, %v17935_v0  ;;  %v17154_v37 = vor.u32 %v19269_v6, %v17151_v20  ;;  %v19409_v29 = vld [vmem:[#allocation13 + $0x146c] sm:$0xf]  ;;  %v17711_v0 = vld [vmem:[#allocation13 + $0x1484] sm:$0xf0] }
 0x6ab   :  { %11877 = vmatpush.bf16.msrb.mxu3 %v15534_v18  ;;  %v18839_v18 = vld [vmem:[#allocation13 + $0x298] sm:$0xf0]  ;;  %11791 = vmatpush.bf16.msrb.mxu0 %v16734_v48  ;;  %v11563_v28 = vpop.f32.mrf.mxu2  ;;  %v15310_v48 = vor.u32 %v18811_v27, %v15309_v4  ;;  %v17823_v20 = vld [vmem:[#allocation13 + $0x1564] sm:$0xf0]  ;;  %v15981_v4 = vld [vmem:[#allocation13 + $0x6e0] sm:$0xf] }
 0x6ac   :  { %v15422_v1 = vor.u32 %v18839_v18, %v15421_v19  ;;  %v15337_v19 = vld [vmem:[#allocation13 + $0x1d8] sm:$0xf]  ;;  %v18818_v18 = vld [vmem:[#allocation13 + $0x1f0] sm:$0xf0]  ;;  %v17826_v43 = vor.u32 %v19437_v39, %v17823_v20  ;;  %v18979_v27 = vld [vmem:[#allocation13 + $0x6f8] sm:$0xf0] }
 0x6ad   :  { %11815 = vmatpush.bf16.msra.mxu2 %v17238_v3  ;;  %v19451_v3 = vld [vmem:[#allocation13 + $0x15bc] sm:$0xf]  ;;  %v20488_v58 = vpop.f32.mrf.mxu3  ;;  %v17599_v39 = vld [vmem:[#allocation13 + $0x13a4] sm:$0xf0]  ;;  %v16317_v20 = vld [vmem:[#allocation13 + $0x980] sm:$0xf] }
 0x6ae   :  { %11806 = vmatpush.bf16.msrb.mxu1 %v16902_v59  ;;  %v17123_v59 = vld [vmem:[#allocation13 + $0xfec] sm:$0xf0]  ;;  %v20486_v52 = vpop.f32.mrf.mxu1 }
 0x6af   :  { %11878 = vmatpush.bf16.msrb.mxu3 %v15506_v61  ;;  %v19423_v61 = vld [vmem:[#allocation13 + $0x14dc] sm:$0xf]  ;;  %11792 = vmatpush.bf16.msrb.mxu0 %v16706_v62  ;;  %v17126_v47 = vor.u32 %v19262_v31, %v17123_v59  ;;  %v17714_v62 = vor.u32 %v19409_v29, %v17711_v0  ;;  %v19430_v31 = vld [vmem:[#allocation13 + $0x1514] sm:$0xf]  ;;  %v15225_v59 = vld [vmem:[#allocation13 + $0xf8] sm:$0xf] }
 0x6b0   :  { %v16345_v29 = vld [vmem:[#allocation13 + $0x9b8] sm:$0xf]  ;;  %v19070_v0 = vld [vmem:[#allocation13 + $0x9d0] sm:$0xf0] }
 0x6b1   :  { %11807 = vmatmul.bf16.vlgmr.msrb.gmra.mxu1 %v20206_v11  ;;  %11816 = vmatpush.bf16.msra.mxu2 %v17210_v56  ;;  %v17882_v56 = vor.u32 %v19451_v3, %v17879_v44  ;;  %v18790_v3 = vld [vmem:[#allocation13 + $0x110] sm:$0xf0]  ;;  %v19395_v44 = vld [vmem:[#allocation13 + $0x13fc] sm:$0xf] }
 0x6b2   :  { %11851 = vmatpush.bf16.msra.mxu1 %v17994_v53  ;;  %v17770_v53 = vor.u32 %v19423_v61, %v17767_v45  ;;  %v16401_v45 = vld [vmem:[#allocation13 + $0xa28] sm:$0xf] }
 0x6b3   :  { %11879 = vmatpush.bf16.msrb.mxu3 %v15478_v36  ;;  %v19416_v36 = vld [vmem:[#allocation13 + $0x14a4] sm:$0xf]  ;;  %11793 = vmatpush.bf16.msrb.mxu0 %v16678_v7  ;;  %v17795_v7 = vld [vmem:[#allocation13 + $0x152c] sm:$0xf0]  ;;  %v20492_v12 = vpop.f32.mrf.mxu0 }
 0x6b4   :  { %v17742_v5 = vor.u32 %v19416_v36, %v17739_v34  ;;  %v16373_v36 = vld [vmem:[#allocation13 + $0x9f0] sm:$0xf]  ;;  %v19077_v34 = vld [vmem:[#allocation13 + $0xa08] sm:$0xf0]  ;;  %v17798_v54 = vor.u32 %v19430_v31, %v17795_v7  ;;  %v15897_v31 = vld [vmem:[#allocation13 + $0x638] sm:$0xf] }
 0x6b5   :  { %11817 = vmatpush.bf16.msra.mxu2 %v17182_v55  ;;  %v11628_v61 = vpop.f32.mrf.mxu3  ;;  %v18958_v7 = vld [vmem:[#allocation13 + $0x650] sm:$0xf0] }
 0x6b6   :  { %11852 = vmatpush.bf16.msra.mxu1 %v17966_v14  ;;  %v19444_v14 = vld [vmem:[#allocation13 + $0x1584] sm:$0xf]  ;;  %11794 = vmatmul.bf16.vlgmr.msrb.gmra.mxu0 %v20204_v63  ;;  %v11602_v40 = vpop.f32.mrf.mxu1 }
 0x6b7   :  { %11880 = vmatpush.bf16.msrb.mxu3 %v15450_v57  ;;  %11838 = vmatpush.bf16.msra.mxu0 %v17770_v53  ;;  %v15281_v57 = vld [vmem:[#allocation13 + $0x168] sm:$0xf]  ;;  %v17854_v55 = vor.u32 %v19444_v14, %v17851_v38  ;;  %v16402_v53 = vor.u32 %v19084_v21, %v16401_v45  ;;  %v18783_v14 = vld [vmem:[#allocation13 + $0xd8] sm:$0xf0]  ;;  %v19388_v38 = vld [vmem:[#allocation13 + $0x13c4] sm:$0xf] }
 0x6b8   :  { %v15282_v6 = vor.u32 %v18804_v9, %v15281_v57  ;;  %v15953_v57 = vld [vmem:[#allocation13 + $0x6a8] sm:$0xf]  ;;  %v18972_v9 = vld [vmem:[#allocation13 + $0x6c0] sm:$0xf0]  ;;  %v18769_v45 = vld [vmem:[#allocation13 + $0x68] sm:$0xf0] }
 0x6b9   :  { %11818 = vmatpush.bf16.msra.mxu2 %v17154_v37  ;;  %v15254_v37 = vor.u32 %v18797_v42, %v15253_v13  ;;  %v15954_v35 = vor.u32 %v18972_v9, %v15953_v57  ;;  %v19063_v13 = vld [vmem:[#allocation13 + $0x998] sm:$0xf0]  ;;  %v19374_v21 = vld [vmem:[#allocation13 + $0x1354] sm:$0xf] }
 0x6ba   :  { %11853 = vmatpush.bf16.msra.mxu1 %v17938_v15  ;;  %v15338_v15 = vor.u32 %v18818_v18, %v15337_v19 }
 0x6bb   :  { %11881 = vmatpush.bf16.msrb.mxu3 %v15422_v1  ;;  %11839 = vmatpush.bf16.msra.mxu0 %v17742_v5  ;;  %v19402_v1 = vld [vmem:[#allocation13 + $0x1434] sm:$0xf]  ;;  %v16374_v5 = vor.u32 %v19077_v34, %v16373_v36  ;;  %v11589_v42 = vpop.f32.mrf.mxu0  ;;  %v15869_v34 = vld [vmem:[#allocation13 + $0x600] sm:$0xf] }
 0x6bc   :  { %v18762_v36 = vld [vmem:[#allocation13 + $0x30] sm:$0xf0]  ;;  %v17325_v42 = vld [vmem:[#allocation13 + $0x1160] sm:$0xf] }
 0x6bd   :  { %11819 = vmatpush.bf16.msra.mxu2 %v17126_v47  ;;  %v15226_v47 = vor.u32 %v18790_v3, %v15225_v59  ;;  %v18923_v59 = vld [vmem:[#allocation13 + $0x538] sm:$0xf0]  ;;  %v16289_v3 = vld [vmem:[#allocation13 + $0x948] sm:$0xf] }
 0x6be   :  { %11854 = vmatpush.bf16.msra.mxu1 %v17910_v41  ;;  %v17686_v41 = vor.u32 %v19402_v1, %v17683_v51  ;;  %v15141_v1 = vld [vmem:[#allocation13 + $0x50] sm:$0xf] }
 0x6bf   :  { %11882 = vmatpush.bf16.msrb.mxu3 %v15394_v16  ;;  %11840 = vmatpush.bf16.msra.mxu0 %v17714_v62  ;;  %v17655_v16 = vld [vmem:[#allocation13 + $0x1414] sm:$0xf0]  ;;  %v15925_v62 = vld [vmem:[#allocation13 + $0x670] sm:$0xf] }
 0x6c0   :  { %11820 = vmatmul.bf16.vlgmr.msra.gmra.mxu2 %v20233_v30  ;;  %v17658_v28 = vor.u32 %v19395_v44, %v17655_v16  ;;  %v19056_v44 = vld [vmem:[#allocation13 + $0x960] sm:$0xf0]  ;;  %v15113_v16 = vld [vmem:[#allocation13 + $0x18] sm:$0xf] }
 0x6c1   :  { %11864 = vmatpush.bf16.msrb.mxu2 %v15310_v48  ;;  %v15197_v48 = vld [vmem:[#allocation13 + $0xc0] sm:$0xf] }
 0x6c2   :  { %11855 = vmatpush.bf16.msra.mxu1 %v17882_v56  ;;  %v15982_v56 = vor.u32 %v18979_v27, %v15981_v4  ;;  %v15198_v19 = vor.u32 %v18783_v14, %v15197_v48  ;;  %v15898_v27 = vor.u32 %v18958_v7, %v15897_v31  ;;  %v19035_v48 = vld [vmem:[#allocation13 + $0x8b8] sm:$0xf0]  ;;  %v15729_v14 = vld [vmem:[#allocation13 + $0x4e8] sm:$0xf]  ;;  %v19021_v31 = vld [vmem:[#allocation13 + $0x848] sm:$0xf0] }
 0x6c3   :  { %11883 = vmatpush.bf16.msrb.mxu3 %v15366_v17  ;;  %11841 = vmatpush.bf16.msra.mxu0 %v17686_v41  ;;  %v17627_v17 = vld [vmem:[#allocation13 + $0x13dc] sm:$0xf0]  ;;  %v20496_v51 = vpop.f32.mrf.mxu2 }
 0x6c4   :  { %v17630_v18 = vor.u32 %v19388_v38, %v17627_v17  ;;  %v15757_v41 = vld [vmem:[#allocation13 + $0x520] sm:$0xf]  ;;  %v18916_v38 = vld [vmem:[#allocation13 + $0x500] sm:$0xf0]  ;;  %v19049_v17 = vld [vmem:[#allocation13 + $0x928] sm:$0xf0] }
 0x6c5   :  { %11865 = vmatpush.bf16.msrb.mxu2 %v15282_v6  ;;  %v16346_v6 = vor.u32 %v19070_v0, %v16345_v29  ;;  %v15114_v29 = vor.u32 %v18762_v36, %v15113_v16  ;;  %v19308_v16 = vld [vmem:[#allocation13 + $0x1140] sm:$0xf0]  ;;  %v15785_v36 = vld [vmem:[#allocation13 + $0x558] sm:$0xf] }
 0x6c6   :  { %11856 = vmatpush.bf16.msra.mxu1 %v17854_v55  ;;  %v19381_v55 = vld [vmem:[#allocation13 + $0x138c] sm:$0xf] }
 0x6c7   :  { %11884 = vmatpush.bf16.msrb.mxu3 %v15338_v15  ;;  %11842 = vmatpush.bf16.msra.mxu0 %v17658_v28  ;;  %v18965_v15 = vld [vmem:[#allocation13 + $0x688] sm:$0xf0]  ;;  %v17602_v40 = vor.u32 %v19381_v55, %v17599_v39  ;;  %v16290_v28 = vor.u32 %v19056_v44, %v16289_v3  ;;  %v19028_v39 = vld [vmem:[#allocation13 + $0x880] sm:$0xf0] }
 0x6c8   :  { %v15926_v61 = vor.u32 %v18965_v15, %v15925_v62  ;;  %v15701_v62 = vld [vmem:[#allocation13 + $0x4b0] sm:$0xf]  ;;  %v18909_v15 = vld [vmem:[#allocation13 + $0x4c8] sm:$0xf0] }
 0x6c9   :  { %11866 = vmatpush.bf16.msrb.mxu2 %v15254_v37  ;;  %v16318_v37 = vor.u32 %v19063_v13, %v16317_v20  ;;  %v16233_v20 = vld [vmem:[#allocation13 + $0x8d8] sm:$0xf]  ;;  %v19042_v13 = vld [vmem:[#allocation13 + $0x8f0] sm:$0xf0] }
 0x6ca   :  { %11857 = vmatpush.bf16.msra.mxu1 %v17826_v43  ;;  %11885 = vmatmul.bf16.vlgmr.msrb.gmra.mxu3 %v20184_v8  ;;  %v15169_v8 = vld [vmem:[#allocation13 + $0x88] sm:$0xf]  ;;  %v17571_v43 = vld [vmem:[#allocation13 + $0x136c] sm:$0xf0] }
 0x6cb   :  { %11929 = vmatpush.bf16.msra.mxu3 %v16430_v10  ;;  %v15170_v10 = vor.u32 %v18776_v26, %v15169_v8  ;;  %11843 = vmatpush.bf16.msra.mxu0 %v17630_v18  ;;  %v17574_v4 = vor.u32 %v19374_v21, %v17571_v43  ;;  %v11615_v0 = vpop.f32.mrf.mxu2  ;;  %v18944_v8 = vld [vmem:[#allocation13 + $0x5e0] sm:$0xf0]  ;;  %v15730_v26 = vor.u32 %v18916_v38, %v15729_v14  ;;  %v18937_v43 = vld [vmem:[#allocation13 + $0x5a8] sm:$0xf0]  ;;  %v16877_v14 = vld [vmem:[#allocation13 + $0xde0] sm:$0xf] }
 0x6cc   :  { %v16234_v21 = vor.u32 %v19042_v13, %v16233_v20  ;;  %v19203_v38 = vld [vmem:[#allocation13 + $0xdf8] sm:$0xf0]  ;;  %v17241_v20 = vld [vmem:[#allocation13 + $0x10b8] sm:$0xf]  ;;  %v19294_v13 = vld [vmem:[#allocation13 + $0x10d0] sm:$0xf0] }
 0x6cd   :  { %11867 = vmatpush.bf16.msrb.mxu2 %v15226_v47  ;;  %v15758_v47 = vor.u32 %v18923_v59, %v15757_v41  ;;  %v20500_v9 = vpop.f32.mrf.mxu3  ;;  %v15673_v41 = vld [vmem:[#allocation13 + $0x478] sm:$0xf]  ;;  %v18902_v59 = vld [vmem:[#allocation13 + $0x490] sm:$0xf0] }
 0x6ce   :  { %11858 = vmatpush.bf16.msra.mxu1 %v17798_v54  ;;  %v18951_v54 = vld [vmem:[#allocation13 + $0x618] sm:$0xf0]  ;;  %v20498_v57 = vpop.f32.mrf.mxu1 }
 0x6cf   :  { %11930 = vmatpush.bf16.msra.mxu3 %v16402_v53  ;;  %v15142_v53 = vor.u32 %v18769_v45, %v15141_v1  ;;  %11844 = vmatpush.bf16.msra.mxu0 %v17602_v40  ;;  %v15702_v45 = vor.u32 %v18909_v15, %v15701_v62  ;;  %v16849_v62 = vld [vmem:[#allocation13 + $0xda8] sm:$0xf]  ;;  %v19196_v15 = vld [vmem:[#allocation13 + $0xdc0] sm:$0xf0] }
 0x6d1   :  { %11859 = vmatmul.bf16.vlgmr.msra.gmra.mxu1 %v20276_v23  ;;  %11868 = vmatpush.bf16.msrb.mxu2 %v15198_v19  ;;  %v15870_v19 = vor.u32 %v18951_v54, %v15869_v34  ;;  %v18930_v34 = vld [vmem:[#allocation13 + $0x570] sm:$0xf0]  ;;  %v15674_v54 = vor.u32 %v18902_v59, %v15673_v41  ;;  %v19287_v41 = vld [vmem:[#allocation13 + $0x1098] sm:$0xf0] }
 0x6d2   :  { %11903 = vmatpush.bf16.msrb.mxu1 %v15982_v56  ;;  %v16205_v56 = vld [vmem:[#allocation13 + $0x8a0] sm:$0xf]  ;;  %v15786_v0 = vor.u32 %v18930_v34, %v15785_v36 }
 0x6d3   :  { %11931 = vmatpush.bf16.msra.mxu3 %v16374_v5  ;;  %v16261_v5 = vld [vmem:[#allocation13 + $0x910] sm:$0xf]  ;;  %11845 = vmatpush.bf16.msra.mxu0 %v17574_v4  ;;  %v16206_v18 = vor.u32 %v19035_v48, %v16205_v56  ;;  %v15645_v56 = vld [vmem:[#allocation13 + $0x440] sm:$0xf]  ;;  %v18895_v48 = vld [vmem:[#allocation13 + $0x458] sm:$0xf0] }
 0x6d4   :  { %v16262_v55 = vor.u32 %v19049_v17, %v16261_v5  ;;  %v17269_v5 = vld [vmem:[#allocation13 + $0x10f0] sm:$0xf]  ;;  %v19301_v17 = vld [vmem:[#allocation13 + $0x1108] sm:$0xf0] }
 0x6d5   :  { %11869 = vmatpush.bf16.msrb.mxu2 %v15170_v10  ;;  %v19315_v10 = vld [vmem:[#allocation13 + $0x1178] sm:$0xf0]  ;;  %v11680_v44 = vpop.f32.mrf.mxu3 }
 0x6d6   :  { %11904 = vmatpush.bf16.msrb.mxu1 %v15954_v35  ;;  %v15841_v35 = vld [vmem:[#allocation13 + $0x5c8] sm:$0xf]  ;;  %11846 = vmatmul.bf16.vlgmr.msra.gmra.mxu0 %v20247_v22  ;;  %v17326_v7 = vor.u32 %v19315_v10, %v17325_v42  ;;  %v11654_v3 = vpop.f32.mrf.mxu1  ;;  %v16037_v44 = vld [vmem:[#allocation13 + $0x750] sm:$0xf] }
 0x6d7   :  { %11932 = vmatpush.bf16.msra.mxu3 %v16346_v6  ;;  %11890 = vmatpush.bf16.msrb.mxu0 %v15758_v47  ;;  %v16177_v6 = vld [vmem:[#allocation13 + $0x868] sm:$0xf]  ;;  %v15842_v1 = vor.u32 %v18944_v8, %v15841_v35  ;;  %v16121_v47 = vld [vmem:[#allocation13 + $0x7f8] sm:$0xf]  ;;  %v16878_v35 = vor.u32 %v19203_v38, %v16877_v14  ;;  %v16093_v8 = vld [vmem:[#allocation13 + $0x7c0] sm:$0xf] }
 0x6d8   :  { %v16178_v40 = vor.u32 %v19028_v39, %v16177_v6  ;;  %v17270_v6 = vor.u32 %v19301_v17, %v17269_v5  ;;  %v18888_v39 = vld [vmem:[#allocation13 + $0x420] sm:$0xf0]  ;;  %v16009_v38 = vld [vmem:[#allocation13 + $0x718] sm:$0xf] }
 0x6d9   :  { %11870 = vmatpush.bf16.msrb.mxu2 %v15142_v53  ;;  %v17297_v53 = vld [vmem:[#allocation13 + $0x1128] sm:$0xf] }
 0x6da   :  { %11905 = vmatpush.bf16.msrb.mxu1 %v15926_v61  ;;  %v15813_v61 = vld [vmem:[#allocation13 + $0x590] sm:$0xf] }
 0x6db   :  { %11933 = vmatpush.bf16.msra.mxu3 %v16318_v37  ;;  %11891 = vmatpush.bf16.msrb.mxu0 %v15730_v26  ;;  %v16149_v37 = vld [vmem:[#allocation13 + $0x830] sm:$0xf]  ;;  %v15814_v4 = vor.u32 %v18937_v43, %v15813_v61  ;;  %v19007_v26 = vld [vmem:[#allocation13 + $0x7d8] sm:$0xf0]  ;;  %v18881_v43 = vld [vmem:[#allocation13 + $0x3e8] sm:$0xf0] }
 0x6dc   :  { %v16094_v42 = vor.u32 %v19007_v26, %v16093_v8  ;;  %v15589_v61 = vld [vmem:[#allocation13 + $0x3d0] sm:$0xf]  ;;  %v17101_v8 = vld [vmem:[#allocation13 + $0xfa0] sm:$0xf]  ;;  %v19259_v26 = vld [vmem:[#allocation13 + $0xfb8] sm:$0xf0] }
 0x6dd   :  { %11871 = vmatpush.bf16.msrb.mxu2 %v15114_v29  ;;  %v20504_v29 = vpop.f32.mrf.mxu0 }
 0x6de   :  { %11906 = vmatpush.bf16.msrb.mxu1 %v15898_v27  ;;  %v16150_v27 = vor.u32 %v19021_v31, %v16149_v37  ;;  %v16821_v37 = vld [vmem:[#allocation13 + $0xd70] sm:$0xf]  ;;  %v19189_v31 = vld [vmem:[#allocation13 + $0xd88] sm:$0xf0] }
 0x6df   :  { %11934 = vmatpush.bf16.msra.mxu3 %v16290_v28  ;;  %11892 = vmatpush.bf16.msrb.mxu0 %v15702_v45  ;;  %v19014_v28 = vld [vmem:[#allocation13 + $0x810] sm:$0xf0]  ;;  %v11588_v45 = vadd.f32 %v20492_v12, %v20484_v32  ;;  %v18993_v32 = vld [vmem:[#allocation13 + $0x768] sm:$0xf0]  ;;  %v15561_v12 = vld [vmem:[#allocation13 + $0x398] sm:$0xf] }
 0x6e0   :  { %11872 = vmatmul.bf16.vlgmr.msrb.gmra.mxu2 %v20159_v50  ;;  %v17298_v50 = vor.u32 %v19308_v16, %v17297_v53  ;;  %v15590_v16 = vor.u32 %v18881_v43, %v15589_v61  ;;  %v16038_v14 = vor.u32 %v18993_v32, %v16037_v44  ;;  %v19252_v43 = vld [vmem:[#allocation13 + $0xf80] sm:$0xf0]  ;;  %v16709_v44 = vld [vmem:[#allocation13 + $0xc90] sm:$0xf]  ;;  %v19161_v32 = vld [vmem:[#allocation13 + $0xca8] sm:$0xf0] }
 0x6e1   :  { %11916 = vmatpush.bf16.msra.mxu2 %v16206_v18  ;;  %v15646_v18 = vor.u32 %v18895_v48, %v15645_v56  ;;  %v11601_v36 = vadd.f32 %v20486_v52, %v11588_v45  ;;  %v17185_v56 = vld [vmem:[#allocation13 + $0x1048] sm:$0xf]  ;;  %v19175_v52 = vld [vmem:[#allocation13 + $0xd18] sm:$0xf0] }
 0x6e2   :  { %11907 = vmatpush.bf16.msrb.mxu1 %v15870_v19  ;;  %v16122_v19 = vor.u32 %v19014_v28, %v16121_v47  ;;  %v16653_v47 = vld [vmem:[#allocation13 + $0xc20] sm:$0xf]  ;;  %v19147_v28 = vld [vmem:[#allocation13 + $0xc38] sm:$0xf0] }
 0x6e3   :  { %11935 = vmatpush.bf16.msra.mxu3 %v16262_v55  ;;  %11893 = vmatpush.bf16.msrb.mxu0 %v15674_v54  ;;  %v15617_v55 = vld [vmem:[#allocation13 + $0x408] sm:$0xf]  ;;  %v20510_v53 = vpop.f32.mrf.mxu2  ;;  %v19182_v54 = vld [vmem:[#allocation13 + $0xd50] sm:$0xf0]  ;;  %v11614_v48 = vadd.f32 %v20496_v51, %v11601_v36  ;;  %v16569_v36 = vld [vmem:[#allocation13 + $0xb78] sm:$0xf] }
 0x6e4   :  { %v15618_v10 = vor.u32 %v18888_v39, %v15617_v55  ;;  %v16625_v55 = vld [vmem:[#allocation13 + $0xbe8] sm:$0xf]  ;;  %v17157_v39 = vld [vmem:[#allocation13 + $0x1010] sm:$0xf] }
 0x6e5   :  { %11917 = vmatpush.bf16.msra.mxu2 %v16178_v40  ;;  %v19000_v40 = vld [vmem:[#allocation13 + $0x7a0] sm:$0xf0]  ;;  %v11641_v59 = vpop.f32.mrf.mxu0  ;;  %v11627_v51 = vadd.f32 %v20488_v58, %v11614_v48  ;;  %v17073_v58 = vld [vmem:[#allocation13 + $0xf68] sm:$0xf]  ;;  %v17017_v48 = vld [vmem:[#allocation13 + $0xef8] sm:$0xf] }
 0x6e6   :  { %11908 = vmatpush.bf16.msrb.mxu1 %v15842_v1  ;;  %v16850_v1 = vor.u32 %v19196_v15, %v16849_v62  ;;  %v19273_v62 = vld [vmem:[#allocation13 + $0x1028] sm:$0xf0] }
 0x6e7   :  { %11936 = vmatpush.bf16.msra.mxu3 %v16234_v21  ;;  %11894 = vmatpush.bf16.msrb.mxu0 %v15646_v18  ;;  %v17242_v21 = vor.u32 %v19294_v13, %v17241_v20  ;;  %v16654_v18 = vor.u32 %v19147_v28, %v16653_v47  ;;  %v11640_v61 = vadd.f32 %v20504_v29, %v11627_v51  ;;  %v19420_v51 = vld [vmem:[#allocation13 + $0x14c0] sm:$0xf0] }
 0x6e8   :  { %v16710_v47 = vor.u32 %v19161_v32, %v16709_v44  ;;  %v19098_v44 = vld [vmem:[#allocation13 + $0xab0] sm:$0xf0]  ;;  %v19371_v32 = vld [vmem:[#allocation13 + $0x1338] sm:$0xf0] }
 0x6e9   :  { %11918 = vmatpush.bf16.msra.mxu2 %v16150_v27  ;;  %v18874_v27 = vld [vmem:[#allocation13 + $0x3b0] sm:$0xf0]  ;;  %v11653_v29 = vadd.f32 %v20498_v57, %v11640_v61  ;;  %v16681_v57 = vld [vmem:[#allocation13 + $0xc58] sm:$0xf]  ;;  %v17717_v61 = vld [vmem:[#allocation13 + $0x1470] sm:$0xf] }
 0x6ea   :  { %11909 = vmatpush.bf16.msrb.mxu1 %v15814_v4  ;;  %11937 = vmatmul.bf16.vlgmr.msra.gmra.mxu3 %v20211_v25  ;;  %v16065_v25 = vld [vmem:[#allocation13 + $0x788] sm:$0xf]  ;;  %v16822_v4 = vor.u32 %v19189_v31, %v16821_v37  ;;  %v15562_v5 = vor.u32 %v18874_v27, %v15561_v12  ;;  %v16597_v37 = vld [vmem:[#allocation13 + $0xbb0] sm:$0xf]  ;;  %v19133_v31 = vld [vmem:[#allocation13 + $0xbc8] sm:$0xf0] }
 0x6eb   :  { %11981 = vmatpush.bf16.msrb.mxu3 %v17326_v7  ;;  %v17213_v7 = vld [vmem:[#allocation13 + $0x1080] sm:$0xf]  ;;  %v16066_v3 = vor.u32 %v19000_v40, %v16065_v25  ;;  %11895 = vmatpush.bf16.msrb.mxu0 %v15618_v10  ;;  %v16737_v25 = vld [vmem:[#allocation13 + $0xcc8] sm:$0xf]  ;;  %v19168_v40 = vld [vmem:[#allocation13 + $0xce0] sm:$0xf0] }
 0x6ec   :  { %v17214_v34 = vor.u32 %v19287_v41, %v17213_v7  ;;  %v17129_v7 = vld [vmem:[#allocation13 + $0xfd8] sm:$0xf]  ;;  %v19266_v41 = vld [vmem:[#allocation13 + $0xff0] sm:$0xf0]  ;;  %v16738_v59 = vor.u32 %v19168_v40, %v16737_v25  ;;  %v17045_v12 = vld [vmem:[#allocation13 + $0xf30] sm:$0xf] }
 0x6ed   :  { %11919 = vmatpush.bf16.msra.mxu2 %v16122_v19  ;;  %v16765_v19 = vld [vmem:[#allocation13 + $0xd00] sm:$0xf]  ;;  %v20517_v20 = vpop.f32.mrf.mxu3  ;;  %v19245_v27 = vld [vmem:[#allocation13 + $0xf48] sm:$0xf0]  ;;  %v16485_v25 = vld [vmem:[#allocation13 + $0xad0] sm:$0xf] }
 0x6ee   :  { %11910 = vmatpush.bf16.msrb.mxu1 %v15786_v0  ;;  %v18986_v0 = vld [vmem:[#allocation13 + $0x730] sm:$0xf0]  ;;  %v20515_v15 = vpop.f32.mrf.mxu1  ;;  %v16766_v10 = vor.u32 %v19175_v52, %v16765_v19  ;;  %v17046_v28 = vor.u32 %v19245_v27, %v17045_v12  ;;  %v19105_v40 = vld [vmem:[#allocation13 + $0xae8] sm:$0xf0] }
 0x6ef   :  { %11982 = vmatpush.bf16.msrb.mxu3 %v17298_v50  ;;  %v19280_v50 = vld [vmem:[#allocation13 + $0x1060] sm:$0xf0]  ;;  %11896 = vmatpush.bf16.msrb.mxu0 %v15590_v16  ;;  %v16010_v13 = vor.u32 %v18986_v0, %v16009_v38  ;;  %v16598_v16 = vor.u32 %v19133_v31, %v16597_v37  ;;  %v16541_v38 = vld [vmem:[#allocation13 + $0xb40] sm:$0xf]  ;;  %v16486_v37 = vor.u32 %v19105_v40, %v16485_v25  ;;  %v19378_v25 = vld [vmem:[#allocation13 + $0x1370] sm:$0xf0] }
 0x6f0   :  { %v17913_v40 = vld [vmem:[#allocation13 + $0x15f8] sm:$0xf] }
 0x6f1   :  { %11911 = vmatmul.bf16.vlgmr.msrb.gmra.mxu1 %v20177_v2  ;;  %11920 = vmatpush.bf16.msra.mxu2 %v16094_v42  ;;  %v16793_v2 = vld [vmem:[#allocation13 + $0xd38] sm:$0xf]  ;;  %v11667_v42 = vpop.f32.mrf.mxu2 }
 0x6f2   :  { %11955 = vmatpush.bf16.msra.mxu1 %v16878_v35  ;;  %v16794_v17 = vor.u32 %v19182_v54, %v16793_v2  ;;  %v17186_v35 = vor.u32 %v19280_v50, %v17185_v56  ;;  %v19154_v56 = vld [vmem:[#allocation13 + $0xc70] sm:$0xf0] }
 0x6f3   :  { %11983 = vmatpush.bf16.msrb.mxu3 %v17270_v6  ;;  %v19140_v6 = vld [vmem:[#allocation13 + $0xc00] sm:$0xf0]  ;;  %11897 = vmatpush.bf16.msrb.mxu0 %v15562_v5  ;;  %v19119_v5 = vld [vmem:[#allocation13 + $0xb58] sm:$0xf0]  ;;  %v16682_v19 = vor.u32 %v19154_v56, %v16681_v57  ;;  %v17521_v57 = vld [vmem:[#allocation13 + $0x12e8] sm:$0xf] }
 0x6f4   :  { %v16626_v45 = vor.u32 %v19140_v6, %v16625_v55  ;;  %v19231_v55 = vld [vmem:[#allocation13 + $0xed8] sm:$0xf0]  ;;  %v16513_v6 = vld [vmem:[#allocation13 + $0xb08] sm:$0xf]  ;;  %v19364_v56 = vld [vmem:[#allocation13 + $0x1300] sm:$0xf0] }
 0x6f5   :  { %11921 = vmatpush.bf16.msra.mxu2 %v16066_v3  ;;  %v17074_v3 = vor.u32 %v19252_v43, %v17073_v58  ;;  %v11732_v54 = vpop.f32.mrf.mxu3 }
 0x6f6   :  { %11956 = vmatpush.bf16.msra.mxu1 %v16850_v1  ;;  %v17102_v1 = vor.u32 %v19259_v26, %v17101_v8  ;;  %11898 = vmatmul.bf16.vlgmr.msrb.gmra.mxu0 %v20199_v60  ;;  %v11666_v60 = vadd.f32 %v20510_v53, %v11653_v29  ;;  %v11706_v2 = vpop.f32.mrf.mxu1  ;;  %v11691_v53 = vpop.f32.mrf.mxu0  ;;  %v16989_v26 = vld [vmem:[#allocation13 + $0xec0] sm:$0xf]  ;;  %v17689_v29 = vld [vmem:[#allocation13 + $0x1438] sm:$0xf]  ;;  %v19399_v54 = vld [vmem:[#allocation13 + $0x1418] sm:$0xf0] }
 0x6f7   :  { %11984 = vmatpush.bf16.msrb.mxu3 %v17242_v21  ;;  %11942 = vmatpush.bf16.msra.mxu0 %v16654_v18  ;;  %v17158_v21 = vor.u32 %v19273_v62, %v17157_v39  ;;  %v19112_v39 = vld [vmem:[#allocation13 + $0xb20] sm:$0xf0]  ;;  %v17745_v62 = vld [vmem:[#allocation13 + $0x14a8] sm:$0xf] }
 0x6f8   :  { %v11679_v0 = vadd.f32 %v20500_v9, %v11666_v60  ;;  %v7097_v9 = vperm.slane %v20477_v33, 5  ;;  %v17746_v42 = vor.u32 %v19420_v51, %v17745_v62  ;;  %v17661_v60 = vld [vmem:[#allocation13 + $0x1400] sm:$0xf]  ;;  %v19469_v62 = vld [vmem:[#allocation13 + $0x1648] sm:$0xf0] }
 0x6f9   :  { %11922 = vmatpush.bf16.msra.mxu2 %v16038_v14  ;;  %v19238_v14 = vld [vmem:[#allocation13 + $0xf10] sm:$0xf0]  ;;  %v17465_v51 = vld [vmem:[#allocation13 + $0x1278] sm:$0xf] }
 0x6fa   :  { %11957 = vmatpush.bf16.msra.mxu1 %v16822_v4  ;;  %v17130_v4 = vor.u32 %v19266_v41, %v17129_v7  ;;  %v17018_v52 = vor.u32 %v19238_v14, %v17017_v48  ;;  %v11692_v18 = vadd.f32 %v11691_v53, %v11679_v0  ;;  %v16933_v7 = vld [vmem:[#allocation13 + $0xe50] sm:$0xf]  ;;  %v19217_v41 = vld [vmem:[#allocation13 + $0xe68] sm:$0xf0]  ;;  %v19392_v0 = vld [vmem:[#allocation13 + $0x13e0] sm:$0xf0] }
 0x6fb   :  { %11985 = vmatpush.bf16.msrb.mxu3 %v17214_v34  ;;  %11943 = vmatpush.bf16.msra.mxu0 %v16626_v45  ;;  %v19126_v34 = vld [vmem:[#allocation13 + $0xb90] sm:$0xf0]  ;;  %v19413_v45 = vld [vmem:[#allocation13 + $0x1488] sm:$0xf0]  ;;  %v17969_v53 = vld [vmem:[#allocation13 + $0x1668] sm:$0xf] }
 0x6fc   :  { %v16570_v50 = vor.u32 %v19126_v34, %v16569_v36  ;;  %12037 = vst [vmem:[%s20564_s11 + $0x20] sm:$0xff] %v11692_v18  ;;  %v17718_v31 = vor.u32 %v19413_v45, %v17717_v61  ;;  %v16905_v36 = vld [vmem:[#allocation13 + $0xe18] sm:$0xf]  ;;  %v19210_v34 = vld [vmem:[#allocation13 + $0xe30] sm:$0xf0] }
 0x6fd   :  { %11923 = vmatpush.bf16.msra.mxu2 %v16010_v13  ;;  %v16990_v13 = vor.u32 %v19231_v55, %v16989_v26  ;;  %v19357_v18 = vld [vmem:[#allocation13 + $0x12c8] sm:$0xf0]  ;;  %v17605_v26 = vld [vmem:[#allocation13 + $0x1390] sm:$0xf]  ;;  %v19462_v61 = vld [vmem:[#allocation13 + $0x1610] sm:$0xf0] }
 0x6fe   :  { %11958 = vmatpush.bf16.msra.mxu1 %v16794_v17  ;;  %v19427_v17 = vld [vmem:[#allocation13 + $0x14f8] sm:$0xf0]  ;;  %v11693_v58 = vpop.f32.mrf.mxu0  ;;  %v17437_v45 = vld [vmem:[#allocation13 + $0x1240] sm:$0xf] }
 0x6ff   :  { %11986 = vmatpush.bf16.msrb.mxu3 %v17186_v35  ;;  %11944 = vmatpush.bf16.msra.mxu0 %v16598_v16  ;;  %v16542_v35 = vor.u32 %v19119_v5, %v16541_v38  ;;  %v19406_v16 = vld [vmem:[#allocation13 + $0x1450] sm:$0xf0]  ;;  %v17662_v38 = vor.u32 %v19399_v54, %v17661_v60  ;;  %v17353_v60 = vld [vmem:[#allocation13 + $0x1198] sm:$0xf] }
 0x700   :  { %11924 = vmatmul.bf16.vlgmr.msra.gmra.mxu2 %v20179_v46  ;;  %v17773_v46 = vld [vmem:[#allocation13 + $0x14e0] sm:$0xf]  ;;  %v17690_v27 = vor.u32 %v19406_v16, %v17689_v29  ;;  %v19448_v29 = vld [vmem:[#allocation13 + $0x15a0] sm:$0xf0]  ;;  %v17381_v16 = vld [vmem:[#allocation13 + $0x11d0] sm:$0xf] }
 0x701   :  { %11968 = vmatpush.bf16.msrb.mxu2 %v17102_v1  ;;  %v17774_v8 = vor.u32 %v19427_v17, %v17773_v46  ;;  %v19224_v1 = vld [vmem:[#allocation13 + $0xea0] sm:$0xf0]  ;;  %v17633_v46 = vld [vmem:[#allocation13 + $0x13c8] sm:$0xf]  ;;  %v17522_v17 = vor.u32 %v19364_v56, %v17521_v57  ;;  %v19434_v57 = vld [vmem:[#allocation13 + $0x1530] sm:$0xf0] }
 0x702   :  { %11959 = vmatpush.bf16.msra.mxu1 %v16766_v10  ;;  %v16961_v10 = vld [vmem:[#allocation13 + $0xe88] sm:$0xf] }
 0x703   :  { %11987 = vmatpush.bf16.msrb.mxu3 %v17158_v21  ;;  %11945 = vmatpush.bf16.msra.mxu0 %v16570_v50  ;;  %v11705_v21 = vadd.f32 %v20515_v15, %v7097_v9  ;;  %v16962_v33 = vor.u32 %v19224_v1, %v16961_v10  ;;  %v11717_v43 = vpop.f32.mrf.mxu2  ;;  %v19350_v9 = vld [vmem:[#allocation13 + $0x1290] sm:$0xf0]  ;;  %v17577_v10 = vld [vmem:[#allocation13 + $0x1358] sm:$0xf] }
 0x704   :  { %v17466_v1 = vor.u32 %v19350_v9, %v17465_v51 }
 0x705   :  { %11969 = vmatpush.bf16.msrb.mxu2 %v17074_v3  ;;  %v11718_v3 = vadd.f32 %v11717_v43, %v11705_v21  ;;  %v19343_v21 = vld [vmem:[#allocation13 + $0x1258] sm:$0xf0] }
 0x706   :  { %11960 = vmatpush.bf16.msra.mxu1 %v16738_v59  ;;  %v16457_v59 = vld [vmem:[#allocation13 + $0xa98] sm:$0xf]  ;;  %v17438_v43 = vor.u32 %v19343_v21, %v17437_v45 }
 0x707   :  { %11988 = vmatpush.bf16.msrb.mxu3 %v17130_v4  ;;  %11946 = vmatpush.bf16.msra.mxu0 %v16542_v35  ;;  %v17549_v4 = vld [vmem:[#allocation13 + $0x1320] sm:$0xf]  ;;  %v20533_v15 = vadd.f32 %v20517_v20, %v11718_v3  ;;  %v16458_v12 = vor.u32 %v19098_v44, %v16457_v59  ;;  %v16906_v20 = vor.u32 %v19210_v34, %v16905_v36  ;;  %v17857_v44 = vld [vmem:[#allocation13 + $0x1588] sm:$0xf]  ;;  %v17829_v36 = vld [vmem:[#allocation13 + $0x1550] sm:$0xf] }
 0x708   :  { %v17550_v2 = vor.u32 %v19371_v32, %v17549_v4  ;;  %v17634_v35 = vor.u32 %v19392_v0, %v17633_v46  ;;  %v19329_v4 = vld [vmem:[#allocation13 + $0x11e8] sm:$0xf0] }
 0x709   :  { %11970 = vmatpush.bf16.msrb.mxu2 %v17046_v28  ;;  %v19483_v28 = vld [vmem:[#allocation13 + $0x16b8] sm:$0xf0]  ;;  %v19441_v34 = vld [vmem:[#allocation13 + $0x1568] sm:$0xf0] }
 0x70a   :  { %11961 = vmatpush.bf16.msra.mxu1 %v16710_v47  ;;  %11989 = vmatmul.bf16.vlgmr.msrb.gmra.mxu3 %v20233_v30  ;;  %v16514_v30 = vor.u32 %v19112_v39, %v16513_v6  ;;  %v17997_v47 = vld [vmem:[#allocation13 + $0x16a0] sm:$0xf]  ;;  %v19385_v6 = vld [vmem:[#allocation13 + $0x13a8] sm:$0xf0]  ;;  %v17941_v39 = vld [vmem:[#allocation13 + $0x1630] sm:$0xf]  ;;  %v17830_v54 = vor.u32 %v19441_v34, %v17829_v36 }
 0x70b   :  { %v11719_v14 = vpop.f32.mrf.mxu2  ;;  %v17998_v5 = vor.u32 %v19483_v28, %v17997_v47  ;;  %v17801_v28 = vld [vmem:[#allocation13 + $0x1518] sm:$0xf] }
 0x70c   :  { %11947 = vmatpush.bf16.msra.mxu0 %v16514_v30 }
 0x70d   :  { %11971 = vmatpush.bf16.msrb.mxu2 %v17018_v52  ;;  %v20537_v48 = vpop.f32.mrf.mxu3  ;;  %v17493_v52 = vld [vmem:[#allocation13 + $0x12b0] sm:$0xf] }
 0x70e   :  { %11962 = vmatpush.bf16.msra.mxu1 %v16682_v19  ;;  %v20535_v50 = vpop.f32.mrf.mxu1  ;;  %v19476_v19 = vld [vmem:[#allocation13 + $0x1680] sm:$0xf0]  ;;  %v17494_v55 = vor.u32 %v19357_v18, %v17493_v52 }
 0x710   :  { %11948 = vmatpush.bf16.msra.mxu0 %v16486_v37  ;;  %v17885_v37 = vld [vmem:[#allocation13 + $0x15c0] sm:$0xf] }
 0x711   :  { %11963 = vmatmul.bf16.vlgmr.msra.gmra.mxu1 %v20204_v63  ;;  %11972 = vmatpush.bf16.msrb.mxu2 %v16990_v13  ;;  %v16934_v63 = vor.u32 %v19217_v41, %v16933_v7  ;;  %v17409_v7 = vld [vmem:[#allocation13 + $0x1208] sm:$0xf]  ;;  %v19336_v41 = vld [vmem:[#allocation13 + $0x1220] sm:$0xf0] }
 0x712   :  { %12007 = vmatpush.bf16.msrb.mxu1 %v17774_v8  ;;  %v17970_v8 = vor.u32 %v19476_v19, %v17969_v53  ;;  %v17410_v3 = vor.u32 %v19336_v41, %v17409_v7 }
 0x713   :  { %v11743_v58 = vpop.f32.mrf.mxu0 }
 0x714   :  { %11949 = vmatpush.bf16.msra.mxu0 %v16458_v12 }
 0x715   :  { %11973 = vmatpush.bf16.msrb.mxu2 %v16962_v33  ;;  %v11784_v30 = vpop.f32.mrf.mxu3  ;;  %v17914_v33 = vor.u32 %v19462_v61, %v17913_v40 }
 0x716   :  { %12008 = vmatpush.bf16.msrb.mxu1 %v17746_v42  ;;  %v11758_v13 = vpop.f32.mrf.mxu1  ;;  %v17942_v42 = vor.u32 %v19469_v62, %v17941_v39 }
 0x717   :  { %11950 = vmatmul.bf16.vlgmr.msra.gmra.mxu0 %v20223_v24  ;;  %v17606_v24 = vor.u32 %v19385_v6, %v17605_v26 }
 0x718   :  { %11994 = vmatpush.bf16.msrb.mxu0 %v17550_v2  ;;  %v19322_v2 = vld [vmem:[#allocation13 + $0x11b0] sm:$0xf0] }
 0x719   :  { %11974 = vmatpush.bf16.msrb.mxu2 %v16934_v63  ;;  %v17858_v63 = vor.u32 %v19448_v29, %v17857_v44  ;;  %v17354_v47 = vor.u32 %v19322_v2, %v17353_v60 }
 0x71a   :  { %12009 = vmatpush.bf16.msrb.mxu1 %v17718_v31  ;;  %v19455_v31 = vld [vmem:[#allocation13 + $0x15d8] sm:$0xf0] }
 0x71b   :  { %v17886_v59 = vor.u32 %v19455_v31, %v17885_v37  ;;  %v11745_v32 = vpop.f32.mrf.mxu0 }
 0x71c   :  { %11995 = vmatpush.bf16.msrb.mxu0 %v17522_v17  ;;  %v11744_v17 = vadd.f32 %v11743_v58, %v20533_v15 }
 0x71d   :  { %11975 = vmatpush.bf16.msrb.mxu2 %v16906_v20 }
 0x71e   :  { %12010 = vmatpush.bf16.msrb.mxu1 %v17690_v27  ;;  %v17382_v27 = vor.u32 %v19329_v4, %v17381_v16  ;;  %v11757_v19 = vadd.f32 %v20535_v50, %v11744_v17 }
 0x720   :  { %11976 = vmatmul.bf16.vlgmr.msrb.gmra.mxu2 %v20206_v11  ;;  %11996 = vmatpush.bf16.msrb.mxu0 %v17494_v55  ;;  %v17578_v11 = vor.u32 %v19378_v25, %v17577_v10 }
 0x721   :  { %12020 = vmatpush.bf16.msra.mxu2 %v17998_v5 }
 0x722   :  { %12011 = vmatpush.bf16.msrb.mxu1 %v17662_v38 }
 0x723   :  { %v11769_v12 = vpop.f32.mrf.mxu2 }
 0x724   :  { %11997 = vmatpush.bf16.msrb.mxu0 %v17466_v1  ;;  %v11770_v52 = vadd.f32 %v11769_v12, %v11757_v19 }
 0x725   :  { %12021 = vmatpush.bf16.msra.mxu2 %v17970_v8 }
 0x726   :  { %12012 = vmatpush.bf16.msrb.mxu1 %v17634_v35  ;;  %v11783_v18 = vadd.f32 %v20537_v48, %v11770_v52 }
 0x728   :  { %11998 = vmatpush.bf16.msrb.mxu0 %v17438_v43 }
 0x729   :  { %12022 = vmatpush.bf16.msra.mxu2 %v17942_v42  ;;  %v19509_v42 = vld [vmem:[#allocation15] sm:$0xff] }
 0x72a   :  { %12013 = vmatpush.bf16.msrb.mxu1 %v17606_v24  ;;  %v7098_v10 = vperm.slane %v19509_v42, 6 }
 0x72b   :  { %v11771_v14 = vpop.f32.mrf.mxu2 }
 0x72c   :  { %11999 = vmatpush.bf16.msrb.mxu0 %v17410_v3 }
 0x72d   :  { %12023 = vmatpush.bf16.msra.mxu2 %v17914_v33  ;;  %v11834_v20 = vpop.f32.mrf.mxu3 }
 0x72e   :  { %12014 = vmatpush.bf16.msrb.mxu1 %v17578_v11  ;;  %v11808_v56 = vpop.f32.mrf.mxu1 }
 0x730   :  { %12000 = vmatpush.bf16.msrb.mxu0 %v17382_v27 }
 0x731   :  { %12015 = vmatmul.bf16.vlgmr.msrb.gmra.mxu1 %v20247_v22  ;;  %12024 = vmatpush.bf16.msra.mxu2 %v17886_v59  ;;  %v17802_v22 = vor.u32 %v19434_v57, %v17801_v28 }
 0x733   :  { %v11795_v46 = vpop.f32.mrf.mxu0 }
 0x734   :  { %12001 = vmatpush.bf16.msrb.mxu0 %v17354_v47  ;;  %v11796_v55 = vadd.f32 %v11795_v46, %v11783_v18 }
 0x735   :  { %12025 = vmatpush.bf16.msra.mxu2 %v17858_v63  ;;  %v11836_v5 = vpop.f32.mrf.mxu3 }
 0x736   :  { %v11810_v38 = vpop.f32.mrf.mxu1 }
 0x737   :  { %12002 = vmatmul.bf16.vlgmr.msrb.gmra.mxu0 %v20250_v49  ;;  %v11809_v49 = vadd.f32 %v11808_v56, %v11796_v55 }
 0x739   :  { %12026 = vmatpush.bf16.msra.mxu2 %v17830_v54 }
 0x73b   :  { %v11797_v0 = vpop.f32.mrf.mxu0 }
 0x73d   :  { %12027 = vmatpush.bf16.msra.mxu2 %v17802_v22 }
 0x740   :  { %12028 = vmatmul.bf16.vlgmr.msra.gmra.mxu2 %v20276_v23 }
 0x743   :  { %v11821_v53 = vpop.f32.mrf.mxu2 }
 0x744   :  { %v11822_v6 = vadd.f32 %v11821_v53, %v11809_v49 }
 0x746   :  { %v11835_v62 = vadd.f32 %v11834_v20, %v11822_v6 }
 0x74b   :  { %v11823_v26 = vpop.f32.mrf.mxu2 }
 0x74d   :  { %v11886_v8 = vpop.f32.mrf.mxu3 }
 0x74e   :  { %v11860_v35 = vpop.f32.mrf.mxu1 }
 0x753   :  { %v11847_v51 = vpop.f32.mrf.mxu0 }
 0x754   :  { %v11848_v9 = vadd.f32 %v11847_v51, %v11835_v62 }
 0x755   :  { %v11888_v23 = vpop.f32.mrf.mxu3 }
 0x756   :  { %v11862_v39 = vpop.f32.mrf.mxu1  ;;  %v11861_v13 = vadd.f32 %v11860_v35, %v11848_v9 }
 0x758   :  { %12038 = vst [vmem:[%s20564_s11 + $0x28] sm:$0xff] %v11861_v13 }
 0x75b   :  { %v11849_v15 = vpop.f32.mrf.mxu0 }
 0x763   :  { %v11873_v50 = vpop.f32.mrf.mxu2 }
 0x764   :  { %v11874_v40 = vadd.f32 %v11873_v50, %v7098_v10 }
 0x766   :  { %v11887_v45 = vadd.f32 %v11886_v8, %v11874_v40 }
 0x76b   :  { %v11875_v24 = vpop.f32.mrf.mxu2 }
 0x76d   :  { %v11938_v48 = vpop.f32.mrf.mxu3 }
 0x76e   :  { %v11912_v30 = vpop.f32.mrf.mxu1 }
 0x773   :  { %v11899_v61 = vpop.f32.mrf.mxu0 }
 0x774   :  { %v11900_v21 = vadd.f32 %v11899_v61, %v11887_v45 }
 0x775   :  { %v11940_v25 = vpop.f32.mrf.mxu3 }
 0x776   :  { %v11914_v1 = vpop.f32.mrf.mxu1  ;;  %v11913_v11 = vadd.f32 %v11912_v30, %v11900_v21 }
 0x77b   :  { %v11901_v58 = vpop.f32.mrf.mxu0 }
 0x783   :  { %v11925_v33 = vpop.f32.mrf.mxu2 }
 0x784   :  { %v11926_v43 = vadd.f32 %v11925_v33, %v11913_v11 }
 0x786   :  { %v11939_v37 = vadd.f32 %v11938_v48, %v11926_v43 }
 0x78b   :  { %v11927_v41 = vpop.f32.mrf.mxu2 }
 0x78d   :  { %v11990_v7 = vpop.f32.mrf.mxu3 }
 0x78e   :  { %v11964_v31 = vpop.f32.mrf.mxu1 }
 0x794   :  { %v11951_v44 = vpop.f32.mrf.mxu0 }
 0x795   :  { %v11992_v3 = vpop.f32.mrf.mxu3  ;;  %v11952_v63 = vadd.f32 %v11951_v44, %v11939_v37 }
 0x796   :  { %v11966_v59 = vpop.f32.mrf.mxu1 }
 0x797   :  { %v11965_v27 = vadd.f32 %v11964_v31, %v11952_v63 }
 0x79c   :  { %v11953_v29 = vpop.f32.mrf.mxu0 }
 0x7a3   :  { %v11977_v16 = vpop.f32.mrf.mxu2 }
 0x7a4   :  { %v11978_v36 = vadd.f32 %v11977_v16, %v11965_v27 }
 0x7a6   :  { %v11991_v60 = vadd.f32 %v11990_v7, %v11978_v36 }
 0x7ab   :  { %v11979_v32 = vpop.f32.mrf.mxu2 }
 0x7ae   :  { %v12016_v4 = vpop.f32.mrf.mxu1 }
 0x7b4   :  { %v12003_v34 = vpop.f32.mrf.mxu0 }
 0x7b5   :  { %v12004_v2 = vadd.f32 %v12003_v34, %v11991_v60 }
 0x7b6   :  { %v12018_v12 = vpop.f32.mrf.mxu1 }
 0x7b7   :  { %v12017_v47 = vadd.f32 %v12016_v4, %v12004_v2 }
 0x7bc   :  { %v12005_v54 = vpop.f32.mrf.mxu0 }
 0x7c3   :  { %v12029_v28 = vpop.f32.mrf.mxu2 }
 0x7c4   :  { %v12030_v57 = vadd.f32 %v12029_v28, %v12017_v47 }
 0x7c6   :  { %12039 = vst [vmem:[%s20564_s11 + $0x30] sm:$0xff] %v12030_v57 }
 0x7cb   :  { %v12031_v56 = vpop.f32.mrf.mxu2 }
 0x7cc   :  { %12044 = vsyncpa [#allocation3], 1 }
 0x7cd   :  { %12045 = vsyncpa [#allocation5], 1 }
 0x7ce   :  { %12046 = vsyncpa [#allocation8], 1 }
 0x7cf   :  { %12047 = vsyncpa [#allocation11], 1 }
 0x7d0   :  { %12048 = vsyncpa [#allocation14], 1 }

</bundles_post_ra>
